<compile_context>
chip_gen: v7x
topology: tpu7x:2x2x1
jax: 0.10.0
libtpu: 0.0.40
codegen_flags: <defaults>
</compile_context>

<pallas_src>
import math
import jax
import jax.numpy as jnp
from jax import lax
from jax.experimental import pallas as pl
from jax.experimental.pallas import tpu as pltpu


# ---------------------------------------------------------------------------
# helpers (mirror the PyTorch module's shape math)
# ---------------------------------------------------------------------------
def calc_out_length(l_in, kernel_lengths, stride, dilation, padding=0):
    l_out = l_in
    for kernel in kernel_lengths:
        l_out = math.floor((l_out + 2 * padding - dilation * (kernel - 1) - 1) / stride + 1)
    return l_out


# ---------------------------------------------------------------------------
# Fused forward kernel
# ---------------------------------------------------------------------------
def _make_fused_kernel(n_conv, n_fc, kernel_sizes, channels, hs, ws, fc_out_dims):
    """Build the fused per-batch-element kernel (all shapes static)."""

    def kernel(*refs):
        # --- unpack refs: inputs..., output, scratch... ---
        idx = 0
        x_ref = refs[idx]; idx += 1
        conv_w, conv_b = [], []
        for _ in range(n_conv):
            conv_w.append(refs[idx]); conv_b.append(refs[idx + 1]); idx += 2
        fc_w, fc_b = [], []
        for _ in range(n_fc):
            fc_w.append(refs[idx]); fc_b.append(refs[idx + 1]); idx += 2
        o_ref = refs[idx]; idx += 1
        scratch = list(refs[idx:])          # one VMEM buffer per non-last conv layer

        def patch2d(src_ref, from_x, i, j, oh, ow, cin):
            # (oh, ow, cin) window -> (oh*ow, cin) matrix (collapse major dims only)
            if from_x:
                s = src_ref[0, i:i + oh, j:j + ow, :]
            else:
                s = src_ref[i:i + oh, j:j + ow, :]
            return s.reshape(oh * ow, cin)

        # ------------------ conv stack (valid, stride 1) ------------------
        src_ref, from_x = x_ref, True
        y_last = None                        # last conv output, shape (C_last, P_last)
        for l in range(n_conv):
            k = kernel_sizes[l]
            cin_l, cout_l = channels[l], channels[l + 1]
            oh, ow = hs[l + 1], ws[l + 1]
            p = oh * ow
            is_last = (l == n_conv - 1)

            if not is_last:
                # (P, Cout) orientation -> stored as (OH, OW, Cout) VMEM scratch
                acc = jnp.zeros((p, cout_l), jnp.float32)
                for i in range(k):
                    for j in range(k):
                        acc = acc + jnp.dot(
                            patch2d(src_ref, from_x, i, j, oh, ow, cin_l),
                            conv_w[l][i, j],                       # (Cin, Cout)
                            preferred_element_type=jnp.float32)
                y = jnp.maximum(acc + conv_b[l][...], 0.0)          # bias (1, Cout)
                scratch[l][...] = y.reshape(oh, ow, cout_l)
                src_ref, from_x = scratch[l], False
            else:
                # (Cout, P) orientation: flatten order matches torch (C, H, W)
                acc = jnp.zeros((cout_l, p), jnp.float32)
                for i in range(k):
                    for j in range(k):
                        acc = acc + lax.dot_general(
                            conv_w[l][i, j],                        # (Cout, Cin)
                            patch2d(src_ref, from_x, i, j, oh, ow, cin_l),  # (P, Cin)
                            dimension_numbers=(((1,), (1,)), ((), ())),
                            preferred_element_type=jnp.float32)
                y_last = jnp.maximum(acc + conv_b[l][...], 0.0)     # bias (Cout, 1)

        # ------------------------ FC stack ------------------------
        c_last = channels[-1]
        # FC0: weight pre-shaped (C_last, P_last, D0); accumulate per channel row
        h = jnp.zeros((1, fc_out_dims[0]), jnp.float32)
        for c in range(c_last):
            h = h + jnp.dot(y_last[c:c + 1, :], fc_w[0][c],
                            preferred_element_type=jnp.float32)
        h = h + fc_b[0][...]
        if n_fc > 1:
            h = jnp.maximum(h, 0.0)
        for fi in range(1, n_fc):
            h = jnp.dot(h, fc_w[fi][...],
                        preferred_element_type=jnp.float32) + fc_b[fi][...]
            if fi < n_fc - 1:
                h = jnp.maximum(h, 0.0)

        o_ref[...] = h.reshape(1, 1, fc_out_dims[-1]).astype(o_ref.dtype)

    return kernel


def ecg12_imagenet_forward(params, x_nchw):
    """Forward pass. x_nchw: (B, Cin, H, W) float32 (PyTorch layout)."""
    B, Cin, H, W = x_nchw.shape
    conv_params = params["conv"]    # list of (w (Cout,Cin,K,K), b (Cout,))
    fc_params = params["fc"]        # list of (w (Dout,Din),     b (Dout,))
    n_conv, n_fc = len(conv_params), len(fc_params)

    # static per-layer geometry
    kernel_sizes = [int(w.shape[2]) for w, _ in conv_params]
    channels = [Cin] + [int(w.shape[0]) for w, _ in conv_params]
    hs, ws = [H], [W]
    for k in kernel_sizes:
        hs.append(hs[-1] - k + 1)
        ws.append(ws[-1] - k + 1)
    C_last, P_last = channels[-1], hs[-1] * ws[-1]
    fc_out_dims = [int(w.shape[0]) for w, _ in fc_params]
    final_dim = fc_out_dims[-1]

    # ---- trace-time operand re-layout (free at runtime under jit) ----
    x_nhwc = jnp.transpose(x_nchw, (0, 2, 3, 1))

    kin = [x_nhwc]
    in_specs = [pl.BlockSpec((1, H, W, Cin), lambda b: (b, 0, 0, 0))]

    for l, (w, bias) in enumerate(conv_params):
        cout_l = channels[l + 1]
        if l < n_conv - 1:
            wk = jnp.transpose(w, (2, 3, 1, 0))       # (K, K, Cin, Cout)
            bk = bias.reshape(1, cout_l)
        else:
            wk = jnp.transpose(w, (2, 3, 0, 1))       # (K, K, Cout, Cin)
            bk = bias.reshape(cout_l, 1)
        kin += [wk, bk]
        in_specs += [pl.BlockSpec(wk.shape, lambda b: (0, 0, 0, 0)),
                     pl.BlockSpec(bk.shape, lambda b: (0, 0))]

    for i, (w, bias) in enumerate(fc_params):
        dout = fc_out_dims[i]
        if i == 0:
            # torch flatten order is (c, h, w) -> weight as (C_last, P_last, Dout)
            wk = jnp.transpose(w.reshape(dout, C_last, P_last), (1, 2, 0))
            w_spec = pl.BlockSpec(wk.shape, lambda b: (0, 0, 0))
        else:
            wk = w.T                                   # (Din, Dout)
            w_spec = pl.BlockSpec(wk.shape, lambda b: (0, 0))
        bk = bias.reshape(1, dout)
        kin += [wk, bk]
        in_specs += [w_spec, pl.BlockSpec(bk.shape, lambda b: (0, 0))]

    scratch_shapes = [pltpu.VMEM((hs[l + 1], ws[l + 1], channels[l + 1]), jnp.float32)
                      for l in range(n_conv - 1)]

    kernel = _make_fused_kernel(n_conv, n_fc, kernel_sizes, channels, hs, ws, fc_out_dims)

    out3 = pl.pallas_call(
        kernel,
        out_shape=jax.ShapeDtypeStruct((B, 1, final_dim), jnp.float32),
        grid=(B,),
        in_specs=in_specs,
        out_specs=pl.BlockSpec((1, 1, final_dim), lambda b: (b, 0, 0)),
        scratch_shapes=scratch_shapes,
        compiler_params=pltpu.CompilerParams(dimension_semantics=("parallel",)),
    )(*kin)
    return out3.reshape(B, final_dim)


# ---------------------------------------------------------------------------
# Parameters (PyTorch layout) + pure-JAX reference
# ---------------------------------------------------------------------------
def init_params(key, in_channels, hidden_channels, kernel_sizes,
                in_h, in_w, fc_hidden_dims, num_of_classes=2):
    assert len(hidden_channels) == len(kernel_sizes)
    params = {"conv": [], "fc": []}
    c_in = in_channels
    for c_out, k in zip(hidden_channels, kernel_sizes):
        key, kw, kb = jax.random.split(key, 3)
        bound = 1.0 / math.sqrt(c_in * k * k)
        w = jax.random.uniform(kw, (c_out, c_in, k, k), jnp.float32, -bound, bound)
        b = jax.random.uniform(kb, (c_out,), jnp.float32, -bound, bound)
        params["conv"].append((w, b))
        c_in = c_out

    out_h = calc_out_length(in_h, kernel_sizes, 1, 1)
    out_w = calc_out_length(in_w, kernel_sizes, 1, 1)
    in_dim = hidden_channels[-1] * out_h * out_w
    dims = list(fc_hidden_dims) + [1 if num_of_classes == 2 else num_of_classes]
    for out_dim in dims:
        key, kw, kb = jax.random.split(key, 3)
        bound = 1.0 / math.sqrt(in_dim)
        w = jax.random.uniform(kw, (out_dim, in_dim), jnp.float32, -bound, bound)
        b = jax.random.uniform(kb, (out_dim,), jnp.float32, -bound, bound)
        params["fc"].append((w, b))
        in_dim = out_dim
    return params


def reference_forward(params, x_nchw):
    h = x_nchw
    for w, b in params["conv"]:
        h = lax.conv_general_dilated(h, w, (1, 1), "VALID",
                                     dimension_numbers=("NCHW", "OIHW", "NCHW"))
        h = jnp.maximum(h + b.reshape(1, -1, 1, 1), 0.0)
    h = h.reshape(x_nchw.shape[0], -1)
    n_fc = len(params["fc"])
    for idx, (w, b) in enumerate(params["fc"]):
        h = h @ w.T + b
        if idx < n_fc - 1:
            h = jnp.maximum(h, 0.0)
    return h


if __name__ == "__main__":
    # small synthetic config consistent with Ecg12ImageNet
    B, Cin, H, W = 2, 4, 16, 16
    hidden_channels = [8, 16]
    kernel_sizes = [3, 3]
    fc_hidden_dims = [32]
    num_of_classes = 2   # -> final Linear(in_dim, 1)

    key = jax.random.PRNGKey(0)
    key, kx = jax.random.split(key)
    x = jax.random.normal(kx, (B, Cin, H, W), jnp.float32)
    params = init_params(key, Cin, hidden_channels, kernel_sizes,
                         H, W, fc_hidden_dims, num_of_classes)

    fwd = jax.jit(ecg12_imagenet_forward)
    out = jax.block_until_ready(fwd(params, x))

    ref = reference_forward(params, x)
    assert out.shape == (B, 1), out.shape
    assert jnp.allclose(out, ref, atol=1e-3, rtol=1e-3), (out, ref)

    print("KERNEL_OK")
</pallas_src>

<mosaic_0001>
module attributes {stable_mosaic.version = 11 : i64} {
  func.func @kernel(%arg0: i32, %arg1: memref<1x16x16x4xf32, #tpu.memory_space<vmem>>, %arg2: memref<3x3x4x8xf32, #tpu.memory_space<vmem>>, %arg3: memref<1x8xf32, #tpu.memory_space<vmem>>, %arg4: memref<3x3x16x8xf32, #tpu.memory_space<vmem>>, %arg5: memref<16x1xf32, #tpu.memory_space<vmem>>, %arg6: memref<16x144x32xf32, #tpu.memory_space<vmem>>, %arg7: memref<1x32xf32, #tpu.memory_space<vmem>>, %arg8: memref<32x1xf32, #tpu.memory_space<vmem>>, %arg9: memref<1x1xf32, #tpu.memory_space<vmem>>, %arg10: memref<1x1x1xf32, #tpu.memory_space<vmem>>, %arg11: memref<14x14x8xf32, #tpu.memory_space<vmem>>) attributes {dimension_semantics = [#tpu.dimension_semantics<parallel>], iteration_bounds = array<i64: 2>, scalar_prefetch = 0 : i64, scratch_operands = 1 : i64, tpu.core_type = #tpu.core_type<tc>, window_params = [{transform_indices = @transform_0, window_bounds = array<i64: 1, 16, 16, 4>}, {pipeline_mode = #tpu.pipeline_mode<synchronous>, transform_indices = @transform_1, window_bounds = array<i64: 3, 3, 4, 8>}, {pipeline_mode = #tpu.pipeline_mode<synchronous>, transform_indices = @transform_2, window_bounds = array<i64: 1, 8>}, {pipeline_mode = #tpu.pipeline_mode<synchronous>, transform_indices = @transform_3, window_bounds = array<i64: 3, 3, 16, 8>}, {pipeline_mode = #tpu.pipeline_mode<synchronous>, transform_indices = @transform_4, window_bounds = array<i64: 16, 1>}, {pipeline_mode = #tpu.pipeline_mode<synchronous>, transform_indices = @transform_5, window_bounds = array<i64: 16, 144, 32>}, {pipeline_mode = #tpu.pipeline_mode<synchronous>, transform_indices = @transform_6, window_bounds = array<i64: 1, 32>}, {pipeline_mode = #tpu.pipeline_mode<synchronous>, transform_indices = @transform_7, window_bounds = array<i64: 32, 1>}, {pipeline_mode = #tpu.pipeline_mode<synchronous>, transform_indices = @transform_8, window_bounds = array<i64: 1, 1>}, {transform_indices = @transform_9, window_bounds = array<i64: 1, 1, 1>}]} {
    %cst = arith.constant 0.000000e+00 : f32
    %0 = vector.broadcast %cst : f32 to vector<196x8xf32>
    %c0 = arith.constant 0 : index
    %c0_0 = arith.constant 0 : index
    %c0_1 = arith.constant 0 : index
    %c0_2 = arith.constant 0 : index
    %1 = vector.load %arg1[%c0, %c0_0, %c0_1, %c0_2] : memref<1x16x16x4xf32, #tpu.memory_space<vmem>>, vector<1x14x14x4xf32>
    %2 = vector.shape_cast %1 : vector<1x14x14x4xf32> to vector<14x14x4xf32>
    %3 = vector.shape_cast %2 : vector<14x14x4xf32> to vector<196x4xf32>
    %c0_3 = arith.constant 0 : index
    %c0_4 = arith.constant 0 : index
    %c0_5 = arith.constant 0 : index
    %c0_6 = arith.constant 0 : index
    %4 = vector.load %arg2[%c0_3, %c0_4, %c0_5, %c0_6] : memref<3x3x4x8xf32, #tpu.memory_space<vmem>>, vector<1x1x4x8xf32>
    %5 = vector.shape_cast %4 : vector<1x1x4x8xf32> to vector<4x8xf32>
    %cst_7 = arith.constant dense<0.000000e+00> : vector<196x8xf32>
    %6 = tpu.matmul %3, %5, %cst_7 {dimension_numbers = #tpu.dot_dimension_numbers<[1], [0], [0], [1], [0, 0, 1, 1], [], []>} : vector<196x4xf32>, vector<4x8xf32>, vector<196x8xf32> -> vector<196x8xf32>
    %7 = arith.addf %0, %6 : vector<196x8xf32>
    %c0_8 = arith.constant 0 : index
    %c0_9 = arith.constant 0 : index
    %c1 = arith.constant 1 : index
    %c0_10 = arith.constant 0 : index
    %8 = vector.load %arg1[%c0_8, %c0_9, %c1, %c0_10] : memref<1x16x16x4xf32, #tpu.memory_space<vmem>>, vector<1x14x14x4xf32>
    %9 = vector.shape_cast %8 : vector<1x14x14x4xf32> to vector<14x14x4xf32>
    %10 = vector.shape_cast %9 : vector<14x14x4xf32> to vector<196x4xf32>
    %c0_11 = arith.constant 0 : index
    %c1_12 = arith.constant 1 : index
    %c0_13 = arith.constant 0 : index
    %c0_14 = arith.constant 0 : index
    %11 = vector.load %arg2[%c0_11, %c1_12, %c0_13, %c0_14] : memref<3x3x4x8xf32, #tpu.memory_space<vmem>>, vector<1x1x4x8xf32>
    %12 = vector.shape_cast %11 : vector<1x1x4x8xf32> to vector<4x8xf32>
    %cst_15 = arith.constant dense<0.000000e+00> : vector<196x8xf32>
    %13 = tpu.matmul %10, %12, %cst_15 {dimension_numbers = #tpu.dot_dimension_numbers<[1], [0], [0], [1], [0, 0, 1, 1], [], []>} : vector<196x4xf32>, vector<4x8xf32>, vector<196x8xf32> -> vector<196x8xf32>
    %14 = arith.addf %7, %13 : vector<196x8xf32>
    %c0_16 = arith.constant 0 : index
    %c0_17 = arith.constant 0 : index
    %c2 = arith.constant 2 : index
    %c0_18 = arith.constant 0 : index
    %15 = vector.load %arg1[%c0_16, %c0_17, %c2, %c0_18] : memref<1x16x16x4xf32, #tpu.memory_space<vmem>>, vector<1x14x14x4xf32>
    %16 = vector.shape_cast %15 : vector<1x14x14x4xf32> to vector<14x14x4xf32>
    %17 = vector.shape_cast %16 : vector<14x14x4xf32> to vector<196x4xf32>
    %c0_19 = arith.constant 0 : index
    %c2_20 = arith.constant 2 : index
    %c0_21 = arith.constant 0 : index
    %c0_22 = arith.constant 0 : index
    %18 = vector.load %arg2[%c0_19, %c2_20, %c0_21, %c0_22] : memref<3x3x4x8xf32, #tpu.memory_space<vmem>>, vector<1x1x4x8xf32>
    %19 = vector.shape_cast %18 : vector<1x1x4x8xf32> to vector<4x8xf32>
    %cst_23 = arith.constant dense<0.000000e+00> : vector<196x8xf32>
    %20 = tpu.matmul %17, %19, %cst_23 {dimension_numbers = #tpu.dot_dimension_numbers<[1], [0], [0], [1], [0, 0, 1, 1], [], []>} : vector<196x4xf32>, vector<4x8xf32>, vector<196x8xf32> -> vector<196x8xf32>
    %21 = arith.addf %14, %20 : vector<196x8xf32>
    %c0_24 = arith.constant 0 : index
    %c1_25 = arith.constant 1 : index
    %c0_26 = arith.constant 0 : index
    %c0_27 = arith.constant 0 : index
    %22 = vector.load %arg1[%c0_24, %c1_25, %c0_26, %c0_27] : memref<1x16x16x4xf32, #tpu.memory_space<vmem>>, vector<1x14x14x4xf32>
    %23 = vector.shape_cast %22 : vector<1x14x14x4xf32> to vector<14x14x4xf32>
    %24 = vector.shape_cast %23 : vector<14x14x4xf32> to vector<196x4xf32>
    %c1_28 = arith.constant 1 : index
    %c0_29 = arith.constant 0 : index
    %c0_30 = arith.constant 0 : index
    %c0_31 = arith.constant 0 : index
    %25 = vector.load %arg2[%c1_28, %c0_29, %c0_30, %c0_31] : memref<3x3x4x8xf32, #tpu.memory_space<vmem>>, vector<1x1x4x8xf32>
    %26 = vector.shape_cast %25 : vector<1x1x4x8xf32> to vector<4x8xf32>
    %cst_32 = arith.constant dense<0.000000e+00> : vector<196x8xf32>
    %27 = tpu.matmul %24, %26, %cst_32 {dimension_numbers = #tpu.dot_dimension_numbers<[1], [0], [0], [1], [0, 0, 1, 1], [], []>} : vector<196x4xf32>, vector<4x8xf32>, vector<196x8xf32> -> vector<196x8xf32>
    %28 = arith.addf %21, %27 : vector<196x8xf32>
    %c0_33 = arith.constant 0 : index
    %c1_34 = arith.constant 1 : index
    %c1_35 = arith.constant 1 : index
    %c0_36 = arith.constant 0 : index
    %29 = vector.load %arg1[%c0_33, %c1_34, %c1_35, %c0_36] : memref<1x16x16x4xf32, #tpu.memory_space<vmem>>, vector<1x14x14x4xf32>
    %30 = vector.shape_cast %29 : vector<1x14x14x4xf32> to vector<14x14x4xf32>
    %31 = vector.shape_cast %30 : vector<14x14x4xf32> to vector<196x4xf32>
    %c1_37 = arith.constant 1 : index
    %c1_38 = arith.constant 1 : index
    %c0_39 = arith.constant 0 : index
    %c0_40 = arith.constant 0 : index
    %32 = vector.load %arg2[%c1_37, %c1_38, %c0_39, %c0_40] : memref<3x3x4x8xf32, #tpu.memory_space<vmem>>, vector<1x1x4x8xf32>
    %33 = vector.shape_cast %32 : vector<1x1x4x8xf32> to vector<4x8xf32>
    %cst_41 = arith.constant dense<0.000000e+00> : vector<196x8xf32>
    %34 = tpu.matmul %31, %33, %cst_41 {dimension_numbers = #tpu.dot_dimension_numbers<[1], [0], [0], [1], [0, 0, 1, 1], [], []>} : vector<196x4xf32>, vector<4x8xf32>, vector<196x8xf32> -> vector<196x8xf32>
    %35 = arith.addf %28, %34 : vector<196x8xf32>
    %c0_42 = arith.constant 0 : index
    %c1_43 = arith.constant 1 : index
    %c2_44 = arith.constant 2 : index
    %c0_45 = arith.constant 0 : index
    %36 = vector.load %arg1[%c0_42, %c1_43, %c2_44, %c0_45] : memref<1x16x16x4xf32, #tpu.memory_space<vmem>>, vector<1x14x14x4xf32>
    %37 = vector.shape_cast %36 : vector<1x14x14x4xf32> to vector<14x14x4xf32>
    %38 = vector.shape_cast %37 : vector<14x14x4xf32> to vector<196x4xf32>
    %c1_46 = arith.constant 1 : index
    %c2_47 = arith.constant 2 : index
    %c0_48 = arith.constant 0 : index
    %c0_49 = arith.constant 0 : index
    %39 = vector.load %arg2[%c1_46, %c2_47, %c0_48, %c0_49] : memref<3x3x4x8xf32, #tpu.memory_space<vmem>>, vector<1x1x4x8xf32>
    %40 = vector.shape_cast %39 : vector<1x1x4x8xf32> to vector<4x8xf32>
    %cst_50 = arith.constant dense<0.000000e+00> : vector<196x8xf32>
    %41 = tpu.matmul %38, %40, %cst_50 {dimension_numbers = #tpu.dot_dimension_numbers<[1], [0], [0], [1], [0, 0, 1, 1], [], []>} : vector<196x4xf32>, vector<4x8xf32>, vector<196x8xf32> -> vector<196x8xf32>
    %42 = arith.addf %35, %41 : vector<196x8xf32>
    %c0_51 = arith.constant 0 : index
    %c2_52 = arith.constant 2 : index
    %c0_53 = arith.constant 0 : index
    %c0_54 = arith.constant 0 : index
    %43 = vector.load %arg1[%c0_51, %c2_52, %c0_53, %c0_54] : memref<1x16x16x4xf32, #tpu.memory_space<vmem>>, vector<1x14x14x4xf32>
    %44 = vector.shape_cast %43 : vector<1x14x14x4xf32> to vector<14x14x4xf32>
    %45 = vector.shape_cast %44 : vector<14x14x4xf32> to vector<196x4xf32>
    %c2_55 = arith.constant 2 : index
    %c0_56 = arith.constant 0 : index
    %c0_57 = arith.constant 0 : index
    %c0_58 = arith.constant 0 : index
    %46 = vector.load %arg2[%c2_55, %c0_56, %c0_57, %c0_58] : memref<3x3x4x8xf32, #tpu.memory_space<vmem>>, vector<1x1x4x8xf32>
    %47 = vector.shape_cast %46 : vector<1x1x4x8xf32> to vector<4x8xf32>
    %cst_59 = arith.constant dense<0.000000e+00> : vector<196x8xf32>
    %48 = tpu.matmul %45, %47, %cst_59 {dimension_numbers = #tpu.dot_dimension_numbers<[1], [0], [0], [1], [0, 0, 1, 1], [], []>} : vector<196x4xf32>, vector<4x8xf32>, vector<196x8xf32> -> vector<196x8xf32>
    %49 = arith.addf %42, %48 : vector<196x8xf32>
    %c0_60 = arith.constant 0 : index
    %c2_61 = arith.constant 2 : index
    %c1_62 = arith.constant 1 : index
    %c0_63 = arith.constant 0 : index
    %50 = vector.load %arg1[%c0_60, %c2_61, %c1_62, %c0_63] : memref<1x16x16x4xf32, #tpu.memory_space<vmem>>, vector<1x14x14x4xf32>
    %51 = vector.shape_cast %50 : vector<1x14x14x4xf32> to vector<14x14x4xf32>
    %52 = vector.shape_cast %51 : vector<14x14x4xf32> to vector<196x4xf32>
    %c2_64 = arith.constant 2 : index
    %c1_65 = arith.constant 1 : index
    %c0_66 = arith.constant 0 : index
    %c0_67 = arith.constant 0 : index
    %53 = vector.load %arg2[%c2_64, %c1_65, %c0_66, %c0_67] : memref<3x3x4x8xf32, #tpu.memory_space<vmem>>, vector<1x1x4x8xf32>
    %54 = vector.shape_cast %53 : vector<1x1x4x8xf32> to vector<4x8xf32>
    %cst_68 = arith.constant dense<0.000000e+00> : vector<196x8xf32>
    %55 = tpu.matmul %52, %54, %cst_68 {dimension_numbers = #tpu.dot_dimension_numbers<[1], [0], [0], [1], [0, 0, 1, 1], [], []>} : vector<196x4xf32>, vector<4x8xf32>, vector<196x8xf32> -> vector<196x8xf32>
    %56 = arith.addf %49, %55 : vector<196x8xf32>
    %c0_69 = arith.constant 0 : index
    %c2_70 = arith.constant 2 : index
    %c2_71 = arith.constant 2 : index
    %c0_72 = arith.constant 0 : index
    %57 = vector.load %arg1[%c0_69, %c2_70, %c2_71, %c0_72] : memref<1x16x16x4xf32, #tpu.memory_space<vmem>>, vector<1x14x14x4xf32>
    %58 = vector.shape_cast %57 : vector<1x14x14x4xf32> to vector<14x14x4xf32>
    %59 = vector.shape_cast %58 : vector<14x14x4xf32> to vector<196x4xf32>
    %c2_73 = arith.constant 2 : index
    %c2_74 = arith.constant 2 : index
    %c0_75 = arith.constant 0 : index
    %c0_76 = arith.constant 0 : index
    %60 = vector.load %arg2[%c2_73, %c2_74, %c0_75, %c0_76] : memref<3x3x4x8xf32, #tpu.memory_space<vmem>>, vector<1x1x4x8xf32>
    %61 = vector.shape_cast %60 : vector<1x1x4x8xf32> to vector<4x8xf32>
    %cst_77 = arith.constant dense<0.000000e+00> : vector<196x8xf32>
    %62 = tpu.matmul %59, %61, %cst_77 {dimension_numbers = #tpu.dot_dimension_numbers<[1], [0], [0], [1], [0, 0, 1, 1], [], []>} : vector<196x4xf32>, vector<4x8xf32>, vector<196x8xf32> -> vector<196x8xf32>
    %63 = arith.addf %56, %62 : vector<196x8xf32>
    %c0_78 = arith.constant 0 : index
    %c0_79 = arith.constant 0 : index
    %64 = vector.load %arg3[%c0_78, %c0_79] : memref<1x8xf32, #tpu.memory_space<vmem>>, vector<1x8xf32>
    %65 = vector.broadcast %64 : vector<1x8xf32> to vector<196x8xf32>
    %66 = arith.addf %63, %65 : vector<196x8xf32>
    %cst_80 = arith.constant 0.000000e+00 : f32
    %67 = vector.broadcast %cst_80 : f32 to vector<196x8xf32>
    %68 = arith.maximumf %66, %67 : vector<196x8xf32>
    %69 = vector.shape_cast %68 : vector<196x8xf32> to vector<14x14x8xf32>
    %c0_81 = arith.constant 0 : index
    %c0_82 = arith.constant 0 : index
    %c0_83 = arith.constant 0 : index
    %70 = vector.load %arg11[%c0_81, %c0_82, %c0_83] : memref<14x14x8xf32, #tpu.memory_space<vmem>>, vector<14x14x8xf32>
    tpu.vector_store %arg11[%c0_81, %c0_82, %c0_83], %69 {strides = array<i32>} : memref<14x14x8xf32, #tpu.memory_space<vmem>>, vector<14x14x8xf32>,
    %cst_84 = arith.constant 0.000000e+00 : f32
    %71 = vector.broadcast %cst_84 : f32 to vector<16x144xf32>
    %c0_85 = arith.constant 0 : index
    %c0_86 = arith.constant 0 : index
    %c0_87 = arith.constant 0 : index
    %c0_88 = arith.constant 0 : index
    %72 = vector.load %arg4[%c0_85, %c0_86, %c0_87, %c0_88] : memref<3x3x16x8xf32, #tpu.memory_space<vmem>>, vector<1x1x16x8xf32>
    %73 = vector.shape_cast %72 : vector<1x1x16x8xf32> to vector<16x8xf32>
    %c0_89 = arith.constant 0 : index
    %c0_90 = arith.constant 0 : index
    %c0_91 = arith.constant 0 : index
    %74 = vector.load %arg11[%c0_89, %c0_90, %c0_91] : memref<14x14x8xf32, #tpu.memory_space<vmem>>, vector<12x12x8xf32>
    %75 = vector.shape_cast %74 : vector<12x12x8xf32> to vector<144x8xf32>
    %cst_92 = arith.constant dense<0.000000e+00> : vector<16x144xf32>
    %76 = tpu.matmul %73, %75, %cst_92 {dimension_numbers = #tpu.dot_dimension_numbers<[1], [1], [0], [0], [0, 0, 1, 0], [], []>} : vector<16x8xf32>, vector<144x8xf32>, vector<16x144xf32> -> vector<16x144xf32>
    %77 = arith.addf %71, %76 : vector<16x144xf32>
    %c0_93 = arith.constant 0 : index
    %c1_94 = arith.constant 1 : index
    %c0_95 = arith.constant 0 : index
    %c0_96 = arith.constant 0 : index
    %78 = vector.load %arg4[%c0_93, %c1_94, %c0_95, %c0_96] : memref<3x3x16x8xf32, #tpu.memory_space<vmem>>, vector<1x1x16x8xf32>
    %79 = vector.shape_cast %78 : vector<1x1x16x8xf32> to vector<16x8xf32>
    %c0_97 = arith.constant 0 : index
    %c1_98 = arith.constant 1 : index
    %c0_99 = arith.constant 0 : index
    %80 = vector.load %arg11[%c0_97, %c1_98, %c0_99] : memref<14x14x8xf32, #tpu.memory_space<vmem>>, vector<12x12x8xf32>
    %81 = vector.shape_cast %80 : vector<12x12x8xf32> to vector<144x8xf32>
    %cst_100 = arith.constant dense<0.000000e+00> : vector<16x144xf32>
    %82 = tpu.matmul %79, %81, %cst_100 {dimension_numbers = #tpu.dot_dimension_numbers<[1], [1], [0], [0], [0, 0, 1, 0], [], []>} : vector<16x8xf32>, vector<144x8xf32>, vector<16x144xf32> -> vector<16x144xf32>
    %83 = arith.addf %77, %82 : vector<16x144xf32>
    %c0_101 = arith.constant 0 : index
    %c2_102 = arith.constant 2 : index
    %c0_103 = arith.constant 0 : index
    %c0_104 = arith.constant 0 : index
    %84 = vector.load %arg4[%c0_101, %c2_102, %c0_103, %c0_104] : memref<3x3x16x8xf32, #tpu.memory_space<vmem>>, vector<1x1x16x8xf32>
    %85 = vector.shape_cast %84 : vector<1x1x16x8xf32> to vector<16x8xf32>
    %c0_105 = arith.constant 0 : index
    %c2_106 = arith.constant 2 : index
    %c0_107 = arith.constant 0 : index
    %86 = vector.load %arg11[%c0_105, %c2_106, %c0_107] : memref<14x14x8xf32, #tpu.memory_space<vmem>>, vector<12x12x8xf32>
    %87 = vector.shape_cast %86 : vector<12x12x8xf32> to vector<144x8xf32>
    %cst_108 = arith.constant dense<0.000000e+00> : vector<16x144xf32>
    %88 = tpu.matmul %85, %87, %cst_108 {dimension_numbers = #tpu.dot_dimension_numbers<[1], [1], [0], [0], [0, 0, 1, 0], [], []>} : vector<16x8xf32>, vector<144x8xf32>, vector<16x144xf32> -> vector<16x144xf32>
    %89 = arith.addf %83, %88 : vector<16x144xf32>
    %c1_109 = arith.constant 1 : index
    %c0_110 = arith.constant 0 : index
    %c0_111 = arith.constant 0 : index
    %c0_112 = arith.constant 0 : index
    %90 = vector.load %arg4[%c1_109, %c0_110, %c0_111, %c0_112] : memref<3x3x16x8xf32, #tpu.memory_space<vmem>>, vector<1x1x16x8xf32>
    %91 = vector.shape_cast %90 : vector<1x1x16x8xf32> to vector<16x8xf32>
    %c1_113 = arith.constant 1 : index
    %c0_114 = arith.constant 0 : index
    %c0_115 = arith.constant 0 : index
    %92 = vector.load %arg11[%c1_113, %c0_114, %c0_115] : memref<14x14x8xf32, #tpu.memory_space<vmem>>, vector<12x12x8xf32>
    %93 = vector.shape_cast %92 : vector<12x12x8xf32> to vector<144x8xf32>
    %cst_116 = arith.constant dense<0.000000e+00> : vector<16x144xf32>
    %94 = tpu.matmul %91, %93, %cst_116 {dimension_numbers = #tpu.dot_dimension_numbers<[1], [1], [0], [0], [0, 0, 1, 0], [], []>} : vector<16x8xf32>, vector<144x8xf32>, vector<16x144xf32> -> vector<16x144xf32>
    %95 = arith.addf %89, %94 : vector<16x144xf32>
    %c1_117 = arith.constant 1 : index
    %c1_118 = arith.constant 1 : index
    %c0_119 = arith.constant 0 : index
    %c0_120 = arith.constant 0 : index
    %96 = vector.load %arg4[%c1_117, %c1_118, %c0_119, %c0_120] : memref<3x3x16x8xf32, #tpu.memory_space<vmem>>, vector<1x1x16x8xf32>
    %97 = vector.shape_cast %96 : vector<1x1x16x8xf32> to vector<16x8xf32>
    %c1_121 = arith.constant 1 : index
    %c1_122 = arith.constant 1 : index
    %c0_123 = arith.constant 0 : index
    %98 = vector.load %arg11[%c1_121, %c1_122, %c0_123] : memref<14x14x8xf32, #tpu.memory_space<vmem>>, vector<12x12x8xf32>
    %99 = vector.shape_cast %98 : vector<12x12x8xf32> to vector<144x8xf32>
    %cst_124 = arith.constant dense<0.000000e+00> : vector<16x144xf32>
    %100 = tpu.matmul %97, %99, %cst_124 {dimension_numbers = #tpu.dot_dimension_numbers<[1], [1], [0], [0], [0, 0, 1, 0], [], []>} : vector<16x8xf32>, vector<144x8xf32>, vector<16x144xf32> -> vector<16x144xf32>
    %101 = arith.addf %95, %100 : vector<16x144xf32>
    %c1_125 = arith.constant 1 : index
    %c2_126 = arith.constant 2 : index
    %c0_127 = arith.constant 0 : index
    %c0_128 = arith.constant 0 : index
    %102 = vector.load %arg4[%c1_125, %c2_126, %c0_127, %c0_128] : memref<3x3x16x8xf32, #tpu.memory_space<vmem>>, vector<1x1x16x8xf32>
    %103 = vector.shape_cast %102 : vector<1x1x16x8xf32> to vector<16x8xf32>
    %c1_129 = arith.constant 1 : index
    %c2_130 = arith.constant 2 : index
    %c0_131 = arith.constant 0 : index
    %104 = vector.load %arg11[%c1_129, %c2_130, %c0_131] : memref<14x14x8xf32, #tpu.memory_space<vmem>>, vector<12x12x8xf32>
    %105 = vector.shape_cast %104 : vector<12x12x8xf32> to vector<144x8xf32>
    %cst_132 = arith.constant dense<0.000000e+00> : vector<16x144xf32>
    %106 = tpu.matmul %103, %105, %cst_132 {dimension_numbers = #tpu.dot_dimension_numbers<[1], [1], [0], [0], [0, 0, 1, 0], [], []>} : vector<16x8xf32>, vector<144x8xf32>, vector<16x144xf32> -> vector<16x144xf32>
    %107 = arith.addf %101, %106 : vector<16x144xf32>
    %c2_133 = arith.constant 2 : index
    %c0_134 = arith.constant 0 : index
    %c0_135 = arith.constant 0 : index
    %c0_136 = arith.constant 0 : index
    %108 = vector.load %arg4[%c2_133, %c0_134, %c0_135, %c0_136] : memref<3x3x16x8xf32, #tpu.memory_space<vmem>>, vector<1x1x16x8xf32>
    %109 = vector.shape_cast %108 : vector<1x1x16x8xf32> to vector<16x8xf32>
    %c2_137 = arith.constant 2 : index
    %c0_138 = arith.constant 0 : index
    %c0_139 = arith.constant 0 : index
    %110 = vector.load %arg11[%c2_137, %c0_138, %c0_139] : memref<14x14x8xf32, #tpu.memory_space<vmem>>, vector<12x12x8xf32>
    %111 = vector.shape_cast %110 : vector<12x12x8xf32> to vector<144x8xf32>
    %cst_140 = arith.constant dense<0.000000e+00> : vector<16x144xf32>
    %112 = tpu.matmul %109, %111, %cst_140 {dimension_numbers = #tpu.dot_dimension_numbers<[1], [1], [0], [0], [0, 0, 1, 0], [], []>} : vector<16x8xf32>, vector<144x8xf32>, vector<16x144xf32> -> vector<16x144xf32>
    %113 = arith.addf %107, %112 : vector<16x144xf32>
    %c2_141 = arith.constant 2 : index
    %c1_142 = arith.constant 1 : index
    %c0_143 = arith.constant 0 : index
    %c0_144 = arith.constant 0 : index
    %114 = vector.load %arg4[%c2_141, %c1_142, %c0_143, %c0_144] : memref<3x3x16x8xf32, #tpu.memory_space<vmem>>, vector<1x1x16x8xf32>
    %115 = vector.shape_cast %114 : vector<1x1x16x8xf32> to vector<16x8xf32>
    %c2_145 = arith.constant 2 : index
    %c1_146 = arith.constant 1 : index
    %c0_147 = arith.constant 0 : index
    %116 = vector.load %arg11[%c2_145, %c1_146, %c0_147] : memref<14x14x8xf32, #tpu.memory_space<vmem>>, vector<12x12x8xf32>
    %117 = vector.shape_cast %116 : vector<12x12x8xf32> to vector<144x8xf32>
    %cst_148 = arith.constant dense<0.000000e+00> : vector<16x144xf32>
    %118 = tpu.matmul %115, %117, %cst_148 {dimension_numbers = #tpu.dot_dimension_numbers<[1], [1], [0], [0], [0, 0, 1, 0], [], []>} : vector<16x8xf32>, vector<144x8xf32>, vector<16x144xf32> -> vector<16x144xf32>
    %119 = arith.addf %113, %118 : vector<16x144xf32>
    %c2_149 = arith.constant 2 : index
    %c2_150 = arith.constant 2 : index
    %c0_151 = arith.constant 0 : index
    %c0_152 = arith.constant 0 : index
    %120 = vector.load %arg4[%c2_149, %c2_150, %c0_151, %c0_152] : memref<3x3x16x8xf32, #tpu.memory_space<vmem>>, vector<1x1x16x8xf32>
    %121 = vector.shape_cast %120 : vector<1x1x16x8xf32> to vector<16x8xf32>
    %c2_153 = arith.constant 2 : index
    %c2_154 = arith.constant 2 : index
    %c0_155 = arith.constant 0 : index
    %122 = vector.load %arg11[%c2_153, %c2_154, %c0_155] : memref<14x14x8xf32, #tpu.memory_space<vmem>>, vector<12x12x8xf32>
    %123 = vector.shape_cast %122 : vector<12x12x8xf32> to vector<144x8xf32>
    %cst_156 = arith.constant dense<0.000000e+00> : vector<16x144xf32>
    %124 = tpu.matmul %121, %123, %cst_156 {dimension_numbers = #tpu.dot_dimension_numbers<[1], [1], [0], [0], [0, 0, 1, 0], [], []>} : vector<16x8xf32>, vector<144x8xf32>, vector<16x144xf32> -> vector<16x144xf32>
    %125 = arith.addf %119, %124 : vector<16x144xf32>
    %c0_157 = arith.constant 0 : index
    %c0_158 = arith.constant 0 : index
    %126 = vector.load %arg5[%c0_157, %c0_158] : memref<16x1xf32, #tpu.memory_space<vmem>>, vector<16x1xf32>
    %127 = vector.broadcast %126 : vector<16x1xf32> to vector<16x144xf32>
    %128 = arith.addf %125, %127 : vector<16x144xf32>
    %cst_159 = arith.constant 0.000000e+00 : f32
    %129 = vector.broadcast %cst_159 : f32 to vector<16x144xf32>
    %130 = arith.maximumf %128, %129 : vector<16x144xf32>
    %cst_160 = arith.constant 0.000000e+00 : f32
    %131 = vector.broadcast %cst_160 : f32 to vector<1x32xf32>
    %132 = vector.extract_strided_slice %130 {offsets = [0, 0], sizes = [1, 144], strides = [1, 1]} : vector<16x144xf32> to vector<1x144xf32>
    %c0_161 = arith.constant 0 : index
    %c0_162 = arith.constant 0 : index
    %c0_163 = arith.constant 0 : index
    %133 = vector.load %arg6[%c0_161, %c0_162, %c0_163] : memref<16x144x32xf32, #tpu.memory_space<vmem>>, vector<1x144x32xf32>
    %134 = vector.shape_cast %133 : vector<1x144x32xf32> to vector<144x32xf32>
    %cst_164 = arith.constant dense<0.000000e+00> : vector<1x32xf32>
    %135 = tpu.matmul %132, %134, %cst_164 {dimension_numbers = #tpu.dot_dimension_numbers<[1], [0], [0], [1], [0, 0, 1, 1], [], []>} : vector<1x144xf32>, vector<144x32xf32>, vector<1x32xf32> -> vector<1x32xf32>
    %136 = arith.addf %131, %135 : vector<1x32xf32>
    %137 = vector.extract_strided_slice %130 {offsets = [1, 0], sizes = [1, 144], strides = [1, 1]} : vector<16x144xf32> to vector<1x144xf32>
    %c1_165 = arith.constant 1 : index
    %c0_166 = arith.constant 0 : index
    %c0_167 = arith.constant 0 : index
    %138 = vector.load %arg6[%c1_165, %c0_166, %c0_167] : memref<16x144x32xf32, #tpu.memory_space<vmem>>, vector<1x144x32xf32>
    %139 = vector.shape_cast %138 : vector<1x144x32xf32> to vector<144x32xf32>
    %cst_168 = arith.constant dense<0.000000e+00> : vector<1x32xf32>
    %140 = tpu.matmul %137, %139, %cst_168 {dimension_numbers = #tpu.dot_dimension_numbers<[1], [0], [0], [1], [0, 0, 1, 1], [], []>} : vector<1x144xf32>, vector<144x32xf32>, vector<1x32xf32> -> vector<1x32xf32>
    %141 = arith.addf %136, %140 : vector<1x32xf32>
    %142 = vector.extract_strided_slice %130 {offsets = [2, 0], sizes = [1, 144], strides = [1, 1]} : vector<16x144xf32> to vector<1x144xf32>
    %c2_169 = arith.constant 2 : index
    %c0_170 = arith.constant 0 : index
    %c0_171 = arith.constant 0 : index
    %143 = vector.load %arg6[%c2_169, %c0_170, %c0_171] : memref<16x144x32xf32, #tpu.memory_space<vmem>>, vector<1x144x32xf32>
    %144 = vector.shape_cast %143 : vector<1x144x32xf32> to vector<144x32xf32>
    %cst_172 = arith.constant dense<0.000000e+00> : vector<1x32xf32>
    %145 = tpu.matmul %142, %144, %cst_172 {dimension_numbers = #tpu.dot_dimension_numbers<[1], [0], [0], [1], [0, 0, 1, 1], [], []>} : vector<1x144xf32>, vector<144x32xf32>, vector<1x32xf32> -> vector<1x32xf32>
    %146 = arith.addf %141, %145 : vector<1x32xf32>
    %147 = vector.extract_strided_slice %130 {offsets = [3, 0], sizes = [1, 144], strides = [1, 1]} : vector<16x144xf32> to vector<1x144xf32>
    %c3 = arith.constant 3 : index
    %c0_173 = arith.constant 0 : index
    %c0_174 = arith.constant 0 : index
    %148 = vector.load %arg6[%c3, %c0_173, %c0_174] : memref<16x144x32xf32, #tpu.memory_space<vmem>>, vector<1x144x32xf32>
    %149 = vector.shape_cast %148 : vector<1x144x32xf32> to vector<144x32xf32>
    %cst_175 = arith.constant dense<0.000000e+00> : vector<1x32xf32>
    %150 = tpu.matmul %147, %149, %cst_175 {dimension_numbers = #tpu.dot_dimension_numbers<[1], [0], [0], [1], [0, 0, 1, 1], [], []>} : vector<1x144xf32>, vector<144x32xf32>, vector<1x32xf32> -> vector<1x32xf32>
    %151 = arith.addf %146, %150 : vector<1x32xf32>
    %152 = vector.extract_strided_slice %130 {offsets = [4, 0], sizes = [1, 144], strides = [1, 1]} : vector<16x144xf32> to vector<1x144xf32>
    %c4 = arith.constant 4 : index
    %c0_176 = arith.constant 0 : index
    %c0_177 = arith.constant 0 : index
    %153 = vector.load %arg6[%c4, %c0_176, %c0_177] : memref<16x144x32xf32, #tpu.memory_space<vmem>>, vector<1x144x32xf32>
    %154 = vector.shape_cast %153 : vector<1x144x32xf32> to vector<144x32xf32>
    %cst_178 = arith.constant dense<0.000000e+00> : vector<1x32xf32>
    %155 = tpu.matmul %152, %154, %cst_178 {dimension_numbers = #tpu.dot_dimension_numbers<[1], [0], [0], [1], [0, 0, 1, 1], [], []>} : vector<1x144xf32>, vector<144x32xf32>, vector<1x32xf32> -> vector<1x32xf32>
    %156 = arith.addf %151, %155 : vector<1x32xf32>
    %157 = vector.extract_strided_slice %130 {offsets = [5, 0], sizes = [1, 144], strides = [1, 1]} : vector<16x144xf32> to vector<1x144xf32>
    %c5 = arith.constant 5 : index
    %c0_179 = arith.constant 0 : index
    %c0_180 = arith.constant 0 : index
    %158 = vector.load %arg6[%c5, %c0_179, %c0_180] : memref<16x144x32xf32, #tpu.memory_space<vmem>>, vector<1x144x32xf32>
    %159 = vector.shape_cast %158 : vector<1x144x32xf32> to vector<144x32xf32>
    %cst_181 = arith.constant dense<0.000000e+00> : vector<1x32xf32>
    %160 = tpu.matmul %157, %159, %cst_181 {dimension_numbers = #tpu.dot_dimension_numbers<[1], [0], [0], [1], [0, 0, 1, 1], [], []>} : vector<1x144xf32>, vector<144x32xf32>, vector<1x32xf32> -> vector<1x32xf32>
    %161 = arith.addf %156, %160 : vector<1x32xf32>
    %162 = vector.extract_strided_slice %130 {offsets = [6, 0], sizes = [1, 144], strides = [1, 1]} : vector<16x144xf32> to vector<1x144xf32>
    %c6 = arith.constant 6 : index
    %c0_182 = arith.constant 0 : index
    %c0_183 = arith.constant 0 : index
    %163 = vector.load %arg6[%c6, %c0_182, %c0_183] : memref<16x144x32xf32, #tpu.memory_space<vmem>>, vector<1x144x32xf32>
    %164 = vector.shape_cast %163 : vector<1x144x32xf32> to vector<144x32xf32>
    %cst_184 = arith.constant dense<0.000000e+00> : vector<1x32xf32>
    %165 = tpu.matmul %162, %164, %cst_184 {dimension_numbers = #tpu.dot_dimension_numbers<[1], [0], [0], [1], [0, 0, 1, 1], [], []>} : vector<1x144xf32>, vector<144x32xf32>, vector<1x32xf32> -> vector<1x32xf32>
    %166 = arith.addf %161, %165 : vector<1x32xf32>
    %167 = vector.extract_strided_slice %130 {offsets = [7, 0], sizes = [1, 144], strides = [1, 1]} : vector<16x144xf32> to vector<1x144xf32>
    %c7 = arith.constant 7 : index
    %c0_185 = arith.constant 0 : index
    %c0_186 = arith.constant 0 : index
    %168 = vector.load %arg6[%c7, %c0_185, %c0_186] : memref<16x144x32xf32, #tpu.memory_space<vmem>>, vector<1x144x32xf32>
    %169 = vector.shape_cast %168 : vector<1x144x32xf32> to vector<144x32xf32>
    %cst_187 = arith.constant dense<0.000000e+00> : vector<1x32xf32>
    %170 = tpu.matmul %167, %169, %cst_187 {dimension_numbers = #tpu.dot_dimension_numbers<[1], [0], [0], [1], [0, 0, 1, 1], [], []>} : vector<1x144xf32>, vector<144x32xf32>, vector<1x32xf32> -> vector<1x32xf32>
    %171 = arith.addf %166, %170 : vector<1x32xf32>
    %172 = vector.extract_strided_slice %130 {offsets = [8, 0], sizes = [1, 144], strides = [1, 1]} : vector<16x144xf32> to vector<1x144xf32>
    %c8 = arith.constant 8 : index
    %c0_188 = arith.constant 0 : index
    %c0_189 = arith.constant 0 : index
    %173 = vector.load %arg6[%c8, %c0_188, %c0_189] : memref<16x144x32xf32, #tpu.memory_space<vmem>>, vector<1x144x32xf32>
    %174 = vector.shape_cast %173 : vector<1x144x32xf32> to vector<144x32xf32>
    %cst_190 = arith.constant dense<0.000000e+00> : vector<1x32xf32>
    %175 = tpu.matmul %172, %174, %cst_190 {dimension_numbers = #tpu.dot_dimension_numbers<[1], [0], [0], [1], [0, 0, 1, 1], [], []>} : vector<1x144xf32>, vector<144x32xf32>, vector<1x32xf32> -> vector<1x32xf32>
    %176 = arith.addf %171, %175 : vector<1x32xf32>
    %177 = vector.extract_strided_slice %130 {offsets = [9, 0], sizes = [1, 144], strides = [1, 1]} : vector<16x144xf32> to vector<1x144xf32>
    %c9 = arith.constant 9 : index
    %c0_191 = arith.constant 0 : index
    %c0_192 = arith.constant 0 : index
    %178 = vector.load %arg6[%c9, %c0_191, %c0_192] : memref<16x144x32xf32, #tpu.memory_space<vmem>>, vector<1x144x32xf32>
    %179 = vector.shape_cast %178 : vector<1x144x32xf32> to vector<144x32xf32>
    %cst_193 = arith.constant dense<0.000000e+00> : vector<1x32xf32>
    %180 = tpu.matmul %177, %179, %cst_193 {dimension_numbers = #tpu.dot_dimension_numbers<[1], [0], [0], [1], [0, 0, 1, 1], [], []>} : vector<1x144xf32>, vector<144x32xf32>, vector<1x32xf32> -> vector<1x32xf32>
    %181 = arith.addf %176, %180 : vector<1x32xf32>
    %182 = vector.extract_strided_slice %130 {offsets = [10, 0], sizes = [1, 144], strides = [1, 1]} : vector<16x144xf32> to vector<1x144xf32>
    %c10 = arith.constant 10 : index
    %c0_194 = arith.constant 0 : index
    %c0_195 = arith.constant 0 : index
    %183 = vector.load %arg6[%c10, %c0_194, %c0_195] : memref<16x144x32xf32, #tpu.memory_space<vmem>>, vector<1x144x32xf32>
    %184 = vector.shape_cast %183 : vector<1x144x32xf32> to vector<144x32xf32>
    %cst_196 = arith.constant dense<0.000000e+00> : vector<1x32xf32>
    %185 = tpu.matmul %182, %184, %cst_196 {dimension_numbers = #tpu.dot_dimension_numbers<[1], [0], [0], [1], [0, 0, 1, 1], [], []>} : vector<1x144xf32>, vector<144x32xf32>, vector<1x32xf32> -> vector<1x32xf32>
    %186 = arith.addf %181, %185 : vector<1x32xf32>
    %187 = vector.extract_strided_slice %130 {offsets = [11, 0], sizes = [1, 144], strides = [1, 1]} : vector<16x144xf32> to vector<1x144xf32>
    %c11 = arith.constant 11 : index
    %c0_197 = arith.constant 0 : index
    %c0_198 = arith.constant 0 : index
    %188 = vector.load %arg6[%c11, %c0_197, %c0_198] : memref<16x144x32xf32, #tpu.memory_space<vmem>>, vector<1x144x32xf32>
    %189 = vector.shape_cast %188 : vector<1x144x32xf32> to vector<144x32xf32>
    %cst_199 = arith.constant dense<0.000000e+00> : vector<1x32xf32>
    %190 = tpu.matmul %187, %189, %cst_199 {dimension_numbers = #tpu.dot_dimension_numbers<[1], [0], [0], [1], [0, 0, 1, 1], [], []>} : vector<1x144xf32>, vector<144x32xf32>, vector<1x32xf32> -> vector<1x32xf32>
    %191 = arith.addf %186, %190 : vector<1x32xf32>
    %192 = vector.extract_strided_slice %130 {offsets = [12, 0], sizes = [1, 144], strides = [1, 1]} : vector<16x144xf32> to vector<1x144xf32>
    %c12 = arith.constant 12 : index
    %c0_200 = arith.constant 0 : index
    %c0_201 = arith.constant 0 : index
    %193 = vector.load %arg6[%c12, %c0_200, %c0_201] : memref<16x144x32xf32, #tpu.memory_space<vmem>>, vector<1x144x32xf32>
    %194 = vector.shape_cast %193 : vector<1x144x32xf32> to vector<144x32xf32>
    %cst_202 = arith.constant dense<0.000000e+00> : vector<1x32xf32>
    %195 = tpu.matmul %192, %194, %cst_202 {dimension_numbers = #tpu.dot_dimension_numbers<[1], [0], [0], [1], [0, 0, 1, 1], [], []>} : vector<1x144xf32>, vector<144x32xf32>, vector<1x32xf32> -> vector<1x32xf32>
    %196 = arith.addf %191, %195 : vector<1x32xf32>
    %197 = vector.extract_strided_slice %130 {offsets = [13, 0], sizes = [1, 144], strides = [1, 1]} : vector<16x144xf32> to vector<1x144xf32>
    %c13 = arith.constant 13 : index
    %c0_203 = arith.constant 0 : index
    %c0_204 = arith.constant 0 : index
    %198 = vector.load %arg6[%c13, %c0_203, %c0_204] : memref<16x144x32xf32, #tpu.memory_space<vmem>>, vector<1x144x32xf32>
    %199 = vector.shape_cast %198 : vector<1x144x32xf32> to vector<144x32xf32>
    %cst_205 = arith.constant dense<0.000000e+00> : vector<1x32xf32>
    %200 = tpu.matmul %197, %199, %cst_205 {dimension_numbers = #tpu.dot_dimension_numbers<[1], [0], [0], [1], [0, 0, 1, 1], [], []>} : vector<1x144xf32>, vector<144x32xf32>, vector<1x32xf32> -> vector<1x32xf32>
    %201 = arith.addf %196, %200 : vector<1x32xf32>
    %202 = vector.extract_strided_slice %130 {offsets = [14, 0], sizes = [1, 144], strides = [1, 1]} : vector<16x144xf32> to vector<1x144xf32>
    %c14 = arith.constant 14 : index
    %c0_206 = arith.constant 0 : index
    %c0_207 = arith.constant 0 : index
    %203 = vector.load %arg6[%c14, %c0_206, %c0_207] : memref<16x144x32xf32, #tpu.memory_space<vmem>>, vector<1x144x32xf32>
    %204 = vector.shape_cast %203 : vector<1x144x32xf32> to vector<144x32xf32>
    %cst_208 = arith.constant dense<0.000000e+00> : vector<1x32xf32>
    %205 = tpu.matmul %202, %204, %cst_208 {dimension_numbers = #tpu.dot_dimension_numbers<[1], [0], [0], [1], [0, 0, 1, 1], [], []>} : vector<1x144xf32>, vector<144x32xf32>, vector<1x32xf32> -> vector<1x32xf32>
    %206 = arith.addf %201, %205 : vector<1x32xf32>
    %207 = vector.extract_strided_slice %130 {offsets = [15, 0], sizes = [1, 144], strides = [1, 1]} : vector<16x144xf32> to vector<1x144xf32>
    %c15 = arith.constant 15 : index
    %c0_209 = arith.constant 0 : index
    %c0_210 = arith.constant 0 : index
    %208 = vector.load %arg6[%c15, %c0_209, %c0_210] : memref<16x144x32xf32, #tpu.memory_space<vmem>>, vector<1x144x32xf32>
    %209 = vector.shape_cast %208 : vector<1x144x32xf32> to vector<144x32xf32>
    %cst_211 = arith.constant dense<0.000000e+00> : vector<1x32xf32>
    %210 = tpu.matmul %207, %209, %cst_211 {dimension_numbers = #tpu.dot_dimension_numbers<[1], [0], [0], [1], [0, 0, 1, 1], [], []>} : vector<1x144xf32>, vector<144x32xf32>, vector<1x32xf32> -> vector<1x32xf32>
    %211 = arith.addf %206, %210 : vector<1x32xf32>
    %c0_212 = arith.constant 0 : index
    %c0_213 = arith.constant 0 : index
    %212 = vector.load %arg7[%c0_212, %c0_213] : memref<1x32xf32, #tpu.memory_space<vmem>>, vector<1x32xf32>
    %213 = arith.addf %211, %212 : vector<1x32xf32>
    %cst_214 = arith.constant 0.000000e+00 : f32
    %214 = vector.broadcast %cst_214 : f32 to vector<1x32xf32>
    %215 = arith.maximumf %213, %214 : vector<1x32xf32>
    %c0_215 = arith.constant 0 : index
    %c0_216 = arith.constant 0 : index
    %216 = vector.load %arg8[%c0_215, %c0_216] : memref<32x1xf32, #tpu.memory_space<vmem>>, vector<32x1xf32>
    %cst_217 = arith.constant dense<0.000000e+00> : vector<1x1xf32>
    %217 = tpu.matmul %215, %216, %cst_217 {dimension_numbers = #tpu.dot_dimension_numbers<[1], [0], [0], [1], [0, 0, 1, 1], [], []>} : vector<1x32xf32>, vector<32x1xf32>, vector<1x1xf32> -> vector<1x1xf32>
    %c0_218 = arith.constant 0 : index
    %c0_219 = arith.constant 0 : index
    %218 = vector.load %arg9[%c0_218, %c0_219] : memref<1x1xf32, #tpu.memory_space<vmem>>, vector<1x1xf32>
    %219 = arith.addf %217, %218 : vector<1x1xf32>
    %220 = vector.shape_cast %219 : vector<1x1xf32> to vector<1x1x1xf32>
    %c0_220 = arith.constant 0 : index
    %c0_221 = arith.constant 0 : index
    %c0_222 = arith.constant 0 : index
    %221 = vector.load %arg10[%c0_220, %c0_221, %c0_222] : memref<1x1x1xf32, #tpu.memory_space<vmem>>, vector<1x1x1xf32>
    tpu.vector_store %arg10[%c0_220, %c0_221, %c0_222], %220 {strides = array<i32>} : memref<1x1x1xf32, #tpu.memory_space<vmem>>, vector<1x1x1xf32>,
    return
  }
  func.func @transform_0(%arg0: i32) -> (i32, i32, i32, i32) {
    %c0_i32 = arith.constant 0 : i32
    %c0_i32_0 = arith.constant 0 : i32
    %c0_i32_1 = arith.constant 0 : i32
    %c0_i32_2 = arith.constant 0 : i32
    return %arg0, %c0_i32, %c0_i32_0, %c0_i32_1 : i32, i32, i32, i32
  }
  func.func @transform_1(%arg0: i32) -> (i32, i32, i32, i32) {
    %c0_i32 = arith.constant 0 : i32
    %c0_i32_0 = arith.constant 0 : i32
    %c0_i32_1 = arith.constant 0 : i32
    %c0_i32_2 = arith.constant 0 : i32
    %c0_i32_3 = arith.constant 0 : i32
    return %c0_i32, %c0_i32_0, %c0_i32_1, %c0_i32_2 : i32, i32, i32, i32
  }
  func.func @transform_2(%arg0: i32) -> (i32, i32) {
    %c0_i32 = arith.constant 0 : i32
    %c0_i32_0 = arith.constant 0 : i32
    %c0_i32_1 = arith.constant 0 : i32
    return %c0_i32, %c0_i32_0 : i32, i32
  }
  func.func @transform_3(%arg0: i32) -> (i32, i32, i32, i32) {
    %c0_i32 = arith.constant 0 : i32
    %c0_i32_0 = arith.constant 0 : i32
    %c0_i32_1 = arith.constant 0 : i32
    %c0_i32_2 = arith.constant 0 : i32
    %c0_i32_3 = arith.constant 0 : i32
    return %c0_i32, %c0_i32_0, %c0_i32_1, %c0_i32_2 : i32, i32, i32, i32
  }
  func.func @transform_4(%arg0: i32) -> (i32, i32) {
    %c0_i32 = arith.constant 0 : i32
    %c0_i32_0 = arith.constant 0 : i32
    %c0_i32_1 = arith.constant 0 : i32
    return %c0_i32, %c0_i32_0 : i32, i32
  }
  func.func @transform_5(%arg0: i32) -> (i32, i32, i32) {
    %c0_i32 = arith.constant 0 : i32
    %c0_i32_0 = arith.constant 0 : i32
    %c0_i32_1 = arith.constant 0 : i32
    %c0_i32_2 = arith.constant 0 : i32
    return %c0_i32, %c0_i32_0, %c0_i32_1 : i32, i32, i32
  }
  func.func @transform_6(%arg0: i32) -> (i32, i32) {
    %c0_i32 = arith.constant 0 : i32
    %c0_i32_0 = arith.constant 0 : i32
    %c0_i32_1 = arith.constant 0 : i32
    return %c0_i32, %c0_i32_0 : i32, i32
  }
  func.func @transform_7(%arg0: i32) -> (i32, i32) {
    %c0_i32 = arith.constant 0 : i32
    %c0_i32_0 = arith.constant 0 : i32
    %c0_i32_1 = arith.constant 0 : i32
    return %c0_i32, %c0_i32_0 : i32, i32
  }
  func.func @transform_8(%arg0: i32) -> (i32, i32) {
    %c0_i32 = arith.constant 0 : i32
    %c0_i32_0 = arith.constant 0 : i32
    %c0_i32_1 = arith.constant 0 : i32
    return %c0_i32, %c0_i32_0 : i32, i32
  }
  func.func @transform_9(%arg0: i32) -> (i32, i32, i32) {
    %c0_i32 = arith.constant 0 : i32
    %c0_i32_0 = arith.constant 0 : i32
    %c0_i32_1 = arith.constant 0 : i32
    return %arg0, %c0_i32, %c0_i32_0 : i32, i32, i32
  }
}

</mosaic_0001>

<bundles_post_ra>
// kernel: ecg12_imagenet_forward.1
= control target key start
LH: loop header
LB: loop body
LE: loop exit
PB: predicated region body
PF: predicated region fallthrough
CT: control target
= control target key end

     0   :  { %s18720_s11 = smov 0   ;;  %s23447_s0 = inlined_call_operand.vmem [shape: f32[2,16,16,4], index: 0, kind: input, shape index: {}]   ;;  %s23448_s1 = inlined_call_operand.vmem [shape: f32[3,3,4,8], index: 1, kind: input, shape index: {}]   ;;  %s23449_s2 = inlined_call_operand.vmem [shape: f32[1,8], index: 2, kind: input, shape index: {}]   ;;  %s23450_s3 = inlined_call_operand.vmem [shape: f32[3,3,16,8], index: 3, kind: input, shape index: {}]   ;;  %s23451_s4 = inlined_call_operand.vmem [shape: f32[16,1], index: 4, kind: input, shape index: {}]   ;;  %s23452_s5 = inlined_call_operand.vmem [shape: f32[16,144,32], index: 5, kind: input, shape index: {}]   ;;  %s23453_s6 = inlined_call_operand.vmem [shape: f32[1,32], index: 6, kind: input, shape index: {}]   ;;  %s23454_s7 = inlined_call_operand.vmem [shape: f32[32,1], index: 7, kind: input, shape index: {}]   ;;  %s23455_s8 = inlined_call_operand.<no memory space> [shape: f32[1,1], index: 8, kind: input, shape index: {}]   ;;  %s23456_s9 = inlined_call_operand.vmem [shape: f32[2,1,1], index: 9, kind: output, shape index: {}]  }
   0x1   :  { %v14_v0 = vstv %s23455_s8 }
   0x2   :  { %15 = vst [vmem:[#allocation3] sm:$0x1] %v14_v0 }
   0x3 LB: > { %s15634_s12 = sadd.s32 4294967295, %s18660_s11   ;;  %p15638_p0 = scmp.ge.s32.totalorder %s18660_s11, 1  ;;  %s18660_s11 = sphi %s18720_s11, %s21_s11  }
   0x4   : > { %p289_p1 = scmp.lt.s32.totalorder %s18660_s11, 3 }
   0x6   : > { %p290_p2 = pnand %p15638_p0, %p289_p1 }
   0x8   : > { %293 = sbr.rel (%p290_p2) target bundleno = 2623 (0xa3f), region = 56 }
   0xf   : > { %v15641_v1 = vld [vmem:[%s23448_s1 + $0x4] sm:$0xf]  ;;  %vm1837_vm0 = vcmask 1043456   ;;  %p323_p3 = scmp.lt.s32.totalorder %s15634_s12, 1  ;;  %v391_v2 = vlaneseq  ;;  %v23457_v3 = vmov 0.0   ;;  %vm18663_vm1 = vmmov 0  }
  0x10   : > { %16777 = vmatprep.subr.mxu0 %v23457_v3  ;;  %16854 = vmatprep.subr.mxu1 %v23457_v3  ;;  %v849_v4 = vld [vmem:[%s23448_s1] sm:$0xf]  ;;  %v18664_v5 = vmov 1983009808   ;;  %vm1786_vm2 = vcmask 31744   ;;  %vm12108_vm3 = vcmask 64512  }
  0x11   : > { %16778 = vmatpush3.msk.msra.mxu0 %vm1837_vm0, %v15641_v1  ;;  %16779 = vmatprep.mubr.msk.f32.mxu0 %vm18663_vm1, %v23457_v3  ;;  %s23556_s12 = smov (!%p323_p3, %s15634_s12), 1  ;;  %v389_v6 = vunpack.c.l.s4 %v18664_v5  ;;  %v392_v7 = vshrl.u32 %v391_v2, 7  ;;  %v15694_v2 = vld [vmem:[%s23448_s1 + $0x8] sm:$0xf]  ;;  %vm12110_vm4 = vcmask 62464   ;;  %vm21427_vm5 = vmpackc.low %vm12108_vm3, %vm12108_vm3  ;;  %vm14029_vm6 = vcmask 130048  }
  0x12   : > { %16855 = vmatpush3.msk.msra.mxu1 %vm1837_vm0, %v849_v4  ;;  %16856 = vmatprep.mubr.msk.f32.mxu1 %vm18663_vm1, %v23457_v3  ;;  %s16537_s16 = sshll.u32 %s23556_s12, 8  ;;  %vm15511_vm7 = vcmask 261120   ;;  %s330_s24 = scalar_lea.vmem %s23456_s9, %s23556_s12  ;;  %vm15585_vm8 = vcmask 0  }
  0x13   : > { %v390_v8 = vunpack.c.0.s8 %v389_v6  ;;  %16931 = vmatprep.subr.mxu0 %v23457_v3  ;;  %17008 = vmatprep.subr.mxu1 %v23457_v3  ;;  %s18750_s19 = scalar_lea.vmem %s23447_s0, %s16537_s16 }
  0x14   : > { %v850_v10 = vld [vmem:[%s18750_s19 + $0x1] sm:$0xff]  ;;  %v851_v12 = vld [vmem:[%s18750_s19 + $0x9] sm:$0x3f]  ;;  %v852_v15 = vld [vmem:[%s18750_s19 + $0x11] sm:$0xff] }
  0x15   : > { %v18752_v9 = vsub.s32 %v390_v8, %v392_v7  ;;  %v331_v11 = vld [vmem:[%s18750_s19] sm:$0xff]  ;;  %v906_v13 = vcombine.high %v850_v10, %v850_v10  ;;  %v923_v16 = vcombine.high %v851_v12, %v851_v12  ;;  %v332_v17 = vld [vmem:[%s18750_s19 + $0x8] sm:$0x3f]  ;;  %v333_v29 = vld [vmem:[%s18750_s19 + $0x10] sm:$0xff]  ;;  %v939_v51 = vcombine.high %v852_v15, %v852_v15 }
  0x16   : > { %v387_v14 = vcombine.high %v331_v11, %v331_v11  ;;  %v404_v25 = vcombine.high %v332_v17, %v332_v17  ;;  %v853_v43 = vld [vmem:[%s18750_s19 + $0x19] sm:$0x3f]  ;;  %v420_v61 = vcombine.high %v333_v29, %v333_v29  ;;  %v854_v0 = vld [vmem:[%s18750_s19 + $0x21] sm:$0xff] }
  0x17   : > { %v913_v18 = vrot.slane %v850_v10, %v18752_v9  ;;  %v394_v19 = vrot.slane %v331_v11, %v18752_v9  ;;  %v930_v20 = vrot.slane %v851_v12, %v18752_v9  ;;  %v946_v21 = vrot.slane %v852_v15, %v18752_v9  ;;  %v334_v52 = vld [vmem:[%s18750_s19 + $0x18] sm:$0x3f] }
  0x18   : > { %v920_v22 = vrot.slane %v906_v13, %v18752_v9  ;;  %v401_v23 = vrot.slane %v387_v14, %v18752_v9  ;;  %v937_v24 = vrot.slane %v923_v16, %v18752_v9  ;;  %v411_v30 = vrot.slane %v332_v17, %v18752_v9 }
  0x19   : > { %v921_v26 = vcombine.high %v913_v18, %v913_v18  ;;  %v402_v27 = vcombine.high %v394_v19, %v394_v19  ;;  %v938_v28 = vcombine.high %v930_v20, %v930_v20  ;;  %v418_v34 = vrot.slane %v404_v25, %v18752_v9 }
  0x1a   : > { %v922_v31 = vcombine.high %v920_v22, %v920_v22  ;;  %v403_v32 = vcombine.high %v401_v23, %v401_v23  ;;  %v1388_v33 = vcombine.low %v937_v24, %v946_v21  ;;  %v419_v38 = vcombine.high %v411_v30, %v411_v30 }
  0x1b   : > { %v1370_v35 = vcombine.low %v913_v18, %v921_v26  ;;  %v2031_v36 = vcombine.low %v394_v19, %v402_v27  ;;  %v1387_v37 = vcombine.low %v930_v20, %v938_v28  ;;  %v427_v42 = vrot.slane %v333_v29, %v18752_v9  ;;  %v335_v18 = vld [vmem:[%s18750_s19 + $0x20] sm:$0xff]  ;;  %v336_v27 = vld [vmem:[%s18750_s19 + $0x28] sm:$0x3f] }
  0x1c   : > { %v1371_v39 = vcombine.low %v920_v22, %v922_v31  ;;  %v2032_v40 = vcombine.low %v401_v23, %v403_v32  ;;  %v1402_v41 = vrot.slane %v1388_v33, %v18752_v9  ;;  %v2048_v47 = vcombine.low %v411_v30, %v419_v38  ;;  %v855_v23 = vld [vmem:[%s18750_s19 + $0x29] sm:$0x3f] }
  0x1d   : > { %v1378_v44 = vrot.slane %v1370_v35, %v18752_v9  ;;  %v2039_v45 = vrot.slane %v2031_v36, %v18752_v9  ;;  %v1395_v46 = vrot.slane %v1387_v37, %v18752_v9  ;;  %v2049_v50 = vcombine.low %v418_v34, %v427_v42  ;;  %v15749_v32 = vld [vmem:[%s23448_s1 + $0xc] sm:$0xf] }
  0x1e   : > { %v1385_v48 = vrot.slane %v1371_v39, %v18752_v9  ;;  %v2046_v49 = vrot.slane %v2032_v40, %v18752_v9  ;;  %v2056_v54 = vrot.slane %v2048_v47, %v18752_v9  ;;  %v954_v55 = vcombine.high %v946_v21, %v946_v21 }
  0x1f   : > { %v1403_v53 = vcombine.low %v1395_v46, %v1402_v41  ;;  %v963_v56 = vrot.slane %v853_v43, %v18752_v9  ;;  %v2063_v59 = vrot.slane %v2049_v50, %v18752_v9  ;;  %v953_v60 = vrot.slane %v939_v51, %v18752_v9  ;;  %v856_v41 = vld [vmem:[%s18750_s19 + $0x31] sm:$0xff] }
  0x20   : > { %v1386_v57 = vcombine.low %v1378_v44, %v1385_v48  ;;  %v2047_v58 = vcombine.low %v2039_v45, %v2046_v49  ;;  %v435_v62 = vcombine.high %v427_v42, %v427_v42  ;;  %v444_v63 = vrot.slane %v334_v52, %v18752_v9 }
  0x21   : > { %v956_v1 = vcombine.high %v853_v43, %v853_v43  ;;  %v2064_v4 = vcombine.low %v2056_v54, %v2063_v59  ;;  %v955_v5 = vcombine.high %v953_v60, %v953_v60  ;;  %v1404_v6 = vcombine.low %v954_v55, %v953_v60 }
  0x22   : > { %16780 = vmatmul.mubr.msk.f32.vlgmr.msra.gmra.mrb[0].mxu0 %vm1786_vm2, %v1386_v57  ;;  %16857 = vmatmul.mubr.msk.f32.vlgmr.msra.gmra.mrb[0].mxu1 %vm1786_vm2, %v2047_v58  ;;  %v434_v7 = vrot.slane %v420_v61, %v18752_v9  ;;  %v971_v10 = vcombine.high %v963_v56, %v963_v56  ;;  %v979_v13 = vrot.slane %v854_v0, %v18752_v9  ;;  %v337_v61 = vld [vmem:[%s18750_s19 + $0x30] sm:$0xff] }
  0x23   : > { %16782 = vmatprep.mubr.msk.f32.mxu0 %vm18663_vm1, %v23457_v3  ;;  %16859 = vmatprep.mubr.msk.f32.mxu1 %vm18663_vm1, %v23457_v3  ;;  %v970_v8 = vrot.slane %v956_v1, %v18752_v9  ;;  %v1405_v11 = vcombine.low %v955_v5, %v963_v56  ;;  %v1412_v12 = vrot.slane %v1404_v6, %v18752_v9 }
  0x24   : > { %v437_v14 = vcombine.high %v334_v52, %v334_v52  ;;  %16932 = vmatpush3.msk.msra.mxu0 %vm1837_vm0, %v15694_v2  ;;  %v436_v15 = vcombine.high %v434_v7, %v434_v7  ;;  %v2065_v16 = vcombine.low %v435_v62, %v434_v7  ;;  %v452_v19 = vcombine.high %v444_v63, %v444_v63  ;;  %v857_v7 = vld [vmem:[%s18750_s19 + $0x39] sm:$0x3f] }
  0x25   : > { %v1421_v17 = vcombine.low %v971_v10, %v970_v8  ;;  %17085 = vmatprep.subr.mxu0 %v23457_v3  ;;  %v1419_v20 = vrot.slane %v1405_v11, %v18752_v9  ;;  %v987_v21 = vcombine.high %v979_v13, %v979_v13  ;;  %v460_v30 = vrot.slane %v335_v18, %v18752_v9 }
  0x26   : > { %16783 = vmatmul.mubr.msk.f32.gmra.mrb[2].mxu0 %vm1786_vm2, %v1403_v53  ;;  %16860 = vmatmul.mubr.msk.f32.gmra.mrb[2].mxu1 %vm1786_vm2, %v2064_v4  ;;  %v451_v22 = vrot.slane %v437_v14, %v18752_v9  ;;  %v2066_v24 = vcombine.low %v436_v15, %v444_v63  ;;  %v2073_v25 = vrot.slane %v2065_v16, %v18752_v9 }
  0x27   : > { %16785 = vmatprep.mubr.msk.f32.mxu0 %vm18663_vm1, %v23457_v3  ;;  %16862 = vmatprep.mubr.msk.f32.mxu1 %vm18663_vm1, %v23457_v3  ;;  %v1429_v26 = vrot.slane %v1421_v17, %v18752_v9  ;;  %v1420_v28 = vcombine.low %v1412_v12, %v1419_v20  ;;  %v1422_v29 = vcombine.low %v979_v13, %v987_v21  ;;  %v338_v13 = vld [vmem:[%s18750_s19 + $0x38] sm:$0x3f] }
  0x28   : > { %v2082_v31 = vcombine.low %v452_v19, %v451_v22  ;;  %v2080_v33 = vrot.slane %v2066_v24, %v18752_v9  ;;  %v972_v34 = vcombine.high %v854_v0, %v854_v0  ;;  %v996_v35 = vrot.slane %v855_v23, %v18752_v9  ;;  %17009 = vmatpush3.msk.msra.mxu1 %vm1837_vm0, %v15749_v32 }
  0x29   : > { %v453_v36 = vcombine.high %v335_v18, %v335_v18  ;;  %v1436_v37 = vrot.slane %v1422_v29, %v18752_v9  ;;  %v468_v38 = vcombine.high %v460_v30, %v460_v30  ;;  %v477_v40 = vrot.slane %v336_v27, %v18752_v9  ;;  %17162 = vmatprep.subr.mxu1 %v23457_v3 }
  0x2a   : > { %16786 = vmatmul.mubr.msk.f32.gmra.mrb[4].mxu0 %vm1786_vm2, %v1420_v28  ;;  %v2090_v39 = vrot.slane %v2082_v31, %v18752_v9  ;;  %v2081_v42 = vcombine.low %v2073_v25, %v2080_v33  ;;  %v986_v43 = vrot.slane %v972_v34, %v18752_v9  ;;  %v1004_v44 = vcombine.high %v996_v35, %v996_v35  ;;  %v339_v34 = vld [vmem:[%s18750_s19 + $0x40] sm:$0xff] }
  0x2b   : > { %16788 = vmatprep.mubr.msk.f32.mxu0 %vm18663_vm1, %v23457_v3  ;;  %v467_v45 = vrot.slane %v453_v36, %v18752_v9  ;;  %v1437_v46 = vcombine.low %v1429_v26, %v1436_v37  ;;  %v2083_v47 = vcombine.low %v460_v30, %v468_v38  ;;  %v485_v48 = vcombine.high %v477_v40, %v477_v40  ;;  %v858_v26 = vld [vmem:[%s18750_s19 + $0x41] sm:$0xff] }
  0x2c   : > { %v989_v49 = vcombine.high %v855_v23, %v855_v23  ;;  %16863 = vmatmul.mubr.msk.f32.gmra.mrb[4].mxu1 %vm1786_vm2, %v2081_v42  ;;  %v988_v50 = vcombine.high %v986_v43, %v986_v43  ;;  %v1439_v51 = vcombine.low %v996_v35, %v1004_v44  ;;  %v1005_v53 = vcombine.high %v856_v41, %v856_v41 }
  0x2d   : > { %v469_v52 = vcombine.high %v467_v45, %v467_v45  ;;  %16865 = vmatprep.mubr.msk.f32.mxu1 %vm18663_vm1, %v23457_v3  ;;  %v2097_v54 = vrot.slane %v2083_v47, %v18752_v9  ;;  %v2100_v55 = vcombine.low %v477_v40, %v485_v48  ;;  %v1012_v60 = vrot.slane %v856_v41, %v18752_v9 }
  0x2e   : > { %16789 = vmatmul.mubr.msk.f32.gmra.mrb[6].mxu0 %vm1786_vm2, %v1437_v46  ;;  %v1003_v56 = vrot.slane %v989_v49, %v18752_v9  ;;  %v1438_v57 = vcombine.low %v986_v43, %v988_v50  ;;  %v1453_v58 = vrot.slane %v1439_v51, %v18752_v9  ;;  %v1019_v0 = vrot.slane %v1005_v53, %v18752_v9  ;;  %v859_v43 = vld [vmem:[%s18750_s19 + $0x49] sm:$0x3f] }
  0x2f   : > { %16791 = vmatprep.mubr.msk.f32.mxu0 %vm18663_vm1, %v23457_v3  ;;  %v2099_v59 = vcombine.low %v467_v45, %v469_v52  ;;  %v2098_v62 = vcombine.low %v2090_v39, %v2097_v54  ;;  %v2114_v63 = vrot.slane %v2100_v55, %v18752_v9  ;;  %v470_v1 = vcombine.high %v336_v27, %v336_v27  ;;  %v860_v55 = vld [vmem:[%s18750_s19 + $0x51] sm:$0xff] }
  0x30   : > { %v1446_v2 = vrot.slane %v1438_v57, %v18752_v9  ;;  %v1020_v5 = vcombine.high %v1012_v60, %v1012_v60  ;;  %v1455_v6 = vcombine.low %v1003_v56, %v1012_v60  ;;  %v486_v10 = vcombine.high %v337_v61, %v337_v61 }
  0x31   : > { %v2107_v4 = vrot.slane %v2099_v59, %v18752_v9  ;;  %16866 = vmatmul.mubr.msk.f32.gmra.mrb[6].mxu1 %vm1786_vm2, %v2098_v62  ;;  %v484_v8 = vrot.slane %v470_v1, %v18752_v9  ;;  %v493_v11 = vrot.slane %v337_v61, %v18752_v9  ;;  %v1021_v12 = vcombine.high %v1019_v0, %v1019_v0  ;;  %v340_v61 = vld [vmem:[%s18750_s19 + $0x48] sm:$0x3f] }
  0x32   : > { %16868 = vmatprep.mubr.msk.f32.mxu1 %vm18663_vm1, %v23457_v3  ;;  %v1454_v14 = vcombine.low %v1446_v2, %v1453_v58  ;;  %v1456_v16 = vcombine.low %v1020_v5, %v1019_v0  ;;  %v1463_v17 = vrot.slane %v1455_v6, %v18752_v9  ;;  %v500_v18 = vrot.slane %v486_v10, %v18752_v9 }
  0x33   : > { %v2115_v15 = vcombine.low %v2107_v4, %v2114_v63  ;;  %v501_v19 = vcombine.high %v493_v11, %v493_v11  ;;  %v2116_v20 = vcombine.low %v484_v8, %v493_v11  ;;  %v1022_v21 = vcombine.high %v857_v7, %v857_v7 }
  0x34   : > { %16792 = vmatmul.mubr.msk.f32.gmra.mrb[8].mxu0 %vm1786_vm2, %v1454_v14  ;;  %v1470_v22 = vrot.slane %v1456_v16, %v18752_v9  ;;  %v1029_v23 = vrot.slane %v857_v7, %v18752_v9  ;;  %v503_v24 = vcombine.high %v338_v13, %v338_v13  ;;  %v510_v25 = vrot.slane %v338_v13, %v18752_v9  ;;  %v341_v7 = vld [vmem:[%s18750_s19 + $0x50] sm:$0xff]  ;;  %v861_v16 = vld [vmem:[%s18750_s19 + $0x59] sm:$0x3f] }
  0x35   : > { %16869 = vmatmul.mubr.msk.f32.gmra.mrb[8].mxu1 %vm1786_vm2, %v2115_v15  ;;  %16794 = vmatprep.mubr.msk.f32.mxu0 %vm18663_vm1, %v23457_v3  ;;  %v2117_v27 = vcombine.low %v501_v19, %v500_v18  ;;  %v2124_v28 = vrot.slane %v2116_v20, %v18752_v9  ;;  %v1036_v29 = vrot.slane %v1022_v21, %v18752_v9 }
  0x36   : > { %16871 = vmatprep.mubr.msk.f32.mxu1 %vm18663_vm1, %v23457_v3  ;;  %v1471_v30 = vcombine.low %v1463_v17, %v1470_v22  ;;  %v1037_v31 = vcombine.high %v1029_v23, %v1029_v23  ;;  %v1472_v32 = vcombine.low %v1021_v12, %v1029_v23  ;;  %v502_v33 = vcombine.high %v500_v18, %v500_v18 }
  0x37   : > { %v2131_v35 = vrot.slane %v2117_v27, %v18752_v9  ;;  %v517_v36 = vrot.slane %v503_v24, %v18752_v9  ;;  %v518_v37 = vcombine.high %v510_v25, %v510_v25  ;;  %v1038_v38 = vcombine.high %v858_v26, %v858_v26 }
  0x38   : > { %16795 = vmatmul.mubr.msk.f32.gmra.mrb[10].mxu0 %vm1786_vm2, %v1471_v30  ;;  %v1473_v39 = vcombine.low %v1037_v31, %v1036_v29  ;;  %v1480_v40 = vrot.slane %v1472_v32, %v18752_v9  ;;  %v2133_v41 = vcombine.low %v502_v33, %v510_v25  ;;  %v1045_v42 = vrot.slane %v858_v26, %v18752_v9  ;;  %v342_v25 = vld [vmem:[%s18750_s19 + $0x58] sm:$0x3f] }
  0x39   : > { %v2132_v44 = vcombine.low %v2124_v28, %v2131_v35  ;;  %16797 = vmatprep.mubr.msk.f32.mxu0 %vm18663_vm1, %v23457_v3  ;;  %v2134_v45 = vcombine.low %v518_v37, %v517_v36  ;;  %v1052_v46 = vrot.slane %v1038_v38, %v18752_v9  ;;  %v519_v47 = vcombine.high %v339_v34, %v339_v34 }
  0x3a   : > { %v1487_v48 = vrot.slane %v1473_v39, %v18752_v9  ;;  %v2141_v49 = vrot.slane %v2133_v41, %v18752_v9  ;;  %v1053_v50 = vcombine.high %v1045_v42, %v1045_v42  ;;  %v526_v51 = vrot.slane %v339_v34, %v18752_v9  ;;  %v862_v34 = vld [vmem:[%s18750_s19 + $0x61] sm:$0xff] }
  0x3b   : > { %16872 = vmatmul.mubr.msk.f32.gmra.mrb[10].mxu1 %vm1786_vm2, %v2132_v44  ;;  %v2148_v52 = vrot.slane %v2134_v45, %v18752_v9  ;;  %v1054_v53 = vcombine.high %v1052_v46, %v1052_v46  ;;  %v533_v54 = vrot.slane %v519_v47, %v18752_v9  ;;  %v1055_v56 = vcombine.high %v859_v43, %v859_v43 }
  0x3c   : > { %16874 = vmatprep.mubr.msk.f32.mxu1 %vm18663_vm1, %v23457_v3  ;;  %v1488_v57 = vcombine.low %v1480_v40, %v1487_v48  ;;  %v1489_v58 = vcombine.low %v1045_v42, %v1053_v50  ;;  %v534_v59 = vcombine.high %v526_v51, %v526_v51  ;;  %v1062_v60 = vrot.slane %v859_v43, %v18752_v9 }
  0x3d   : > { %v2149_v62 = vcombine.low %v2141_v49, %v2148_v52  ;;  %v1490_v63 = vcombine.low %v1052_v46, %v1054_v53  ;;  %v535_v0 = vcombine.high %v533_v54, %v533_v54  ;;  %v1069_v1 = vrot.slane %v1055_v56, %v18752_v9  ;;  %v343_v46 = vld [vmem:[%s18750_s19 + $0x60] sm:$0xff] }
  0x3e   : > { %16798 = vmatmul.mubr.msk.f32.gmra.mrb[12].mxu0 %vm1786_vm2, %v1488_v57  ;;  %v1497_v2 = vrot.slane %v1489_v58, %v18752_v9  ;;  %v2150_v4 = vcombine.low %v526_v51, %v534_v59  ;;  %v1070_v5 = vcombine.high %v1062_v60, %v1062_v60  ;;  %v1078_v6 = vrot.slane %v860_v55, %v18752_v9 }
  0x3f   : > { %16875 = vmatmul.mubr.msk.f32.gmra.mrb[12].mxu1 %vm1786_vm2, %v2149_v62  ;;  %16800 = vmatprep.mubr.msk.f32.mxu0 %vm18663_vm1, %v23457_v3  ;;  %v1504_v8 = vrot.slane %v1490_v63, %v18752_v9  ;;  %v2151_v10 = vcombine.low %v533_v54, %v535_v0  ;;  %v536_v11 = vcombine.high %v340_v61, %v340_v61 }
  0x40   : > { %16877 = vmatprep.mubr.msk.f32.mxu1 %vm18663_vm1, %v23457_v3  ;;  %v2158_v12 = vrot.slane %v2150_v4, %v18752_v9  ;;  %v1506_v13 = vcombine.low %v1062_v60, %v1070_v5  ;;  %v1507_v14 = vcombine.low %v1069_v1, %v1078_v6  ;;  %v543_v15 = vrot.slane %v340_v61, %v18752_v9  ;;  %v863_v60 = vld [vmem:[%s18750_s19 + $0x69] sm:$0x3f] }
  0x41   : > { %v1505_v17 = vcombine.low %v1497_v2, %v1504_v8  ;;  %v2165_v18 = vrot.slane %v2151_v10, %v18752_v9  ;;  %v550_v19 = vrot.slane %v536_v11, %v18752_v9  ;;  %v559_v20 = vrot.slane %v341_v7, %v18752_v9  ;;  %v344_v1 = vld [vmem:[%s18750_s19 + $0x68] sm:$0x3f] }
  0x42   : > { %v1514_v21 = vrot.slane %v1506_v13, %v18752_v9  ;;  %v1521_v22 = vrot.slane %v1507_v14, %v18752_v9  ;;  %v551_v23 = vcombine.high %v543_v15, %v543_v15  ;;  %v1071_v24 = vcombine.high %v860_v55, %v860_v55 }
  0x43   : > { %16801 = vmatmul.mubr.msk.f32.gmra.mrb[14].mxu0 %vm1786_vm2, %v1505_v17  ;;  %v2166_v26 = vcombine.low %v2158_v12, %v2165_v18  ;;  %v2168_v27 = vcombine.low %v550_v19, %v559_v20  ;;  %v1086_v28 = vcombine.high %v1078_v6, %v1078_v6  ;;  %v1095_v29 = vrot.slane %v861_v16, %v18752_v9  ;;  %v864_v12 = vld [vmem:[%s18750_s19 + $0x71] sm:$0xff] }
  0x44   : > { %16803 = vmatprep.mubr.msk.f32.mxu0 %vm18663_vm1, %v23457_v3  ;;  %v1522_v30 = vcombine.low %v1514_v21, %v1521_v22  ;;  %v2167_v31 = vcombine.low %v543_v15, %v551_v23  ;;  %v1085_v32 = vrot.slane %v1071_v24, %v18752_v9  ;;  %v552_v33 = vcombine.high %v341_v7, %v341_v7 }
  0x45   : > { %16878 = vmatmul.mubr.msk.f32.gmra.mrb[14].mxu1 %vm1786_vm2, %v2166_v26  ;;  %v2182_v35 = vrot.slane %v2168_v27, %v18752_v9  ;;  %v567_v36 = vcombine.high %v559_v20, %v559_v20  ;;  %v576_v37 = vrot.slane %v342_v25, %v18752_v9  ;;  %v1088_v38 = vcombine.high %v861_v16, %v861_v16 }
  0x46   : > { %16880 = vmatprep.mubr.msk.f32.mxu1 %vm18663_vm1, %v23457_v3  ;;  %v2175_v39 = vrot.slane %v2167_v31, %v18752_v9  ;;  %v1087_v40 = vcombine.high %v1085_v32, %v1085_v32  ;;  %v1523_v41 = vcombine.low %v1086_v28, %v1085_v32  ;;  %v566_v42 = vrot.slane %v552_v33, %v18752_v9 }
  0x47   : > { %16804 = vmatmul.mubr.msk.f32.gmra.mrb[16].mxu0 %vm1786_vm2, %v1522_v30  ;;  %v1102_v43 = vrot.slane %v1088_v38, %v18752_v9  ;;  %v1103_v44 = vcombine.high %v1095_v29, %v1095_v29  ;;  %v1111_v45 = vrot.slane %v862_v34, %v18752_v9  ;;  %v569_v47 = vcombine.high %v342_v25, %v342_v25 }
  0x48   : > { %v2183_v48 = vcombine.low %v2175_v39, %v2182_v35  ;;  %16806 = vmatprep.mubr.msk.f32.mxu0 %vm18663_vm1, %v23457_v3  ;;  %v1524_v49 = vcombine.low %v1087_v40, %v1095_v29  ;;  %v1531_v50 = vrot.slane %v1523_v41, %v18752_v9  ;;  %v568_v51 = vcombine.high %v566_v42, %v566_v42  ;;  %v345_v29 = vld [vmem:[%s18750_s19 + $0x70] sm:$0xff] }
  0x49   : > { %v2184_v52 = vcombine.low %v567_v36, %v566_v42  ;;  %v1119_v53 = vcombine.high %v1111_v45, %v1111_v45  ;;  %v1540_v54 = vcombine.low %v1103_v44, %v1102_v43  ;;  %v583_v55 = vrot.slane %v569_v47, %v18752_v9  ;;  %v865_v42 = vld [vmem:[%s18750_s19 + $0x79] sm:$0x3f] }
  0x4a   : > { %16881 = vmatmul.mubr.msk.f32.gmra.mrb[16].mxu1 %vm1786_vm2, %v2183_v48  ;;  %v1538_v56 = vrot.slane %v1524_v49, %v18752_v9  ;;  %v2185_v57 = vcombine.low %v568_v51, %v576_v37  ;;  %v584_v58 = vcombine.high %v576_v37, %v576_v37  ;;  %v592_v59 = vrot.slane %v343_v46, %v18752_v9  ;;  %v346_v47 = vld [vmem:[%s18750_s19 + $0x78] sm:$0x3f] }
  0x4b   : > { %16883 = vmatprep.mubr.msk.f32.mxu1 %vm18663_vm1, %v23457_v3  ;;  %v2192_v61 = vrot.slane %v2184_v52, %v18752_v9  ;;  %v1541_v62 = vcombine.low %v1111_v45, %v1119_v53  ;;  %v1548_v63 = vrot.slane %v1540_v54, %v18752_v9  ;;  %v1104_v0 = vcombine.high %v862_v34, %v862_v34 }
  0x4c   : > { %v1539_v2 = vcombine.low %v1531_v50, %v1538_v56  ;;  %v2199_v4 = vrot.slane %v2185_v57, %v18752_v9  ;;  %v600_v5 = vcombine.high %v592_v59, %v592_v59  ;;  %v2201_v6 = vcombine.low %v584_v58, %v583_v55 }
  0x4d   : > { %v1555_v7 = vrot.slane %v1541_v62, %v18752_v9  ;;  %v1118_v8 = vrot.slane %v1104_v0, %v18752_v9  ;;  %v1128_v10 = vrot.slane %v863_v60, %v18752_v9  ;;  %v585_v11 = vcombine.high %v343_v46, %v343_v46 }
  0x4e   : > { %16807 = vmatmul.mubr.msk.f32.gmra.mrb[18].mxu0 %vm1786_vm2, %v1539_v2  ;;  %v2200_v13 = vcombine.low %v2192_v61, %v2199_v4  ;;  %v2202_v14 = vcombine.low %v592_v59, %v600_v5  ;;  %v2209_v15 = vrot.slane %v2201_v6, %v18752_v9  ;;  %v609_v16 = vrot.slane %v344_v1, %v18752_v9 }
  0x4f   : > { %16809 = vmatprep.mubr.msk.f32.mxu0 %vm18663_vm1, %v23457_v3  ;;  %v1556_v17 = vcombine.low %v1548_v63, %v1555_v7  ;;  %v1120_v18 = vcombine.high %v1118_v8, %v1118_v8  ;;  %v1136_v19 = vcombine.high %v1128_v10, %v1128_v10  ;;  %v599_v20 = vrot.slane %v585_v11, %v18752_v9 }
  0x50   : > { %16884 = vmatmul.mubr.msk.f32.gmra.mrb[18].mxu1 %vm1786_vm2, %v2200_v13  ;;  %v2216_v21 = vrot.slane %v2202_v14, %v18752_v9  ;;  %v617_v22 = vcombine.high %v609_v16, %v609_v16  ;;  %v1121_v23 = vcombine.high %v863_v60, %v863_v60  ;;  %v1137_v24 = vcombine.high %v864_v12, %v864_v12  ;;  %v866_v60 = vld [vmem:[%s18750_s19 + $0x81] sm:$0xff] }
  0x51   : > { %16886 = vmatprep.mubr.msk.f32.mxu1 %vm18663_vm1, %v23457_v3  ;;  %v1557_v25 = vcombine.low %v1118_v8, %v1120_v18  ;;  %v1558_v26 = vcombine.low %v1128_v10, %v1136_v19  ;;  %v601_v27 = vcombine.high %v599_v20, %v599_v20  ;;  %v1144_v28 = vrot.slane %v864_v12, %v18752_v9 }
  0x52   : > { %16810 = vmatmul.mubr.msk.f32.gmra.mrb[20].mxu0 %vm1786_vm2, %v1556_v17  ;;  %v2217_v30 = vcombine.low %v2209_v15, %v2216_v21  ;;  %v2219_v31 = vcombine.low %v609_v16, %v617_v22  ;;  %v1135_v32 = vrot.slane %v1121_v23, %v18752_v9  ;;  %v1151_v33 = vrot.slane %v1137_v24, %v18752_v9  ;;  %v867_v16 = vld [vmem:[%s18750_s19 + $0x89] sm:$0x3f] }
  0x53   : > { %16812 = vmatprep.mubr.msk.f32.mxu0 %vm18663_vm1, %v23457_v3  ;;  %v1565_v34 = vrot.slane %v1557_v25, %v18752_v9  ;;  %v1572_v35 = vrot.slane %v1558_v26, %v18752_v9  ;;  %v2218_v36 = vcombine.low %v599_v20, %v601_v27  ;;  %v1152_v37 = vcombine.high %v1144_v28, %v1144_v28  ;;  %v868_v27 = vld [vmem:[%s18750_s19 + $0x91] sm:$0xff] }
  0x54   : > { %16887 = vmatmul.mubr.msk.f32.gmra.mrb[20].mxu1 %vm1786_vm2, %v2217_v30  ;;  %v2233_v38 = vrot.slane %v2219_v31, %v18752_v9  ;;  %v1574_v39 = vcombine.low %v1135_v32, %v1144_v28  ;;  %v602_v40 = vcombine.high %v344_v1, %v344_v1  ;;  %v618_v41 = vcombine.high %v345_v29, %v345_v29  ;;  %v347_v1 = vld [vmem:[%s18750_s19 + $0x80] sm:$0xff] }
  0x55   : > { %16889 = vmatprep.mubr.msk.f32.mxu1 %vm18663_vm1, %v23457_v3  ;;  %v1573_v43 = vcombine.low %v1565_v34, %v1572_v35  ;;  %v2226_v44 = vrot.slane %v2218_v36, %v18752_v9  ;;  %v1575_v45 = vcombine.low %v1152_v37, %v1151_v33  ;;  %v625_v46 = vrot.slane %v345_v29, %v18752_v9  ;;  %v348_v34 = vld [vmem:[%s18750_s19 + $0x88] sm:$0x3f] }
  0x56   : > { %v1582_v48 = vrot.slane %v1574_v39, %v18752_v9  ;;  %v616_v49 = vrot.slane %v602_v40, %v18752_v9  ;;  %v632_v50 = vrot.slane %v618_v41, %v18752_v9  ;;  %v1153_v51 = vcombine.high %v1151_v33, %v1151_v33 }
  0x57   : > { %16813 = vmatmul.mubr.msk.f32.gmra.mrb[22].mxu0 %vm1786_vm2, %v1573_v43  ;;  %v2234_v52 = vcombine.low %v2226_v44, %v2233_v38  ;;  %v1589_v53 = vrot.slane %v1575_v45, %v18752_v9  ;;  %v633_v54 = vcombine.high %v625_v46, %v625_v46  ;;  %v1154_v55 = vcombine.high %v865_v42, %v865_v42  ;;  %v349_v43 = vld [vmem:[%s18750_s19 + $0x90] sm:$0xff] }
  0x58   : > { %16815 = vmatprep.mubr.msk.f32.mxu0 %vm18663_vm1, %v23457_v3  ;;  %v2235_v56 = vcombine.low %v616_v49, %v625_v46  ;;  %v1161_v57 = vrot.slane %v865_v42, %v18752_v9  ;;  %v634_v58 = vcombine.high %v632_v50, %v632_v50  ;;  %v635_v59 = vcombine.high %v346_v47, %v346_v47 }
  0x59   : > { %16890 = vmatmul.mubr.msk.f32.gmra.mrb[22].mxu1 %vm1786_vm2, %v2234_v52  ;;  %v1590_v61 = vcombine.low %v1582_v48, %v1589_v53  ;;  %v2236_v62 = vcombine.low %v633_v54, %v632_v50  ;;  %v1168_v63 = vrot.slane %v1154_v55, %v18752_v9  ;;  %v642_v0 = vrot.slane %v346_v47, %v18752_v9 }
  0x5a   : > { %16892 = vmatprep.mubr.msk.f32.mxu1 %vm18663_vm1, %v23457_v3  ;;  %v2243_v2 = vrot.slane %v2235_v56, %v18752_v9  ;;  %v1169_v4 = vcombine.high %v1161_v57, %v1161_v57  ;;  %v1591_v5 = vcombine.low %v1153_v51, %v1161_v57  ;;  %v649_v6 = vrot.slane %v635_v59, %v18752_v9  ;;  %v869_v51 = vld [vmem:[%s18750_s19 + $0x99] sm:$0x3f] }
  0x5b   : > { %16816 = vmatmul.mubr.msk.f32.gmra.mrb[24].mxu0 %vm1786_vm2, %v1590_v61  ;;  %v2250_v7 = vrot.slane %v2236_v62, %v18752_v9  ;;  %v650_v8 = vcombine.high %v642_v0, %v642_v0  ;;  %v2252_v10 = vcombine.low %v634_v58, %v642_v0  ;;  %v1170_v11 = vcombine.high %v866_v60, %v866_v60 }
  0x5c   : > { %16818 = vmatprep.mubr.msk.f32.mxu0 %vm18663_vm1, %v23457_v3  ;;  %v1592_v12 = vcombine.low %v1169_v4, %v1168_v63  ;;  %v1599_v13 = vrot.slane %v1591_v5, %v18752_v9  ;;  %v1177_v14 = vrot.slane %v866_v60, %v18752_v9  ;;  %v651_v15 = vcombine.high %v347_v1, %v347_v1  ;;  %v350_v60 = vld [vmem:[%s18750_s19 + $0x98] sm:$0x3f]  ;;  %v870_v5 = vld [vmem:[%s18750_s19 + $0xa1] sm:$0xff] }
  0x5d   : > { %v2251_v17 = vcombine.low %v2243_v2, %v2250_v7  ;;  %v2253_v18 = vcombine.low %v650_v8, %v649_v6  ;;  %v2260_v19 = vrot.slane %v2252_v10, %v18752_v9  ;;  %v1184_v20 = vrot.slane %v1170_v11, %v18752_v9 }
  0x5e   : > { %v1606_v21 = vrot.slane %v1592_v12, %v18752_v9  ;;  %v1185_v22 = vcombine.high %v1177_v14, %v1177_v14  ;;  %v658_v23 = vrot.slane %v347_v1, %v18752_v9  ;;  %v665_v24 = vrot.slane %v651_v15, %v18752_v9 }
  0x5f   : > { %16893 = vmatmul.mubr.msk.f32.gmra.mrb[24].mxu1 %vm1786_vm2, %v2251_v17  ;;  %v2267_v25 = vrot.slane %v2253_v18, %v18752_v9  ;;  %v1186_v26 = vcombine.high %v1184_v20, %v1184_v20  ;;  %v1187_v28 = vcombine.high %v867_v16, %v867_v16  ;;  %v1194_v29 = vrot.slane %v867_v16, %v18752_v9 }
  0x60   : > { %16895 = vmatprep.mubr.msk.f32.mxu1 %vm18663_vm1, %v23457_v3  ;;  %v1607_v30 = vcombine.low %v1599_v13, %v1606_v21  ;;  %v1608_v31 = vcombine.low %v1177_v14, %v1185_v22  ;;  %v666_v32 = vcombine.high %v658_v23, %v658_v23  ;;  %v667_v33 = vcombine.high %v665_v24, %v665_v24 }
  0x61   : > { %v2268_v35 = vcombine.low %v2260_v19, %v2267_v25  ;;  %v1609_v36 = vcombine.low %v1184_v20, %v1186_v26  ;;  %v1201_v37 = vrot.slane %v1187_v28, %v18752_v9  ;;  %v1202_v38 = vcombine.high %v1194_v29, %v1194_v29  ;;  %v351_v19 = vld [vmem:[%s18750_s19 + $0xa0] sm:$0xff]  ;;  %v871_v28 = vld [vmem:[%s18750_s19 + $0xa9] sm:$0x3f] }
  0x62   : > { %16819 = vmatmul.mubr.msk.f32.gmra.mrb[26].mxu0 %vm1786_vm2, %v1607_v30  ;;  %v1616_v39 = vrot.slane %v1608_v31, %v18752_v9  ;;  %v2269_v40 = vcombine.low %v658_v23, %v666_v32  ;;  %v2270_v41 = vcombine.low %v665_v24, %v667_v33  ;;  %v1210_v42 = vrot.slane %v868_v27, %v18752_v9 }
  0x63   : > { %16896 = vmatmul.mubr.msk.f32.gmra.mrb[26].mxu1 %vm1786_vm2, %v2268_v35  ;;  %16821 = vmatprep.mubr.msk.f32.mxu0 %vm18663_vm1, %v23457_v3  ;;  %v1623_v44 = vrot.slane %v1609_v36, %v18752_v9  ;;  %v1625_v45 = vcombine.low %v1194_v29, %v1202_v38  ;;  %v668_v46 = vcombine.high %v348_v34, %v348_v34 }
  0x64   : > { %16898 = vmatprep.mubr.msk.f32.mxu1 %vm18663_vm1, %v23457_v3  ;;  %v2277_v47 = vrot.slane %v2269_v40, %v18752_v9  ;;  %v2284_v48 = vrot.slane %v2270_v41, %v18752_v9  ;;  %v1626_v49 = vcombine.low %v1201_v37, %v1210_v42  ;;  %v675_v50 = vrot.slane %v348_v34, %v18752_v9  ;;  %v352_v37 = vld [vmem:[%s18750_s19 + $0xa8] sm:$0x3f] }
  0x65   : > { %v1624_v52 = vcombine.low %v1616_v39, %v1623_v44  ;;  %v1633_v53 = vrot.slane %v1625_v45, %v18752_v9  ;;  %v682_v54 = vrot.slane %v668_v46, %v18752_v9  ;;  %v691_v55 = vrot.slane %v349_v43, %v18752_v9 }
  0x66   : > { %v2285_v56 = vcombine.low %v2277_v47, %v2284_v48  ;;  %v1640_v57 = vrot.slane %v1626_v49, %v18752_v9  ;;  %v683_v58 = vcombine.high %v675_v50, %v675_v50  ;;  %v1203_v59 = vcombine.high %v868_v27, %v868_v27 }
  0x67   : > { %16822 = vmatmul.mubr.msk.f32.gmra.mrb[28].mxu0 %vm1786_vm2, %v1624_v52  ;;  %v2287_v61 = vcombine.low %v682_v54, %v691_v55  ;;  %v1218_v62 = vcombine.high %v1210_v42, %v1210_v42  ;;  %v1227_v63 = vrot.slane %v869_v51, %v18752_v9  ;;  %v684_v0 = vcombine.high %v349_v43, %v349_v43 }
  0x68   : > { %16899 = vmatmul.mubr.msk.f32.gmra.mrb[28].mxu1 %vm1786_vm2, %v2285_v56  ;;  %16824 = vmatprep.mubr.msk.f32.mxu0 %vm18663_vm1, %v23457_v3  ;;  %v1641_v1 = vcombine.low %v1633_v53, %v1640_v57  ;;  %v2286_v2 = vcombine.low %v675_v50, %v683_v58  ;;  %v1217_v4 = vrot.slane %v1203_v59, %v18752_v9  ;;  %v872_v50 = vld [vmem:[%s18750_s19 + $0xb1] sm:$0xff] }
  0x69   : > { %16901 = vmatprep.mubr.msk.f32.mxu1 %vm18663_vm1, %v23457_v3  ;;  %v2301_v6 = vrot.slane %v2287_v61, %v18752_v9  ;;  %v698_v7 = vrot.slane %v684_v0, %v18752_v9  ;;  %v699_v8 = vcombine.high %v691_v55, %v691_v55  ;;  %v708_v10 = vrot.slane %v350_v60, %v18752_v9 }
  0x6a   : > { %v2294_v11 = vrot.slane %v2286_v2, %v18752_v9  ;;  %v1219_v12 = vcombine.high %v1217_v4, %v1217_v4  ;;  %v1642_v13 = vcombine.low %v1218_v62, %v1217_v4  ;;  %v1220_v14 = vcombine.high %v869_v51, %v869_v51  ;;  %v353_v62 = vld [vmem:[%s18750_s19 + $0xb0] sm:$0xff] }
  0x6b   : > { %16825 = vmatmul.mubr.msk.f32.gmra.mrb[30].mxu0 %vm1786_vm2, %v1641_v1  ;;  %v700_v15 = vcombine.high %v698_v7, %v698_v7  ;;  %v2303_v16 = vcombine.low %v699_v8, %v698_v7  ;;  %v1235_v17 = vcombine.high %v1227_v63, %v1227_v63  ;;  %v1243_v18 = vrot.slane %v870_v5, %v18752_v9 }
  0x6c   : > { %v2302_v20 = vcombine.low %v2294_v11, %v2301_v6  ;;  %16827 = vmatprep.mubr.msk.f32.mxu0 %vm18663_vm1, %v23457_v3  ;;  %v1643_v21 = vcombine.low %v1219_v12, %v1227_v63  ;;  %v1650_v22 = vrot.slane %v1642_v13, %v18752_v9  ;;  %v1234_v23 = vrot.slane %v1220_v14, %v18752_v9  ;;  %v873_v13 = vld [vmem:[%s18750_s19 + $0xb9] sm:$0x3f] }
  0x6d   : > { %v2304_v24 = vcombine.low %v700_v15, %v708_v10  ;;  %v2311_v25 = vrot.slane %v2303_v16, %v18752_v9  ;;  %v1251_v26 = vcombine.high %v1243_v18, %v1243_v18  ;;  %v701_v27 = vcombine.high %v350_v60, %v350_v60 }
  0x6e   : > { %16902 = vmatmul.mubr.msk.f32.gmra.mrb[30].mxu1 %vm1786_vm2, %v2302_v20  ;;  %v1657_v29 = vrot.slane %v1643_v21, %v18752_v9  ;;  %v1659_v30 = vcombine.low %v1235_v17, %v1234_v23  ;;  %v716_v31 = vcombine.high %v708_v10, %v708_v10  ;;  %v724_v32 = vrot.slane %v351_v19, %v18752_v9 }
  0x6f   : > { %16904 = vmatprep.mubr.msk.f32.mxu1 %vm18663_vm1, %v23457_v3  ;;  %v2318_v33 = vrot.slane %v2304_v24, %v18752_v9  ;;  %v1660_v34 = vcombine.low %v1243_v18, %v1251_v26  ;;  %v715_v35 = vrot.slane %v701_v27, %v18752_v9  ;;  %v1236_v36 = vcombine.high %v870_v5, %v870_v5 }
  0x70   : > { %v1658_v38 = vcombine.low %v1650_v22, %v1657_v29  ;;  %v1667_v39 = vrot.slane %v1659_v30, %v18752_v9  ;;  %v732_v40 = vcombine.high %v724_v32, %v724_v32  ;;  %v1260_v41 = vrot.slane %v871_v28, %v18752_v9  ;;  %v354_v22 = vld [vmem:[%s18750_s19 + $0xb8] sm:$0x3f] }
  0x71   : > { %v2319_v42 = vcombine.low %v2311_v25, %v2318_v33  ;;  %v1674_v43 = vrot.slane %v1660_v34, %v18752_v9  ;;  %v2320_v44 = vcombine.low %v716_v31, %v715_v35  ;;  %v1250_v45 = vrot.slane %v1236_v36, %v18752_v9  ;;  %v874_v31 = vld [vmem:[%s18750_s19 + $0xc1] sm:$0xff] }
  0x72   : > { %16828 = vmatmul.mubr.msk.f32.gmra.mrb[32].mxu0 %vm1786_vm2, %v1658_v38  ;;  %v2321_v46 = vcombine.low %v724_v32, %v732_v40  ;;  %v1268_v47 = vcombine.high %v1260_v41, %v1260_v41  ;;  %v717_v48 = vcombine.high %v351_v19, %v351_v19  ;;  %v741_v49 = vrot.slane %v352_v37, %v18752_v9  ;;  %v355_v40 = vld [vmem:[%s18750_s19 + $0xc0] sm:$0xff] }
  0x73   : > { %16905 = vmatmul.mubr.msk.f32.gmra.mrb[32].mxu1 %vm1786_vm2, %v2319_v42  ;;  %16830 = vmatprep.mubr.msk.f32.mxu0 %vm18663_vm1, %v23457_v3  ;;  %v1675_v51 = vcombine.low %v1667_v39, %v1674_v43  ;;  %v2328_v52 = vrot.slane %v2320_v44, %v18752_v9  ;;  %v1252_v53 = vcombine.high %v1250_v45, %v1250_v45 }
  0x74   : > { %16907 = vmatprep.mubr.msk.f32.mxu1 %vm18663_vm1, %v23457_v3  ;;  %v2335_v54 = vrot.slane %v2321_v46, %v18752_v9  ;;  %v1677_v55 = vcombine.low %v1260_v41, %v1268_v47  ;;  %v731_v56 = vrot.slane %v717_v48, %v18752_v9  ;;  %v749_v57 = vcombine.high %v741_v49, %v741_v49  ;;  %v875_v48 = vld [vmem:[%s18750_s19 + $0xc9] sm:$0x3f] }
  0x75   : > { %v1676_v58 = vcombine.low %v1250_v45, %v1252_v53  ;;  %v1253_v59 = vcombine.high %v871_v28, %v871_v28  ;;  %v1269_v60 = vcombine.high %v872_v50, %v872_v50  ;;  %v1276_v61 = vrot.slane %v872_v50, %v18752_v9 }
  0x76   : > { %16831 = vmatmul.mubr.msk.f32.gmra.mrb[34].mxu0 %vm1786_vm2, %v1675_v51  ;;  %v2336_v63 = vcombine.low %v2328_v52, %v2335_v54  ;;  %v1691_v0 = vrot.slane %v1677_v55, %v18752_v9  ;;  %v733_v1 = vcombine.high %v731_v56, %v731_v56  ;;  %v2338_v2 = vcombine.low %v741_v49, %v749_v57 }
  0x77   : > { %16833 = vmatprep.mubr.msk.f32.mxu0 %vm18663_vm1, %v23457_v3  ;;  %v1684_v4 = vrot.slane %v1676_v58, %v18752_v9  ;;  %v1267_v5 = vrot.slane %v1253_v59, %v18752_v9  ;;  %v1283_v6 = vrot.slane %v1269_v60, %v18752_v9  ;;  %v1284_v7 = vcombine.high %v1276_v61, %v1276_v61  ;;  %v876_v60 = vld [vmem:[%s18750_s19 + $0xd1] sm:$0xff] }
  0x78   : > { %16908 = vmatmul.mubr.msk.f32.gmra.mrb[34].mxu1 %vm1786_vm2, %v2336_v63  ;;  %v2337_v8 = vcombine.low %v731_v56, %v733_v1  ;;  %v2352_v10 = vrot.slane %v2338_v2, %v18752_v9  ;;  %v734_v11 = vcombine.high %v352_v37, %v352_v37  ;;  %v750_v12 = vcombine.high %v353_v62, %v353_v62  ;;  %v356_v2 = vld [vmem:[%s18750_s19 + $0xc8] sm:$0x3f] }
  0x79   : > { %16910 = vmatprep.mubr.msk.f32.mxu1 %vm18663_vm1, %v23457_v3  ;;  %v1692_v14 = vcombine.low %v1684_v4, %v1691_v0  ;;  %v1693_v15 = vcombine.low %v1267_v5, %v1276_v61  ;;  %v1694_v16 = vcombine.low %v1284_v7, %v1283_v6  ;;  %v757_v17 = vrot.slane %v353_v62, %v18752_v9 }
  0x7a   : > { %v2345_v18 = vrot.slane %v2337_v8, %v18752_v9  ;;  %v748_v19 = vrot.slane %v734_v11, %v18752_v9  ;;  %v764_v20 = vrot.slane %v750_v12, %v18752_v9  ;;  %v1285_v21 = vcombine.high %v1283_v6, %v1283_v6 }
  0x7b   : > { %16834 = vmatmul.mubr.msk.f32.gmra.mrb[36].mxu0 %vm1786_vm2, %v1692_v14  ;;  %v1701_v23 = vrot.slane %v1693_v15, %v18752_v9  ;;  %v1708_v24 = vrot.slane %v1694_v16, %v18752_v9  ;;  %v765_v25 = vcombine.high %v757_v17, %v757_v17  ;;  %v1286_v26 = vcombine.high %v873_v13, %v873_v13 }
  0x7c   : > { %v2353_v27 = vcombine.low %v2345_v18, %v2352_v10  ;;  %16836 = vmatprep.mubr.msk.f32.mxu0 %vm18663_vm1, %v23457_v3  ;;  %v2354_v28 = vcombine.low %v748_v19, %v757_v17  ;;  %v1293_v29 = vrot.slane %v873_v13, %v18752_v9  ;;  %v766_v30 = vcombine.high %v764_v20, %v764_v20  ;;  %v357_v13 = vld [vmem:[%s18750_s19 + $0xd0] sm:$0xff] }
  0x7d   : > { %v1709_v32 = vcombine.low %v1701_v23, %v1708_v24  ;;  %v2355_v33 = vcombine.low %v765_v25, %v764_v20  ;;  %v1300_v34 = vrot.slane %v1286_v26, %v18752_v9  ;;  %v767_v35 = vcombine.high %v354_v22, %v354_v22 }
  0x7e   : > { %16911 = vmatmul.mubr.msk.f32.gmra.mrb[36].mxu1 %vm1786_vm2, %v2353_v27  ;;  %v2362_v36 = vrot.slane %v2354_v28, %v18752_v9  ;;  %v1301_v37 = vcombine.high %v1293_v29, %v1293_v29  ;;  %v1710_v38 = vcombine.low %v1285_v21, %v1293_v29  ;;  %v774_v39 = vrot.slane %v354_v22, %v18752_v9  ;;  %v877_v22 = vld [vmem:[%s18750_s19 + $0xd9] sm:$0x3f] }
  0x7f   : > { %16913 = vmatprep.mubr.msk.f32.mxu1 %vm18663_vm1, %v23457_v3  ;;  %16837 = vmatmul.mubr.msk.f32.gmra.mrb[38].mxu0 %vm1786_vm2, %v1709_v32  ;;  %v2369_v41 = vrot.slane %v2355_v33, %v18752_v9  ;;  %v781_v42 = vrot.slane %v767_v35, %v18752_v9  ;;  %v1302_v43 = vcombine.high %v874_v31, %v874_v31 }
  0x80   : > { %16839 = vmatprep.mubr.msk.f32.mxu0 %vm18663_vm1, %v23457_v3  ;;  %v1711_v44 = vcombine.low %v1301_v37, %v1300_v34  ;;  %v1718_v45 = vrot.slane %v1710_v38, %v18752_v9  ;;  %v782_v46 = vcombine.high %v774_v39, %v774_v39  ;;  %v2371_v47 = vcombine.low %v766_v30, %v774_v39 }
  0x81   : > { %v2370_v49 = vcombine.low %v2362_v36, %v2369_v41  ;;  %v1309_v50 = vrot.slane %v874_v31, %v18752_v9  ;;  %v1316_v51 = vrot.slane %v1302_v43, %v18752_v9  ;;  %v783_v52 = vcombine.high %v355_v40, %v355_v40  ;;  %v358_v31 = vld [vmem:[%s18750_s19 + $0xd8] sm:$0x3f] }
  0x82   : > { %v1725_v53 = vrot.slane %v1711_v44, %v18752_v9  ;;  %v2372_v54 = vcombine.low %v782_v46, %v781_v42  ;;  %v2379_v55 = vrot.slane %v2371_v47, %v18752_v9  ;;  %v790_v56 = vrot.slane %v355_v40, %v18752_v9 }
  0x83   : > { %16914 = vmatmul.mubr.msk.f32.gmra.mrb[38].mxu1 %vm1786_vm2, %v2370_v49  ;;  %v1317_v57 = vcombine.high %v1309_v50, %v1309_v50  ;;  %v1318_v58 = vcombine.high %v1316_v51, %v1316_v51  ;;  %v797_v59 = vrot.slane %v783_v52, %v18752_v9  ;;  %v1319_v61 = vcombine.high %v875_v48, %v875_v48 }
  0x84   : > { %16916 = vmatprep.mubr.msk.f32.mxu1 %vm18663_vm1, %v23457_v3  ;;  %v1726_v62 = vcombine.low %v1718_v45, %v1725_v53  ;;  %v2386_v63 = vrot.slane %v2372_v54, %v18752_v9  ;;  %v798_v0 = vcombine.high %v790_v56, %v790_v56  ;;  %v1326_v1 = vrot.slane %v875_v48, %v18752_v9  ;;  %v2690_v48 = vld [vmem:[%s18750_s19 + $0x2] sm:$0xff]  ;;  %v15721_v53 = vld [vmem:[%s18750_s19 + $0x10] sm:$0xff] }
  0x85   : > { %v1727_v4 = vcombine.low %v1309_v50, %v1317_v57  ;;  %v1728_v5 = vcombine.low %v1316_v51, %v1318_v58  ;;  %v799_v6 = vcombine.high %v797_v59, %v797_v59  ;;  %v1333_v7 = vrot.slane %v1319_v61, %v18752_v9 }
  0x86   : > { %16840 = vmatmul.mubr.msk.f32.gmra.mrb[40].mxu0 %vm1786_vm2, %v1726_v62  ;;  %v2387_v8 = vcombine.low %v2379_v55, %v2386_v63  ;;  %v2388_v10 = vcombine.low %v790_v56, %v798_v0  ;;  %v1334_v11 = vcombine.high %v1326_v1, %v1326_v1  ;;  %v1342_v12 = vrot.slane %v876_v60, %v18752_v9 }
  0x87   : > { %16842 = vmatprep.mubr.msk.f32.mxu0 %vm18663_vm1, %v23457_v3  ;;  %v1735_v14 = vrot.slane %v1727_v4, %v18752_v9  ;;  %v1742_v15 = vrot.slane %v1728_v5, %v18752_v9  ;;  %v2389_v16 = vcombine.low %v797_v59, %v799_v6  ;;  %v800_v17 = vcombine.high %v356_v2, %v356_v2 }
  0x88   : > { %16917 = vmatmul.mubr.msk.f32.gmra.mrb[40].mxu1 %vm1786_vm2, %v2387_v8  ;;  %v2396_v18 = vrot.slane %v2388_v10, %v18752_v9  ;;  %v1744_v19 = vcombine.low %v1326_v1, %v1334_v11  ;;  %v1745_v20 = vcombine.low %v1333_v7, %v1342_v12  ;;  %v807_v21 = vrot.slane %v356_v2, %v18752_v9  ;;  %v2691_v2 = vld [vmem:[%s18750_s19 + $0xa] sm:$0x3f] }
  0x89   : > { %16919 = vmatprep.mubr.msk.f32.mxu1 %vm18663_vm1, %v23457_v3  ;;  %v1743_v23 = vcombine.low %v1735_v14, %v1742_v15  ;;  %v2403_v24 = vrot.slane %v2389_v16, %v18752_v9  ;;  %v814_v25 = vrot.slane %v800_v17, %v18752_v9  ;;  %v823_v26 = vrot.slane %v357_v13, %v18752_v9 }
  0x8a   : > { %v1752_v27 = vrot.slane %v1744_v19, %v18752_v9  ;;  %v1759_v28 = vrot.slane %v1745_v20, %v18752_v9  ;;  %v815_v29 = vcombine.high %v807_v21, %v807_v21  ;;  %v1335_v30 = vcombine.high %v876_v60, %v876_v60 }
  0x8b   : > { %16843 = vmatmul.mubr.msk.f32.gmra.mrb[42].mxu0 %vm1786_vm2, %v1743_v23  ;;  %v2404_v32 = vcombine.low %v2396_v18, %v2403_v24  ;;  %v2406_v33 = vcombine.low %v814_v25, %v823_v26  ;;  %v1350_v34 = vcombine.high %v1342_v12, %v1342_v12  ;;  %v1359_v35 = vrot.slane %v877_v22, %v18752_v9  ;;  %v15722_v18 = vld [vmem:[%s18750_s19 + $0x18] sm:$0x3f] }
  0x8c   : > { %16845 = vmatprep.mubr.msk.f32.mxu0 %vm18663_vm1, %v23457_v3  ;;  %v1760_v36 = vcombine.low %v1752_v27, %v1759_v28  ;;  %v2405_v37 = vcombine.low %v807_v21, %v815_v29  ;;  %v1349_v38 = vrot.slane %v1335_v30, %v18752_v9  ;;  %v816_v39 = vcombine.high %v357_v13, %v357_v13  ;;  %v2692_v13 = vld [vmem:[%s18750_s19 + $0x12] sm:$0xff]  ;;  %v15723_v27 = vld [vmem:[%s18750_s19 + $0x20] sm:$0xff] }
  0x8d   : > { %16920 = vmatmul.mubr.msk.f32.gmra.mrb[42].mxu1 %vm1786_vm2, %v2404_v32  ;;  %v2420_v40 = vrot.slane %v2406_v33, %v18752_v9  ;;  %v831_v41 = vcombine.high %v823_v26, %v823_v26  ;;  %v840_v42 = vrot.slane %v358_v31, %v18752_v9  ;;  %v1352_v43 = vcombine.high %v877_v22, %v877_v22 }
  0x8e   : > { %16922 = vmatprep.mubr.msk.f32.mxu1 %vm18663_vm1, %v23457_v3  ;;  %v2413_v44 = vrot.slane %v2405_v37, %v18752_v9  ;;  %v1351_v45 = vcombine.high %v1349_v38, %v1349_v38  ;;  %v1761_v46 = vcombine.low %v1350_v34, %v1349_v38  ;;  %v830_v47 = vrot.slane %v816_v39, %v18752_v9 }
  0x8f   : > { %16846 = vmatmul.mubr.msk.f32.gmra.mrb[44].mxu0 %vm1786_vm2, %v1760_v36  ;;  %v1366_v49 = vrot.slane %v1352_v43, %v18752_v9  ;;  %v1367_v50 = vcombine.high %v1359_v35, %v1359_v35  ;;  %v833_v51 = vcombine.high %v358_v31, %v358_v31  ;;  %v848_v52 = vcombine.high %v840_v42, %v840_v42 }
  0x90   : > { %v2421_v54 = vcombine.low %v2413_v44, %v2420_v40  ;;  %16848 = vmatprep.mubr.msk.f32.mxu0 %vm18663_vm1, %v23457_v3  ;;  %v1762_v55 = vcombine.low %v1351_v45, %v1359_v35  ;;  %v1769_v56 = vrot.slane %v1761_v46, %v18752_v9  ;;  %v832_v57 = vcombine.high %v830_v47, %v830_v47  ;;  %v2693_v40 = vld [vmem:[%s18750_s19 + $0x1a] sm:$0x3f] }
  0x91   : > { %v2422_v58 = vcombine.low %v831_v41, %v830_v47  ;;  %v1778_v59 = vcombine.low %v1367_v50, %v1366_v49  ;;  %v847_v60 = vrot.slane %v833_v51, %v18752_v9  ;;  %v2746_v61 = vcombine.high %v2690_v48, %v2690_v48  ;;  %v15724_v49 = vld [vmem:[%s18750_s19 + $0x28] sm:$0x3f] }
  0x92   : > { %16923 = vmatmul.mubr.msk.f32.gmra.mrb[44].mxu1 %vm1786_vm2, %v2421_v54  ;;  %v1776_v62 = vrot.slane %v1762_v55, %v18752_v9  ;;  %v2423_v63 = vcombine.low %v832_v57, %v840_v42  ;;  %v2753_v0 = vrot.slane %v2690_v48, %v18752_v9  ;;  %v3951_v1 = vcombine.high %v15721_v53, %v15721_v53  ;;  %v2694_v54 = vld [vmem:[%s18750_s19 + $0x22] sm:$0xff] }
  0x93   : > { %16925 = vmatprep.mubr.msk.f32.mxu1 %vm18663_vm1, %v23457_v3  ;;  %v2430_v4 = vrot.slane %v2422_v58, %v18752_v9  ;;  %v1785_v5 = vrot.slane %v1778_v59, %v18752_v9  ;;  %v2439_v6 = vcombine.low %v848_v52, %v847_v60  ;;  %v2760_v7 = vrot.slane %v2746_v61, %v18752_v9 }
  0x94   : > { %v1777_v8 = vcombine.low %v1769_v56, %v1776_v62  ;;  %v2437_v10 = vrot.slane %v2423_v63, %v18752_v9  ;;  %v2761_v11 = vcombine.high %v2753_v0, %v2753_v0  ;;  %v3958_v12 = vrot.slane %v15721_v53, %v18752_v9 }
  0x95   : > { %v2446_v14 = vrot.slane %v2439_v6, %v18752_v9  ;;  %v2762_v15 = vcombine.high %v2760_v7, %v2760_v7  ;;  %v3965_v16 = vrot.slane %v3951_v1, %v18752_v9  ;;  %v2763_v17 = vcombine.high %v2691_v2, %v2691_v2 }
  0x96   : > { %16849 = vmatmul.mubr.msk.f32.gmra.mrb[46].mxu0 %vm1786_vm2, %v1777_v8  ;;  %v2438_v19 = vcombine.low %v2430_v4, %v2437_v10  ;;  %v3210_v20 = vcombine.low %v2753_v0, %v2761_v11  ;;  %v3966_v21 = vcombine.high %v3958_v12, %v3958_v12  ;;  %v2770_v22 = vrot.slane %v2691_v2, %v18752_v9  ;;  %v15725_v8 = vld [vmem:[%s18750_s19 + $0x30] sm:$0xff] }
  0x97   : > { %16851 = vmatprep.mubr.msk.f32.mxu0 %vm18663_vm1, %v23457_v3  ;;  %v3211_v23 = vcombine.low %v2760_v7, %v2762_v15  ;;  %v3967_v24 = vcombine.high %v3965_v16, %v3965_v16  ;;  %v2777_v25 = vrot.slane %v2763_v17, %v18752_v9  ;;  %v2786_v26 = vrot.slane %v2692_v13, %v18752_v9 }
  0x98   : > { %16926 = vmatmul.mubr.msk.f32.gmra.mrb[46].mxu1 %vm1786_vm2, %v2438_v19  ;;  %v3218_v28 = vrot.slane %v3210_v20, %v18752_v9  ;;  %v4415_v29 = vcombine.low %v3958_v12, %v3966_v21  ;;  %v2778_v30 = vcombine.high %v2770_v22, %v2770_v22  ;;  %v3968_v31 = vcombine.high %v15722_v18, %v15722_v18  ;;  %v15804_v19 = vld [vmem:[%s23448_s1 + $0x10] sm:$0xf] }
  0x99   : > { %16928 = vmatprep.mubr.msk.f32.mxu1 %vm18663_vm1, %v23457_v3  ;;  %v3225_v32 = vrot.slane %v3211_v23, %v18752_v9  ;;  %v4416_v33 = vcombine.low %v3965_v16, %v3967_v24  ;;  %v3228_v34 = vcombine.low %v2777_v25, %v2786_v26  ;;  %v3975_v35 = vrot.slane %v15722_v18, %v18752_v9  ;;  %v15859_v24 = vld [vmem:[%s23448_s1 + $0x14] sm:$0xf] }
  0x9a   : > { %16852 = vmatmul.mubr.msk.f32.gmra.mrb[48].mxu0 %vm1786_vm2, %v1785_v5  ;;  %v4423_v36 = vrot.slane %v4415_v29, %v18752_v9  ;;  %v3227_v37 = vcombine.low %v2770_v22, %v2778_v30  ;;  %v3982_v38 = vrot.slane %v3968_v31, %v18752_v9  ;;  %v3991_v39 = vrot.slane %v15723_v27, %v18752_v9  ;;  %v15726_v29 = vld [vmem:[%s18750_s19 + $0x38] sm:$0x3f] }
  0x9b   : > { %16933 = vmatprep.mubr.msk.f32.mxu0 %vm18663_vm1, %v23457_v3  ;;  %v3226_v41 = vcombine.low %v3218_v28, %v3225_v32  ;;  %v4430_v42 = vrot.slane %v4416_v33, %v18752_v9  ;;  %v3242_v43 = vrot.slane %v3228_v34, %v18752_v9  ;;  %v3983_v44 = vcombine.high %v3975_v35, %v3975_v35 }
  0x9c   : > { %16929 = vmatmul.mubr.msk.f32.gmra.mrb[48].mxu1 %vm1786_vm2, %v2446_v14  ;;  %v3235_v45 = vrot.slane %v3227_v37, %v18752_v9  ;;  %v4433_v46 = vcombine.low %v3982_v38, %v3991_v39  ;;  %v2779_v47 = vcombine.high %v2692_v13, %v2692_v13  ;;  %v2794_v48 = vcombine.high %v2786_v26, %v2786_v26  ;;  %v2695_v14 = vld [vmem:[%s18750_s19 + $0x2a] sm:$0x3f]  ;;  %v2696_v38 = vld [vmem:[%s18750_s19 + $0x32] sm:$0xff] }
  0x9d   : > { %17010 = vmatprep.mubr.msk.f32.mxu1 %vm18663_vm1, %v23457_v3  ;;  %v4431_v50 = vcombine.low %v4423_v36, %v4430_v42  ;;  %v4432_v51 = vcombine.low %v3975_v35, %v3983_v44  ;;  %v2803_v52 = vrot.slane %v2693_v40, %v18752_v9  ;;  %v3984_v53 = vcombine.high %v15723_v27, %v15723_v27 }
  0x9e   : > { %16934 = vmatmul.mubr.msk.f32.vlgmr.msra.gmra.mrb[50].mxu0 %vm1786_vm2, %v3226_v41  ;;  %v3243_v55 = vcombine.low %v3235_v45, %v3242_v43  ;;  %v4447_v56 = vrot.slane %v4433_v46, %v18752_v9  ;;  %v2793_v57 = vrot.slane %v2779_v47, %v18752_v9  ;;  %v3999_v58 = vcombine.high %v3991_v39, %v3991_v39 }
  0x9f   : > { %16936 = vmatprep.mubr.msk.f32.mxu0 %vm18663_vm1, %v23457_v3  ;;  %v4440_v59 = vrot.slane %v4432_v51, %v18752_v9  ;;  %v3998_v60 = vrot.slane %v3984_v53, %v18752_v9  ;;  %v4008_v61 = vrot.slane %v15724_v49, %v18752_v9  ;;  %v2796_v62 = vcombine.high %v2693_v40, %v2693_v40 }
  0xa0   : > { %17011 = vmatmul.mubr.msk.f32.vlgmr.msra.gmra.mrb[50].mxu1 %vm1786_vm2, %v4431_v50  ;;  %v2795_v63 = vcombine.high %v2793_v57, %v2793_v57  ;;  %v3244_v0 = vcombine.low %v2794_v48, %v2793_v57  ;;  %v2811_v1 = vcombine.high %v2803_v52, %v2803_v52  ;;  %v2819_v2 = vrot.slane %v2694_v54, %v18752_v9 }
  0xa1   : > { %17013 = vmatprep.mubr.msk.f32.mxu1 %vm18663_vm1, %v23457_v3  ;;  %v4448_v4 = vcombine.low %v4440_v59, %v4447_v56  ;;  %v4000_v5 = vcombine.high %v3998_v60, %v3998_v60  ;;  %v4449_v6 = vcombine.low %v3999_v58, %v3998_v60  ;;  %v2810_v7 = vrot.slane %v2796_v62, %v18752_v9 }
  0xa2   : > { %16937 = vmatmul.mubr.msk.f32.gmra.mrb[52].mxu0 %vm1786_vm2, %v3243_v55  ;;  %v3245_v10 = vcombine.low %v2795_v63, %v2803_v52  ;;  %v3252_v11 = vrot.slane %v3244_v0, %v18752_v9  ;;  %v2827_v12 = vcombine.high %v2819_v2, %v2819_v2  ;;  %v4001_v13 = vcombine.high %v15724_v49, %v15724_v49 }
  0xa3   : > { %16939 = vmatprep.mubr.msk.f32.mxu0 %vm18663_vm1, %v23457_v3  ;;  %v4450_v15 = vcombine.low %v4000_v5, %v4008_v61  ;;  %v4457_v16 = vrot.slane %v4449_v6, %v18752_v9  ;;  %v3261_v17 = vcombine.low %v2811_v1, %v2810_v7  ;;  %v4016_v18 = vcombine.high %v4008_v61, %v4008_v61 }
  0xa4   : > { %17014 = vmatmul.mubr.msk.f32.gmra.mrb[52].mxu1 %vm1786_vm2, %v4448_v4  ;;  %v3259_v20 = vrot.slane %v3245_v10, %v18752_v9  ;;  %v3262_v21 = vcombine.low %v2819_v2, %v2827_v12  ;;  %v4015_v22 = vrot.slane %v4001_v13, %v18752_v9  ;;  %v4024_v23 = vrot.slane %v15725_v8, %v18752_v9  ;;  %v2697_v4 = vld [vmem:[%s18750_s19 + $0x3a] sm:$0x3f]  ;;  %v15728_v10 = vld [vmem:[%s18750_s19 + $0x48] sm:$0x3f] }
  0xa5   : > { %17016 = vmatprep.mubr.msk.f32.mxu1 %vm18663_vm1, %v23457_v3  ;;  %v4464_v25 = vrot.slane %v4450_v15, %v18752_v9  ;;  %v3269_v26 = vrot.slane %v3261_v17, %v18752_v9  ;;  %v2812_v27 = vcombine.high %v2694_v54, %v2694_v54  ;;  %v2836_v28 = vrot.slane %v2695_v14, %v18752_v9  ;;  %v15727_v54 = vld [vmem:[%s18750_s19 + $0x40] sm:$0xff] }
  0xa6   : > { %v3260_v30 = vcombine.low %v3252_v11, %v3259_v20  ;;  %v3276_v31 = vrot.slane %v3262_v21, %v18752_v9  ;;  %v4032_v32 = vcombine.high %v4024_v23, %v4024_v23  ;;  %v4466_v33 = vcombine.low %v4016_v18, %v4015_v22  ;;  %17086 = vmatpush3.msk.msra.mxu0 %vm1837_vm0, %v15804_v19 }
  0xa7   : > { %v4465_v34 = vcombine.low %v4457_v16, %v4464_v25  ;;  %v2826_v35 = vrot.slane %v2812_v27, %v18752_v9  ;;  %v2844_v36 = vcombine.high %v2836_v28, %v2836_v28  ;;  %v4017_v37 = vcombine.high %v15725_v8, %v15725_v8  ;;  %17163 = vmatpush3.msk.msra.mxu1 %vm1837_vm0, %v15859_v24 }
  0xa8   : > { %16940 = vmatmul.mubr.msk.f32.gmra.mrb[54].mxu0 %vm1786_vm2, %v3260_v30  ;;  %v3277_v39 = vcombine.low %v3269_v26, %v3276_v31  ;;  %v4467_v40 = vcombine.low %v4024_v23, %v4032_v32  ;;  %v4474_v41 = vrot.slane %v4466_v33, %v18752_v9  ;;  %v4041_v42 = vrot.slane %v15726_v29, %v18752_v9  ;;  %v2698_v23 = vld [vmem:[%s18750_s19 + $0x42] sm:$0xff] }
  0xa9   : > { %17017 = vmatmul.mubr.msk.f32.gmra.mrb[54].mxu1 %vm1786_vm2, %v4465_v34  ;;  %16942 = vmatprep.mubr.msk.f32.mxu0 %vm18663_vm1, %v23457_v3  ;;  %v2828_v43 = vcombine.high %v2826_v35, %v2826_v35  ;;  %v3279_v44 = vcombine.low %v2836_v28, %v2844_v36  ;;  %v4031_v45 = vrot.slane %v4017_v37, %v18752_v9  ;;  %v15729_v28 = vld [vmem:[%s18750_s19 + $0x50] sm:$0xff]  ;;  %v2699_v37 = vld [vmem:[%s18750_s19 + $0x4a] sm:$0x3f] }
  0xaa   : > { %17019 = vmatprep.mubr.msk.f32.mxu1 %vm18663_vm1, %v23457_v3  ;;  %v4481_v46 = vrot.slane %v4467_v40, %v18752_v9  ;;  %v4049_v47 = vcombine.high %v4041_v42, %v4041_v42  ;;  %v2829_v48 = vcombine.high %v2695_v14, %v2695_v14  ;;  %v2845_v49 = vcombine.high %v2696_v38, %v2696_v38 }
  0xab   : > { %v3278_v50 = vcombine.low %v2826_v35, %v2828_v43  ;;  %v3293_v51 = vrot.slane %v3279_v44, %v18752_v9  ;;  %v4033_v52 = vcombine.high %v4031_v45, %v4031_v45  ;;  %v2852_v53 = vrot.slane %v2696_v38, %v18752_v9  ;;  %17239 = vmatprep.subr.mxu0 %v23457_v3 }
  0xac   : > { %16943 = vmatmul.mubr.msk.f32.gmra.mrb[56].mxu0 %vm1786_vm2, %v3277_v39  ;;  %v4482_v55 = vcombine.low %v4474_v41, %v4481_v46  ;;  %v4484_v56 = vcombine.low %v4041_v42, %v4049_v47  ;;  %v2843_v57 = vrot.slane %v2829_v48, %v18752_v9  ;;  %v2859_v58 = vrot.slane %v2845_v49, %v18752_v9 }
  0xad   : > { %16945 = vmatprep.mubr.msk.f32.mxu0 %vm18663_vm1, %v23457_v3  ;;  %v3286_v59 = vrot.slane %v3278_v50, %v18752_v9  ;;  %v4483_v60 = vcombine.low %v4031_v45, %v4033_v52  ;;  %v2860_v61 = vcombine.high %v2852_v53, %v2852_v53  ;;  %v4034_v62 = vcombine.high %v15726_v29, %v15726_v29 }
  0xae   : > { %17020 = vmatmul.mubr.msk.f32.gmra.mrb[56].mxu1 %vm1786_vm2, %v4482_v55  ;;  %v4498_v63 = vrot.slane %v4484_v56, %v18752_v9  ;;  %v3295_v0 = vcombine.low %v2843_v57, %v2852_v53  ;;  %v4050_v1 = vcombine.high %v15727_v54, %v15727_v54  ;;  %v4057_v2 = vrot.slane %v15727_v54, %v18752_v9  ;;  %v2700_v53 = vld [vmem:[%s18750_s19 + $0x52] sm:$0xff] }
  0xaf   : > { %v3294_v5 = vcombine.low %v3286_v59, %v3293_v51  ;;  %17022 = vmatprep.mubr.msk.f32.mxu1 %vm18663_vm1, %v23457_v3  ;;  %v4491_v6 = vrot.slane %v4483_v60, %v18752_v9  ;;  %v3296_v7 = vcombine.low %v2860_v61, %v2859_v58  ;;  %v4048_v8 = vrot.slane %v4034_v62, %v18752_v9  ;;  %v15730_v55 = vld [vmem:[%s18750_s19 + $0x58] sm:$0x3f] }
  0xb0   : > { %v3303_v11 = vrot.slane %v3295_v0, %v18752_v9  ;;  %v4064_v12 = vrot.slane %v4050_v1, %v18752_v9  ;;  %v4065_v13 = vcombine.high %v4057_v2, %v4057_v2  ;;  %v2861_v14 = vcombine.high %v2859_v58, %v2859_v58  ;;  %17316 = vmatprep.subr.mxu1 %v23457_v3 }
  0xb1   : > { %16946 = vmatmul.mubr.msk.f32.gmra.mrb[58].mxu0 %vm1786_vm2, %v3294_v5  ;;  %v4499_v15 = vcombine.low %v4491_v6, %v4498_v63  ;;  %v3310_v16 = vrot.slane %v3296_v7, %v18752_v9  ;;  %v4500_v17 = vcombine.low %v4048_v8, %v4057_v2  ;;  %v2862_v18 = vcombine.high %v2697_v4, %v2697_v4 }
  0xb2   : > { %16948 = vmatprep.mubr.msk.f32.mxu0 %vm18663_vm1, %v23457_v3  ;;  %v4501_v19 = vcombine.low %v4065_v13, %v4064_v12  ;;  %v2869_v20 = vrot.slane %v2697_v4, %v18752_v9  ;;  %v4066_v21 = vcombine.high %v4064_v12, %v4064_v12  ;;  %v4067_v22 = vcombine.high %v15728_v10, %v15728_v10  ;;  %v15731_v4 = vld [vmem:[%s18750_s19 + $0x60] sm:$0xff] }
  0xb3   : > { %17023 = vmatmul.mubr.msk.f32.gmra.mrb[58].mxu1 %vm1786_vm2, %v4499_v15  ;;  %v3311_v24 = vcombine.low %v3303_v11, %v3310_v16  ;;  %v4508_v25 = vrot.slane %v4500_v17, %v18752_v9  ;;  %v2876_v26 = vrot.slane %v2862_v18, %v18752_v9  ;;  %v4074_v27 = vrot.slane %v15728_v10, %v18752_v9 }
  0xb4   : > { %17025 = vmatprep.mubr.msk.f32.mxu1 %vm18663_vm1, %v23457_v3  ;;  %v4515_v29 = vrot.slane %v4501_v19, %v18752_v9  ;;  %v2877_v30 = vcombine.high %v2869_v20, %v2869_v20  ;;  %v3312_v31 = vcombine.low %v2861_v14, %v2869_v20  ;;  %v4081_v32 = vrot.slane %v4067_v22, %v18752_v9  ;;  %v2701_v14 = vld [vmem:[%s18750_s19 + $0x5a] sm:$0x3f] }
  0xb5   : > { %16949 = vmatmul.mubr.msk.f32.gmra.mrb[60].mxu0 %vm1786_vm2, %v3311_v24  ;;  %v4082_v33 = vcombine.high %v4074_v27, %v4074_v27  ;;  %v4517_v34 = vcombine.low %v4066_v21, %v4074_v27  ;;  %v2878_v35 = vcombine.high %v2698_v23, %v2698_v23  ;;  %v2885_v36 = vrot.slane %v2698_v23, %v18752_v9  ;;  %v15732_v23 = vld [vmem:[%s18750_s19 + $0x68] sm:$0x3f] }
  0xb6   : > { %v4516_v38 = vcombine.low %v4508_v25, %v4515_v29  ;;  %16951 = vmatprep.mubr.msk.f32.mxu0 %vm18663_vm1, %v23457_v3  ;;  %v3313_v39 = vcombine.low %v2877_v30, %v2876_v26  ;;  %v3320_v40 = vrot.slane %v3312_v31, %v18752_v9  ;;  %v4083_v41 = vcombine.high %v15729_v28, %v15729_v28  ;;  %v2702_v31 = vld [vmem:[%s18750_s19 + $0x62] sm:$0xff] }
  0xb7   : > { %v4518_v42 = vcombine.low %v4082_v33, %v4081_v32  ;;  %v4525_v43 = vrot.slane %v4517_v34, %v18752_v9  ;;  %v2892_v44 = vrot.slane %v2878_v35, %v18752_v9  ;;  %v2893_v45 = vcombine.high %v2885_v36, %v2885_v36 }
  0xb8   : > { %17026 = vmatmul.mubr.msk.f32.gmra.mrb[60].mxu1 %vm1786_vm2, %v4516_v38  ;;  %v3327_v46 = vrot.slane %v3313_v39, %v18752_v9  ;;  %v4090_v47 = vrot.slane %v15729_v28, %v18752_v9  ;;  %v4097_v48 = vrot.slane %v4083_v41, %v18752_v9  ;;  %v2895_v49 = vcombine.high %v2699_v37, %v2699_v37 }
  0xb9   : > { %17028 = vmatprep.mubr.msk.f32.mxu1 %vm18663_vm1, %v23457_v3  ;;  %v4532_v50 = vrot.slane %v4518_v42, %v18752_v9  ;;  %v2894_v51 = vcombine.high %v2892_v44, %v2892_v44  ;;  %v3329_v52 = vcombine.low %v2885_v36, %v2893_v45  ;;  %v2902_v54 = vrot.slane %v2699_v37, %v18752_v9 }
  0xba   : > { %v3328_v56 = vcombine.low %v3320_v40, %v3327_v46  ;;  %v4098_v57 = vcombine.high %v4090_v47, %v4090_v47  ;;  %v4099_v58 = vcombine.high %v4097_v48, %v4097_v48  ;;  %v2909_v59 = vrot.slane %v2895_v49, %v18752_v9  ;;  %v2703_v49 = vld [vmem:[%s18750_s19 + $0x6a] sm:$0x3f] }
  0xbb   : > { %v4533_v60 = vcombine.low %v4525_v43, %v4532_v50  ;;  %v3330_v61 = vcombine.low %v2892_v44, %v2894_v51  ;;  %v3337_v62 = vrot.slane %v3329_v52, %v18752_v9  ;;  %v2910_v63 = vcombine.high %v2902_v54, %v2902_v54  ;;  %v15733_v44 = vld [vmem:[%s18750_s19 + $0x70] sm:$0xff] }
  0xbc   : > { %16952 = vmatmul.mubr.msk.f32.gmra.mrb[62].mxu0 %vm1786_vm2, %v3328_v56  ;;  %v4534_v0 = vcombine.low %v4090_v47, %v4098_v57  ;;  %v4535_v1 = vcombine.low %v4097_v48, %v4099_v58  ;;  %v2918_v2 = vrot.slane %v2700_v53, %v18752_v9  ;;  %v4100_v5 = vcombine.high %v15730_v55, %v15730_v55 }
  0xbd   : > { %17029 = vmatmul.mubr.msk.f32.gmra.mrb[62].mxu1 %vm1786_vm2, %v4533_v60  ;;  %16954 = vmatprep.mubr.msk.f32.mxu0 %vm18663_vm1, %v23457_v3  ;;  %v3344_v6 = vrot.slane %v3330_v61, %v18752_v9  ;;  %v3346_v7 = vcombine.low %v2902_v54, %v2910_v63  ;;  %v4107_v8 = vrot.slane %v15730_v55, %v18752_v9 }
  0xbe   : > { %17031 = vmatprep.mubr.msk.f32.mxu1 %vm18663_vm1, %v23457_v3  ;;  %v4542_v10 = vrot.slane %v4534_v0, %v18752_v9  ;;  %v4549_v11 = vrot.slane %v4535_v1, %v18752_v9  ;;  %v3347_v12 = vcombine.low %v2909_v59, %v2918_v2  ;;  %v4114_v13 = vrot.slane %v4100_v5, %v18752_v9 }
  0xbf   : > { %v3345_v15 = vcombine.low %v3337_v62, %v3344_v6  ;;  %v3354_v16 = vrot.slane %v3346_v7, %v18752_v9  ;;  %v4115_v17 = vcombine.high %v4107_v8, %v4107_v8  ;;  %v4123_v18 = vrot.slane %v15731_v4, %v18752_v9  ;;  %v15734_v62 = vld [vmem:[%s18750_s19 + $0x78] sm:$0x3f] }
  0xc0   : > { %v4550_v19 = vcombine.low %v4542_v10, %v4549_v11  ;;  %v3361_v20 = vrot.slane %v3347_v12, %v18752_v9  ;;  %v2911_v21 = vcombine.high %v2700_v53, %v2700_v53  ;;  %v2926_v22 = vcombine.high %v2918_v2, %v2918_v2 }
  0xc1   : > { %16955 = vmatmul.mubr.msk.f32.gmra.mrb[64].mxu0 %vm1786_vm2, %v3345_v15  ;;  %v4551_v24 = vcombine.low %v4107_v8, %v4115_v17  ;;  %v4552_v25 = vcombine.low %v4114_v13, %v4123_v18  ;;  %v2935_v26 = vrot.slane %v2701_v14, %v18752_v9  ;;  %v4116_v27 = vcombine.high %v15731_v4, %v15731_v4  ;;  %v2704_v13 = vld [vmem:[%s18750_s19 + $0x72] sm:$0xff] }
  0xc2   : > { %17032 = vmatmul.mubr.msk.f32.gmra.mrb[64].mxu1 %vm1786_vm2, %v4550_v19  ;;  %16957 = vmatprep.mubr.msk.f32.mxu0 %vm18663_vm1, %v23457_v3  ;;  %v3362_v28 = vcombine.low %v3354_v16, %v3361_v20  ;;  %v2925_v29 = vrot.slane %v2911_v21, %v18752_v9  ;;  %v4131_v30 = vcombine.high %v4123_v18, %v4123_v18 }
  0xc3   : > { %17034 = vmatprep.mubr.msk.f32.mxu1 %vm18663_vm1, %v23457_v3  ;;  %v4559_v32 = vrot.slane %v4551_v24, %v18752_v9  ;;  %v4566_v33 = vrot.slane %v4552_v25, %v18752_v9  ;;  %v4130_v34 = vrot.slane %v4116_v27, %v18752_v9  ;;  %v4140_v35 = vrot.slane %v15732_v23, %v18752_v9  ;;  %v15735_v25 = vld [vmem:[%s18750_s19 + $0x80] sm:$0xff] }
  0xc4   : > { %v2927_v36 = vcombine.high %v2925_v29, %v2925_v29  ;;  %v3363_v37 = vcombine.low %v2926_v22, %v2925_v29  ;;  %v2928_v38 = vcombine.high %v2701_v14, %v2701_v14  ;;  %v2943_v39 = vcombine.high %v2935_v26, %v2935_v26 }
  0xc5   : > { %16958 = vmatmul.mubr.msk.f32.gmra.mrb[66].mxu0 %vm1786_vm2, %v3362_v28  ;;  %v4567_v40 = vcombine.low %v4559_v32, %v4566_v33  ;;  %v4132_v41 = vcombine.high %v4130_v34, %v4130_v34  ;;  %v4568_v42 = vcombine.low %v4131_v30, %v4130_v34  ;;  %v2951_v43 = vrot.slane %v2702_v31, %v18752_v9 }
  0xc6   : > { %16960 = vmatprep.mubr.msk.f32.mxu0 %vm18663_vm1, %v23457_v3  ;;  %v3364_v45 = vcombine.low %v2927_v36, %v2935_v26  ;;  %v3371_v46 = vrot.slane %v3363_v37, %v18752_v9  ;;  %v2942_v47 = vrot.slane %v2928_v38, %v18752_v9  ;;  %v4133_v48 = vcombine.high %v15732_v23, %v15732_v23  ;;  %v2705_v38 = vld [vmem:[%s18750_s19 + $0x7a] sm:$0x3f] }
  0xc7   : > { %17035 = vmatmul.mubr.msk.f32.gmra.mrb[66].mxu1 %vm1786_vm2, %v4567_v40  ;;  %v4569_v50 = vcombine.low %v4132_v41, %v4140_v35  ;;  %v4576_v51 = vrot.slane %v4568_v42, %v18752_v9  ;;  %v2959_v52 = vcombine.high %v2951_v43, %v2951_v43  ;;  %v4148_v53 = vcombine.high %v4140_v35, %v4140_v35 }
  0xc8   : > { %v3378_v54 = vrot.slane %v3364_v45, %v18752_v9  ;;  %17037 = vmatprep.mubr.msk.f32.mxu1 %vm18663_vm1, %v23457_v3  ;;  %v3380_v55 = vcombine.low %v2943_v39, %v2942_v47  ;;  %v4147_v56 = vrot.slane %v4133_v48, %v18752_v9  ;;  %v4156_v57 = vrot.slane %v15733_v44, %v18752_v9 }
  0xc9   : > { %v4583_v58 = vrot.slane %v4569_v50, %v18752_v9  ;;  %v3381_v59 = vcombine.low %v2951_v43, %v2959_v52  ;;  %v2944_v60 = vcombine.high %v2702_v31, %v2702_v31  ;;  %v2968_v61 = vrot.slane %v2703_v49, %v18752_v9  ;;  %v15736_v43 = vld [vmem:[%s18750_s19 + $0x88] sm:$0x3f] }
  0xca   : > { %v3379_v63 = vcombine.low %v3371_v46, %v3378_v54  ;;  %v3388_v0 = vrot.slane %v3380_v55, %v18752_v9  ;;  %v4164_v1 = vcombine.high %v4156_v57, %v4156_v57  ;;  %v4585_v2 = vcombine.low %v4148_v53, %v4147_v56  ;;  %v2706_v56 = vld [vmem:[%s18750_s19 + $0x82] sm:$0xff] }
  0xcb   : > { %v4584_v4 = vcombine.low %v4576_v51, %v4583_v58  ;;  %v3395_v5 = vrot.slane %v3381_v59, %v18752_v9  ;;  %v2958_v6 = vrot.slane %v2944_v60, %v18752_v9  ;;  %v2976_v7 = vcombine.high %v2968_v61, %v2968_v61 }
  0xcc   : > { %16961 = vmatmul.mubr.msk.f32.gmra.mrb[68].mxu0 %vm1786_vm2, %v3379_v63  ;;  %v4586_v8 = vcombine.low %v4156_v57, %v4164_v1  ;;  %v4593_v10 = vrot.slane %v4585_v2, %v18752_v9  ;;  %v4149_v11 = vcombine.high %v15733_v44, %v15733_v44  ;;  %v4173_v12 = vrot.slane %v15734_v62, %v18752_v9  ;;  %v15737_v1 = vld [vmem:[%s18750_s19 + $0x90] sm:$0xff] }
  0xcd   : > { %17038 = vmatmul.mubr.msk.f32.gmra.mrb[68].mxu1 %vm1786_vm2, %v4584_v4  ;;  %16963 = vmatprep.mubr.msk.f32.mxu0 %vm18663_vm1, %v23457_v3  ;;  %v3396_v14 = vcombine.low %v3388_v0, %v3395_v5  ;;  %v2960_v15 = vcombine.high %v2958_v6, %v2958_v6  ;;  %v3398_v16 = vcombine.low %v2968_v61, %v2976_v7 }
  0xce   : > { %17040 = vmatprep.mubr.msk.f32.mxu1 %vm18663_vm1, %v23457_v3  ;;  %v4600_v17 = vrot.slane %v4586_v8, %v18752_v9  ;;  %v4163_v18 = vrot.slane %v4149_v11, %v18752_v9  ;;  %v4181_v19 = vcombine.high %v4173_v12, %v4173_v12  ;;  %v2961_v20 = vcombine.high %v2703_v49, %v2703_v49  ;;  %v2707_v11 = vld [vmem:[%s18750_s19 + $0x8a] sm:$0x3f] }
  0xcf   : > { %v3397_v21 = vcombine.low %v2958_v6, %v2960_v15  ;;  %v3412_v22 = vrot.slane %v3398_v16, %v18752_v9  ;;  %v2977_v23 = vcombine.high %v2704_v13, %v2704_v13  ;;  %v2984_v24 = vrot.slane %v2704_v13, %v18752_v9 }
  0xd0   : > { %16964 = vmatmul.mubr.msk.f32.gmra.mrb[70].mxu0 %vm1786_vm2, %v3396_v14  ;;  %v4601_v26 = vcombine.low %v4593_v10, %v4600_v17  ;;  %v4165_v27 = vcombine.high %v4163_v18, %v4163_v18  ;;  %v4603_v28 = vcombine.low %v4173_v12, %v4181_v19  ;;  %v2975_v29 = vrot.slane %v2961_v20, %v18752_v9 }
  0xd1   : > { %16966 = vmatprep.mubr.msk.f32.mxu0 %vm18663_vm1, %v23457_v3  ;;  %v3405_v30 = vrot.slane %v3397_v21, %v18752_v9  ;;  %v2991_v31 = vrot.slane %v2977_v23, %v18752_v9  ;;  %v2992_v32 = vcombine.high %v2984_v24, %v2984_v24  ;;  %v4166_v33 = vcombine.high %v15734_v62, %v15734_v62  ;;  %v2708_v23 = vld [vmem:[%s18750_s19 + $0x92] sm:$0xff] }
  0xd2   : > { %17041 = vmatmul.mubr.msk.f32.gmra.mrb[70].mxu1 %vm1786_vm2, %v4601_v26  ;;  %v4602_v34 = vcombine.low %v4163_v18, %v4165_v27  ;;  %v4617_v35 = vrot.slane %v4603_v28, %v18752_v9  ;;  %v3414_v36 = vcombine.low %v2975_v29, %v2984_v24  ;;  %v4182_v37 = vcombine.high %v15735_v25, %v15735_v25  ;;  %v15738_v29 = vld [vmem:[%s18750_s19 + $0x98] sm:$0x3f] }
  0xd3   : > { %v3413_v39 = vcombine.low %v3405_v30, %v3412_v22  ;;  %17043 = vmatprep.mubr.msk.f32.mxu1 %vm18663_vm1, %v23457_v3  ;;  %v3415_v40 = vcombine.low %v2992_v32, %v2991_v31  ;;  %v4180_v41 = vrot.slane %v4166_v33, %v18752_v9  ;;  %v4189_v42 = vrot.slane %v15735_v25, %v18752_v9 }
  0xd4   : > { %v4610_v44 = vrot.slane %v4602_v34, %v18752_v9  ;;  %v3422_v45 = vrot.slane %v3414_v36, %v18752_v9  ;;  %v4196_v46 = vrot.slane %v4182_v37, %v18752_v9  ;;  %v2993_v47 = vcombine.high %v2991_v31, %v2991_v31  ;;  %v15739_v34 = vld [vmem:[%s18750_s19 + $0xa0] sm:$0xff] }
  0xd5   : > { %16967 = vmatmul.mubr.msk.f32.gmra.mrb[72].mxu0 %vm1786_vm2, %v3413_v39  ;;  %v3429_v48 = vrot.slane %v3415_v40, %v18752_v9  ;;  %v4197_v49 = vcombine.high %v4189_v42, %v4189_v42  ;;  %v4619_v50 = vcombine.low %v4180_v41, %v4189_v42  ;;  %v2994_v51 = vcombine.high %v2705_v38, %v2705_v38 }
  0xd6   : > { %v4618_v52 = vcombine.low %v4610_v44, %v4617_v35  ;;  %16969 = vmatprep.mubr.msk.f32.mxu0 %vm18663_vm1, %v23457_v3  ;;  %v3001_v53 = vrot.slane %v2705_v38, %v18752_v9  ;;  %v4198_v54 = vcombine.high %v4196_v46, %v4196_v46  ;;  %v4199_v55 = vcombine.high %v15736_v43, %v15736_v43 }
  0xd7   : > { %v3430_v57 = vcombine.low %v3422_v45, %v3429_v48  ;;  %v4620_v58 = vcombine.low %v4197_v49, %v4196_v46  ;;  %v4627_v59 = vrot.slane %v4619_v50, %v18752_v9  ;;  %v3008_v60 = vrot.slane %v2994_v51, %v18752_v9 }
  0xd8   : > { %17044 = vmatmul.mubr.msk.f32.gmra.mrb[72].mxu1 %vm1786_vm2, %v4618_v52  ;;  %v3009_v61 = vcombine.high %v3001_v53, %v3001_v53  ;;  %v3431_v62 = vcombine.low %v2993_v47, %v3001_v53  ;;  %v4206_v63 = vrot.slane %v15736_v43, %v18752_v9  ;;  %v4213_v0 = vrot.slane %v4199_v55, %v18752_v9  ;;  %v2709_v47 = vld [vmem:[%s18750_s19 + $0x9a] sm:$0x3f] }
  0xd9   : > { %16970 = vmatmul.mubr.msk.f32.gmra.mrb[74].mxu0 %vm1786_vm2, %v3430_v57  ;;  %17046 = vmatprep.mubr.msk.f32.mxu1 %vm18663_vm1, %v23457_v3  ;;  %v4634_v2 = vrot.slane %v4620_v58, %v18752_v9  ;;  %v3010_v4 = vcombine.high %v2706_v56, %v2706_v56  ;;  %v3017_v5 = vrot.slane %v2706_v56, %v18752_v9  ;;  %v15740_v56 = vld [vmem:[%s18750_s19 + $0xa8] sm:$0x3f] }
  0xda   : > { %16972 = vmatprep.mubr.msk.f32.mxu0 %vm18663_vm1, %v23457_v3  ;;  %v3432_v6 = vcombine.low %v3009_v61, %v3008_v60  ;;  %v3439_v7 = vrot.slane %v3431_v62, %v18752_v9  ;;  %v4214_v8 = vcombine.high %v4206_v63, %v4206_v63  ;;  %v4636_v10 = vcombine.low %v4198_v54, %v4206_v63 }
  0xdb   : > { %v4635_v12 = vcombine.low %v4627_v59, %v4634_v2  ;;  %v3024_v13 = vrot.slane %v3010_v4, %v18752_v9  ;;  %v3025_v14 = vcombine.high %v3017_v5, %v3017_v5  ;;  %v4215_v15 = vcombine.high %v15737_v1, %v15737_v1 }
  0xdc   : > { %v3446_v16 = vrot.slane %v3432_v6, %v18752_v9  ;;  %v4637_v17 = vcombine.low %v4214_v8, %v4213_v0  ;;  %v4644_v18 = vrot.slane %v4636_v10, %v18752_v9  ;;  %v4222_v19 = vrot.slane %v15737_v1, %v18752_v9  ;;  %v2710_v1 = vld [vmem:[%s18750_s19 + $0xa2] sm:$0xff] }
  0xdd   : > { %17047 = vmatmul.mubr.msk.f32.gmra.mrb[74].mxu1 %vm1786_vm2, %v4635_v12  ;;  %v3026_v20 = vcombine.high %v3024_v13, %v3024_v13  ;;  %v3448_v21 = vcombine.low %v3017_v5, %v3025_v14  ;;  %v4229_v22 = vrot.slane %v4215_v15, %v18752_v9  ;;  %v3027_v24 = vcombine.high %v2707_v11, %v2707_v11  ;;  %v15741_v15 = vld [vmem:[%s18750_s19 + $0xb0] sm:$0xff] }
  0xde   : > { %v3447_v25 = vcombine.low %v3439_v7, %v3446_v16  ;;  %17049 = vmatprep.mubr.msk.f32.mxu1 %vm18663_vm1, %v23457_v3  ;;  %v4651_v26 = vrot.slane %v4637_v17, %v18752_v9  ;;  %v4230_v27 = vcombine.high %v4222_v19, %v4222_v19  ;;  %v3034_v28 = vrot.slane %v2707_v11, %v18752_v9 }
  0xdf   : > { %v3449_v30 = vcombine.low %v3024_v13, %v3026_v20  ;;  %v3456_v31 = vrot.slane %v3448_v21, %v18752_v9  ;;  %v4231_v32 = vcombine.high %v4229_v22, %v4229_v22  ;;  %v3041_v33 = vrot.slane %v3027_v24, %v18752_v9 }
  0xe0   : > { %16973 = vmatmul.mubr.msk.f32.gmra.mrb[76].mxu0 %vm1786_vm2, %v3447_v25  ;;  %v4652_v35 = vcombine.low %v4644_v18, %v4651_v26  ;;  %v4653_v36 = vcombine.low %v4222_v19, %v4230_v27  ;;  %v3042_v37 = vcombine.high %v3034_v28, %v3034_v28  ;;  %v3050_v38 = vrot.slane %v2708_v23, %v18752_v9  ;;  %v2711_v25 = vld [vmem:[%s18750_s19 + $0xaa] sm:$0x3f] }
  0xe1   : > { %16975 = vmatprep.mubr.msk.f32.mxu0 %vm18663_vm1, %v23457_v3  ;;  %v3463_v39 = vrot.slane %v3449_v30, %v18752_v9  ;;  %v4654_v40 = vcombine.low %v4229_v22, %v4231_v32  ;;  %v4232_v41 = vcombine.high %v15738_v29, %v15738_v29  ;;  %v4239_v42 = vrot.slane %v15738_v29, %v18752_v9 }
  0xe2   : > { %17050 = vmatmul.mubr.msk.f32.gmra.mrb[76].mxu1 %vm1786_vm2, %v4652_v35  ;;  %v4661_v43 = vrot.slane %v4653_v36, %v18752_v9  ;;  %v3465_v44 = vcombine.low %v3034_v28, %v3042_v37  ;;  %v3466_v45 = vcombine.low %v3041_v33, %v3050_v38  ;;  %v4255_v46 = vrot.slane %v15739_v34, %v18752_v9 }
  0xe3   : > { %v3464_v48 = vcombine.low %v3456_v31, %v3463_v39  ;;  %17052 = vmatprep.mubr.msk.f32.mxu1 %vm18663_vm1, %v23457_v3  ;;  %v4668_v49 = vrot.slane %v4654_v40, %v18752_v9  ;;  %v4246_v50 = vrot.slane %v4232_v41, %v18752_v9  ;;  %v4247_v51 = vcombine.high %v4239_v42, %v4239_v42 }
  0xe4   : > { %v3473_v52 = vrot.slane %v3465_v44, %v18752_v9  ;;  %v3480_v53 = vrot.slane %v3466_v45, %v18752_v9  ;;  %v3043_v54 = vcombine.high %v2708_v23, %v2708_v23  ;;  %v3058_v55 = vcombine.high %v3050_v38, %v3050_v38 }
  0xe5   : > { %16976 = vmatmul.mubr.msk.f32.gmra.mrb[78].mxu0 %vm1786_vm2, %v3464_v48  ;;  %v4669_v57 = vcombine.low %v4661_v43, %v4668_v49  ;;  %v4670_v58 = vcombine.low %v4239_v42, %v4247_v51  ;;  %v4671_v59 = vcombine.low %v4246_v50, %v4255_v46  ;;  %v3067_v60 = vrot.slane %v2709_v47, %v18752_v9  ;;  %v2712_v43 = vld [vmem:[%s18750_s19 + $0xb2] sm:$0xff] }
  0xe6   : > { %16978 = vmatprep.mubr.msk.f32.mxu0 %vm18663_vm1, %v23457_v3  ;;  %v3481_v61 = vcombine.low %v3473_v52, %v3480_v53  ;;  %v3057_v62 = vrot.slane %v3043_v54, %v18752_v9  ;;  %v4248_v63 = vcombine.high %v15739_v34, %v15739_v34  ;;  %v4263_v0 = vcombine.high %v4255_v46, %v4255_v46  ;;  %v15742_v34 = vld [vmem:[%s18750_s19 + $0xb8] sm:$0x3f] }
  0xe7   : > { %17053 = vmatmul.mubr.msk.f32.gmra.mrb[78].mxu1 %vm1786_vm2, %v4669_v57  ;;  %v4678_v2 = vrot.slane %v4670_v58, %v18752_v9  ;;  %v4685_v4 = vrot.slane %v4671_v59, %v18752_v9  ;;  %v4272_v5 = vrot.slane %v15740_v56, %v18752_v9  ;;  %v3060_v6 = vcombine.high %v2709_v47, %v2709_v47 }
  0xe8   : > { %17055 = vmatprep.mubr.msk.f32.mxu1 %vm18663_vm1, %v23457_v3  ;;  %v3059_v7 = vcombine.high %v3057_v62, %v3057_v62  ;;  %v3482_v8 = vcombine.low %v3058_v55, %v3057_v62  ;;  %v4262_v10 = vrot.slane %v4248_v63, %v18752_v9  ;;  %v3075_v11 = vcombine.high %v3067_v60, %v3067_v60 }
  0xe9   : > { %16979 = vmatmul.mubr.msk.f32.gmra.mrb[80].mxu0 %vm1786_vm2, %v3481_v61  ;;  %v4686_v12 = vcombine.low %v4678_v2, %v4685_v4  ;;  %v3074_v13 = vrot.slane %v3060_v6, %v18752_v9  ;;  %v3083_v14 = vrot.slane %v2710_v1, %v18752_v9  ;;  %v4265_v16 = vcombine.high %v15740_v56, %v15740_v56 }
  0xea   : > { %16981 = vmatprep.mubr.msk.f32.mxu0 %vm18663_vm1, %v23457_v3  ;;  %v3483_v17 = vcombine.low %v3059_v7, %v3067_v60  ;;  %v3490_v18 = vrot.slane %v3482_v8, %v18752_v9  ;;  %v4264_v19 = vcombine.high %v4262_v10, %v4262_v10  ;;  %v4687_v20 = vcombine.low %v4263_v0, %v4262_v10  ;;  %v15743_v60 = vld [vmem:[%s18750_s19 + $0xc0] sm:$0xff] }
  0xeb   : > { %17056 = vmatmul.mubr.msk.f32.gmra.mrb[80].mxu1 %vm1786_vm2, %v4686_v12  ;;  %v3091_v21 = vcombine.high %v3083_v14, %v3083_v14  ;;  %v3499_v22 = vcombine.low %v3075_v11, %v3074_v13  ;;  %v4279_v23 = vrot.slane %v4265_v16, %v18752_v9  ;;  %v4280_v24 = vcombine.high %v4272_v5, %v4272_v5 }
  0xec   : > { %v3497_v26 = vrot.slane %v3483_v17, %v18752_v9  ;;  %17058 = vmatprep.mubr.msk.f32.mxu1 %vm18663_vm1, %v23457_v3  ;;  %v4688_v27 = vcombine.low %v4264_v19, %v4272_v5  ;;  %v4695_v28 = vrot.slane %v4687_v20, %v18752_v9  ;;  %v4288_v29 = vrot.slane %v15741_v15, %v18752_v9  ;;  %v15744_v20 = vld [vmem:[%s18750_s19 + $0xc8] sm:$0x3f] }
  0xed   : > { %v3500_v30 = vcombine.low %v3083_v14, %v3091_v21  ;;  %v3507_v31 = vrot.slane %v3499_v22, %v18752_v9  ;;  %v4704_v32 = vcombine.low %v4280_v24, %v4279_v23  ;;  %v3076_v33 = vcombine.high %v2710_v1, %v2710_v1 }
  0xee   : > { %v3498_v35 = vcombine.low %v3490_v18, %v3497_v26  ;;  %v4702_v36 = vrot.slane %v4688_v27, %v18752_v9  ;;  %v4296_v37 = vcombine.high %v4288_v29, %v4288_v29  ;;  %v3100_v38 = vrot.slane %v2711_v25, %v18752_v9 }
  0xef   : > { %v3514_v39 = vrot.slane %v3500_v30, %v18752_v9  ;;  %v4712_v40 = vrot.slane %v4704_v32, %v18752_v9  ;;  %v3090_v41 = vrot.slane %v3076_v33, %v18752_v9  ;;  %v4281_v42 = vcombine.high %v15741_v15, %v15741_v15  ;;  %v2713_v15 = vld [vmem:[%s18750_s19 + $0xba] sm:$0x3f] }
  0xf0   : > { %16982 = vmatmul.mubr.msk.f32.gmra.mrb[82].mxu0 %vm1786_vm2, %v3498_v35  ;;  %v4703_v44 = vcombine.low %v4695_v28, %v4702_v36  ;;  %v4705_v45 = vcombine.low %v4288_v29, %v4296_v37  ;;  %v3108_v46 = vcombine.high %v3100_v38, %v3100_v38  ;;  %v4305_v47 = vrot.slane %v15742_v34, %v18752_v9  ;;  %v2714_v37 = vld [vmem:[%s18750_s19 + $0xc2] sm:$0xff] }
  0xf1   : > { %16984 = vmatprep.mubr.msk.f32.mxu0 %vm18663_vm1, %v23457_v3  ;;  %v3515_v48 = vcombine.low %v3507_v31, %v3514_v39  ;;  %v3092_v49 = vcombine.high %v3090_v41, %v3090_v41  ;;  %v4295_v50 = vrot.slane %v4281_v42, %v18752_v9  ;;  %v3093_v51 = vcombine.high %v2711_v25, %v2711_v25  ;;  %v15745_v42 = vld [vmem:[%s18750_s19 + $0xd0] sm:$0xff] }
  0xf2   : > { %17059 = vmatmul.mubr.msk.f32.gmra.mrb[82].mxu1 %vm1786_vm2, %v4703_v44  ;;  %v4719_v52 = vrot.slane %v4705_v45, %v18752_v9  ;;  %v3517_v53 = vcombine.low %v3100_v38, %v3108_v46  ;;  %v4313_v54 = vcombine.high %v4305_v47, %v4305_v47  ;;  %v3109_v55 = vcombine.high %v2712_v43, %v2712_v43 }
  0xf3   : > { %17061 = vmatprep.mubr.msk.f32.mxu1 %vm18663_vm1, %v23457_v3  ;;  %v3516_v56 = vcombine.low %v3090_v41, %v3092_v49  ;;  %v4297_v57 = vcombine.high %v4295_v50, %v4295_v50  ;;  %v3107_v58 = vrot.slane %v3093_v51, %v18752_v9  ;;  %v3116_v59 = vrot.slane %v2712_v43, %v18752_v9 }
  0xf4   : > { %16985 = vmatmul.mubr.msk.f32.gmra.mrb[84].mxu0 %vm1786_vm2, %v3515_v48  ;;  %v4720_v61 = vcombine.low %v4712_v40, %v4719_v52  ;;  %v3531_v62 = vrot.slane %v3517_v53, %v18752_v9  ;;  %v4722_v63 = vcombine.low %v4305_v47, %v4313_v54  ;;  %v3123_v0 = vrot.slane %v3109_v55, %v18752_v9  ;;  %v2715_v52 = vld [vmem:[%s18750_s19 + $0xca] sm:$0x3f] }
  0xf5   : > { %v19501_v1 = vpop.f32.mrb[0].mxu0  ;;  %v19503_v2 = vpop.f32.mrb[0].mxu1  ;;  %16987 = vmatprep.mubr.msk.f32.mxu0 %vm18663_vm1, %v23457_v3  ;;  %v3524_v4 = vrot.slane %v3516_v56, %v18752_v9  ;;  %v4721_v5 = vcombine.low %v4295_v50, %v4297_v57  ;;  %v3124_v6 = vcombine.high %v3116_v59, %v3116_v59  ;;  %v3533_v7 = vcombine.low %v3107_v58, %v3116_v59 }
  0xf6   : > { %v16781_v8 = vpop.f32.mrb[1].mxu0  ;;  %v16858_v10 = vpop.f32.mrb[1].mxu1  ;;  %17062 = vmatmul.mubr.msk.f32.gmra.mrb[84].mxu1 %vm1786_vm2, %v4720_v61  ;;  %v4736_v11 = vrot.slane %v4722_v63, %v18752_v9  ;;  %v4298_v12 = vcombine.high %v15742_v34, %v15742_v34  ;;  %v4314_v13 = vcombine.high %v15743_v60, %v15743_v60  ;;  %v4321_v14 = vrot.slane %v15743_v60, %v18752_v9 }
  0xf7   : > { %v3532_v16 = vcombine.low %v3524_v4, %v3531_v62  ;;  %17064 = vmatprep.mubr.msk.f32.mxu1 %vm18663_vm1, %v23457_v3  ;;  %v4729_v17 = vrot.slane %v4721_v5, %v18752_v9  ;;  %v3534_v18 = vcombine.low %v3124_v6, %v3123_v0  ;;  %v3541_v19 = vrot.slane %v3533_v7, %v18752_v9  ;;  %v2716_v5 = vld [vmem:[%s18750_s19 + $0xd2] sm:$0xff] }
  0xf8   : > { %v4312_v21 = vrot.slane %v4298_v12, %v18752_v9  ;;  %v4328_v22 = vrot.slane %v4314_v13, %v18752_v9  ;;  %v4329_v23 = vcombine.high %v4321_v14, %v4321_v14  ;;  %v3125_v24 = vcombine.high %v3123_v0, %v3123_v0 }
  0xf9   : > { %v19519_v25 = vpop.f32.mrb[2].mxu0  ;;  %v19521_v26 = vpop.f32.mrb[2].mxu1  ;;  %16988 = vmatmul.mubr.msk.f32.gmra.mrb[86].mxu0 %vm1786_vm2, %v3532_v16  ;;  %v4737_v27 = vcombine.low %v4729_v17, %v4736_v11  ;;  %v3548_v28 = vrot.slane %v3534_v18, %v18752_v9  ;;  %v3126_v29 = vcombine.high %v2713_v15, %v2713_v15  ;;  %v3133_v30 = vrot.slane %v2713_v15, %v18752_v9 }
  0xfa   : > { %v16784_v31 = vpop.f32.mrb[3].mxu0  ;;  %v16861_v32 = vpop.f32.mrb[3].mxu1  ;;  %16990 = vmatprep.mubr.msk.f32.mxu0 %vm18663_vm1, %v23457_v3  ;;  %v4738_v33 = vcombine.low %v4312_v21, %v4321_v14  ;;  %v4739_v34 = vcombine.low %v4329_v23, %v4328_v22  ;;  %v4330_v35 = vcombine.high %v4328_v22, %v4328_v22  ;;  %v4331_v36 = vcombine.high %v15744_v20, %v15744_v20  ;;  %v15746_v14 = vld [vmem:[%s18750_s19 + $0xd8] sm:$0x3f] }
  0xfb   : > { %17065 = vmatmul.mubr.msk.f32.gmra.mrb[86].mxu1 %vm1786_vm2, %v4737_v27  ;;  %v3549_v38 = vcombine.low %v3541_v19, %v3548_v28  ;;  %v3140_v39 = vrot.slane %v3126_v29, %v18752_v9  ;;  %v3141_v40 = vcombine.high %v3133_v30, %v3133_v30  ;;  %v3550_v41 = vcombine.low %v3125_v24, %v3133_v30  ;;  %v15747_v24 = vld [vmem:[%s18750_s19 + $0xe0] sm:$0xff] }
  0xfc   : > { %17067 = vmatprep.mubr.msk.f32.mxu1 %vm18663_vm1, %v23457_v3  ;;  %v4746_v43 = vrot.slane %v4738_v33, %v18752_v9  ;;  %v4753_v44 = vrot.slane %v4739_v34, %v18752_v9  ;;  %v4338_v45 = vrot.slane %v15744_v20, %v18752_v9  ;;  %v4345_v46 = vrot.slane %v4331_v36, %v18752_v9 }
  0xfd   : > { %v19538_v47 = vpop.f32.mrb[4].mxu0  ;;  %16991 = vmatmul.mubr.msk.f32.gmra.mrb[88].mxu0 %vm1786_vm2, %v3549_v38  ;;  %v3551_v48 = vcombine.low %v3141_v40, %v3140_v39  ;;  %v3558_v49 = vrot.slane %v3550_v41, %v18752_v9  ;;  %v3142_v50 = vcombine.high %v2714_v37, %v2714_v37  ;;  %v3149_v51 = vrot.slane %v2714_v37, %v18752_v9  ;;  %v2717_v41 = vld [vmem:[%s18750_s19 + $0xda] sm:$0x3f] }
  0xfe   : > { %v16787_v53 = vpop.f32.mrb[5].mxu0  ;;  %v4754_v54 = vcombine.low %v4746_v43, %v4753_v44  ;;  %16993 = vmatprep.mubr.msk.f32.mxu0 %vm18663_vm1, %v23457_v3  ;;  %v4346_v55 = vcombine.high %v4338_v45, %v4338_v45  ;;  %v4755_v56 = vcombine.low %v4330_v35, %v4338_v45  ;;  %v4347_v57 = vcombine.high %v15745_v42, %v15745_v42 }
  0xff   : > { %v3565_v58 = vrot.slane %v3551_v48, %v18752_v9  ;;  %v3156_v59 = vrot.slane %v3142_v50, %v18752_v9  ;;  %v3157_v60 = vcombine.high %v3149_v51, %v3149_v51  ;;  %v4354_v61 = vrot.slane %v15745_v42, %v18752_v9  ;;  %v19549_v62 = vpop.f32.mrb[4].mxu1 }
 0x100   : > { %17068 = vmatmul.mubr.msk.f32.gmra.mrb[88].mxu1 %vm1786_vm2, %v4754_v54  ;;  %v4756_v63 = vcombine.low %v4346_v55, %v4345_v46  ;;  %v4763_v0 = vrot.slane %v4755_v56, %v18752_v9  ;;  %v4361_v4 = vrot.slane %v4347_v57, %v18752_v9  ;;  %v3159_v6 = vcombine.high %v2715_v52, %v2715_v52  ;;  %v16864_v7 = vpop.f32.mrb[5].mxu1  ;;  %v15748_v57 = vld [vmem:[%s18750_s19 + $0xe8] sm:$0x3f] }
 0x101   : > { %v19555_v8 = vpop.f32.mrb[6].mxu0  ;;  %v3566_v10 = vcombine.low %v3558_v49, %v3565_v58  ;;  %17070 = vmatprep.mubr.msk.f32.mxu1 %vm18663_vm1, %v23457_v3  ;;  %v3158_v11 = vcombine.high %v3156_v59, %v3156_v59  ;;  %v3567_v12 = vcombine.low %v3149_v51, %v3157_v60  ;;  %v4362_v13 = vcombine.high %v4354_v61, %v4354_v61 }
 0x102   : > { %v16790_v15 = vpop.f32.mrb[7].mxu0  ;;  %v4770_v16 = vrot.slane %v4756_v63, %v18752_v9  ;;  %v4363_v17 = vcombine.high %v4361_v4, %v4361_v4  ;;  %v3166_v18 = vrot.slane %v2715_v52, %v18752_v9  ;;  %v3173_v19 = vrot.slane %v3159_v6, %v18752_v9 }
 0x103   : > { %16994 = vmatmul.mubr.msk.f32.gmra.mrb[90].mxu0 %vm1786_vm2, %v3566_v10  ;;  %v3568_v20 = vcombine.low %v3156_v59, %v3158_v11  ;;  %v3575_v21 = vrot.slane %v3567_v12, %v18752_v9  ;;  %v4772_v22 = vcombine.low %v4354_v61, %v4362_v13  ;;  %v3182_v23 = vrot.slane %v2716_v5, %v18752_v9 }
 0x104   : > { %v4771_v27 = vcombine.low %v4763_v0, %v4770_v16  ;;  %16996 = vmatprep.mubr.msk.f32.mxu0 %vm18663_vm1, %v23457_v3  ;;  %v4773_v28 = vcombine.low %v4361_v4, %v4363_v17  ;;  %v3174_v29 = vcombine.high %v3166_v18, %v3166_v18  ;;  %v4364_v30 = vcombine.high %v15746_v14, %v15746_v14  ;;  %v19569_v31 = vpop.f32.mrb[6].mxu1 }
 0x105   : > { %v3582_v32 = vrot.slane %v3568_v20, %v18752_v9  ;;  %v4780_v33 = vrot.slane %v4772_v22, %v18752_v9  ;;  %v3585_v34 = vcombine.low %v3173_v19, %v3182_v23  ;;  %v4371_v35 = vrot.slane %v15746_v14, %v18752_v9  ;;  %v16867_v36 = vpop.f32.mrb[7].mxu1  ;;  %v15776_v14 = vld [vmem:[%s18750_s19 + $0x11] sm:$0xff] }
 0x106   : > { %17071 = vmatmul.mubr.msk.f32.gmra.mrb[90].mxu1 %vm1786_vm2, %v4771_v27  ;;  %v4787_v37 = vrot.slane %v4773_v28, %v18752_v9  ;;  %v3584_v38 = vcombine.low %v3166_v18, %v3174_v29  ;;  %v4378_v39 = vrot.slane %v4364_v30, %v18752_v9  ;;  %v4387_v40 = vrot.slane %v15747_v24, %v18752_v9  ;;  %v15831_v20 = vld [vmem:[%s18750_s19 + $0x12] sm:$0xff] }
 0x107   : > { %v3583_v42 = vcombine.low %v3575_v21, %v3582_v32  ;;  %17073 = vmatprep.mubr.msk.f32.mxu1 %vm18663_vm1, %v23457_v3  ;;  %v3599_v43 = vrot.slane %v3585_v34, %v18752_v9  ;;  %v4379_v44 = vcombine.high %v4371_v35, %v4371_v35  ;;  %v3175_v45 = vcombine.high %v2716_v5, %v2716_v5  ;;  %v19582_v46 = vpop.f32.mrb[8].mxu0 }
 0x108   : > { %v4788_v48 = vcombine.low %v4780_v33, %v4787_v37  ;;  %v3592_v49 = vrot.slane %v3584_v38, %v18752_v9  ;;  %v4790_v50 = vcombine.low %v4378_v39, %v4387_v40  ;;  %v3190_v51 = vcombine.high %v3182_v23, %v3182_v23  ;;  %v19585_v52 = vpop.f32.mrb[8].mxu1  ;;  %v16793_v53 = vpop.f32.mrb[9].mxu0  ;;  %v15777_v38 = vld [vmem:[%s18750_s19 + $0x19] sm:$0x3f] }
 0x109   : > { %16997 = vmatmul.mubr.msk.f32.gmra.mrb[92].mxu0 %vm1786_vm2, %v3583_v42  ;;  %v4789_v54 = vcombine.low %v4371_v35, %v4379_v44  ;;  %v3189_v55 = vrot.slane %v3175_v45, %v18752_v9  ;;  %v3199_v56 = vrot.slane %v2717_v41, %v18752_v9  ;;  %v4380_v58 = vcombine.high %v15747_v24, %v15747_v24  ;;  %v16870_v59 = vpop.f32.mrb[9].mxu1 }
 0x10a   : > { %17074 = vmatmul.mubr.msk.f32.gmra.mrb[92].mxu1 %vm1786_vm2, %v4788_v48  ;;  %16999 = vmatprep.mubr.msk.f32.mxu0 %vm18663_vm1, %v23457_v3  ;;  %v3600_v60 = vcombine.low %v3592_v49, %v3599_v43  ;;  %v4804_v61 = vrot.slane %v4790_v50, %v18752_v9  ;;  %v4395_v63 = vcombine.high %v4387_v40, %v4387_v40  ;;  %v15778_v43 = vld [vmem:[%s18750_s19 + $0x21] sm:$0xff] }
 0x10b   : > { %17076 = vmatprep.mubr.msk.f32.mxu1 %vm18663_vm1, %v23457_v3  ;;  %v4797_v0 = vrot.slane %v4789_v54, %v18752_v9  ;;  %v3191_v4 = vcombine.high %v3189_v55, %v3189_v55  ;;  %v3601_v5 = vcombine.low %v3190_v51, %v3189_v55  ;;  %v4394_v6 = vrot.slane %v4380_v58, %v18752_v9  ;;  %v19599_v7 = vpop.f32.mrb[10].mxu0  ;;  %v15832_v51 = vld [vmem:[%s18750_s19 + $0x1a] sm:$0x3f] }
 0x10c   : > { %v4404_v10 = vrot.slane %v15748_v57, %v18752_v9  ;;  %v3192_v11 = vcombine.high %v2717_v41, %v2717_v41  ;;  %v3207_v12 = vcombine.high %v3199_v56, %v3199_v56  ;;  %v4397_v13 = vcombine.high %v15748_v57, %v15748_v57  ;;  %v16796_v15 = vpop.f32.mrb[11].mxu0 }
 0x10d   : > { %17000 = vmatmul.mubr.msk.f32.gmra.mrb[94].mxu0 %vm1786_vm2, %v3600_v60  ;;  %v4805_v16 = vcombine.low %v4797_v0, %v4804_v61  ;;  %v3602_v17 = vcombine.low %v3191_v4, %v3199_v56  ;;  %v3609_v18 = vrot.slane %v3601_v5, %v18752_v9  ;;  %v4396_v19 = vcombine.high %v4394_v6, %v4394_v6  ;;  %v15833_v4 = vld [vmem:[%s18750_s19 + $0x22] sm:$0xff] }
 0x10e   : > { %17002 = vmatprep.mubr.msk.f32.mxu0 %vm18663_vm1, %v23457_v3  ;;  %v4806_v21 = vcombine.low %v4395_v63, %v4394_v6  ;;  %v3206_v22 = vrot.slane %v3192_v11, %v18752_v9  ;;  %v4411_v23 = vrot.slane %v4397_v13, %v18752_v9  ;;  %v4412_v24 = vcombine.high %v4404_v10, %v4404_v10  ;;  %v19610_v27 = vpop.f32.mrb[10].mxu1 }
 0x10f   : > { %17077 = vmatmul.mubr.msk.f32.gmra.mrb[94].mxu1 %vm1786_vm2, %v4805_v16  ;;  %v3616_v28 = vrot.slane %v3602_v17, %v18752_v9  ;;  %v4807_v29 = vcombine.low %v4396_v19, %v4404_v10  ;;  %v5155_v30 = vcombine.high %v15776_v14, %v15776_v14  ;;  %v5162_v32 = vrot.slane %v15776_v14, %v18752_v9  ;;  %v16873_v33 = vpop.f32.mrb[11].mxu1 }
 0x110   : > { %17079 = vmatprep.mubr.msk.f32.mxu1 %vm18663_vm1, %v23457_v3  ;;  %v4814_v34 = vrot.slane %v4806_v21, %v18752_v9  ;;  %v3618_v35 = vcombine.low %v3207_v12, %v3206_v22  ;;  %v4823_v36 = vcombine.low %v4412_v24, %v4411_v23  ;;  %v6359_v37 = vcombine.high %v15831_v20, %v15831_v20 }
 0x111   : > { %v3617_v39 = vcombine.low %v3609_v18, %v3616_v28  ;;  %v4821_v40 = vrot.slane %v4807_v29, %v18752_v9  ;;  %v5169_v41 = vrot.slane %v5155_v30, %v18752_v9  ;;  %v5170_v42 = vcombine.high %v5162_v32, %v5162_v32  ;;  %v19622_v44 = vpop.f32.mrb[12].mxu0  ;;  %v15779_v29 = vld [vmem:[%s18750_s19 + $0x29] sm:$0x3f] }
 0x112   : > { %v3625_v45 = vrot.slane %v3618_v35, %v18752_v9  ;;  %v4830_v48 = vrot.slane %v4823_v36, %v18752_v9  ;;  %v6366_v49 = vrot.slane %v15831_v20, %v18752_v9  ;;  %v6373_v50 = vrot.slane %v6359_v37, %v18752_v9  ;;  %v19629_v53 = vpop.f32.mrb[12].mxu1  ;;  %v16799_v54 = vpop.f32.mrb[13].mxu0  ;;  %v15834_v36 = vld [vmem:[%s18750_s19 + $0x2a] sm:$0x3f] }
 0x113   : > { %17003 = vmatmul.mubr.msk.f32.gmra.mrb[96].mxu0 %vm1786_vm2, %v3617_v39  ;;  %v4822_v55 = vcombine.low %v4814_v34, %v4821_v40  ;;  %v5171_v56 = vcombine.high %v5169_v41, %v5169_v41  ;;  %v5619_v57 = vcombine.low %v5162_v32, %v5170_v42  ;;  %v5172_v58 = vcombine.high %v15777_v38, %v15777_v38  ;;  %v16876_v59 = vpop.f32.mrb[13].mxu1 }
 0x114   : > { %17005 = vmatprep.mubr.msk.f32.mxu0 %vm18663_vm1, %v23457_v3  ;;  %v6374_v60 = vcombine.high %v6366_v49, %v6366_v49  ;;  %v6375_v61 = vcombine.high %v6373_v50, %v6373_v50  ;;  %v5179_v63 = vrot.slane %v15777_v38, %v18752_v9  ;;  %v5195_v0 = vrot.slane %v15778_v43, %v18752_v9 }
 0x115   : > { %17080 = vmatmul.mubr.msk.f32.gmra.mrb[96].mxu1 %vm1786_vm2, %v4822_v55  ;;  %v5620_v5 = vcombine.low %v5169_v41, %v5171_v56  ;;  %v5627_v6 = vrot.slane %v5619_v57, %v18752_v9  ;;  %v5186_v10 = vrot.slane %v5172_v58, %v18752_v9  ;;  %v6376_v11 = vcombine.high %v15832_v51, %v15832_v51 }
 0x116   : > { %17082 = vmatprep.mubr.msk.f32.mxu1 %vm18663_vm1, %v23457_v3  ;;  %v6823_v12 = vcombine.low %v6366_v49, %v6374_v60  ;;  %v6824_v13 = vcombine.low %v6373_v50, %v6375_v61  ;;  %v5187_v14 = vcombine.high %v5179_v63, %v5179_v63  ;;  %v6383_v15 = vrot.slane %v15832_v51, %v18752_v9  ;;  %v19643_v16 = vpop.f32.mrb[14].mxu0  ;;  %v15780_v50 = vld [vmem:[%s18750_s19 + $0x31] sm:$0xff] }
 0x117   : > { %17006 = vmatmul.mubr.msk.f32.gmra.mrb[98].mxu0 %vm1786_vm2, %v3625_v45  ;;  %v5634_v17 = vrot.slane %v5620_v5, %v18752_v9  ;;  %v5637_v18 = vcombine.low %v5186_v10, %v5195_v0  ;;  %v6390_v19 = vrot.slane %v6376_v11, %v18752_v9  ;;  %v6399_v20 = vrot.slane %v15833_v4, %v18752_v9  ;;  %v16802_v21 = vpop.f32.mrb[15].mxu0  ;;  %v15835_v10 = vld [vmem:[%s18750_s19 + $0x32] sm:$0xff] }
 0x118   : > { %17087 = vmatprep.mubr.msk.f32.mxu0 %vm18663_vm1, %v23457_v3  ;;  %v6831_v22 = vrot.slane %v6823_v12, %v18752_v9  ;;  %v6838_v23 = vrot.slane %v6824_v13, %v18752_v9  ;;  %v5636_v24 = vcombine.low %v5179_v63, %v5187_v14  ;;  %v6391_v28 = vcombine.high %v6383_v15, %v6383_v15  ;;  %v19654_v30 = vpop.f32.mrb[14].mxu1 }
 0x119   : > { %17083 = vmatmul.mubr.msk.f32.gmra.mrb[98].mxu1 %vm1786_vm2, %v4830_v48  ;;  %v5635_v32 = vcombine.low %v5627_v6, %v5634_v17  ;;  %v5651_v33 = vrot.slane %v5637_v18, %v18752_v9  ;;  %v6841_v34 = vcombine.low %v6390_v19, %v6399_v20  ;;  %v5188_v35 = vcombine.high %v15778_v43, %v15778_v43  ;;  %v16879_v37 = vpop.f32.mrb[15].mxu1  ;;  %v15914_v19 = vld [vmem:[%s23448_s1 + $0x18] sm:$0xf] }
 0x11a   : > { %17164 = vmatprep.mubr.msk.f32.mxu1 %vm18663_vm1, %v23457_v3  ;;  %v6839_v38 = vcombine.low %v6831_v22, %v6838_v23  ;;  %v5644_v39 = vrot.slane %v5636_v24, %v18752_v9  ;;  %v6840_v40 = vcombine.low %v6383_v15, %v6391_v28  ;;  %v5203_v41 = vcombine.high %v5195_v0, %v5195_v0  ;;  %v19662_v42 = vpop.f32.mrb[16].mxu0  ;;  %v15781_v24 = vld [vmem:[%s18750_s19 + $0x39] sm:$0x3f] }
 0x11b   : > { %17088 = vmatmul.mubr.msk.f32.vlgmr.msra.gmra.mrb[100].mxu0 %vm1786_vm2, %v5635_v32  ;;  %v6855_v45 = vrot.slane %v6841_v34, %v18752_v9  ;;  %v5202_v48 = vrot.slane %v5188_v35, %v18752_v9  ;;  %v5212_v43 = vrot.slane %v15779_v29, %v18752_v9  ;;  %v6392_v49 = vcombine.high %v15833_v4, %v15833_v4  ;;  %v16805_v51 = vpop.f32.mrb[17].mxu0 }
 0x11c   : > { %17090 = vmatprep.mubr.msk.f32.mxu0 %vm18663_vm1, %v23457_v3  ;;  %v5652_v54 = vcombine.low %v5644_v39, %v5651_v33  ;;  %v6848_v55 = vrot.slane %v6840_v40, %v18752_v9  ;;  %v6407_v56 = vcombine.high %v6399_v20, %v6399_v20  ;;  %v6416_v57 = vrot.slane %v15834_v36, %v18752_v9 }
 0x11d   : > { %17165 = vmatmul.mubr.msk.f32.vlgmr.msra.gmra.mrb[100].mxu1 %vm1786_vm2, %v6839_v38  ;;  %v5204_v58 = vcombine.high %v5202_v48, %v5202_v48  ;;  %v5653_v59 = vcombine.low %v5203_v41, %v5202_v48  ;;  %v6406_v60 = vrot.slane %v6392_v49, %v18752_v9  ;;  %v19677_v61 = vadd.f32 %v19503_v2, %v19501_v1  ;;  %v19679_v63 = vpop.f32.mrb[16].mxu1  ;;  %v15836_v41 = vld [vmem:[%s18750_s19 + $0x3a] sm:$0x3f] }
 0x11e   : > { %17167 = vmatprep.mubr.msk.f32.mxu1 %vm18663_vm1, %v23457_v3  ;;  %v6856_v0 = vcombine.low %v6848_v55, %v6855_v45  ;;  %v5205_v4 = vcombine.high %v15779_v29, %v15779_v29  ;;  %v5220_v5 = vcombine.high %v5212_v43, %v5212_v43  ;;  %v5228_v6 = vrot.slane %v15780_v50, %v18752_v9  ;;  %v16882_v11 = vpop.f32.mrb[17].mxu1  ;;  %v15969_v29 = vld [vmem:[%s23448_s1 + $0x1c] sm:$0xf] }
 0x11f   : > { %17091 = vmatmul.mubr.msk.f32.gmra.mrb[102].mxu0 %vm1786_vm2, %v5652_v54  ;;  %v5654_v12 = vcombine.low %v5204_v58, %v5212_v43  ;;  %v5661_v13 = vrot.slane %v5653_v59, %v18752_v9  ;;  %v6408_v1 = vcombine.high %v6406_v60, %v6406_v60  ;;  %v6857_v2 = vcombine.low %v6407_v56, %v6406_v60  ;;  %v15782_v56 = vld [vmem:[%s18750_s19 + $0x41] sm:$0xff] }
 0x120   : > { %17093 = vmatprep.mubr.msk.f32.mxu0 %vm18663_vm1, %v23457_v3  ;;  %v5219_v14 = vrot.slane %v5205_v4, %v18752_v9  ;;  %v5236_v15 = vcombine.high %v5228_v6, %v5228_v6  ;;  %v6409_v17 = vcombine.high %v15834_v36, %v15834_v36  ;;  %v6424_v18 = vcombine.high %v6416_v57, %v6416_v57 }
 0x121   : > { %17168 = vmatmul.mubr.msk.f32.gmra.mrb[102].mxu1 %vm1786_vm2, %v6856_v0  ;;  %v5668_v20 = vrot.slane %v5654_v12, %v18752_v9  ;;  %v6858_v21 = vcombine.low %v6408_v1, %v6416_v57  ;;  %v6865_v22 = vrot.slane %v6857_v2, %v18752_v9  ;;  %v6432_v23 = vrot.slane %v15835_v10, %v18752_v9  ;;  %v19698_v28 = vpop.f32.mrb[18].mxu0 }
 0x122   : > { %17170 = vmatprep.mubr.msk.f32.mxu1 %vm18663_vm1, %v23457_v3  ;;  %v5670_v32 = vcombine.low %v5220_v5, %v5219_v14  ;;  %v5671_v33 = vcombine.low %v5228_v6, %v5236_v15  ;;  %v6423_v34 = vrot.slane %v6409_v17, %v18752_v9  ;;  %v19708_v35 = vadd.f32 %v19521_v26, %v19519_v25  ;;  %v16808_v36 = vpop.f32.mrb[19].mxu0 }
 0x123   : > { %v5669_v37 = vcombine.low %v5661_v13, %v5668_v20  ;;  %v6872_v38 = vrot.slane %v6858_v21, %v18752_v9  ;;  %v6440_v39 = vcombine.high %v6432_v23, %v6432_v23  ;;  %v5221_v40 = vcombine.high %v15780_v50, %v15780_v50  ;;  %17240 = vmatpush3.msk.msra.mxu0 %vm1837_vm0, %v15914_v19  ;;  %v19713_v45 = vpop.f32.mrb[18].mxu1  ;;  %v15837_v21 = vld [vmem:[%s18750_s19 + $0x42] sm:$0xff] }
 0x124   : > { %v5678_v48 = vrot.slane %v5670_v32, %v18752_v9  ;;  %v5685_v43 = vrot.slane %v5671_v33, %v18752_v9  ;;  %v6874_v49 = vcombine.low %v6424_v18, %v6423_v34  ;;  %v5245_v25 = vrot.slane %v15781_v24, %v18752_v9  ;;  %v16885_v26 = vpop.f32.mrb[19].mxu1  ;;  %17317 = vmatpush3.msk.msra.mxu1 %vm1837_vm0, %v15969_v29 }
 0x125   : > { %17094 = vmatmul.mubr.msk.f32.gmra.mrb[104].mxu0 %vm1786_vm2, %v5669_v37  ;;  %v6873_v51 = vcombine.low %v6865_v22, %v6872_v38  ;;  %v6875_v54 = vcombine.low %v6432_v23, %v6440_v39  ;;  %v5235_v50 = vrot.slane %v5221_v40, %v18752_v9  ;;  %v6425_v55 = vcombine.high %v15835_v10, %v15835_v10  ;;  %v19722_v57 = vpop.f32.mrb[20].mxu0 }
 0x126   : > { %17096 = vmatprep.mubr.msk.f32.mxu0 %vm18663_vm1, %v23457_v3  ;;  %v5686_v58 = vcombine.low %v5678_v48, %v5685_v43  ;;  %v6882_v59 = vrot.slane %v6874_v49, %v18752_v9  ;;  %v5253_v60 = vcombine.high %v5245_v25, %v5245_v25  ;;  %v6449_v0 = vrot.slane %v15836_v41, %v18752_v9  ;;  %v16811_v4 = vpop.f32.mrb[21].mxu0 }
 0x127   : > { %17171 = vmatmul.mubr.msk.f32.gmra.mrb[104].mxu1 %vm1786_vm2, %v6873_v51  ;;  %v6889_v5 = vrot.slane %v6875_v54, %v18752_v9  ;;  %v5237_v6 = vcombine.high %v5235_v50, %v5235_v50  ;;  %v6439_v10 = vrot.slane %v6425_v55, %v18752_v9  ;;  %v19733_v11 = vadd.f32 %v19549_v62, %v19538_v47  ;;  %v19735_v12 = vpop.f32.mrb[20].mxu1 }
 0x128   : > { %17173 = vmatprep.mubr.msk.f32.mxu1 %vm18663_vm1, %v23457_v3  ;;  %v5688_v13 = vcombine.low %v5245_v25, %v5253_v60  ;;  %v6457_v1 = vcombine.high %v6449_v0, %v6449_v0  ;;  %v5238_v2 = vcombine.high %v15781_v24, %v15781_v24  ;;  %v5254_v14 = vcombine.high %v15782_v56, %v15782_v56  ;;  %v16888_v15 = vpop.f32.mrb[21].mxu1 }
 0x129   : > { %17097 = vmatmul.mubr.msk.f32.gmra.mrb[106].mxu0 %vm1786_vm2, %v5686_v58  ;;  %v6890_v17 = vcombine.low %v6882_v59, %v6889_v5  ;;  %v5687_v18 = vcombine.low %v5235_v50, %v5237_v6  ;;  %v6441_v19 = vcombine.high %v6439_v10, %v6439_v10  ;;  %v5261_v20 = vrot.slane %v15782_v56, %v18752_v9  ;;  %v15838_v58 = vld [vmem:[%s18750_s19 + $0x4a] sm:$0x3f] }
 0x12a   : > { %17099 = vmatprep.mubr.msk.f32.mxu0 %vm18663_vm1, %v23457_v3  ;;  %v5702_v47 = vrot.slane %v5688_v13, %v18752_v9  ;;  %v6892_v62 = vcombine.low %v6449_v0, %v6457_v1  ;;  %v5252_v22 = vrot.slane %v5238_v2, %v18752_v9  ;;  %v5268_v23 = vrot.slane %v5254_v14, %v18752_v9  ;;  %v19747_v24 = vpop.f32.mrb[22].mxu0 }
 0x12b   : > { %17174 = vmatmul.mubr.msk.f32.gmra.mrb[106].mxu1 %vm1786_vm2, %v6890_v17  ;;  %v5695_v29 = vrot.slane %v5687_v18, %v18752_v9  ;;  %v6891_v32 = vcombine.low %v6439_v10, %v6441_v19  ;;  %v5269_v33 = vcombine.high %v5261_v20, %v5261_v20  ;;  %v6442_v34 = vcombine.high %v15836_v41, %v15836_v41  ;;  %v16814_v36 = vpop.f32.mrb[23].mxu0  ;;  %v15783_v41 = vld [vmem:[%s18750_s19 + $0x49] sm:$0x3f]  ;;  %v15784_v17 = vld [vmem:[%s18750_s19 + $0x51] sm:$0xff] }
 0x12c   : > { %17176 = vmatprep.mubr.msk.f32.mxu1 %vm18663_vm1, %v23457_v3  ;;  %v6906_v37 = vrot.slane %v6892_v62, %v18752_v9  ;;  %v5704_v38 = vcombine.low %v5252_v22, %v5261_v20  ;;  %v6458_v39 = vcombine.high %v15837_v21, %v15837_v21  ;;  %v6465_v40 = vrot.slane %v15837_v21, %v18752_v9  ;;  %v19755_v48 = vpop.f32.mrb[22].mxu1 }
 0x12d   : > { %v5703_v43 = vcombine.low %v5695_v29, %v5702_v47  ;;  %v6899_v49 = vrot.slane %v6891_v32, %v18752_v9  ;;  %v5705_v25 = vcombine.low %v5269_v33, %v5268_v23  ;;  %v6456_v26 = vrot.slane %v6442_v34, %v18752_v9  ;;  %v16891_v51 = vpop.f32.mrb[23].mxu1  ;;  %17393 = vmatprep.subr.mxu0 %v23457_v3  ;;  %v15839_v47 = vld [vmem:[%s18750_s19 + $0x52] sm:$0xff] }
 0x12e   : > { %v5712_v54 = vrot.slane %v5704_v38, %v18752_v9  ;;  %v6472_v50 = vrot.slane %v6458_v39, %v18752_v9  ;;  %v6473_v55 = vcombine.high %v6465_v40, %v6465_v40  ;;  %v19765_v56 = vadd.f32 %v19569_v31, %v19555_v8  ;;  %v19768_v59 = vpop.f32.mrb[24].mxu0  ;;  %v15785_v39 = vld [vmem:[%s18750_s19 + $0x59] sm:$0x3f] }
 0x12f   : > { %17100 = vmatmul.mubr.msk.f32.gmra.mrb[108].mxu0 %vm1786_vm2, %v5703_v43  ;;  %v6907_v60 = vcombine.low %v6899_v49, %v6906_v37  ;;  %v5719_v0 = vrot.slane %v5705_v25, %v18752_v9  ;;  %v6908_v4 = vcombine.low %v6456_v26, %v6465_v40  ;;  %v5270_v5 = vcombine.high %v5268_v23, %v5268_v23  ;;  %v16817_v6 = vpop.f32.mrb[25].mxu0 }
 0x130   : > { %17102 = vmatprep.mubr.msk.f32.mxu0 %vm18663_vm1, %v23457_v3  ;;  %v6909_v10 = vcombine.low %v6473_v55, %v6472_v50  ;;  %v5271_v13 = vcombine.high %v15783_v41, %v15783_v41  ;;  %v5278_v8 = vrot.slane %v15783_v41, %v18752_v9  ;;  %v6474_v31 = vcombine.high %v6472_v50, %v6472_v50 }
 0x131   : > { %17177 = vmatmul.mubr.msk.f32.gmra.mrb[108].mxu1 %vm1786_vm2, %v6907_v60  ;;  %v5720_v1 = vcombine.low %v5712_v54, %v5719_v0  ;;  %v6916_v2 = vrot.slane %v6908_v4, %v18752_v9  ;;  %v6475_v14 = vcombine.high %v15838_v58, %v15838_v58  ;;  %v6482_v15 = vrot.slane %v15838_v58, %v18752_v9  ;;  %v15786_v0 = vld [vmem:[%s18750_s19 + $0x61] sm:$0xff] }
 0x132   : > { %17179 = vmatprep.mubr.msk.f32.mxu1 %vm18663_vm1, %v23457_v3  ;;  %v6923_v18 = vrot.slane %v6909_v10, %v18752_v9  ;;  %v5285_v19 = vrot.slane %v5271_v13, %v18752_v9  ;;  %v5286_v20 = vcombine.high %v5278_v8, %v5278_v8  ;;  %v5721_v21 = vcombine.low %v5270_v5, %v5278_v8  ;;  %v19784_v62 = vpop.f32.mrb[24].mxu1 }
 0x133   : > { %17103 = vmatmul.mubr.msk.f32.gmra.mrb[110].mxu0 %vm1786_vm2, %v5720_v1  ;;  %v6489_v22 = vrot.slane %v6475_v14, %v18752_v9  ;;  %v6490_v23 = vcombine.high %v6482_v15, %v6482_v15  ;;  %v6925_v29 = vcombine.low %v6474_v31, %v6482_v15  ;;  %v19790_v32 = vadd.f32 %v19585_v52, %v19582_v46  ;;  %v16894_v33 = vpop.f32.mrb[25].mxu1 }
 0x134   : > { %v6924_v34 = vcombine.low %v6916_v2, %v6923_v18  ;;  %17105 = vmatprep.mubr.msk.f32.mxu0 %vm18663_vm1, %v23457_v3  ;;  %v5722_v36 = vcombine.low %v5286_v20, %v5285_v19  ;;  %v5729_v37 = vrot.slane %v5721_v21, %v18752_v9  ;;  %v5287_v38 = vcombine.high %v15784_v17, %v15784_v17  ;;  %v15841_v19 = vld [vmem:[%s18750_s19 + $0x62] sm:$0xff] }
 0x135   : > { %v6926_v40 = vcombine.low %v6490_v23, %v6489_v22  ;;  %v6933_v43 = vrot.slane %v6925_v29, %v18752_v9  ;;  %v5294_v49 = vrot.slane %v15784_v17, %v18752_v9  ;;  %v6491_v25 = vcombine.high %v15839_v47, %v15839_v47  ;;  %v19798_v26 = vpop.f32.mrb[26].mxu0 }
 0x136   : > { %17180 = vmatmul.mubr.msk.f32.gmra.mrb[110].mxu1 %vm1786_vm2, %v6924_v34  ;;  %v5736_v46 = vrot.slane %v5722_v36, %v18752_v9  ;;  %v5301_v52 = vrot.slane %v5287_v38, %v18752_v9  ;;  %v6498_v41 = vrot.slane %v15839_v47, %v18752_v9  ;;  %v19806_v51 = vadd.f32 %v19610_v27, %v19599_v7  ;;  %v19808_v54 = vpop.f32.mrb[26].mxu1  ;;  %v16820_v50 = vpop.f32.mrb[27].mxu0  ;;  %v15840_v27 = vld [vmem:[%s18750_s19 + $0x5a] sm:$0x3f] }
 0x137   : > { %17182 = vmatprep.mubr.msk.f32.mxu1 %vm18663_vm1, %v23457_v3  ;;  %v6940_v55 = vrot.slane %v6926_v40, %v18752_v9  ;;  %v5302_v58 = vcombine.high %v5294_v49, %v5294_v49  ;;  %v6505_v60 = vrot.slane %v6491_v25, %v18752_v9  ;;  %v5304_v4 = vcombine.high %v15785_v39, %v15785_v39  ;;  %v16897_v5 = vpop.f32.mrb[27].mxu1  ;;  %v15787_v25 = vld [vmem:[%s18750_s19 + $0x69] sm:$0x3f] }
 0x138   : > { %v5737_v6 = vcombine.low %v5729_v37, %v5736_v46  ;;  %v5303_v10 = vcombine.high %v5301_v52, %v5301_v52  ;;  %v6506_v13 = vcombine.high %v6498_v41, %v6498_v41  ;;  %v5311_v7 = vrot.slane %v15785_v39, %v18752_v9 }
 0x139   : > { %v6941_v8 = vcombine.low %v6933_v43, %v6940_v55  ;;  %v5738_v31 = vcombine.low %v5294_v49, %v5302_v58  ;;  %v6507_v1 = vcombine.high %v6505_v60, %v6505_v60  ;;  %v5318_v2 = vrot.slane %v5304_v4, %v18752_v9 }
 0x13a   : > { %17106 = vmatmul.mubr.msk.f32.gmra.mrb[112].mxu0 %vm1786_vm2, %v5737_v6  ;;  %v5739_v14 = vcombine.low %v5301_v52, %v5303_v10  ;;  %v6942_v15 = vcombine.low %v6498_v41, %v6506_v13  ;;  %v5319_v17 = vcombine.high %v5311_v7, %v5311_v7  ;;  %v5327_v18 = vrot.slane %v15786_v0, %v18752_v9  ;;  %v19821_v20 = vpop.f32.mrb[28].mxu0  ;;  %v15842_v6 = vld [vmem:[%s18750_s19 + $0x6a] sm:$0x3f] }
 0x13b   : > { %17183 = vmatmul.mubr.msk.f32.gmra.mrb[112].mxu1 %vm1786_vm2, %v6941_v8  ;;  %17108 = vmatprep.mubr.msk.f32.mxu0 %vm18663_vm1, %v23457_v3  ;;  %v5746_v21 = vrot.slane %v5738_v31, %v18752_v9  ;;  %v6943_v47 = vcombine.low %v6505_v60, %v6507_v1  ;;  %v6508_v22 = vcombine.high %v15840_v27, %v15840_v27  ;;  %v19827_v23 = vpop.f32.mrb[28].mxu1  ;;  %v16823_v29 = vpop.f32.mrb[29].mxu0 }
 0x13c   : > { %v5753_v33 = vrot.slane %v5739_v14, %v18752_v9  ;;  %17185 = vmatprep.mubr.msk.f32.mxu1 %vm18663_vm1, %v23457_v3  ;;  %v6950_v34 = vrot.slane %v6942_v15, %v18752_v9  ;;  %v5755_v36 = vcombine.low %v5311_v7, %v5319_v17  ;;  %v5756_v37 = vcombine.low %v5318_v2, %v5327_v18  ;;  %v16900_v38 = vpop.f32.mrb[29].mxu1 }
 0x13d   : > { %v6957_v39 = vrot.slane %v6943_v47, %v18752_v9  ;;  %v6515_v40 = vrot.slane %v15840_v27, %v18752_v9  ;;  %v6522_v43 = vrot.slane %v6508_v22, %v18752_v9  ;;  %v6531_v49 = vrot.slane %v15841_v19, %v18752_v9 }
 0x13e   : > { %v5754_v46 = vcombine.low %v5746_v21, %v5753_v33  ;;  %v5763_v52 = vrot.slane %v5755_v36, %v18752_v9  ;;  %v5770_v41 = vrot.slane %v5756_v37, %v18752_v9  ;;  %v19842_v50 = vadd.f32 %v19629_v53, %v19622_v44  ;;  %v19844_v55 = vpop.f32.mrb[30].mxu0  ;;  %v15843_v37 = vld [vmem:[%s18750_s19 + $0x72] sm:$0xff] }
 0x13f   : > { %v6958_v58 = vcombine.low %v6950_v34, %v6957_v39  ;;  %v6523_v60 = vcombine.high %v6515_v40, %v6515_v40  ;;  %v6960_v4 = vcombine.low %v6522_v43, %v6531_v49  ;;  %v5320_v5 = vcombine.high %v15786_v0, %v15786_v0  ;;  %v16826_v10 = vpop.f32.mrb[31].mxu0  ;;  %v15788_v0 = vld [vmem:[%s18750_s19 + $0x71] sm:$0xff] }
 0x140   : > { %17109 = vmatmul.mubr.msk.f32.gmra.mrb[114].mxu0 %vm1786_vm2, %v5754_v46  ;;  %v5771_v13 = vcombine.low %v5763_v52, %v5770_v41  ;;  %v5335_v7 = vcombine.high %v5327_v18, %v5327_v18  ;;  %v5344_v27 = vrot.slane %v15787_v25, %v18752_v9  ;;  %v6524_v8 = vcombine.high %v15841_v19, %v15841_v19  ;;  %v15789_v10 = vld [vmem:[%s18750_s19 + $0x79] sm:$0x3f] }
 0x141   : > { %17186 = vmatmul.mubr.msk.f32.gmra.mrb[114].mxu1 %vm1786_vm2, %v6958_v58  ;;  %17111 = vmatprep.mubr.msk.f32.mxu0 %vm18663_vm1, %v23457_v3  ;;  %v6959_v44 = vcombine.low %v6515_v40, %v6523_v60  ;;  %v6974_v53 = vrot.slane %v6960_v4, %v18752_v9  ;;  %v5334_v31 = vrot.slane %v5320_v5, %v18752_v9  ;;  %v19855_v1 = vpop.f32.mrb[30].mxu1 }
 0x142   : > { %17188 = vmatprep.mubr.msk.f32.mxu1 %vm18663_vm1, %v23457_v3  ;;  %v6538_v2 = vrot.slane %v6524_v8, %v18752_v9  ;;  %v6539_v14 = vcombine.high %v6531_v49, %v6531_v49  ;;  %v6548_v15 = vrot.slane %v15842_v6, %v18752_v9  ;;  %v19863_v17 = vadd.f32 %v19654_v30, %v19643_v16  ;;  %v16903_v18 = vpop.f32.mrb[31].mxu1 }
 0x143   : > { %v6967_v19 = vrot.slane %v6959_v44, %v18752_v9  ;;  %v5336_v21 = vcombine.high %v5334_v31, %v5334_v31  ;;  %v5772_v47 = vcombine.low %v5335_v7, %v5334_v31  ;;  %v5337_v22 = vcombine.high %v15787_v25, %v15787_v25  ;;  %v19891_v44 = vld [vmem:[%s18750_s19 + $0x7a] sm:$0x3f] }
 0x144   : > { %17112 = vmatmul.mubr.msk.f32.gmra.mrb[116].mxu0 %vm1786_vm2, %v5771_v13  ;;  %v6540_v29 = vcombine.high %v6538_v2, %v6538_v2  ;;  %v6976_v33 = vcombine.low %v6539_v14, %v6538_v2  ;;  %v5352_v34 = vcombine.high %v5344_v27, %v5344_v27  ;;  %v5360_v36 = vrot.slane %v15788_v0, %v18752_v9 }
 0x145   : > { %v6975_v38 = vcombine.low %v6967_v19, %v6974_v53  ;;  %17114 = vmatprep.mubr.msk.f32.mxu0 %vm18663_vm1, %v23457_v3  ;;  %v5773_v16 = vcombine.low %v5336_v21, %v5344_v27  ;;  %v5780_v30 = vrot.slane %v5772_v47, %v18752_v9  ;;  %v5351_v39 = vrot.slane %v5337_v22, %v18752_v9  ;;  %v19873_v40 = vpop.f32.mrb[32].mxu0 }
 0x146   : > { %v6977_v43 = vcombine.low %v6540_v29, %v6548_v15  ;;  %v6984_v49 = vrot.slane %v6976_v33, %v18752_v9  ;;  %v5368_v25 = vcombine.high %v5360_v36, %v5360_v36  ;;  %v6541_v46 = vcombine.high %v15842_v6, %v15842_v6  ;;  %v19876_v52 = vpop.f32.mrb[32].mxu1  ;;  %v16829_v41 = vpop.f32.mrb[33].mxu0 }
 0x147   : > { %17189 = vmatmul.mubr.msk.f32.gmra.mrb[116].mxu1 %vm1786_vm2, %v6975_v38  ;;  %v5787_v58 = vrot.slane %v5773_v16, %v18752_v9  ;;  %v5789_v60 = vcombine.low %v5352_v34, %v5351_v39  ;;  %v6556_v4 = vcombine.high %v6548_v15, %v6548_v15  ;;  %v6564_v5 = vrot.slane %v15843_v37, %v18752_v9  ;;  %v16906_v13 = vpop.f32.mrb[33].mxu1  ;;  %v15790_v34 = vld [vmem:[%s18750_s19 + $0x81] sm:$0xff] }
 0x148   : > { %17191 = vmatprep.mubr.msk.f32.mxu1 %vm18663_vm1, %v23457_v3  ;;  %v6991_v7 = vrot.slane %v6977_v43, %v18752_v9  ;;  %v5790_v27 = vcombine.low %v5360_v36, %v5368_v25  ;;  %v6555_v6 = vrot.slane %v6541_v46, %v18752_v9  ;;  %v19888_v8 = vadd.f32 %v19679_v63, %v19662_v42 }
 0x149   : > { %v5788_v53 = vcombine.low %v5780_v30, %v5787_v58  ;;  %v5797_v31 = vrot.slane %v5789_v60, %v18752_v9  ;;  %v6572_v2 = vcombine.high %v6564_v5, %v6564_v5  ;;  %v5353_v14 = vcombine.high %v15788_v0, %v15788_v0  ;;  %v19894_v15 = vpop.f32.mrb[34].mxu0 }
 0x14a   : > { %v6992_v18 = vcombine.low %v6984_v49, %v6991_v7  ;;  %v5804_v19 = vrot.slane %v5790_v27, %v18752_v9  ;;  %v6993_v21 = vcombine.low %v6556_v4, %v6555_v6  ;;  %v5377_v47 = vrot.slane %v15789_v10, %v18752_v9  ;;  %v16832_v22 = vpop.f32.mrb[35].mxu0  ;;  %v15845_v27 = vld [vmem:[%s18750_s19 + $0x82] sm:$0xff] }
 0x14b   : > { %17115 = vmatmul.mubr.msk.f32.gmra.mrb[118].mxu0 %vm1786_vm2, %v5788_v53  ;;  %v6994_v42 = vcombine.low %v6564_v5, %v6572_v2  ;;  %v5367_v63 = vrot.slane %v5353_v14, %v18752_v9  ;;  %v6557_v29 = vcombine.high %v15843_v37, %v15843_v37  ;;  %v6581_v33 = vrot.slane %v19891_v44, %v18752_v9  ;;  %v19903_v0 = vpop.f32.mrb[34].mxu1 }
 0x14c   : > { %17192 = vmatmul.mubr.msk.f32.gmra.mrb[118].mxu1 %vm1786_vm2, %v6992_v18  ;;  %17117 = vmatprep.mubr.msk.f32.mxu0 %vm18663_vm1, %v23457_v3  ;;  %v5805_v36 = vcombine.low %v5797_v31, %v5804_v19  ;;  %v7001_v38 = vrot.slane %v6993_v21, %v18752_v9  ;;  %v5385_v16 = vcombine.high %v5377_v47, %v5377_v47  ;;  %v16909_v30 = vpop.f32.mrb[35].mxu1 }
 0x14d   : > { %17194 = vmatprep.mubr.msk.f32.mxu1 %vm18663_vm1, %v23457_v3  ;;  %v7008_v37 = vrot.slane %v6994_v42, %v18752_v9  ;;  %v5369_v39 = vcombine.high %v5367_v63, %v5367_v63  ;;  %v6571_v43 = vrot.slane %v6557_v29, %v18752_v9  ;;  %v6589_v49 = vcombine.high %v6581_v33, %v6581_v33 }
 0x14e   : > { %v5807_v25 = vcombine.low %v5377_v47, %v5385_v16  ;;  %v19915_v46 = vadd.f32 %v19713_v45, %v19698_v28  ;;  %v5370_v41 = vcombine.high %v15789_v10, %v15789_v10  ;;  %v5386_v58 = vcombine.high %v15790_v34, %v15790_v34  ;;  %v19917_v60 = vpop.f32.mrb[36].mxu0 }
 0x14f   : > { %17118 = vmatmul.mubr.msk.f32.gmra.mrb[120].mxu0 %vm1786_vm2, %v5805_v36  ;;  %v7009_v4 = vcombine.low %v7001_v38, %v7008_v37  ;;  %v5806_v5 = vcombine.low %v5367_v63, %v5369_v39  ;;  %v6573_v13 = vcombine.high %v6571_v43, %v6571_v43  ;;  %v7011_v7 = vcombine.low %v6581_v33, %v6589_v49  ;;  %v16835_v6 = vpop.f32.mrb[37].mxu0  ;;  %v15791_v63 = vld [vmem:[%s18750_s19 + $0x89] sm:$0x3f] }
 0x150   : > { %17120 = vmatprep.mubr.msk.f32.mxu0 %vm18663_vm1, %v23457_v3  ;;  %v5821_v53 = vrot.slane %v5807_v25, %v18752_v9  ;;  %v5384_v28 = vrot.slane %v5370_v41, %v18752_v9  ;;  %v5393_v45 = vrot.slane %v15790_v34, %v18752_v9  ;;  %v5400_v10 = vrot.slane %v5386_v58, %v18752_v9  ;;  %v15846_v49 = vld [vmem:[%s18750_s19 + $0x8a] sm:$0x3f] }
 0x151   : > { %17195 = vmatmul.mubr.msk.f32.gmra.mrb[120].mxu1 %vm1786_vm2, %v7009_v4  ;;  %v5814_v31 = vrot.slane %v5806_v5, %v18752_v9  ;;  %v7010_v2 = vcombine.low %v6571_v43, %v6573_v13  ;;  %v7025_v14 = vrot.slane %v7011_v7, %v18752_v9  ;;  %v6574_v18 = vcombine.high %v19891_v44, %v19891_v44  ;;  %v19932_v19 = vpop.f32.mrb[36].mxu1 }
 0x152   : > { %17197 = vmatprep.mubr.msk.f32.mxu1 %vm18663_vm1, %v23457_v3  ;;  %v5401_v21 = vcombine.high %v5393_v45, %v5393_v45  ;;  %v5823_v47 = vcombine.low %v5384_v28, %v5393_v45  ;;  %v6590_v22 = vcombine.high %v15845_v27, %v15845_v27  ;;  %v6597_v42 = vrot.slane %v15845_v27, %v18752_v9  ;;  %v16912_v29 = vpop.f32.mrb[37].mxu1  ;;  %v19938_v33 = vpop.f32.mrb[38].mxu0  ;;  %v15792_v45 = vld [vmem:[%s18750_s19 + $0x91] sm:$0xff] }
 0x153   : > { %v5822_v34 = vcombine.low %v5814_v31, %v5821_v53  ;;  %v7018_v36 = vrot.slane %v7010_v2, %v18752_v9  ;;  %v6588_v44 = vrot.slane %v6574_v18, %v18752_v9  ;;  %v19944_v38 = vadd.f32 %v19735_v12, %v19722_v57  ;;  %v16838_v16 = vpop.f32.mrb[39].mxu0 }
 0x154   : > { %v5824_v30 = vcombine.low %v5401_v21, %v5400_v10  ;;  %v5831_v37 = vrot.slane %v5823_v47, %v18752_v9  ;;  %v6604_v39 = vrot.slane %v6590_v22, %v18752_v9  ;;  %v6605_v43 = vcombine.high %v6597_v42, %v6597_v42  ;;  %v15847_v21 = vld [vmem:[%s18750_s19 + $0x92] sm:$0xff] }
 0x155   : > { %17121 = vmatmul.mubr.msk.f32.gmra.mrb[122].mxu0 %vm1786_vm2, %v5822_v34  ;;  %v7026_v25 = vcombine.low %v7018_v36, %v7025_v14  ;;  %v7027_v41 = vcombine.low %v6588_v44, %v6597_v42  ;;  %v5402_v58 = vcombine.high %v5400_v10, %v5400_v10  ;;  %v5403_v4 = vcombine.high %v15791_v63, %v15791_v63 }
 0x156   : > { %17123 = vmatprep.mubr.msk.f32.mxu0 %vm18663_vm1, %v23457_v3  ;;  %v5838_v57 = vrot.slane %v5824_v30, %v18752_v9  ;;  %v7028_v12 = vcombine.low %v6605_v43, %v6604_v39  ;;  %v5410_v5 = vrot.slane %v15791_v63, %v18752_v9  ;;  %v6606_v13 = vcombine.high %v6604_v39, %v6604_v39  ;;  %v19954_v7 = vpop.f32.mrb[38].mxu1  ;;  %v15793_v30 = vld [vmem:[%s18750_s19 + $0x99] sm:$0x3f] }
 0x157   : > { %17198 = vmatmul.mubr.msk.f32.gmra.mrb[122].mxu1 %vm1786_vm2, %v7026_v25  ;;  %v7035_v27 = vrot.slane %v7027_v41, %v18752_v9  ;;  %v5417_v6 = vrot.slane %v5403_v4, %v18752_v9  ;;  %v6607_v53 = vcombine.high %v15846_v49, %v15846_v49  ;;  %v6614_v28 = vrot.slane %v15846_v49, %v18752_v9  ;;  %v16915_v10 = vpop.f32.mrb[39].mxu1 }
 0x158   : > { %v5839_v31 = vcombine.low %v5831_v37, %v5838_v57  ;;  %17200 = vmatprep.mubr.msk.f32.mxu1 %vm18663_vm1, %v23457_v3  ;;  %v7042_v2 = vrot.slane %v7028_v12, %v18752_v9  ;;  %v5418_v14 = vcombine.high %v5410_v5, %v5410_v5  ;;  %v5840_v18 = vcombine.low %v5402_v58, %v5410_v5 }
 0x159   : > { %v6621_v47 = vrot.slane %v6607_v53, %v18752_v9  ;;  %v6622_v22 = vcombine.high %v6614_v28, %v6614_v28  ;;  %v7044_v42 = vcombine.low %v6606_v13, %v6614_v28  ;;  %v19968_v63 = vadd.f32 %v19755_v48, %v19747_v24  ;;  %v19970_v29 = vpop.f32.mrb[40].mxu0 }
 0x15a   : > { %17124 = vmatmul.mubr.msk.f32.gmra.mrb[124].mxu0 %vm1786_vm2, %v5839_v31  ;;  %v7043_v34 = vcombine.low %v7035_v27, %v7042_v2  ;;  %v5841_v36 = vcombine.low %v5418_v14, %v5417_v6  ;;  %v5848_v44 = vrot.slane %v5840_v18, %v18752_v9  ;;  %v5419_v16 = vcombine.high %v15792_v45, %v15792_v45  ;;  %v16841_v37 = vpop.f32.mrb[41].mxu0  ;;  %v15794_v27 = vld [vmem:[%s18750_s19 + $0xa1] sm:$0xff]  ;;  %v15848_v31 = vld [vmem:[%s18750_s19 + $0x9a] sm:$0x3f] }
 0x15b   : > { %17126 = vmatprep.mubr.msk.f32.mxu0 %vm18663_vm1, %v23457_v3  ;;  %v7045_v39 = vcombine.low %v6622_v22, %v6621_v47  ;;  %v7052_v43 = vrot.slane %v7044_v42, %v18752_v9  ;;  %v5426_v24 = vrot.slane %v15792_v45, %v18752_v9  ;;  %v6623_v48 = vcombine.high %v15847_v21, %v15847_v21  ;;  %v19979_v49 = vpop.f32.mrb[40].mxu1 }
 0x15c   : > { %17201 = vmatmul.mubr.msk.f32.gmra.mrb[124].mxu1 %vm1786_vm2, %v7043_v34  ;;  %v5855_v25 = vrot.slane %v5841_v36, %v18752_v9  ;;  %v5433_v41 = vrot.slane %v5419_v16, %v18752_v9  ;;  %v6630_v58 = vrot.slane %v15847_v21, %v18752_v9  ;;  %v19987_v4 = vadd.f32 %v19784_v62, %v19768_v59  ;;  %v16918_v57 = vpop.f32.mrb[41].mxu1  ;;  %v15849_v36 = vld [vmem:[%s18750_s19 + $0xa2] sm:$0xff] }
 0x15d   : > { %17203 = vmatprep.mubr.msk.f32.mxu1 %vm18663_vm1, %v23457_v3  ;;  %v7059_v12 = vrot.slane %v7045_v39, %v18752_v9  ;;  %v5434_v5 = vcombine.high %v5426_v24, %v5426_v24  ;;  %v6637_v13 = vrot.slane %v6623_v48, %v18752_v9  ;;  %v5436_v6 = vcombine.high %v15793_v30, %v15793_v30 }
 0x15e   : > { %v5856_v53 = vcombine.low %v5848_v44, %v5855_v25  ;;  %v5435_v28 = vcombine.high %v5433_v41, %v5433_v41  ;;  %v6638_v45 = vcombine.high %v6630_v58, %v6630_v58  ;;  %v5443_v10 = vrot.slane %v15793_v30, %v18752_v9  ;;  %v19996_v59 = vpop.f32.mrb[42].mxu0 }
 0x15f   : > { %v7060_v62 = vcombine.low %v7052_v43, %v7059_v12  ;;  %v5857_v2 = vcombine.low %v5426_v24, %v5434_v5  ;;  %v6639_v14 = vcombine.high %v6637_v13, %v6637_v13  ;;  %v5450_v18 = vrot.slane %v5436_v6, %v18752_v9  ;;  %v16844_v21 = vpop.f32.mrb[43].mxu0 }
 0x160   : > { %17127 = vmatmul.mubr.msk.f32.gmra.mrb[126].mxu0 %vm1786_vm2, %v5856_v53  ;;  %v5858_v47 = vcombine.low %v5433_v41, %v5435_v28  ;;  %v7061_v22 = vcombine.low %v6630_v58, %v6638_v45  ;;  %v5451_v42 = vcombine.high %v5443_v10, %v5443_v10  ;;  %v5459_v34 = vrot.slane %v15794_v27, %v18752_v9  ;;  %v20002_v44 = vpop.f32.mrb[42].mxu1 }
 0x161   : > { %17204 = vmatmul.mubr.msk.f32.gmra.mrb[126].mxu1 %vm1786_vm2, %v7060_v62  ;;  %17129 = vmatprep.mubr.msk.f32.mxu0 %vm18663_vm1, %v23457_v3  ;;  %v5865_v16 = vrot.slane %v5857_v2, %v18752_v9  ;;  %v7062_v30 = vcombine.low %v6637_v13, %v6639_v14  ;;  %v6640_v37 = vcombine.high %v15848_v31, %v15848_v31  ;;  %v16921_v39 = vpop.f32.mrb[43].mxu1  ;;  %v15795_v13 = vld [vmem:[%s18750_s19 + $0xa9] sm:$0x3f] }
 0x162   : > { %v5872_v43 = vrot.slane %v5858_v47, %v18752_v9  ;;  %17206 = vmatprep.mubr.msk.f32.mxu1 %vm18663_vm1, %v23457_v3  ;;  %v7069_v24 = vrot.slane %v7061_v22, %v18752_v9  ;;  %v5874_v48 = vcombine.low %v5443_v10, %v5451_v42  ;;  %v5875_v25 = vcombine.low %v5450_v18, %v5459_v34  ;;  %v20012_v41 = vpop.f32.mrb[44].mxu0  ;;  %v15850_v18 = vld [vmem:[%s18750_s19 + $0xaa] sm:$0x3f] }
 0x163   : > { %v7076_v58 = vrot.slane %v7062_v30, %v18752_v9  ;;  %v6647_v57 = vrot.slane %v15848_v31, %v18752_v9  ;;  %v6654_v12 = vrot.slane %v6640_v37, %v18752_v9  ;;  %v6663_v5 = vrot.slane %v15849_v36, %v18752_v9  ;;  %v16847_v6 = vpop.f32.mrb[45].mxu0  ;;  %v15796_v37 = vld [vmem:[%s18750_s19 + $0xb1] sm:$0xff] }
 0x164   : > { %v5873_v53 = vcombine.low %v5865_v16, %v5872_v43  ;;  %v5882_v28 = vrot.slane %v5874_v48, %v18752_v9  ;;  %v5889_v45 = vrot.slane %v5875_v25, %v18752_v9  ;;  %v20023_v10 = vadd.f32 %v19808_v54, %v19798_v26 }
 0x165   : > { %v7077_v62 = vcombine.low %v7069_v24, %v7076_v58  ;;  %v6655_v2 = vcombine.high %v6647_v57, %v6647_v57  ;;  %v7079_v14 = vcombine.low %v6654_v12, %v6663_v5  ;;  %v5452_v31 = vcombine.high %v15794_v27, %v15794_v27  ;;  %v20026_v21 = vpop.f32.mrb[44].mxu1 }
 0x166   : > { %17130 = vmatmul.mubr.msk.f32.gmra.mrb[128].mxu0 %vm1786_vm2, %v5873_v53  ;;  %v5890_v47 = vcombine.low %v5882_v28, %v5889_v45  ;;  %v5467_v22 = vcombine.high %v5459_v34, %v5459_v34  ;;  %v5476_v42 = vrot.slane %v15795_v13, %v18752_v9  ;;  %v6656_v16 = vcombine.high %v15849_v36, %v15849_v36  ;;  %v16924_v30 = vpop.f32.mrb[45].mxu1  ;;  %v15851_v28 = vld [vmem:[%s18750_s19 + $0xb2] sm:$0xff] }
 0x167   : > { %17207 = vmatmul.mubr.msk.f32.gmra.mrb[128].mxu1 %vm1786_vm2, %v7077_v62  ;;  %17132 = vmatprep.mubr.msk.f32.mxu0 %vm18663_vm1, %v23457_v3  ;;  %v7078_v26 = vcombine.low %v6647_v57, %v6655_v2  ;;  %v7093_v54 = vrot.slane %v7079_v14, %v18752_v9  ;;  %v5466_v27 = vrot.slane %v5452_v31, %v18752_v9 }
 0x168   : > { %17209 = vmatprep.mubr.msk.f32.mxu1 %vm18663_vm1, %v23457_v3  ;;  %v6670_v34 = vrot.slane %v6656_v16, %v18752_v9  ;;  %v6671_v39 = vcombine.high %v6663_v5, %v6663_v5  ;;  %v6680_v36 = vrot.slane %v15850_v18, %v18752_v9  ;;  %v20042_v43 = vadd.f32 %v19827_v23, %v19821_v20 }
 0x169   : > { %v7086_v24 = vrot.slane %v7078_v26, %v18752_v9  ;;  %v5468_v48 = vcombine.high %v5466_v27, %v5466_v27  ;;  %v5891_v25 = vcombine.low %v5467_v22, %v5466_v27  ;;  %v5469_v58 = vcombine.high %v15795_v13, %v15795_v13  ;;  %v20045_v57 = vpop.f32.mrb[46].mxu0  ;;  %v15797_v27 = vld [vmem:[%s18750_s19 + $0xb9] sm:$0x3f] }
 0x16a   : > { %17133 = vmatmul.mubr.msk.f32.gmra.mrb[130].mxu0 %vm1786_vm2, %v5890_v47  ;;  %v6672_v12 = vcombine.high %v6670_v34, %v6670_v34  ;;  %v7095_v6 = vcombine.low %v6671_v39, %v6670_v34  ;;  %v5484_v53 = vcombine.high %v5476_v42, %v5476_v42  ;;  %v5492_v5 = vrot.slane %v15796_v37, %v18752_v9  ;;  %v16850_v45 = vpop.f32.mrb[47].mxu0 }
 0x16b   : > { %v7094_v62 = vcombine.low %v7086_v24, %v7093_v54  ;;  %17135 = vmatprep.mubr.msk.f32.mxu0 %vm18663_vm1, %v23457_v3  ;;  %v5892_v20 = vcombine.low %v5468_v48, %v5476_v42  ;;  %v5899_v23 = vrot.slane %v5891_v25, %v18752_v9  ;;  %v5483_v13 = vrot.slane %v5469_v58, %v18752_v9  ;;  %v20054_v2 = vpop.f32.mrb[46].mxu1  ;;  %v20072_v25 = vld [vmem:[%s18750_s19 + $0xba] sm:$0x3f] }
 0x16c   : > { %v7096_v14 = vcombine.low %v6672_v12, %v6680_v36  ;;  %v7103_v31 = vrot.slane %v7095_v6, %v18752_v9  ;;  %v5500_v47 = vcombine.high %v5492_v5, %v5492_v5  ;;  %v6673_v22 = vcombine.high %v15850_v18, %v15850_v18  ;;  %v16927_v16 = vpop.f32.mrb[47].mxu1 }
 0x16d   : > { %17210 = vmatmul.mubr.msk.f32.gmra.mrb[130].mxu1 %vm1786_vm2, %v7094_v62  ;;  %v5906_v30 = vrot.slane %v5892_v20, %v18752_v9  ;;  %v5908_v26 = vcombine.low %v5484_v53, %v5483_v13  ;;  %v6688_v54 = vcombine.high %v6680_v36, %v6680_v36  ;;  %v6696_v42 = vrot.slane %v15851_v28, %v18752_v9  ;;  %v20061_v34 = vpop.f32.mrb[48].mxu0 }
 0x16e   : > { %17212 = vmatprep.mubr.msk.f32.mxu1 %vm18663_vm1, %v23457_v3  ;;  %v7110_v39 = vrot.slane %v7096_v14, %v18752_v9  ;;  %v5909_v24 = vcombine.low %v5492_v5, %v5500_v47  ;;  %v6687_v18 = vrot.slane %v6673_v22, %v18752_v9  ;;  %v20069_v48 = vadd.f32 %v19855_v1, %v19844_v55  ;;  %v16853_v36 = vpop.f32.mrb[49].mxu0  ;;  %v15798_v22 = vld [vmem:[%s18750_s19 + $0xc1] sm:$0xff] }
 0x16f   : > { %v5907_v58 = vcombine.low %v5899_v23, %v5906_v30  ;;  %v5916_v12 = vrot.slane %v5908_v26, %v18752_v9  ;;  %v6704_v6 = vcombine.high %v6696_v42, %v6696_v42  ;;  %v5485_v53 = vcombine.high %v15796_v37, %v15796_v37  ;;  %v20075_v45 = vpop.f32.mrb[48].mxu1 }
 0x170   : > { %v7111_v62 = vcombine.low %v7103_v31, %v7110_v39  ;;  %v5923_v5 = vrot.slane %v5909_v24, %v18752_v9  ;;  %v7112_v20 = vcombine.low %v6688_v54, %v6687_v18  ;;  %v5509_v13 = vrot.slane %v15797_v27, %v18752_v9  ;;  %v16930_v14 = vpop.f32.mrb[49].mxu1 }
 0x171   : > { %17136 = vmatmul.mubr.msk.f32.gmra.mrb[132].mxu0 %vm1786_vm2, %v5907_v58  ;;  %v7113_v55 = vcombine.low %v6696_v42, %v6704_v6  ;;  %v5499_v1 = vrot.slane %v5485_v53, %v18752_v9  ;;  %v6689_v47 = vcombine.high %v15851_v28, %v15851_v28  ;;  %v6713_v23 = vrot.slane %v20072_v25, %v18752_v9  ;;  %v20084_v37 = vpop.f32.mrb[50].mxu0  ;;  %v15853_v14 = vld [vmem:[%s18750_s19 + $0xc2] sm:$0xff] }
 0x172   : > { %17213 = vmatmul.mubr.msk.f32.gmra.mrb[132].mxu1 %vm1786_vm2, %v7111_v62  ;;  %17138 = vmatprep.mubr.msk.f32.mxu0 %vm18663_vm1, %v23457_v3  ;;  %v5924_v31 = vcombine.low %v5916_v12, %v5923_v5  ;;  %v7120_v16 = vrot.slane %v7112_v20, %v18752_v9  ;;  %v5517_v30 = vcombine.high %v5509_v13, %v5509_v13  ;;  %v16935_v26 = vpop.f32.mrb[51].mxu0 }
 0x173   : > { %17215 = vmatprep.mubr.msk.f32.mxu1 %vm18663_vm1, %v23457_v3  ;;  %v7127_v28 = vrot.slane %v7113_v55, %v18752_v9  ;;  %v5501_v54 = vcombine.high %v5499_v1, %v5499_v1  ;;  %v6703_v42 = vrot.slane %v6689_v47, %v18752_v9  ;;  %v6721_v39 = vcombine.high %v6713_v23, %v6713_v23  ;;  %v20094_v24 = vpop.f32.mrb[50].mxu1 }
 0x174   : > { %v5926_v18 = vcombine.low %v5509_v13, %v5517_v30  ;;  %v20098_v36 = vadd.f32 %v19876_v52, %v19873_v40  ;;  %v5502_v58 = vcombine.high %v15797_v27, %v15797_v27  ;;  %v5518_v12 = vcombine.high %v15798_v22, %v15798_v22  ;;  %v17012_v6 = vpop.f32.mrb[51].mxu1 }
 0x175   : > { %17139 = vmatmul.mubr.msk.f32.gmra.mrb[134].mxu0 %vm1786_vm2, %v5924_v31  ;;  %v7128_v53 = vcombine.low %v7120_v16, %v7127_v28  ;;  %v5925_v62 = vcombine.low %v5499_v1, %v5501_v54  ;;  %v6705_v5 = vcombine.high %v6703_v42, %v6703_v42  ;;  %v7130_v20 = vcombine.low %v6713_v23, %v6721_v39  ;;  %v20102_v55 = vpop.f32.mrb[52].mxu0  ;;  %v15799_v39 = vld [vmem:[%s18750_s19 + $0xc9] sm:$0x3f] }
 0x176   : > { %23469 = vst [vmem:[#allocation4_spill] sm:$0xff] %v20098_v36  ;;  %17141 = vmatprep.mubr.msk.f32.mxu0 %vm18663_vm1, %v23457_v3  ;;  %v5940_v13 = vrot.slane %v5926_v18, %v18752_v9  ;;  %v5516_v40 = vrot.slane %v5502_v58, %v18752_v9  ;;  %v5525_v52 = vrot.slane %v15798_v22, %v18752_v9  ;;  %v16938_v47 = vpop.f32.mrb[53].mxu0 }
 0x177   : > { %v5532_v27 = vrot.slane %v5518_v12, %v18752_v9  ;;  %17216 = vmatmul.mubr.msk.f32.gmra.mrb[134].mxu1 %vm1786_vm2, %v7128_v53  ;;  %v5933_v1 = vrot.slane %v5925_v62, %v18752_v9  ;;  %v7129_v23 = vcombine.low %v6703_v42, %v6705_v5  ;;  %v7144_v31 = vrot.slane %v7130_v20, %v18752_v9  ;;  %v20115_v30 = vpop.f32.mrb[52].mxu1  ;;  %v15854_v20 = vld [vmem:[%s18750_s19 + $0xca] sm:$0x3f] }
 0x178   : > { %v6706_v16 = vcombine.high %v20072_v25, %v20072_v25  ;;  %17218 = vmatprep.mubr.msk.f32.mxu1 %vm18663_vm1, %v23457_v3  ;;  %v5533_v22 = vcombine.high %v5525_v52, %v5525_v52  ;;  %v5942_v26 = vcombine.low %v5516_v40, %v5525_v52  ;;  %v6722_v28 = vcombine.high %v15853_v14, %v15853_v14  ;;  %v17015_v18 = vpop.f32.mrb[53].mxu1 }
 0x179   : > { %v6729_v54 = vrot.slane %v15853_v14, %v18752_v9  ;;  %v5941_v58 = vcombine.low %v5933_v1, %v5940_v13  ;;  %v7137_v42 = vrot.slane %v7129_v23, %v18752_v9  ;;  %v20125_v25 = vadd.f32 %v19903_v0, %v19894_v15 }
 0x17a   : > { %v6720_v12 = vrot.slane %v6706_v16, %v18752_v9  ;;  %v5943_v6 = vcombine.low %v5533_v22, %v5532_v27  ;;  %v5950_v53 = vrot.slane %v5942_v26, %v18752_v9  ;;  %v6736_v62 = vrot.slane %v6722_v28, %v18752_v9 }
 0x17b   : > { %23470 = vst [vmem:[#allocation5_spill] sm:$0xff] %v20125_v25  ;;  %v6737_v5 = vcombine.high %v6729_v54, %v6729_v54  ;;  %17142 = vmatmul.mubr.msk.f32.gmra.mrb[136].mxu0 %vm1786_vm2, %v5941_v58  ;;  %v7145_v14 = vcombine.low %v7137_v42, %v7144_v31  ;;  %v5534_v13 = vcombine.high %v5532_v27, %v5532_v27  ;;  %v20131_v47 = vpop.f32.mrb[54].mxu0 }
 0x17c   : > { %v7146_v40 = vcombine.low %v6720_v12, %v6729_v54  ;;  %v5535_v52 = vcombine.high %v15799_v39, %v15799_v39  ;;  %17144 = vmatprep.mubr.msk.f32.mxu0 %vm18663_vm1, %v23457_v3  ;;  %v5957_v15 = vrot.slane %v5943_v6, %v18752_v9  ;;  %v5542_v1 = vrot.slane %v15799_v39, %v18752_v9  ;;  %v16941_v16 = vpop.f32.mrb[55].mxu0  ;;  %v20137_v22 = vpop.f32.mrb[54].mxu1  ;;  %v15800_v54 = vld [vmem:[%s18750_s19 + $0xd1] sm:$0xff] }
 0x17d   : > { %v7147_v0 = vcombine.low %v6737_v5, %v6736_v62  ;;  %v6738_v23 = vcombine.high %v6736_v62, %v6736_v62  ;;  %17219 = vmatmul.mubr.msk.f32.gmra.mrb[136].mxu1 %vm1786_vm2, %v7145_v14  ;;  %v6739_v26 = vcombine.high %v15854_v20, %v15854_v20  ;;  %v6746_v28 = vrot.slane %v15854_v20, %v18752_v9  ;;  %v17018_v18 = vpop.f32.mrb[55].mxu1  ;;  %v15855_v6 = vld [vmem:[%s18750_s19 + $0xd2] sm:$0xff] }
 0x17e   : > { %v7154_v27 = vrot.slane %v7146_v40, %v18752_v9  ;;  %v5549_v31 = vrot.slane %v5535_v52, %v18752_v9  ;;  %v5958_v58 = vcombine.low %v5950_v53, %v5957_v15  ;;  %17221 = vmatprep.mubr.msk.f32.mxu1 %vm18663_vm1, %v23457_v3  ;;  %v5550_v42 = vcombine.high %v5542_v1, %v5542_v1  ;;  %v15801_v16 = vld [vmem:[%s18750_s19 + $0xd9] sm:$0x3f] }
 0x17f   : > { %v7161_v39 = vrot.slane %v7147_v0, %v18752_v9  ;;  %v5959_v12 = vcombine.low %v5534_v13, %v5542_v1  ;;  %v6753_v62 = vrot.slane %v6739_v26, %v18752_v9  ;;  %v6754_v5 = vcombine.high %v6746_v28, %v6746_v28  ;;  %v20153_v20 = vpop.f32.mrb[56].mxu0 }
 0x180   : > { %v7163_v14 = vcombine.low %v6738_v23, %v6746_v28  ;;  %v20151_v40 = vadd.f32 %v19932_v19, %v19917_v60  ;;  %17145 = vmatmul.mubr.msk.f32.gmra.mrb[138].mxu0 %vm1786_vm2, %v5958_v58  ;;  %v5960_v52 = vcombine.low %v5550_v42, %v5549_v31  ;;  %v5551_v0 = vcombine.high %v15800_v54, %v15800_v54  ;;  %v16944_v13 = vpop.f32.mrb[57].mxu0 }
 0x181   : > { %v7162_v53 = vcombine.low %v7154_v27, %v7161_v39  ;;  %v5967_v15 = vrot.slane %v5959_v12, %v18752_v9  ;;  %17147 = vmatprep.mubr.msk.f32.mxu0 %vm18663_vm1, %v23457_v3  ;;  %v7164_v1 = vcombine.low %v6754_v5, %v6753_v62  ;;  %v5558_v60 = vrot.slane %v15800_v54, %v18752_v9  ;;  %v20162_v26 = vpop.f32.mrb[56].mxu1  ;;  %v15802_v12 = vld [vmem:[%s18750_s19 + $0xe1] sm:$0xff] }
 0x182   : > { %23471 = vst [vmem:[#allocation6_spill] sm:$0xff] %v20151_v40  ;;  %v7171_v23 = vrot.slane %v7163_v14, %v18752_v9  ;;  %v6755_v19 = vcombine.high %v15855_v6, %v15855_v6  ;;  %v5974_v27 = vrot.slane %v5960_v52, %v18752_v9  ;;  %v5565_v31 = vrot.slane %v5551_v0, %v18752_v9  ;;  %v17021_v58 = vpop.f32.mrb[57].mxu1  ;;  %v15856_v52 = vld [vmem:[%s18750_s19 + $0xda] sm:$0x3f] }
 0x183   : > { %17222 = vmatmul.mubr.msk.f32.gmra.mrb[138].mxu1 %vm1786_vm2, %v7162_v53  ;;  %v6762_v28 = vrot.slane %v15855_v6, %v18752_v9  ;;  %v20170_v18 = vadd.f32 %v19954_v7, %v19938_v33  ;;  %v7178_v54 = vrot.slane %v7164_v1, %v18752_v9  ;;  %v5566_v39 = vcombine.high %v5558_v60, %v5558_v60 }
 0x184   : > { %17224 = vmatprep.mubr.msk.f32.mxu1 %vm18663_vm1, %v23457_v3  ;;  %v6769_v42 = vrot.slane %v6755_v19, %v18752_v9  ;;  %v5568_v62 = vcombine.high %v15801_v16, %v15801_v16  ;;  %v5975_v5 = vcombine.low %v5967_v15, %v5974_v27  ;;  %v5567_v14 = vcombine.high %v5565_v31, %v5565_v31  ;;  %v20179_v33 = vpop.f32.mrb[58].mxu0  ;;  %v15857_v27 = vld [vmem:[%s18750_s19 + $0xe2] sm:$0xff] }
 0x185   : > { %23472 = vst [vmem:[#allocation7_spill] sm:$0xff] %v20170_v18  ;;  %v6770_v53 = vcombine.high %v6762_v28, %v6762_v28  ;;  %v5575_v6 = vrot.slane %v15801_v16, %v18752_v9  ;;  %v7179_v7 = vcombine.low %v7171_v23, %v7178_v54  ;;  %v5976_v0 = vcombine.low %v5558_v60, %v5566_v39  ;;  %v16947_v1 = vpop.f32.mrb[59].mxu0 }
 0x186   : > { %v6771_v13 = vcombine.high %v6769_v42, %v6769_v42  ;;  %v5582_v58 = vrot.slane %v5568_v62, %v18752_v9  ;;  %17148 = vmatmul.mubr.msk.f32.gmra.mrb[140].mxu0 %vm1786_vm2, %v5975_v5  ;;  %v5977_v19 = vcombine.low %v5565_v31, %v5567_v14  ;;  %v5591_v15 = vrot.slane %v15802_v12, %v18752_v9  ;;  %v20185_v40 = vpop.f32.mrb[58].mxu1 }
 0x187   : > { %v7180_v3 = vcombine.low %v6762_v28, %v6770_v53  ;;  %v5583_v18 = vcombine.high %v5575_v6, %v5575_v6  ;;  %17225 = vmatmul.mubr.msk.f32.gmra.mrb[140].mxu1 %vm1786_vm2, %v7179_v7  ;;  %v23473_v16 = vmov 0.0   ;;  %v5984_v23 = vrot.slane %v5976_v0, %v18752_v9  ;;  %v17024_v39 = vpop.f32.mrb[59].mxu1 }
 0x188   : > { %17150 = vmatprep.mubr.msk.f32.mxu0 %vm18663_vm1, %v23473_v16  ;;  %v7181_v60 = vcombine.low %v6769_v42, %v6771_v13  ;;  %v6772_v54 = vcombine.high %v15856_v52, %v15856_v52  ;;  %v5991_v31 = vrot.slane %v5977_v19, %v18752_v9  ;;  %17227 = vmatprep.mubr.msk.f32.mxu1 %vm18663_vm1, %v23473_v16  ;;  %v20195_v14 = vpop.f32.mrb[60].mxu0  ;;  %v15803_v13 = vld [vmem:[%s18750_s19 + $0xe9] sm:$0x3f] }
 0x189   : > { %v7188_v28 = vrot.slane %v7180_v3, %v18752_v9  ;;  %v5993_v62 = vcombine.low %v5575_v6, %v5583_v18  ;;  %v5994_v5 = vcombine.low %v5582_v58, %v5591_v15  ;;  %v6779_v7 = vrot.slane %v15856_v52, %v18752_v9  ;;  %v16950_v1 = vpop.f32.mrb[61].mxu0  ;;  %v15858_v52 = vld [vmem:[%s18750_s19 + $0xea] sm:$0x3f] }
 0x18a   : > { %v7195_v53 = vrot.slane %v7181_v60, %v18752_v9  ;;  %v6786_v42 = vrot.slane %v6772_v54, %v18752_v9  ;;  %v6795_v0 = vrot.slane %v15857_v27, %v18752_v9  ;;  %v5992_v19 = vcombine.low %v5984_v23, %v5991_v31 }
 0x18b   : > { %v6001_v39 = vrot.slane %v5993_v62, %v18752_v9  ;;  %v6008_v3 = vrot.slane %v5994_v5, %v18752_v9  ;;  %v20206_v18 = vadd.f32 %v19979_v49, %v19970_v29  ;;  %v6787_v58 = vcombine.high %v6779_v7, %v6779_v7  ;;  %v20209_v36 = vpop.f32.mrb[60].mxu1 }
 0x18c   : > { %v7196_v6 = vcombine.low %v7188_v28, %v7195_v53  ;;  %v7198_v60 = vcombine.low %v6786_v42, %v6795_v0  ;;  %v5584_v25 = vcombine.high %v15802_v12, %v15802_v12  ;;  %17151 = vmatmul.mubr.msk.f32.gmra.mrb[142].mxu0 %vm1786_vm2, %v5992_v19  ;;  %v5599_v1 = vcombine.high %v5591_v15, %v5591_v15  ;;  %v17027_v62 = vpop.f32.mrb[61].mxu1 }
 0x18d   : > { %v6009_v54 = vcombine.low %v6001_v39, %v6008_v3  ;;  %v5608_v23 = vrot.slane %v15803_v13, %v18752_v9  ;;  %v6788_v31 = vcombine.high %v15857_v27, %v15857_v27  ;;  %17153 = vmatprep.mubr.msk.f32.mxu0 %vm18663_vm1, %v23473_v16  ;;  %v7197_v29 = vcombine.low %v6779_v7, %v6787_v58  ;;  %v15886_v58 = vld [vmem:[%s18750_s19 + $0x20] sm:$0xff] }
 0x18e   : > { %17228 = vmatmul.mubr.msk.f32.gmra.mrb[142].mxu1 %vm1786_vm2, %v7196_v6  ;;  %v7212_v49 = vrot.slane %v7198_v60, %v18752_v9  ;;  %v5598_v12 = vrot.slane %v5584_v25, %v18752_v9  ;;  %v6803_v28 = vcombine.high %v6795_v0, %v6795_v0  ;;  %v6812_v27 = vrot.slane %v15858_v52, %v18752_v9  ;;  %v15941_v62 = vld [vmem:[%s18750_s19 + $0x21] sm:$0xff] }
 0x18f   : > { %17230 = vmatprep.mubr.msk.f32.mxu1 %vm18663_vm1, %v23473_v16  ;;  %v6802_v15 = vrot.slane %v6788_v31, %v18752_v9  ;;  %v20224_v5 = vadd.f32 %v20002_v44, %v19996_v59  ;;  %v7205_v53 = vrot.slane %v7197_v29, %v18752_v9  ;;  %v5601_v19 = vcombine.high %v15803_v13, %v15803_v13  ;;  %v20227_v25 = vpop.f32.mrb[62].mxu0 }
 0x190   : > { %v5600_v7 = vcombine.high %v5598_v12, %v5598_v12  ;;  %v6010_v42 = vcombine.low %v5599_v1, %v5598_v12  ;;  %17154 = vmatmul.mubr.msk.f32.gmra.mrb[144].mxu0 %vm1786_vm2, %v6009_v54  ;;  %v5616_v6 = vcombine.high %v5608_v23, %v5608_v23  ;;  %v6805_v0 = vcombine.high %v15858_v52, %v15858_v52  ;;  %v16953_v60 = vpop.f32.mrb[63].mxu0  ;;  %v20231_v31 = vpop.f32.mrb[62].mxu1 }
 0x191   : > { %v6804_v39 = vcombine.high %v6802_v15, %v6802_v15  ;;  %v7214_v3 = vcombine.low %v6803_v28, %v6802_v15  ;;  %v7213_v59 = vcombine.low %v7205_v53, %v7212_v49  ;;  %17156 = vmatprep.mubr.msk.f32.mxu0 %vm18663_vm1, %v23473_v16  ;;  %v5615_v13 = vrot.slane %v5601_v19, %v18752_v9  ;;  %v17030_v54 = vpop.f32.mrb[63].mxu1 }
 0x192   : > { %v6011_v44 = vcombine.low %v5600_v7, %v5608_v23  ;;  %v6018_v1 = vrot.slane %v6010_v42, %v18752_v9  ;;  %v6819_v52 = vrot.slane %v6805_v0, %v18752_v9  ;;  %v6820_v15 = vcombine.high %v6812_v27, %v6812_v27 }
 0x193   : > { %v7215_v29 = vcombine.low %v6804_v39, %v6812_v27  ;;  %v7222_v12 = vrot.slane %v7214_v3, %v18752_v9  ;;  %17231 = vmatmul.mubr.msk.f32.gmra.mrb[144].mxu1 %vm1786_vm2, %v7213_v59  ;;  %v6027_v28 = vcombine.low %v5616_v6, %v5615_v13  ;;  %v20244_v23 = vadd.f32 %v20026_v21, %v20012_v41  ;;  %v15887_v39 = vld [vmem:[%s18750_s19 + $0x28] sm:$0x3f] }
 0x194   : > { %v6025_v49 = vrot.slane %v6011_v44, %v18752_v9  ;;  %v7564_v53 = vcombine.high %v15886_v58, %v15886_v58  ;;  %17233 = vmatprep.mubr.msk.f32.mxu1 %vm18663_vm1, %v23473_v16  ;;  %v7231_v42 = vcombine.low %v6820_v15, %v6819_v52  ;;  %v7571_v19 = vrot.slane %v15886_v58, %v18752_v9  ;;  %v20251_v3 = vpop.f32.mrb[64].mxu0 }
 0x195   : > { %23474 = vst [vmem:[#allocation8_spill] sm:$0xff] %v20244_v23  ;;  %v7229_v7 = vrot.slane %v7215_v29, %v18752_v9  ;;  %v8768_v27 = vcombine.high %v15941_v62, %v15941_v62  ;;  %v6034_v6 = vrot.slane %v6027_v28, %v18752_v9  ;;  %v8775_v21 = vrot.slane %v15941_v62, %v18752_v9  ;;  %v16956_v60 = vpop.f32.mrb[65].mxu0  ;;  %v20256_v59 = vpop.f32.mrb[64].mxu1  ;;  %v15888_v29 = vld [vmem:[%s18750_s19 + $0x30] sm:$0xff]  ;;  %v15942_v28 = vld [vmem:[%s18750_s19 + $0x29] sm:$0x3f] }
 0x196   : > { %v6026_v0 = vcombine.low %v6018_v1, %v6025_v49  ;;  %v7578_v41 = vrot.slane %v7564_v53, %v18752_v9  ;;  %v7238_v13 = vrot.slane %v7231_v42, %v18752_v9  ;;  %v7579_v54 = vcombine.high %v7571_v19, %v7571_v19  ;;  %v17033_v52 = vpop.f32.mrb[65].mxu1 }
 0x197   : > { %v7230_v44 = vcombine.low %v7222_v12, %v7229_v7  ;;  %v8782_v58 = vrot.slane %v8768_v27, %v18752_v9  ;;  %v8783_v15 = vcombine.high %v8775_v21, %v8775_v21  ;;  %v20264_v49 = vadd.f32 %v20054_v2, %v20045_v57 }
 0x198   : > { %17157 = vmatmul.mubr.msk.f32.gmra.mrb[146].mxu0 %vm1786_vm2, %v6026_v0  ;;  %v7580_v1 = vcombine.high %v7578_v41, %v7578_v41  ;;  %v7581_v62 = vcombine.high %v15887_v39, %v15887_v39  ;;  %v8028_v12 = vcombine.low %v7571_v19, %v7579_v54  ;;  %v7588_v7 = vrot.slane %v15887_v39, %v18752_v9  ;;  %v20271_v42 = vpop.f32.mrb[66].mxu0  ;;  %v15943_v54 = vld [vmem:[%s18750_s19 + $0x31] sm:$0xff] }
 0x199   : > { %23475 = vst [vmem:[#allocation9_spill] sm:$0xff] %v20264_v49  ;;  %17234 = vmatmul.mubr.msk.f32.gmra.mrb[146].mxu1 %vm1786_vm2, %v7230_v44  ;;  %17159 = vmatprep.mubr.msk.f32.mxu0 %vm18663_vm1, %v23473_v16  ;;  %v8784_v53 = vcombine.high %v8782_v58, %v8782_v58  ;;  %v9232_v57 = vcombine.low %v8775_v21, %v8783_v15  ;;  %v16959_v60 = vpop.f32.mrb[67].mxu0 }
 0x19a   : > { %17236 = vmatprep.mubr.msk.f32.mxu1 %vm18663_vm1, %v23473_v16  ;;  %v8029_v27 = vcombine.low %v7578_v41, %v7580_v1  ;;  %v7595_v2 = vrot.slane %v7581_v62, %v18752_v9  ;;  %v7604_v0 = vrot.slane %v15888_v29, %v18752_v9  ;;  %v8036_v44 = vrot.slane %v8028_v12, %v18752_v9  ;;  %v20279_v39 = vpop.f32.mrb[66].mxu1 }
 0x19b   : > { %v9233_v52 = vcombine.low %v8782_v58, %v8784_v53  ;;  %v7596_v19 = vcombine.high %v7588_v7, %v7588_v7  ;;  %v8785_v49 = vcombine.high %v15942_v28, %v15942_v28  ;;  %v9240_v41 = vrot.slane %v9232_v57, %v18752_v9  ;;  %v17036_v15 = vpop.f32.mrb[67].mxu1 }
 0x19c   : > { %17160 = vmatmul.mubr.msk.f32.gmra.mrb[148].mxu0 %vm1786_vm2, %v6034_v6  ;;  %v8043_v23 = vrot.slane %v8029_v27, %v18752_v9  ;;  %v8046_v21 = vcombine.low %v7595_v2, %v7604_v0  ;;  %v8792_v1 = vrot.slane %v15942_v28, %v18752_v9  ;;  %v15889_v6 = vld [vmem:[%s18750_s19 + $0x38] sm:$0x3f]  ;;  %v8808_v57 = vrot.slane %v15943_v54, %v18752_v9 }
 0x19d   : > { %17237 = vmatmul.mubr.msk.f32.gmra.mrb[148].mxu1 %vm1786_vm2, %v7238_v13  ;;  %17241 = vmatprep.mubr.msk.f32.mxu0 %vm18663_vm1, %v23473_v16  ;;  %v9247_v58 = vrot.slane %v9233_v52, %v18752_v9  ;;  %v8045_v62 = vcombine.low %v7588_v7, %v7596_v19  ;;  %v8799_v12 = vrot.slane %v8785_v49, %v18752_v9  ;;  %v15944_v49 = vld [vmem:[%s18750_s19 + $0x39] sm:$0x3f] }
 0x19e   : > { %v8044_v53 = vcombine.low %v8036_v44, %v8043_v23  ;;  %17318 = vmatprep.mubr.msk.f32.mxu1 %vm18663_vm1, %v23473_v16  ;;  %v8060_v27 = vrot.slane %v8046_v21, %v18752_v9  ;;  %v8800_v28 = vcombine.high %v8792_v1, %v8792_v1  ;;  %v20298_v60 = vadd.f32 %v20075_v45, %v20061_v34 }
 0x19f   : > { %v9248_v2 = vcombine.low %v9240_v41, %v9247_v58  ;;  %v8053_v13 = vrot.slane %v8045_v62, %v18752_v9  ;;  %v7597_v7 = vcombine.high %v15888_v29, %v15888_v29  ;;  %v9250_v44 = vcombine.low %v8799_v12, %v8808_v57  ;;  %v16024_v41 = vld [vmem:[%s23448_s1 + $0x20] sm:$0xf]  ;;  %v20306_v21 = vpop.f32.mrb[68].mxu0 }
 0x1a0   : > { %23476 = vst [vmem:[#allocation10_spill] sm:$0xff] %v20298_v60  ;;  %17242 = vmatmul.mubr.msk.f32.vlgmr.msra.gmra.mrb[150].mxu0 %vm1786_vm2, %v8044_v53  ;;  %v9249_v23 = vcombine.low %v8792_v1, %v8800_v28  ;;  %v7612_v52 = vcombine.high %v7604_v0, %v7604_v0  ;;  %v7621_v19 = vrot.slane %v15889_v6, %v18752_v9  ;;  %v15890_v1 = vld [vmem:[%s18750_s19 + $0x40] sm:$0xff]  ;;  %v16962_v15 = vpop.f32.mrb[69].mxu0  ;;  %v20313_v0 = vpop.f32.mrb[68].mxu1 }
 0x1a1   : > { %17319 = vmatmul.mubr.msk.f32.vlgmr.msra.gmra.mrb[150].mxu1 %vm1786_vm2, %v9248_v2  ;;  %17244 = vmatprep.mubr.msk.f32.mxu0 %vm18663_vm1, %v23473_v16  ;;  %v8061_v34 = vcombine.low %v8053_v13, %v8060_v27  ;;  %v7611_v45 = vrot.slane %v7597_v7, %v18752_v9  ;;  %v8801_v29 = vcombine.high %v15943_v54, %v15943_v54  ;;  %v17039_v28 = vpop.f32.mrb[69].mxu1 }
 0x1a2   : > { %17321 = vmatprep.mubr.msk.f32.mxu1 %vm18663_vm1, %v23473_v16  ;;  %v9257_v58 = vrot.slane %v9249_v23, %v18752_v9  ;;  %v9264_v62 = vrot.slane %v9250_v44, %v18752_v9  ;;  %v8816_v12 = vcombine.high %v8808_v57, %v8808_v57  ;;  %v8825_v53 = vrot.slane %v15944_v49, %v18752_v9 }
 0x1a3   : > { %v7613_v2 = vcombine.high %v7611_v45, %v7611_v45  ;;  %v8062_v27 = vcombine.low %v7612_v52, %v7611_v45  ;;  %v8815_v54 = vrot.slane %v8801_v29, %v18752_v9  ;;  %v3869_v13 = vadd.f32 %v20084_v37, %v19677_v61  ;;  %17394 = vmatpush3.msk.msra.mxu0 %vm1837_vm0, %v16024_v41  ;;  %v20326_v44 = vpop.f32.mrb[70].mxu0  ;;  %v15945_v61 = vld [vmem:[%s18750_s19 + $0x41] sm:$0xff] }
 0x1a4   : > { %17245 = vmatmul.mubr.msk.f32.gmra.mrb[152].mxu0 %vm1786_vm2, %v8061_v34  ;;  %v9265_v7 = vcombine.low %v9257_v58, %v9264_v62  ;;  %v7614_v23 = vcombine.high %v15889_v6, %v15889_v6  ;;  %v7629_v15 = vcombine.high %v7621_v19, %v7621_v19  ;;  %v7637_v57 = vrot.slane %v15890_v1, %v18752_v9  ;;  %v16965_v37 = vpop.f32.mrb[71].mxu0 }
 0x1a5   : > { %17247 = vmatprep.mubr.msk.f32.mxu0 %vm18663_vm1, %v23473_v16  ;;  %v8063_v52 = vcombine.low %v7613_v2, %v7621_v19  ;;  %v8070_v45 = vrot.slane %v8062_v27, %v18752_v9  ;;  %v8817_v29 = vcombine.high %v8815_v54, %v8815_v54  ;;  %v9266_v28 = vcombine.low %v8816_v12, %v8815_v54  ;;  %v20337_v62 = vpop.f32.mrb[70].mxu1 }
 0x1a6   : > { %17322 = vmatmul.mubr.msk.f32.gmra.mrb[152].mxu1 %vm1786_vm2, %v9265_v7  ;;  %v7628_v6 = vrot.slane %v7614_v23, %v18752_v9  ;;  %v7645_v41 = vcombine.high %v7637_v57, %v7637_v57  ;;  %v20335_v34 = vadd.f32 %v20094_v24, %v3869_v13  ;;  %v8818_v58 = vcombine.high %v15944_v49, %v15944_v49  ;;  %v17042_v54 = vpop.f32.mrb[71].mxu1  ;;  %v15891_v49 = vld [vmem:[%s18750_s19 + $0x48] sm:$0x3f] }
 0x1a7   : > { %v8077_v19 = vrot.slane %v8063_v52, %v18752_v9  ;;  %17324 = vmatprep.mubr.msk.f32.mxu1 %vm18663_vm1, %v23473_v16  ;;  %v9267_v12 = vcombine.low %v8817_v29, %v8825_v53  ;;  %v9274_v2 = vrot.slane %v9266_v28, %v18752_v9  ;;  %v8833_v27 = vcombine.high %v8825_v53, %v8825_v53 }
 0x1a8   : > { %23477 = vst [vmem:[#allocation11_spill] sm:$0xff] %v20335_v34  ;;  %v8079_v7 = vcombine.low %v7629_v15, %v7628_v6  ;;  %v8080_v23 = vcombine.low %v7637_v57, %v7645_v41  ;;  %v8832_v37 = vrot.slane %v8818_v58, %v18752_v9  ;;  %v8841_v24 = vrot.slane %v15945_v61, %v18752_v9  ;;  %v20349_v60 = vpop.f32.mrb[72].mxu0  ;;  %v15946_v6 = vld [vmem:[%s18750_s19 + $0x49] sm:$0x3f] }
 0x1a9   : > { %v8078_v13 = vcombine.low %v8070_v45, %v8077_v19  ;;  %v9281_v52 = vrot.slane %v9267_v12, %v18752_v9  ;;  %v3870_v34 = vadd.f32 %v20102_v55, %v19708_v35  ;;  %v7630_v29 = vcombine.high %v15890_v1, %v15890_v1  ;;  %v16968_v41 = vpop.f32.mrb[73].mxu0  ;;  %v15892_v55 = vld [vmem:[%s18750_s19 + $0x50] sm:$0xff] }
 0x1aa   : > { %v8087_v53 = vrot.slane %v8079_v7, %v18752_v9  ;;  %v8094_v15 = vrot.slane %v8080_v23, %v18752_v9  ;;  %v8849_v57 = vcombine.high %v8841_v24, %v8841_v24  ;;  %v9283_v28 = vcombine.low %v8833_v27, %v8832_v37 }
 0x1ab   : > { %17248 = vmatmul.mubr.msk.f32.gmra.mrb[154].mxu0 %vm1786_vm2, %v8078_v13  ;;  %v9282_v45 = vcombine.low %v9274_v2, %v9281_v52  ;;  %v7644_v58 = vrot.slane %v7630_v29, %v18752_v9  ;;  %v7654_v19 = vrot.slane %v15891_v49, %v18752_v9  ;;  %v20358_v35 = vadd.f32 %v20115_v30, %v3870_v34  ;;  %v20364_v7 = vpop.f32.mrb[72].mxu1 }
 0x1ac   : > { %17250 = vmatprep.mubr.msk.f32.mxu0 %vm18663_vm1, %v23473_v16  ;;  %v8095_v1 = vcombine.low %v8087_v53, %v8094_v15  ;;  %v9284_v12 = vcombine.low %v8841_v24, %v8849_v57  ;;  %v9291_v27 = vrot.slane %v9283_v28, %v18752_v9  ;;  %v8834_v54 = vcombine.high %v15945_v61, %v15945_v61  ;;  %v20370_v34 = vpop.f32.mrb[74].mxu0  ;;  %v17045_v13 = vpop.f32.mrb[73].mxu1 }
 0x1ad   : > { %17325 = vmatmul.mubr.msk.f32.gmra.mrb[154].mxu1 %vm1786_vm2, %v9282_v45  ;;  %v7646_v2 = vcombine.high %v7644_v58, %v7644_v58  ;;  %v7662_v23 = vcombine.high %v7654_v19, %v7654_v19  ;;  %v8858_v37 = vrot.slane %v15946_v6, %v18752_v9  ;;  %v3871_v30 = vadd.f32 %v20131_v47, %v19733_v11  ;;  %v16971_v53 = vpop.f32.mrb[75].mxu0 }
 0x1ae   : > { %17327 = vmatprep.mubr.msk.f32.mxu1 %vm18663_vm1, %v23473_v16  ;;  %v9298_v61 = vrot.slane %v9284_v12, %v18752_v9  ;;  %v8848_v24 = vrot.slane %v8834_v54, %v18752_v9  ;;  %v7647_v52 = vcombine.high %v15891_v49, %v15891_v49  ;;  %v7663_v29 = vcombine.high %v15892_v55, %v15892_v55  ;;  %v15947_v54 = vld [vmem:[%s18750_s19 + $0x51] sm:$0xff] }
 0x1af   : > { %17251 = vmatmul.mubr.msk.f32.gmra.mrb[156].mxu0 %vm1786_vm2, %v8095_v1  ;;  %v8096_v15 = vcombine.low %v7644_v58, %v7646_v2  ;;  %v8097_v57 = vcombine.low %v7654_v19, %v7662_v23  ;;  %v8866_v28 = vcombine.high %v8858_v37, %v8858_v37  ;;  %v7670_v11 = vrot.slane %v15892_v55, %v18752_v9 }
 0x1b0   : > { %v9299_v47 = vcombine.low %v9291_v27, %v9298_v61  ;;  %17253 = vmatprep.mubr.msk.f32.mxu0 %vm18663_vm1, %v23473_v16  ;;  %v8850_v41 = vcombine.high %v8848_v24, %v8848_v24  ;;  %v7661_v45 = vrot.slane %v7647_v52, %v18752_v9  ;;  %v7677_v12 = vrot.slane %v7663_v29, %v18752_v9  ;;  %v20385_v2 = vpop.f32.mrb[74].mxu1 }
 0x1b1   : > { %v8104_v49 = vrot.slane %v8096_v15, %v18752_v9  ;;  %v8111_v1 = vrot.slane %v8097_v57, %v18752_v9  ;;  %v9301_v58 = vcombine.low %v8858_v37, %v8866_v28  ;;  %v7678_v19 = vcombine.high %v7670_v11, %v7670_v11  ;;  %v17048_v61 = vpop.f32.mrb[75].mxu1  ;;  %v15893_v15 = vld [vmem:[%s18750_s19 + $0x58] sm:$0x3f] }
 0x1b2   : > { %17328 = vmatmul.mubr.msk.f32.gmra.mrb[156].mxu1 %vm1786_vm2, %v9299_v47  ;;  %v9300_v55 = vcombine.low %v8848_v24, %v8850_v41  ;;  %v8113_v27 = vcombine.low %v7661_v45, %v7670_v11  ;;  %v20389_v23 = vadd.f32 %v20137_v22, %v3871_v30  ;;  %v8851_v13 = vcombine.high %v15946_v6, %v15946_v6  ;;  %v15948_v45 = vld [vmem:[%s18750_s19 + $0x59] sm:$0x3f] }
 0x1b3   : > { %v8112_v52 = vcombine.low %v8104_v49, %v8111_v1  ;;  %17330 = vmatprep.mubr.msk.f32.mxu1 %vm18663_vm1, %v23473_v16  ;;  %v9315_v29 = vrot.slane %v9301_v58, %v18752_v9  ;;  %v8114_v37 = vcombine.low %v7678_v19, %v7677_v12  ;;  %v8867_v53 = vcombine.high %v15947_v54, %v15947_v54  ;;  %v20399_v6 = vpop.f32.mrb[76].mxu0 }
 0x1b4   : > { %v9308_v57 = vrot.slane %v9300_v55, %v18752_v9  ;;  %v8121_v24 = vrot.slane %v8113_v27, %v18752_v9  ;;  %v8865_v28 = vrot.slane %v8851_v13, %v18752_v9  ;;  %v8874_v22 = vrot.slane %v15947_v54, %v18752_v9  ;;  %v16974_v49 = vpop.f32.mrb[77].mxu0 }
 0x1b5   : > { %17254 = vmatmul.mubr.msk.f32.gmra.mrb[158].mxu0 %vm1786_vm2, %v8112_v52  ;;  %v8128_v30 = vrot.slane %v8114_v37, %v18752_v9  ;;  %v8881_v11 = vrot.slane %v8867_v53, %v18752_v9  ;;  %v3872_v47 = vadd.f32 %v20153_v20, %v19765_v56  ;;  %v7679_v41 = vcombine.high %v7677_v12, %v7677_v12  ;;  %v20409_v55 = vpop.f32.mrb[76].mxu1  ;;  %v15894_v56 = vld [vmem:[%s18750_s19 + $0x60] sm:$0xff] }
 0x1b6   : > { %v9316_v1 = vcombine.low %v9308_v57, %v9315_v29  ;;  %17256 = vmatprep.mubr.msk.f32.mxu0 %vm18663_vm1, %v23473_v16  ;;  %v8882_v54 = vcombine.high %v8874_v22, %v8874_v22  ;;  %v9317_v58 = vcombine.low %v8865_v28, %v8874_v22  ;;  %v7680_v19 = vcombine.high %v15893_v15, %v15893_v15  ;;  %v17051_v20 = vpop.f32.mrb[77].mxu1 }
 0x1b7   : > { %v8129_v27 = vcombine.low %v8121_v24, %v8128_v30  ;;  %v7687_v13 = vrot.slane %v15893_v15, %v18752_v9  ;;  %v20413_v61 = vadd.f32 %v20162_v26, %v3872_v47  ;;  %v8883_v52 = vcombine.high %v8881_v11, %v8881_v11  ;;  %v15949_v47 = vld [vmem:[%s18750_s19 + $0x61] sm:$0xff] }
 0x1b8   : > { %17331 = vmatmul.mubr.msk.f32.gmra.mrb[158].mxu1 %vm1786_vm2, %v9316_v1  ;;  %v9318_v12 = vcombine.low %v8882_v54, %v8881_v11  ;;  %v9325_v29 = vrot.slane %v9317_v58, %v18752_v9  ;;  %v7694_v37 = vrot.slane %v7680_v19, %v18752_v9  ;;  %v8884_v53 = vcombine.high %v15948_v45, %v15948_v45  ;;  %v20423_v24 = vpop.f32.mrb[78].mxu0 }
 0x1b9   : > { %17257 = vmatmul.mubr.msk.f32.gmra.mrb[160].mxu0 %vm1786_vm2, %v8129_v27  ;;  %17333 = vmatprep.mubr.msk.f32.mxu1 %vm18663_vm1, %v23473_v16  ;;  %v7695_v15 = vcombine.high %v7687_v13, %v7687_v13  ;;  %v8130_v26 = vcombine.low %v7679_v41, %v7687_v13  ;;  %v8891_v57 = vrot.slane %v15948_v45, %v18752_v9  ;;  %v16977_v49 = vpop.f32.mrb[79].mxu0 }
 0x1ba   : > { %v9332_v28 = vrot.slane %v9318_v12, %v18752_v9  ;;  %17259 = vmatprep.mubr.msk.f32.mxu0 %vm18663_vm1, %v23473_v16  ;;  %v8898_v22 = vrot.slane %v8884_v53, %v18752_v9  ;;  %v3873_v30 = vadd.f32 %v20179_v33, %v19790_v32  ;;  %v7696_v11 = vcombine.high %v15894_v56, %v15894_v56  ;;  %v20433_v58 = vpop.f32.mrb[78].mxu1  ;;  %v15895_v32 = vld [vmem:[%s18750_s19 + $0x68] sm:$0x3f] }
 0x1bb   : > { %v8131_v1 = vcombine.low %v7695_v15, %v7694_v37  ;;  %v8138_v41 = vrot.slane %v8130_v26, %v18752_v9  ;;  %v8899_v45 = vcombine.high %v8891_v57, %v8891_v57  ;;  %v9334_v54 = vcombine.low %v8883_v52, %v8891_v57  ;;  %v17054_v33 = vpop.f32.mrb[79].mxu1  ;;  %v15896_v57 = vld [vmem:[%s18750_s19 + $0x70] sm:$0xff] }
 0x1bc   : > { %v9333_v19 = vcombine.low %v9325_v29, %v9332_v28  ;;  %v7703_v27 = vrot.slane %v15894_v56, %v18752_v9  ;;  %v7710_v13 = vrot.slane %v7696_v11, %v18752_v9  ;;  %v20438_v20 = vadd.f32 %v20185_v40, %v3873_v30  ;;  %v20443_v52 = vpop.f32.mrb[80].mxu0 }
 0x1bd   : > { %v8145_v12 = vrot.slane %v8131_v1, %v18752_v9  ;;  %v9335_v37 = vcombine.low %v8899_v45, %v8898_v22  ;;  %v9342_v53 = vrot.slane %v9334_v54, %v18752_v9  ;;  %v8900_v15 = vcombine.high %v15949_v47, %v15949_v47  ;;  %v16980_v28 = vpop.f32.mrb[81].mxu0 }
 0x1be   : > { %17334 = vmatmul.mubr.msk.f32.gmra.mrb[160].mxu1 %vm1786_vm2, %v9333_v19  ;;  %v7711_v29 = vcombine.high %v7703_v27, %v7703_v27  ;;  %v7712_v56 = vcombine.high %v7710_v13, %v7710_v13  ;;  %v8907_v26 = vrot.slane %v15949_v47, %v18752_v9  ;;  %v3874_v40 = vadd.f32 %v20195_v14, %v19806_v51  ;;  %v20454_v1 = vpop.f32.mrb[80].mxu1  ;;  %v15950_v51 = vld [vmem:[%s18750_s19 + $0x69] sm:$0x3f] }
 0x1bf   : > { %v8146_v30 = vcombine.low %v8138_v41, %v8145_v12  ;;  %17336 = vmatprep.mubr.msk.f32.mxu1 %vm18663_vm1, %v23473_v16  ;;  %v9349_v22 = vrot.slane %v9335_v37, %v18752_v9  ;;  %v8914_v11 = vrot.slane %v8900_v15, %v18752_v9  ;;  %v7713_v49 = vcombine.high %v15895_v32, %v15895_v32  ;;  %v17057_v14 = vpop.f32.mrb[81].mxu1 }
 0x1c0   : > { %v8147_v45 = vcombine.low %v7703_v27, %v7711_v29  ;;  %v8148_v54 = vcombine.low %v7710_v13, %v7712_v56  ;;  %v8915_v47 = vcombine.high %v8907_v26, %v8907_v26  ;;  %v7720_v19 = vrot.slane %v15895_v32, %v18752_v9  ;;  %v15951_v29 = vld [vmem:[%s18750_s19 + $0x71] sm:$0xff] }
 0x1c1   : > { %17260 = vmatmul.mubr.msk.f32.gmra.mrb[162].mxu0 %vm1786_vm2, %v8146_v30  ;;  %v9350_v41 = vcombine.low %v9342_v53, %v9349_v22  ;;  %v8916_v33 = vcombine.high %v8914_v11, %v8914_v11  ;;  %v7727_v12 = vrot.slane %v7713_v49, %v18752_v9  ;;  %v7736_v37 = vrot.slane %v15896_v57, %v18752_v9 }
 0x1c2   : > { %17262 = vmatprep.mubr.msk.f32.mxu0 %vm18663_vm1, %v23473_v16  ;;  %v8155_v27 = vrot.slane %v8147_v45, %v18752_v9  ;;  %v8162_v13 = vrot.slane %v8148_v54, %v18752_v9  ;;  %v9351_v15 = vcombine.low %v8907_v26, %v8915_v47  ;;  %v7728_v32 = vcombine.high %v7720_v19, %v7720_v19  ;;  %v15897_v54 = vld [vmem:[%s18750_s19 + $0x78] sm:$0x3f] }
 0x1c3   : > { %17337 = vmatmul.mubr.msk.f32.gmra.mrb[162].mxu1 %vm1786_vm2, %v9350_v41  ;;  %v9352_v56 = vcombine.low %v8914_v11, %v8916_v33  ;;  %v8165_v53 = vcombine.low %v7727_v12, %v7736_v37  ;;  %v20468_v28 = vadd.f32 %v20209_v36, %v3874_v40  ;;  %v8917_v30 = vcombine.high %v15950_v51, %v15950_v51  ;;  %v20475_v47 = vpop.f32.mrb[82].mxu0 }
 0x1c4   : > { %v8163_v22 = vcombine.low %v8155_v27, %v8162_v13  ;;  %17339 = vmatprep.mubr.msk.f32.mxu1 %vm18663_vm1, %v23473_v16  ;;  %v9359_v49 = vrot.slane %v9351_v15, %v18752_v9  ;;  %v8164_v45 = vcombine.low %v7720_v19, %v7728_v32  ;;  %v8924_v26 = vrot.slane %v15950_v51, %v18752_v9  ;;  %v16983_v41 = vpop.f32.mrb[83].mxu0  ;;  %v15952_v27 = vld [vmem:[%s18750_s19 + $0x79] sm:$0x3f] }
 0x1c5   : > { %23478 = vst [vmem:[#allocation12_spill] sm:$0xff] %v20468_v28  ;;  %v9366_v11 = vrot.slane %v9352_v56, %v18752_v9  ;;  %v8179_v14 = vrot.slane %v8165_v53, %v18752_v9  ;;  %v8931_v36 = vrot.slane %v8917_v30, %v18752_v9  ;;  %v8940_v40 = vrot.slane %v15951_v29, %v18752_v9  ;;  %v20486_v13 = vpop.f32.mrb[82].mxu1 }
 0x1c6   : > { %17263 = vmatmul.mubr.msk.f32.gmra.mrb[164].mxu0 %vm1786_vm2, %v8163_v22  ;;  %v8172_v33 = vrot.slane %v8164_v45, %v18752_v9  ;;  %v8932_v12 = vcombine.high %v8924_v26, %v8924_v26  ;;  %v3875_v19 = vadd.f32 %v20227_v25, %v19842_v50  ;;  %v7729_v51 = vcombine.high %v15896_v57, %v15896_v57  ;;  %v17060_v30 = vpop.f32.mrb[83].mxu1 }
 0x1c7   : > { %v9367_v15 = vcombine.low %v9359_v49, %v9366_v11  ;;  %17265 = vmatprep.mubr.msk.f32.mxu0 %vm18663_vm1, %v23473_v16  ;;  %v9369_v32 = vcombine.low %v8931_v36, %v8940_v40  ;;  %v7744_v56 = vcombine.high %v7736_v37, %v7736_v37  ;;  %v7753_v53 = vrot.slane %v15897_v54, %v18752_v9  ;;  %v20495_v25 = vpop.f32.mrb[84].mxu0  ;;  %v15898_v36 = vld [vmem:[%s18750_s19 + $0x80] sm:$0xff] }
 0x1c8   : > { %v8180_v22 = vcombine.low %v8172_v33, %v8179_v14  ;;  %v9368_v45 = vcombine.low %v8924_v26, %v8932_v12  ;;  %v7743_v41 = vrot.slane %v7729_v51, %v18752_v9  ;;  %v20493_v50 = vadd.f32 %v20231_v31, %v3875_v19  ;;  %v16986_v28 = vpop.f32.mrb[85].mxu0 }
 0x1c9   : > { %17340 = vmatmul.mubr.msk.f32.gmra.mrb[164].mxu1 %vm1786_vm2, %v9367_v15  ;;  %v9383_v57 = vrot.slane %v9369_v32, %v18752_v9  ;;  %v8933_v49 = vcombine.high %v15951_v29, %v15951_v29  ;;  %v8948_v11 = vcombine.high %v8940_v40, %v8940_v40  ;;  %v8957_v37 = vrot.slane %v15952_v27, %v18752_v9  ;;  %v20505_v33 = vpop.f32.mrb[84].mxu1 }
 0x1ca   : > { %23479 = vst [vmem:[#allocation13_spill] sm:$0xff] %v20493_v50  ;;  %17266 = vmatmul.mubr.msk.f32.gmra.mrb[166].mxu0 %vm1786_vm2, %v8180_v22  ;;  %17342 = vmatprep.mubr.msk.f32.mxu1 %vm18663_vm1, %v23473_v16  ;;  %v9376_v31 = vrot.slane %v9368_v45, %v18752_v9  ;;  %v7745_v26 = vcombine.high %v7743_v41, %v7743_v41  ;;  %v17063_v19 = vpop.f32.mrb[85].mxu1 }
 0x1cb   : > { %v8181_v14 = vcombine.low %v7744_v56, %v7743_v41  ;;  %17268 = vmatprep.mubr.msk.f32.mxu0 %vm18663_vm1, %v23473_v16  ;;  %v8947_v29 = vrot.slane %v8933_v49, %v18752_v9  ;;  %v3876_v28 = vadd.f32 %v20251_v3, %v19863_v17  ;;  %v7746_v40 = vcombine.high %v15897_v54, %v15897_v54  ;;  %v15953_v56 = vld [vmem:[%s18750_s19 + $0x81] sm:$0xff] }
 0x1cc   : > { %v7761_v12 = vcombine.high %v7753_v53, %v7753_v53  ;;  %v9384_v51 = vcombine.low %v9376_v31, %v9383_v57  ;;  %v8182_v15 = vcombine.low %v7745_v26, %v7753_v53  ;;  %v7769_v30 = vrot.slane %v15898_v36, %v18752_v9  ;;  %v20519_v50 = vpop.f32.mrb[86].mxu0 }
 0x1cd   : > { %v8189_v32 = vrot.slane %v8181_v14, %v18752_v9  ;;  %v8949_v22 = vcombine.high %v8947_v29, %v8947_v29  ;;  %v9385_v45 = vcombine.low %v8948_v11, %v8947_v29  ;;  %v7760_v41 = vrot.slane %v7746_v40, %v18752_v9  ;;  %v16989_v57 = vpop.f32.mrb[87].mxu0  ;;  %v15899_v14 = vld [vmem:[%s18750_s19 + $0x88] sm:$0x3f] }
 0x1ce   : > { %v20517_v49 = vadd.f32 %v20256_v59, %v3876_v28  ;;  %17343 = vmatmul.mubr.msk.f32.gmra.mrb[166].mxu1 %vm1786_vm2, %v9384_v51  ;;  %v8196_v17 = vrot.slane %v8182_v15, %v18752_v9  ;;  %v7777_v3 = vcombine.high %v7769_v30, %v7769_v30  ;;  %v8950_v54 = vcombine.high %v15952_v27, %v15952_v27  ;;  %v20528_v29 = vpop.f32.mrb[86].mxu1 }
 0x1cf   : > { %v8965_v53 = vcombine.high %v8957_v37, %v8957_v37  ;;  %17345 = vmatprep.mubr.msk.f32.mxu1 %vm18663_vm1, %v23473_v16  ;;  %v9386_v11 = vcombine.low %v8949_v22, %v8957_v37  ;;  %v9393_v31 = vrot.slane %v9385_v45, %v18752_v9  ;;  %v8198_v26 = vcombine.low %v7761_v12, %v7760_v41  ;;  %v17066_v51 = vpop.f32.mrb[87].mxu1  ;;  %v15954_v12 = vld [vmem:[%s18750_s19 + $0x89] sm:$0x3f] }
 0x1d0   : > { %v8973_v59 = vrot.slane %v15953_v56, %v18752_v9  ;;  %v8197_v28 = vcombine.low %v8189_v32, %v8196_v17  ;;  %v8199_v40 = vcombine.low %v7769_v30, %v7777_v3  ;;  %v8964_v19 = vrot.slane %v8950_v54, %v18752_v9  ;;  %v20536_v41 = vpop.f32.mrb[88].mxu0 }
 0x1d1   : > { %v3877_v27 = vadd.f32 %v20271_v42, %v19888_v8  ;;  %v9400_v15 = vrot.slane %v9386_v11, %v18752_v9  ;;  %v8206_v37 = vrot.slane %v8198_v26, %v18752_v9  ;;  %v7762_v45 = vcombine.high %v15898_v36, %v15898_v36  ;;  %v16992_v42 = vpop.f32.mrb[89].mxu0 }
 0x1d2   : > { %v8981_v22 = vcombine.high %v8973_v59, %v8973_v59  ;;  %17269 = vmatmul.mubr.msk.f32.gmra.mrb[168].mxu0 %vm1786_vm2, %v8197_v28  ;;  %v8213_v32 = vrot.slane %v8199_v40, %v18752_v9  ;;  %v9402_v30 = vcombine.low %v8965_v53, %v8964_v19  ;;  %v7786_v17 = vrot.slane %v15899_v14, %v18752_v9  ;;  %v15900_v40 = vld [vmem:[%s18750_s19 + $0x90] sm:$0xff] }
 0x1d3   : > { %v20542_v8 = vadd.f32 %v20279_v39, %v3877_v27  ;;  %v9401_v3 = vcombine.low %v9393_v31, %v9400_v15  ;;  %17271 = vmatprep.mubr.msk.f32.mxu0 %vm18663_vm1, %v23473_v16  ;;  %v7776_v54 = vrot.slane %v7762_v45, %v18752_v9  ;;  %v8966_v57 = vcombine.high %v15953_v56, %v15953_v56  ;;  %v20550_v19 = vpop.f32.mrb[88].mxu1 }
 0x1d4   : > { %v9403_v36 = vcombine.low %v8973_v59, %v8981_v22  ;;  %v8214_v11 = vcombine.low %v8206_v37, %v8213_v32  ;;  %v9410_v26 = vrot.slane %v9402_v30, %v18752_v9  ;;  %v7794_v28 = vcombine.high %v7786_v17, %v7786_v17  ;;  %v17069_v56 = vpop.f32.mrb[89].mxu1 }
 0x1d5   : > { %v8990_v53 = vrot.slane %v15954_v12, %v18752_v9  ;;  %17346 = vmatmul.mubr.msk.f32.gmra.mrb[168].mxu1 %vm1786_vm2, %v9401_v3  ;;  %v7778_v31 = vcombine.high %v7776_v54, %v7776_v54  ;;  %v8980_v27 = vrot.slane %v8966_v57, %v18752_v9  ;;  %v3878_v59 = vadd.f32 %v20306_v21, %v19915_v46  ;;  %v15955_v57 = vld [vmem:[%s18750_s19 + $0x91] sm:$0xff] }
 0x1d6   : > { %v9417_v39 = vrot.slane %v9403_v36, %v18752_v9  ;;  %17272 = vmatmul.mubr.msk.f32.gmra.mrb[170].mxu0 %vm1786_vm2, %v8214_v11  ;;  %17348 = vmatprep.mubr.msk.f32.mxu1 %vm18663_vm1, %v23473_v16  ;;  %v8216_v51 = vcombine.low %v7786_v17, %v7794_v28  ;;  %v7779_v37 = vcombine.high %v15899_v14, %v15899_v14  ;;  %v20562_v42 = vpop.f32.mrb[90].mxu0 }
 0x1d7   : > { %v8998_v15 = vcombine.high %v8990_v53, %v8990_v53  ;;  %17274 = vmatprep.mubr.msk.f32.mxu0 %vm18663_vm1, %v23473_v16  ;;  %v8215_v45 = vcombine.low %v7776_v54, %v7778_v31  ;;  %v8982_v32 = vcombine.high %v8980_v27, %v8980_v27  ;;  %v7795_v30 = vcombine.high %v15900_v40, %v15900_v40  ;;  %v16995_v17 = vpop.f32.mrb[91].mxu0 }
 0x1d8   : > { %v9418_v22 = vcombine.low %v9410_v26, %v9417_v39  ;;  %v8230_v46 = vrot.slane %v8216_v51, %v18752_v9  ;;  %v7793_v3 = vrot.slane %v7779_v37, %v18752_v9  ;;  %v7802_v36 = vrot.slane %v15900_v40, %v18752_v9  ;;  %v15901_v37 = vld [vmem:[%s18750_s19 + $0x98] sm:$0x3f] }
 0x1d9   : > { %v9420_v21 = vcombine.low %v8990_v53, %v8998_v15  ;;  %v8223_v14 = vrot.slane %v8215_v45, %v18752_v9  ;;  %v9419_v11 = vcombine.low %v8980_v27, %v8982_v32  ;;  %v7809_v54 = vrot.slane %v7795_v30, %v18752_v9  ;;  %v20577_v31 = vpop.f32.mrb[90].mxu1  ;;  %v15956_v30 = vld [vmem:[%s18750_s19 + $0x99] sm:$0x3f] }
 0x1da   : > { %17349 = vmatmul.mubr.msk.f32.gmra.mrb[170].mxu1 %vm1786_vm2, %v9418_v22  ;;  %v20572_v26 = vadd.f32 %v20313_v0, %v3878_v59  ;;  %v7810_v53 = vcombine.high %v7802_v36, %v7802_v36  ;;  %v8232_v40 = vcombine.low %v7793_v3, %v7802_v36  ;;  %v8983_v39 = vcombine.high %v15954_v12, %v15954_v12  ;;  %v17072_v0 = vpop.f32.mrb[91].mxu1 }
 0x1db   : > { %17351 = vmatprep.mubr.msk.f32.mxu1 %vm18663_vm1, %v23473_v16  ;;  %v9434_v28 = vrot.slane %v9420_v21, %v18752_v9  ;;  %v8231_v56 = vcombine.low %v8223_v14, %v8230_v46  ;;  %v9427_v51 = vrot.slane %v9419_v11, %v18752_v9  ;;  %v8999_v27 = vcombine.high %v15955_v57, %v15955_v57 }
 0x1dc   : > { %v9006_v15 = vrot.slane %v15955_v57, %v18752_v9  ;;  %v8233_v59 = vcombine.low %v7810_v53, %v7809_v54  ;;  %v8240_v22 = vrot.slane %v8232_v40, %v18752_v9  ;;  %v8997_v45 = vrot.slane %v8983_v39, %v18752_v9  ;;  %v20589_v36 = vpop.f32.mrb[92].mxu0  ;;  %v15902_v39 = vld [vmem:[%s18750_s19 + $0xa0] sm:$0xff] }
 0x1dd   : > { %v3879_v32 = vadd.f32 %v20326_v44, %v19944_v38  ;;  %17275 = vmatmul.mubr.msk.f32.gmra.mrb[172].mxu0 %vm1786_vm2, %v8231_v56  ;;  %v9435_v12 = vcombine.low %v9427_v51, %v9434_v28  ;;  %v9013_v46 = vrot.slane %v8999_v27, %v18752_v9  ;;  %v7811_v3 = vcombine.high %v7809_v54, %v7809_v54  ;;  %v16998_v44 = vpop.f32.mrb[93].mxu0  ;;  %v20595_v11 = vpop.f32.mrb[92].mxu1 }
 0x1de   : > { %v9014_v21 = vcombine.high %v9006_v15, %v9006_v15  ;;  %17277 = vmatprep.mubr.msk.f32.mxu0 %vm18663_vm1, %v23473_v16  ;;  %v8247_v57 = vrot.slane %v8233_v59, %v18752_v9  ;;  %v9436_v17 = vcombine.low %v8997_v45, %v9006_v15  ;;  %v7812_v14 = vcombine.high %v15901_v37, %v15901_v37  ;;  %v17075_v56 = vpop.f32.mrb[93].mxu1 }
 0x1df   : > { %v7819_v38 = vrot.slane %v15901_v37, %v18752_v9  ;;  %17352 = vmatmul.mubr.msk.f32.gmra.mrb[172].mxu1 %vm1786_vm2, %v9435_v12  ;;  %v20599_v53 = vadd.f32 %v20337_v62, %v3879_v32  ;;  %v9015_v54 = vcombine.high %v9013_v46, %v9013_v46  ;;  %v9016_v40 = vcombine.high %v15956_v30, %v15956_v30 }
 0x1e0   : > { %v9437_v28 = vcombine.low %v9014_v21, %v9013_v46  ;;  %v8248_v51 = vcombine.low %v8240_v22, %v8247_v57  ;;  %17354 = vmatprep.mubr.msk.f32.mxu1 %vm18663_vm1, %v23473_v16  ;;  %v9444_v27 = vrot.slane %v9436_v17, %v18752_v9  ;;  %v7826_v15 = vrot.slane %v7812_v14, %v18752_v9  ;;  %v20609_v32 = vpop.f32.mrb[94].mxu0  ;;  %v15957_v57 = vld [vmem:[%s18750_s19 + $0xa1] sm:$0xff] }
 0x1e1   : > { %v7827_v37 = vcombine.high %v7819_v38, %v7819_v38  ;;  %v8249_v59 = vcombine.low %v7811_v3, %v7819_v38  ;;  %v9023_v62 = vrot.slane %v15956_v30, %v18752_v9  ;;  %v9030_v45 = vrot.slane %v9016_v40, %v18752_v9  ;;  %v17001_v17 = vpop.f32.mrb[95].mxu0 }
 0x1e2   : > { %v9451_v0 = vrot.slane %v9437_v28, %v18752_v9  ;;  %17278 = vmatmul.mubr.msk.f32.gmra.mrb[174].mxu0 %vm1786_vm2, %v8248_v51  ;;  %v3880_v12 = vadd.f32 %v20349_v60, %v19968_v63  ;;  %v7828_v46 = vcombine.high %v15902_v39, %v15902_v39  ;;  %v7835_v21 = vrot.slane %v15902_v39, %v18752_v9  ;;  %v20619_v44 = vpop.f32.mrb[94].mxu1  ;;  %v15903_v39 = vld [vmem:[%s18750_s19 + $0xa8] sm:$0x3f] }
 0x1e3   : > { %v8250_v22 = vcombine.low %v7827_v37, %v7826_v15  ;;  %17280 = vmatprep.mubr.msk.f32.mxu0 %vm18663_vm1, %v23473_v16  ;;  %v8257_v30 = vrot.slane %v8249_v59, %v18752_v9  ;;  %v9031_v3 = vcombine.high %v9023_v62, %v9023_v62  ;;  %v9453_v38 = vcombine.low %v9015_v54, %v9023_v62  ;;  %v17078_v56 = vpop.f32.mrb[95].mxu1  ;;  %v20631_v37 = vld [vmem:[%s18750_s19 + $0xb0] sm:$0xff]  ;;  %v15958_v17 = vld [vmem:[%s18750_s19 + $0xa9] sm:$0x3f] }
 0x1e4   : > { %v9452_v14 = vcombine.low %v9444_v27, %v9451_v0  ;;  %v7842_v63 = vrot.slane %v7828_v46, %v18752_v9  ;;  %v7843_v60 = vcombine.high %v7835_v21, %v7835_v21  ;;  %v20624_v40 = vadd.f32 %v20364_v7, %v3880_v12  ;;  %v15959_v56 = vld [vmem:[%s18750_s19 + $0xb1] sm:$0xff] }
 0x1e5   : > { %v8264_v28 = vrot.slane %v8250_v22, %v18752_v9  ;;  %v9454_v51 = vcombine.low %v9031_v3, %v9030_v45  ;;  %v9461_v27 = vrot.slane %v9453_v38, %v18752_v9  ;;  %v9032_v15 = vcombine.high %v15957_v57, %v15957_v57 }
 0x1e6   : > { %17355 = vmatmul.mubr.msk.f32.gmra.mrb[174].mxu1 %vm1786_vm2, %v9452_v14  ;;  %v9039_v54 = vrot.slane %v15957_v57, %v18752_v9  ;;  %v7844_v59 = vcombine.high %v7842_v63, %v7842_v63  ;;  %v8266_v7 = vcombine.low %v7835_v21, %v7843_v60  ;;  %v3881_v62 = vadd.f32 %v20370_v34, %v19987_v4  ;;  %v20640_v57 = vpop.f32.mrb[96].mxu0 }
 0x1e7   : > { %v8265_v0 = vcombine.low %v8257_v30, %v8264_v28  ;;  %17357 = vmatprep.mubr.msk.f32.mxu1 %vm18663_vm1, %v23473_v16  ;;  %v9468_v22 = vrot.slane %v9454_v51, %v18752_v9  ;;  %v9046_v45 = vrot.slane %v9032_v15, %v18752_v9  ;;  %v7845_v46 = vcombine.high %v15903_v39, %v15903_v39  ;;  %v17004_v34 = vpop.f32.mrb[97].mxu0 }
 0x1e8   : > { %v9047_v12 = vcombine.high %v9039_v54, %v9039_v54  ;;  %v8267_v14 = vcombine.low %v7842_v63, %v7844_v59  ;;  %v8274_v30 = vrot.slane %v8266_v7, %v18752_v9  ;;  %v7852_v21 = vrot.slane %v15903_v39, %v18752_v9  ;;  %v20651_v51 = vpop.f32.mrb[96].mxu1  ;;  %v15905_v34 = vld [vmem:[%s18750_s19 + $0xb8] sm:$0x3f] }
 0x1e9   : > { %17281 = vmatmul.mubr.msk.f32.gmra.mrb[176].mxu0 %vm1786_vm2, %v8265_v0  ;;  %v7868_v4 = vrot.slane %v20631_v37, %v18752_v9  ;;  %v9469_v3 = vcombine.low %v9461_v27, %v9468_v22  ;;  %v9048_v38 = vcombine.high %v9046_v45, %v9046_v45  ;;  %v7859_v60 = vrot.slane %v7845_v46, %v18752_v9  ;;  %v17081_v59 = vpop.f32.mrb[97].mxu1 }
 0x1ea   : > { %17283 = vmatprep.mubr.msk.f32.mxu0 %vm18663_vm1, %v23473_v16  ;;  %v9470_v28 = vcombine.low %v9039_v54, %v9047_v12  ;;  %v8281_v63 = vrot.slane %v8267_v14, %v18752_v9  ;;  %v7860_v15 = vcombine.high %v7852_v21, %v7852_v21  ;;  %v20655_v39 = vadd.f32 %v20385_v2, %v3881_v62  ;;  %v20660_v12 = vpop.f32.mrb[98].mxu0 }
 0x1eb   : > { %v9049_v0 = vcombine.high %v15958_v17, %v15958_v17  ;;  %17358 = vmatmul.mubr.msk.f32.gmra.mrb[176].mxu1 %vm1786_vm2, %v9469_v3  ;;  %v9471_v27 = vcombine.low %v9046_v45, %v9048_v38  ;;  %v8284_v54 = vcombine.low %v7859_v60, %v7868_v4  ;;  %v9056_v22 = vrot.slane %v15958_v17, %v18752_v9  ;;  %v17007_v3 = vpop.f32.mrb[99].mxu0 }
 0x1ec   : > { %v9478_v7 = vrot.slane %v9470_v28, %v18752_v9  ;;  %v8282_v46 = vcombine.low %v8274_v30, %v8281_v63  ;;  %17360 = vmatprep.mubr.msk.f32.mxu1 %vm18663_vm1, %v23473_v16  ;;  %v8283_v14 = vcombine.low %v7852_v21, %v7860_v15  ;;  %v9072_v62 = vrot.slane %v15959_v56, %v18752_v9  ;;  %v20671_v30 = vpop.f32.mrb[98].mxu1  ;;  %v15906_v3 = vld [vmem:[%s18750_s19 + $0xc0] sm:$0xff] }
 0x1ed   : > { %v9063_v2 = vrot.slane %v9049_v0, %v18752_v9  ;;  %v9485_v45 = vrot.slane %v9471_v27, %v18752_v9  ;;  %v8298_v38 = vrot.slane %v8284_v54, %v18752_v9  ;;  %v9064_v28 = vcombine.high %v9056_v22, %v9056_v22  ;;  %v15960_v0 = vld [vmem:[%s18750_s19 + $0xb9] sm:$0x3f]  ;;  %v17084_v59 = vpop.f32.mrb[99].mxu1 }
 0x1ee   : > { %v3882_v17 = vadd.f32 %v20399_v6, %v20023_v10  ;;  %17284 = vmatmul.mubr.msk.f32.gmra.mrb[178].mxu0 %vm1786_vm2, %v8282_v46  ;;  %v8291_v21 = vrot.slane %v8283_v14, %v18752_v9  ;;  %v7861_v63 = vcombine.high %v20631_v37, %v20631_v37  ;;  %v7876_v15 = vcombine.high %v7868_v4, %v7868_v4  ;;  %v20684_v46 = vpop.f32.mrb[100].mxu0 }
 0x1ef   : > { %v9488_v60 = vcombine.low %v9063_v2, %v9072_v62  ;;  %v9486_v27 = vcombine.low %v9478_v7, %v9485_v45  ;;  %17286 = vmatprep.mubr.msk.f32.mxu0 %vm18663_vm1, %v23473_v16  ;;  %v9487_v54 = vcombine.low %v9056_v22, %v9064_v28  ;;  %v7885_v10 = vrot.slane %v15905_v34, %v18752_v9  ;;  %v17089_v59 = vpop.f32.mrb[101].mxu0 }
 0x1f0   : > { %v20682_v6 = vadd.f32 %v20409_v55, %v3882_v17  ;;  %v8299_v14 = vcombine.low %v8291_v21, %v8298_v38  ;;  %v7875_v37 = vrot.slane %v7861_v63, %v18752_v9  ;;  %v9065_v4 = vcombine.high %v15959_v56, %v15959_v56  ;;  %v20694_v28 = vpop.f32.mrb[100].mxu1 }
 0x1f1   : > { %v9502_v2 = vrot.slane %v9488_v60, %v18752_v9  ;;  %17361 = vmatmul.mubr.msk.f32.gmra.mrb[178].mxu1 %vm1786_vm2, %v9486_v27  ;;  %v9495_v7 = vrot.slane %v9487_v54, %v18752_v9  ;;  %v9080_v22 = vcombine.high %v9072_v62, %v9072_v62  ;;  %v9089_v45 = vrot.slane %v15960_v0, %v18752_v9  ;;  %v17166_v21 = vpop.f32.mrb[101].mxu1 }
 0x1f2   : > { %23480 = vst [vmem:[#allocation14_spill] sm:$0xff] %v20682_v6  ;;  %v3883_v55 = vadd.f32 %v20423_v24, %v20042_v43  ;;  %17287 = vmatmul.mubr.msk.f32.gmra.mrb[180].mxu0 %vm1786_vm2, %v8299_v14  ;;  %17363 = vmatprep.mubr.msk.f32.mxu1 %vm18663_vm1, %v23473_v16  ;;  %v7877_v56 = vcombine.high %v7875_v37, %v7875_v37  ;;  %v20703_v24 = vpop.f32.mrb[102].mxu0  ;;  %v15961_v6 = vld [vmem:[%s18750_s19 + $0xc1] sm:$0xff] }
 0x1f3   : > { %v8300_v38 = vcombine.low %v7876_v15, %v7875_v37  ;;  %v9079_v17 = vrot.slane %v9065_v4, %v18752_v9  ;;  %v9503_v60 = vcombine.low %v9495_v7, %v9502_v2  ;;  %17289 = vmatprep.mubr.msk.f32.mxu0 %vm18663_vm1, %v23473_v16  ;;  %v7878_v62 = vcombine.high %v15905_v34, %v15905_v34  ;;  %v17092_v15 = vpop.f32.mrb[103].mxu0 }
 0x1f4   : > { %v7893_v63 = vcombine.high %v7885_v10, %v7885_v10  ;;  %v7901_v43 = vrot.slane %v15906_v3, %v18752_v9  ;;  %v8301_v27 = vcombine.low %v7877_v56, %v7885_v10  ;;  %v20710_v34 = vadd.f32 %v20433_v58, %v3883_v55  ;;  %v20712_v7 = vpop.f32.mrb[102].mxu1 }
 0x1f5   : > { %v8308_v54 = vrot.slane %v8300_v38, %v18752_v9  ;;  %v9081_v14 = vcombine.high %v9079_v17, %v9079_v17  ;;  %v9504_v59 = vcombine.low %v9080_v22, %v9079_v17  ;;  %17364 = vmatmul.mubr.msk.f32.gmra.mrb[180].mxu1 %vm1786_vm2, %v9503_v60  ;;  %v7892_v2 = vrot.slane %v7878_v62, %v18752_v9  ;;  %v17169_v17 = vpop.f32.mrb[103].mxu1 }
 0x1f6   : > { %v7909_v37 = vcombine.high %v7901_v43, %v7901_v43  ;;  %23481 = vst [vmem:[#allocation15_spill] sm:$0xff] %v20710_v34  ;;  %v9082_v4 = vcombine.high %v15960_v0, %v15960_v0  ;;  %v8315_v10 = vrot.slane %v8301_v27, %v18752_v9  ;;  %17366 = vmatprep.mubr.msk.f32.mxu1 %vm18663_vm1, %v23473_v16  ;;  %v15907_v0 = vld [vmem:[%s18750_s19 + $0xc8] sm:$0x3f] }
 0x1f7   : > { %v9505_v22 = vcombine.low %v9081_v14, %v9089_v45  ;;  %v9512_v56 = vrot.slane %v9504_v59, %v18752_v9  ;;  %v9097_v38 = vcombine.high %v9089_v45, %v9089_v45  ;;  %v8317_v21 = vcombine.low %v7893_v63, %v7892_v2 }
 0x1f8   : > { %v8318_v60 = vcombine.low %v7901_v43, %v7909_v37  ;;  %v9096_v62 = vrot.slane %v9082_v4, %v18752_v9  ;;  %v9105_v58 = vrot.slane %v15961_v6, %v18752_v9  ;;  %v8316_v55 = vcombine.low %v8308_v54, %v8315_v10  ;;  %v15962_v43 = vld [vmem:[%s18750_s19 + $0xc9] sm:$0x3f]  ;;  %v20727_v2 = vpop.f32.mrb[104].mxu0 }
 0x1f9   : > { %v9519_v27 = vrot.slane %v9505_v22, %v18752_v9  ;;  %v3884_v15 = vadd.f32 %v20443_v52, %v20069_v48  ;;  %v7894_v14 = vcombine.high %v15906_v3, %v15906_v3  ;;  %v8325_v59 = vrot.slane %v8317_v21, %v18752_v9  ;;  %v15908_v48 = vld [vmem:[%s18750_s19 + $0xd0] sm:$0xff]  ;;  %v17095_v52 = vpop.f32.mrb[105].mxu0 }
 0x1fa   : > { %v8332_v45 = vrot.slane %v8318_v60, %v18752_v9  ;;  %v9113_v17 = vcombine.high %v9105_v58, %v9105_v58  ;;  %v9521_v63 = vcombine.low %v9097_v38, %v9096_v62  ;;  %17290 = vmatmul.mubr.msk.f32.gmra.mrb[182].mxu0 %vm1786_vm2, %v8316_v55  ;;  %v7918_v4 = vrot.slane %v15907_v0, %v18752_v9  ;;  %v20739_v60 = vpop.f32.mrb[104].mxu1 }
 0x1fb   : > { %v9520_v37 = vcombine.low %v9512_v56, %v9519_v27  ;;  %v7908_v54 = vrot.slane %v7894_v14, %v18752_v9  ;;  %v20733_v10 = vadd.f32 %v20454_v1, %v3884_v15  ;;  %17292 = vmatprep.mubr.msk.f32.mxu0 %vm18663_vm1, %v23473_v16  ;;  %v9098_v21 = vcombine.high %v15961_v6, %v15961_v6  ;;  %v23483_v1 = vld [vmem:[#allocation4_spill] sm:$0xff]  ;;  %v17172_v15 = vpop.f32.mrb[105].mxu1 }
 0x1fc   : > { %v8333_v3 = vcombine.low %v8325_v59, %v8332_v45  ;;  %v9522_v22 = vcombine.low %v9105_v58, %v9113_v17  ;;  %v9529_v38 = vrot.slane %v9521_v63, %v18752_v9  ;;  %v7926_v62 = vcombine.high %v7918_v4, %v7918_v4  ;;  %v20749_v45 = vpop.f32.mrb[106].mxu0 }
 0x1fd   : > { %23482 = vst [vmem:[#allocation16_spill] sm:$0xff] %v20733_v10  ;;  %17367 = vmatmul.mubr.msk.f32.gmra.mrb[182].mxu1 %vm1786_vm2, %v9520_v37  ;;  %v7910_v56 = vcombine.high %v7908_v54, %v7908_v54  ;;  %v9122_v55 = vrot.slane %v15962_v43, %v18752_v9  ;;  %v3885_v27 = vadd.f32 %v20475_v47, %v23483_v1  ;;  %v17098_v52 = vpop.f32.mrb[107].mxu0 }
 0x1fe   : > { %17369 = vmatprep.mubr.msk.f32.mxu1 %vm18663_vm1, %v23473_v16  ;;  %v9536_v58 = vrot.slane %v9522_v22, %v18752_v9  ;;  %v9112_v6 = vrot.slane %v9098_v21, %v18752_v9  ;;  %v7911_v14 = vcombine.high %v15907_v0, %v15907_v0  ;;  %v7927_v59 = vcombine.high %v15908_v48, %v15908_v48  ;;  %v15963_v21 = vld [vmem:[%s18750_s19 + $0xd1] sm:$0xff]  ;;  %v20758_v10 = vpop.f32.mrb[106].mxu1 }
 0x1ff   : > { %17293 = vmatmul.mubr.msk.f32.gmra.mrb[184].mxu0 %vm1786_vm2, %v8333_v3  ;;  %v8334_v17 = vcombine.low %v7908_v54, %v7910_v56  ;;  %v8335_v63 = vcombine.low %v7918_v4, %v7926_v62  ;;  %v9130_v37 = vcombine.high %v9122_v55, %v9122_v55  ;;  %v7934_v47 = vrot.slane %v15908_v48, %v18752_v9  ;;  %v17175_v56 = vpop.f32.mrb[107].mxu1 }
 0x200   : > { %v9537_v1 = vcombine.low %v9529_v38, %v9536_v58  ;;  %17295 = vmatprep.mubr.msk.f32.mxu0 %vm18663_vm1, %v23473_v16  ;;  %v9114_v22 = vcombine.high %v9112_v6, %v9112_v6  ;;  %v7925_v15 = vrot.slane %v7911_v14, %v18752_v9  ;;  %v7941_v0 = vrot.slane %v7927_v59, %v18752_v9 }
 0x201   : > { %v8342_v54 = vrot.slane %v8334_v17, %v18752_v9  ;;  %v8349_v4 = vrot.slane %v8335_v63, %v18752_v9  ;;  %v9539_v3 = vcombine.low %v9122_v55, %v9130_v37  ;;  %v7942_v48 = vcombine.high %v7934_v47, %v7934_v47  ;;  %v15909_v55 = vld [vmem:[%s18750_s19 + $0xd8] sm:$0x3f] }
 0x202   : > { %17370 = vmatmul.mubr.msk.f32.gmra.mrb[184].mxu1 %vm1786_vm2, %v9537_v1  ;;  %v9538_v38 = vcombine.low %v9112_v6, %v9114_v22  ;;  %v8351_v62 = vcombine.low %v7925_v15, %v7934_v47  ;;  %v20764_v58 = vadd.f32 %v20486_v13, %v3885_v27  ;;  %v9115_v14 = vcombine.high %v15962_v43, %v15962_v43  ;;  %v20774_v27 = vpop.f32.mrb[108].mxu0  ;;  %v23485_v22 = vld [vmem:[#allocation5_spill] sm:$0xff] }
 0x203   : > { %v8350_v59 = vcombine.low %v8342_v54, %v8349_v4  ;;  %17372 = vmatprep.mubr.msk.f32.mxu1 %vm18663_vm1, %v23473_v16  ;;  %v9553_v17 = vrot.slane %v9539_v3, %v18752_v9  ;;  %v8352_v52 = vcombine.low %v7942_v48, %v7941_v0  ;;  %v9131_v63 = vcombine.high %v15963_v21, %v15963_v21  ;;  %v15964_v4 = vld [vmem:[%s18750_s19 + $0xd9] sm:$0x3f]  ;;  %v17101_v3 = vpop.f32.mrb[109].mxu0 }
 0x204   : > { %23484 = vst [vmem:[#allocation4_spill] sm:$0xff] %v20764_v58  ;;  %v9546_v37 = vrot.slane %v9538_v38, %v18752_v9  ;;  %v8359_v1 = vrot.slane %v8351_v62, %v18752_v9  ;;  %v9129_v6 = vrot.slane %v9115_v14, %v18752_v9  ;;  %v9138_v13 = vrot.slane %v15963_v21, %v18752_v9  ;;  %v20784_v62 = vpop.f32.mrb[108].mxu1  ;;  %v23487_v3 = vld [vmem:[#allocation6_spill] sm:$0xff] }
 0x205   : > { %17296 = vmatmul.mubr.msk.f32.gmra.mrb[186].mxu0 %vm1786_vm2, %v8350_v59  ;;  %v8366_v43 = vrot.slane %v8352_v52, %v18752_v9  ;;  %v9145_v47 = vrot.slane %v9131_v63, %v18752_v9  ;;  %v3886_v15 = vadd.f32 %v20495_v25, %v23485_v22  ;;  %v7943_v54 = vcombine.high %v7941_v0, %v7941_v0  ;;  %v15910_v25 = vld [vmem:[%s18750_s19 + $0xe0] sm:$0xff]  ;;  %v17178_v0 = vpop.f32.mrb[109].mxu1 }
 0x206   : > { %v9554_v48 = vcombine.low %v9546_v37, %v9553_v17  ;;  %17298 = vmatprep.mubr.msk.f32.mxu0 %vm18663_vm1, %v23473_v16  ;;  %v9146_v21 = vcombine.high %v9138_v13, %v9138_v13  ;;  %v9555_v56 = vcombine.low %v9129_v6, %v9138_v13  ;;  %v7944_v38 = vcombine.high %v15909_v55, %v15909_v55  ;;  %v20794_v22 = vpop.f32.mrb[110].mxu0 }
 0x207   : > { %v8367_v14 = vcombine.low %v8359_v1, %v8366_v43  ;;  %v7951_v59 = vrot.slane %v15909_v55, %v18752_v9  ;;  %v20788_v52 = vadd.f32 %v20505_v33, %v3886_v15  ;;  %v9147_v63 = vcombine.high %v9145_v47, %v9145_v47  ;;  %v17104_v43 = vpop.f32.mrb[111].mxu0 }
 0x208   : > { %17373 = vmatmul.mubr.msk.f32.gmra.mrb[186].mxu1 %vm1786_vm2, %v9554_v48  ;;  %v9556_v17 = vcombine.low %v9146_v21, %v9145_v47  ;;  %v9563_v37 = vrot.slane %v9555_v56, %v18752_v9  ;;  %v7958_v6 = vrot.slane %v7944_v38, %v18752_v9  ;;  %v9148_v13 = vcombine.high %v15964_v4, %v15964_v4  ;;  %v15965_v56 = vld [vmem:[%s18750_s19 + $0xe1] sm:$0xff] }
 0x209   : > { %23486 = vst [vmem:[#allocation5_spill] sm:$0xff] %v20788_v52  ;;  %17299 = vmatmul.mubr.msk.f32.gmra.mrb[188].mxu0 %vm1786_vm2, %v8367_v14  ;;  %17375 = vmatprep.mubr.msk.f32.mxu1 %vm18663_vm1, %v23473_v16  ;;  %v7959_v33 = vcombine.high %v7951_v59, %v7951_v59  ;;  %v8368_v55 = vcombine.low %v7943_v54, %v7951_v59  ;;  %v15911_v52 = vld [vmem:[%s18750_s19 + $0xe8] sm:$0x3f] }
 0x20a   : > { %v9155_v1 = vrot.slane %v15964_v4, %v18752_v9  ;;  %v9570_v47 = vrot.slane %v9556_v17, %v18752_v9  ;;  %17301 = vmatprep.mubr.msk.f32.mxu0 %vm18663_vm1, %v23473_v16  ;;  %v9162_v15 = vrot.slane %v9148_v13, %v18752_v9  ;;  %v3887_v48 = vadd.f32 %v20519_v50, %v23487_v3  ;;  %v20808_v4 = vpop.f32.mrb[110].mxu1 }
 0x20b   : > { %v7960_v21 = vcombine.high %v15910_v25, %v15910_v25  ;;  %v8369_v38 = vcombine.low %v7959_v33, %v7958_v6  ;;  %v8376_v14 = vrot.slane %v8368_v55, %v18752_v9  ;;  %v7967_v17 = vrot.slane %v15910_v25, %v18752_v9  ;;  %v17181_v50 = vpop.f32.mrb[111].mxu1 }
 0x20c   : > { %v9163_v54 = vcombine.high %v9155_v1, %v9155_v1  ;;  %v9572_v59 = vcombine.low %v9147_v63, %v9155_v1  ;;  %v9571_v0 = vcombine.low %v9563_v37, %v9570_v47  ;;  %v20813_v13 = vadd.f32 %v20528_v29, %v3887_v48  ;;  %v23489_v1 = vld [vmem:[#allocation7_spill] sm:$0xff]  ;;  %v15912_v29 = vld [vmem:[%s18750_s19 + $0xf0] sm:$0xff] }
 0x20d   : > { %v7974_v43 = vrot.slane %v7960_v21, %v18752_v9  ;;  %v8383_v3 = vrot.slane %v8369_v38, %v18752_v9  ;;  %v9164_v55 = vcombine.high %v15965_v56, %v15965_v56  ;;  %v7975_v63 = vcombine.high %v7967_v17, %v7967_v17 }
 0x20e   : > { %23488 = vst [vmem:[#allocation6_spill] sm:$0xff] %v20813_v13  ;;  %v9573_v6 = vcombine.low %v9163_v54, %v9162_v15  ;;  %v9580_v33 = vrot.slane %v9572_v59, %v18752_v9  ;;  %17376 = vmatmul.mubr.msk.f32.gmra.mrb[188].mxu1 %vm1786_vm2, %v9571_v0  ;;  %v9171_v25 = vrot.slane %v15965_v56, %v18752_v9  ;;  %v20827_v54 = vpop.f32.mrb[112].mxu0  ;;  %v15966_v13 = vld [vmem:[%s18750_s19 + $0xe9] sm:$0x3f] }
 0x20f   : > { %v7976_v37 = vcombine.high %v7974_v43, %v7974_v43  ;;  %v3888_v47 = vadd.f32 %v20536_v41, %v23489_v1  ;;  %v8384_v48 = vcombine.low %v8376_v14, %v8383_v3  ;;  %17378 = vmatprep.mubr.msk.f32.mxu1 %vm18663_vm1, %v23473_v16  ;;  %v9178_v21 = vrot.slane %v9164_v55, %v18752_v9  ;;  %v17107_v41 = vpop.f32.mrb[113].mxu0  ;;  %v20831_v1 = vpop.f32.mrb[112].mxu1 }
 0x210   : > { %v9587_v15 = vrot.slane %v9573_v6, %v18752_v9  ;;  %v7977_v38 = vcombine.high %v15911_v52, %v15911_v52  ;;  %v8385_v59 = vcombine.low %v7967_v17, %v7975_v63  ;;  %v9179_v50 = vcombine.high %v9171_v25, %v9171_v25  ;;  %v17184_v58 = vpop.f32.mrb[113].mxu1 }
 0x211   : > { %v8386_v0 = vcombine.low %v7974_v43, %v7976_v37  ;;  %v7984_v56 = vrot.slane %v15911_v52, %v18752_v9  ;;  %17302 = vmatmul.mubr.msk.f32.gmra.mrb[190].mxu0 %vm1786_vm2, %v8384_v48  ;;  %v9180_v3 = vcombine.high %v9178_v21, %v9178_v21  ;;  %v8000_v55 = vrot.slane %v15912_v29, %v18752_v9  ;;  %v15967_v37 = vld [vmem:[%s18750_s19 + $0xf1] sm:$0xff] }
 0x212   : > { %v9588_v14 = vcombine.low %v9580_v33, %v9587_v15  ;;  %v7991_v6 = vrot.slane %v7977_v38, %v18752_v9  ;;  %17304 = vmatprep.mubr.msk.f32.mxu0 %vm18663_vm1, %v23473_v16  ;;  %v8393_v17 = vrot.slane %v8385_v59, %v18752_v9  ;;  %v9589_v43 = vcombine.low %v9171_v25, %v9179_v50 }
 0x213   : > { %v8400_v52 = vrot.slane %v8386_v0, %v18752_v9  ;;  %v7992_v63 = vcombine.high %v7984_v56, %v7984_v56  ;;  %v9590_v33 = vcombine.low %v9178_v21, %v9180_v3  ;;  %v20843_v15 = vadd.f32 %v20550_v19, %v3888_v47  ;;  %v15913_v0 = vld [vmem:[%s18750_s19 + $0xf8] sm:$0x3f]  ;;  %v20854_v47 = vpop.f32.mrb[114].mxu0 }
 0x214   : > { %17379 = vmatmul.mubr.msk.f32.gmra.mrb[190].mxu1 %vm1786_vm2, %v9588_v14  ;;  %v8403_v48 = vcombine.low %v7991_v6, %v8000_v55  ;;  %v9181_v38 = vcombine.high %v15966_v13, %v15966_v13  ;;  %v9597_v59 = vrot.slane %v9589_v43, %v18752_v9  ;;  %v9188_v25 = vrot.slane %v15966_v13, %v18752_v9  ;;  %v20861_v43 = vpop.f32.mrb[114].mxu1 }
 0x215   : > { %23490 = vst [vmem:[#allocation7_spill] sm:$0xff] %v20843_v15  ;;  %v8401_v58 = vcombine.low %v8393_v17, %v8400_v52  ;;  %17381 = vmatprep.mubr.msk.f32.mxu1 %vm18663_vm1, %v23473_v16  ;;  %v8402_v41 = vcombine.low %v7984_v56, %v7992_v63  ;;  %v9604_v50 = vrot.slane %v9590_v33, %v18752_v9  ;;  %v15968_v17 = vld [vmem:[%s18750_s19 + $0xf9] sm:$0x3f]  ;;  %v17110_v52 = vpop.f32.mrb[115].mxu0 }
 0x216   : > { %v8417_v21 = vrot.slane %v8403_v48, %v18752_v9  ;;  %v9195_v14 = vrot.slane %v9181_v38, %v18752_v9  ;;  %v9204_v19 = vrot.slane %v15967_v37, %v18752_v9  ;;  %v9196_v6 = vcombine.high %v9188_v25, %v9188_v25 }
 0x217   : > { %17305 = vmatmul.mubr.msk.f32.gmra.mrb[192].mxu0 %vm1786_vm2, %v8401_v58  ;;  %v8410_v3 = vrot.slane %v8402_v41, %v18752_v9  ;;  %v3889_v56 = vadd.f32 %v20562_v42, %v20206_v18  ;;  %v7993_v13 = vcombine.high %v15912_v29, %v15912_v29  ;;  %v9605_v63 = vcombine.low %v9597_v59, %v9604_v50  ;;  %v17187_v58 = vpop.f32.mrb[115].mxu1 }
 0x218   : > { %17307 = vmatprep.mubr.msk.f32.mxu0 %vm18663_vm1, %v23473_v16  ;;  %v9607_v33 = vcombine.low %v9195_v14, %v9204_v19  ;;  %v8008_v48 = vcombine.high %v8000_v55, %v8000_v55  ;;  %v8017_v38 = vrot.slane %v15913_v0, %v18752_v9  ;;  %v9606_v41 = vcombine.low %v9188_v25, %v9196_v6  ;;  %v20873_v14 = vpop.f32.mrb[116].mxu0 }
 0x219   : > { %v8418_v15 = vcombine.low %v8410_v3, %v8417_v21  ;;  %v8007_v34 = vrot.slane %v7993_v13, %v18752_v9  ;;  %v20868_v18 = vadd.f32 %v20577_v31, %v3889_v56  ;;  %17382 = vmatmul.mubr.msk.f32.gmra.mrb[192].mxu1 %vm1786_vm2, %v9605_v63  ;;  %v9197_v29 = vcombine.high %v15967_v37, %v15967_v37  ;;  %v17113_v21 = vpop.f32.mrb[117].mxu0  ;;  %v15996_v63 = vld [vmem:[%s18750_s19 + $0x22] sm:$0xff] }
 0x21a   : > { %v9621_v42 = vrot.slane %v9607_v33, %v18752_v9  ;;  %v9212_v59 = vcombine.high %v9204_v19, %v9204_v19  ;;  %v9221_v50 = vrot.slane %v15968_v17, %v18752_v9  ;;  %17384 = vmatprep.mubr.msk.f32.mxu1 %vm18663_vm1, %v23473_v16  ;;  %v9614_v55 = vrot.slane %v9606_v41, %v18752_v9  ;;  %v20886_v33 = vpop.f32.mrb[116].mxu1 }
 0x21b   : > { %17308 = vmatmul.mubr.msk.f32.gmra.mrb[194].mxu0 %vm1786_vm2, %v8418_v15  ;;  %v8009_v31 = vcombine.high %v8007_v34, %v8007_v34  ;;  %v8419_v25 = vcombine.low %v8008_v48, %v8007_v34  ;;  %v9211_v37 = vrot.slane %v9197_v29, %v18752_v9  ;;  %v3890_v19 = vadd.f32 %v20589_v36, %v20224_v5  ;;  %v17190_v29 = vpop.f32.mrb[117].mxu1 }
 0x21c   : > { %17310 = vmatprep.mubr.msk.f32.mxu0 %vm18663_vm1, %v23473_v16  ;;  %v8010_v3 = vcombine.high %v15913_v0, %v15913_v0  ;;  %v8025_v6 = vcombine.high %v8017_v38, %v8017_v38  ;;  %v9622_v56 = vcombine.low %v9614_v55, %v9621_v42  ;;  %v9214_v52 = vcombine.high %v15968_v17, %v15968_v17  ;;  %v23491_v17 = vld [vmem:[#allocation8_spill] sm:$0xff]  ;;  %v15999_v29 = vld [vmem:[%s18750_s19 + $0x3a] sm:$0x3f] }
 0x21d   : > { %v8420_v15 = vcombine.low %v8009_v31, %v8017_v38  ;;  %v8427_v13 = vrot.slane %v8419_v25, %v18752_v9  ;;  %v9213_v34 = vcombine.high %v9211_v37, %v9211_v37  ;;  %v9623_v48 = vcombine.low %v9212_v59, %v9211_v37  ;;  %v15997_v31 = vld [vmem:[%s18750_s19 + $0x2a] sm:$0x3f] }
 0x21e   : > { %v8024_v58 = vrot.slane %v8010_v3, %v18752_v9  ;;  %v20890_v41 = vadd.f32 %v20595_v11, %v3890_v19  ;;  %17385 = vmatmul.mubr.msk.f32.gmra.mrb[194].mxu1 %vm1786_vm2, %v9622_v56  ;;  %v9228_v36 = vrot.slane %v9214_v52, %v18752_v9  ;;  %v9229_v0 = vcombine.high %v9221_v50, %v9221_v50  ;;  %v15998_v3 = vld [vmem:[%s18750_s19 + $0x32] sm:$0xff]  ;;  %v20906_v56 = vpop.f32.mrb[118].mxu0 }
 0x21f   : > { %v8434_v5 = vrot.slane %v8420_v15, %v18752_v9  ;;  %v3891_v38 = vadd.f32 %v20609_v32, %v23491_v17  ;;  %17387 = vmatprep.mubr.msk.f32.mxu1 %vm18663_vm1, %v23473_v16  ;;  %v9624_v42 = vcombine.low %v9213_v34, %v9221_v50  ;;  %v9631_v59 = vrot.slane %v9623_v48, %v18752_v9  ;;  %v20913_v34 = vpop.f32.mrb[118].mxu1 }
 0x220   : > { %v8436_v11 = vcombine.low %v8025_v6, %v8024_v58  ;;  %v9972_v55 = vcombine.high %v15996_v63, %v15996_v63  ;;  %v9640_v21 = vcombine.low %v9229_v0, %v9228_v36  ;;  %v9979_v37 = vrot.slane %v15996_v63, %v18752_v9  ;;  %v23492_v6 = vld [vmem:[#allocation9_spill] sm:$0xff] }
 0x221   : > { %v8435_v25 = vcombine.low %v8427_v13, %v8434_v5  ;;  %v20903_v19 = vadd.f32 %v20619_v44, %v3891_v38  ;;  %v9638_v32 = vrot.slane %v9624_v42, %v18752_v9  ;;  %v3892_v52 = vadd.f32 %v20640_v57, %v23492_v6  ;;  %v17116_v13 = vpop.f32.mrb[119].mxu0  ;;  %v17193_v5 = vpop.f32.mrb[119].mxu1 }
 0x222   : > { %v8443_v50 = vrot.slane %v8436_v11, %v18752_v9  ;;  %v9986_v15 = vrot.slane %v9972_v55, %v18752_v9  ;;  %v9647_v44 = vrot.slane %v9640_v21, %v18752_v9  ;;  %v9987_v63 = vcombine.high %v9979_v37, %v9979_v37  ;;  %v23493_v55 = vld [vmem:[#allocation10_spill] sm:$0xff] }
 0x223   : > { %17311 = vmatmul.mubr.msk.f32.gmra.mrb[196].mxu0 %vm1786_vm2, %v8435_v25  ;;  %v9989_v48 = vcombine.high %v15997_v31, %v15997_v31  ;;  %v9996_v58 = vrot.slane %v15997_v31, %v18752_v9  ;;  %v9639_v36 = vcombine.low %v9631_v59, %v9638_v32  ;;  %v10012_v57 = vrot.slane %v15998_v3, %v18752_v9  ;;  %v20928_v25 = vpop.f32.mrb[120].mxu0 }
 0x224   : > { %17313 = vmatprep.mubr.msk.f32.mxu0 %vm18663_vm1, %v23473_v16  ;;  %v9988_v0 = vcombine.high %v9986_v15, %v9986_v15  ;;  %v20923_v17 = vadd.f32 %v20651_v51, %v3892_v52  ;;  %v10436_v38 = vcombine.low %v9979_v37, %v9987_v63  ;;  %v3893_v31 = vadd.f32 %v20660_v12, %v23493_v55  ;;  %v17119_v13 = vpop.f32.mrb[121].mxu0  ;;  %v16000_v12 = vld [vmem:[%s18750_s19 + $0x42] sm:$0xff]  ;;  %v20937_v63 = vpop.f32.mrb[120].mxu1 }
 0x225   : > { %v10003_v42 = vrot.slane %v9989_v48, %v18752_v9  ;;  %v10004_v11 = vcombine.high %v9996_v58, %v9996_v58  ;;  %17388 = vmatmul.mubr.msk.f32.gmra.mrb[196].mxu1 %vm1786_vm2, %v9639_v36  ;;  %v10005_v21 = vcombine.high %v15998_v3, %v15998_v3  ;;  %v10020_v32 = vcombine.high %v10012_v57, %v10012_v57  ;;  %v23494_v48 = vld [vmem:[#allocation11_spill] sm:$0xff]  ;;  %v17196_v36 = vpop.f32.mrb[121].mxu1 }
 0x226   : > { %v10437_v59 = vcombine.low %v9986_v15, %v9988_v0  ;;  %v10029_v6 = vrot.slane %v15999_v29, %v18752_v9  ;;  %17390 = vmatprep.mubr.msk.f32.mxu1 %vm18663_vm1, %v23473_v16  ;;  %v10444_v51 = vrot.slane %v10436_v38, %v18752_v9  ;;  %v6278_v5 = vadd.f32 %v20684_v46, %v23494_v48 }
 0x227   : > { %17314 = vmatmul.mubr.msk.f32.gmra.mrb[198].mxu0 %vm1786_vm2, %v8443_v50  ;;  %v10453_v37 = vcombine.low %v9996_v58, %v10004_v11  ;;  %v10454_v52 = vcombine.low %v10003_v42, %v10012_v57  ;;  %v10019_v15 = vrot.slane %v10005_v21, %v18752_v9  ;;  %v20944_v50 = vadd.f32 %v20671_v30, %v3893_v31  ;;  %v16001_v30 = vld [vmem:[%s18750_s19 + $0x4a] sm:$0x3f] }
 0x228   : > { %17395 = vmatprep.mubr.msk.f32.mxu0 %vm18663_vm1, %v23473_v16  ;;  %v10451_v3 = vrot.slane %v10437_v59, %v18752_v9  ;;  %v10022_v57 = vcombine.high %v15999_v29, %v15999_v29  ;;  %v10037_v38 = vcombine.high %v10029_v6, %v10029_v6  ;;  %v10045_v59 = vrot.slane %v16000_v12, %v18752_v9  ;;  %v20959_v29 = vpop.f32.mrb[122].mxu0 }
 0x229   : > { %v10461_v58 = vrot.slane %v10453_v37, %v18752_v9  ;;  %v10468_v0 = vrot.slane %v10454_v52, %v18752_v9  ;;  %17391 = vmatmul.mubr.msk.f32.gmra.mrb[198].mxu1 %vm1786_vm2, %v9647_v44  ;;  %v10021_v11 = vcombine.high %v10019_v15, %v10019_v15  ;;  %v10470_v55 = vcombine.low %v10020_v32, %v10019_v15  ;;  %v16002_v52 = vld [vmem:[%s18750_s19 + $0x52] sm:$0xff] }
 0x22a   : > { %v10452_v42 = vcombine.low %v10444_v51, %v10451_v3  ;;  %v10036_v21 = vrot.slane %v10022_v57, %v18752_v9  ;;  %v20955_v46 = vadd.f32 %v20694_v28, %v6278_v5  ;;  %v6279_v13 = vadd.f32 %v20703_v24, %v20358_v35  ;;  %12387 = vmatprep.mubr.f32.mxu1 %v23473_v16  ;;  %v17122_v3 = vpop.f32.mrb[123].mxu0 }
 0x22b   : > { %v10469_v31 = vcombine.low %v10461_v58, %v10468_v0  ;;  %v10471_v44 = vcombine.low %v10021_v11, %v10029_v6  ;;  %v10478_v32 = vrot.slane %v10470_v55, %v18752_v9  ;;  %v10053_v51 = vcombine.high %v10045_v59, %v10045_v59  ;;  %v20973_v6 = vpop.f32.mrb[122].mxu1  ;;  %v16003_v55 = vld [vmem:[%s18750_s19 + $0x5a] sm:$0x3f] }
 0x22c   : > { %17396 = vmatmul.mubr.msk.f32.vlgmr.msra.gmra.mrb[200].mxu0 %vm1786_vm2, %v10452_v42  ;;  %v10038_v37 = vcombine.high %v16000_v12, %v16000_v12  ;;  %v10487_v28 = vcombine.low %v10037_v38, %v10036_v21  ;;  %v10062_v15 = vrot.slane %v16001_v30, %v18752_v9  ;;  %v20969_v35 = vadd.f32 %v20712_v7, %v6279_v13  ;;  %v17199_v58 = vpop.f32.mrb[123].mxu1 }
 0x22d   : > { %17398 = vmatprep.mubr.msk.f32.mxu0 %vm18663_vm1, %v23473_v16  ;;  %v6280_v24 = vadd.f32 %v20727_v2, %v20389_v23  ;;  %v10485_v48 = vrot.slane %v10471_v44, %v18752_v9  ;;  %v10488_v12 = vcombine.low %v10045_v59, %v10053_v51  ;;  %v10055_v36 = vcombine.high %v16001_v30, %v16001_v30  ;;  %v20983_v59 = vpop.f32.mrb[124].mxu0 }
 0x22e   : > { %v10052_v5 = vrot.slane %v10038_v37, %v18752_v9  ;;  %v10495_v0 = vrot.slane %v10487_v28, %v18752_v9  ;;  %v10070_v57 = vcombine.high %v10062_v15, %v10062_v15  ;;  %v10071_v38 = vcombine.high %v16002_v52, %v16002_v52 }
 0x22f   : > { %v10078_v7 = vrot.slane %v16002_v52, %v18752_v9  ;;  %v10486_v23 = vcombine.low %v10478_v32, %v10485_v48  ;;  %v10502_v2 = vrot.slane %v10488_v12, %v18752_v9  ;;  %v10069_v11 = vrot.slane %v10055_v36, %v18752_v9  ;;  %v16004_v52 = vld [vmem:[%s18750_s19 + $0x62] sm:$0xff]  ;;  %v20994_v3 = vpop.f32.mrb[124].mxu1 }
 0x230   : > { %17399 = vmatmul.mubr.msk.f32.gmra.mrb[202].mxu0 %vm1786_vm2, %v10469_v31  ;;  %v10054_v42 = vcombine.high %v10052_v5, %v10052_v5  ;;  %v10505_v30 = vcombine.low %v10062_v15, %v10070_v57  ;;  %v10085_v21 = vrot.slane %v10071_v38, %v18752_v9  ;;  %v20989_v44 = vadd.f32 %v20739_v60, %v6280_v24  ;;  %v17125_v31 = vpop.f32.mrb[125].mxu0  ;;  %v17202_v36 = vpop.f32.mrb[125].mxu1  ;;  %v16005_v57 = vld [vmem:[%s18750_s19 + $0x6a] sm:$0x3f] }
 0x231   : > { %17401 = vmatprep.mubr.msk.f32.mxu0 %vm18663_vm1, %v23473_v16  ;;  %v10086_v13 = vcombine.high %v10078_v7, %v10078_v7  ;;  %v10521_v51 = vcombine.low %v10069_v11, %v10078_v7  ;;  %v6281_v37 = vadd.f32 %v20749_v45, %v20413_v61  ;;  %v10503_v28 = vcombine.low %v10495_v0, %v10502_v2  ;;  %v23496_v36 = vld [vmem:[#allocation13_spill] sm:$0xff] }
 0x232   : > { %v10504_v32 = vcombine.low %v10052_v5, %v10054_v42  ;;  %v10087_v12 = vcombine.high %v10085_v21, %v10085_v21  ;;  %v10088_v15 = vcombine.high %v16003_v55, %v16003_v55  ;;  %v10519_v24 = vrot.slane %v10505_v30, %v18752_v9  ;;  %v23495_v30 = vld [vmem:[#allocation12_spill] sm:$0xff] }
 0x233   : > { %v10522_v48 = vcombine.low %v10086_v13, %v10085_v21  ;;  %v10095_v5 = vrot.slane %v16003_v55, %v18752_v9  ;;  %v21001_v58 = vadd.f32 %v20758_v10, %v6281_v37  ;;  %v6282_v45 = vadd.f32 %v20774_v27, %v20438_v20  ;;  %v21011_v42 = vpop.f32.mrb[126].mxu0 }
 0x234   : > { %17402 = vmatmul.mubr.msk.f32.gmra.mrb[204].mxu0 %vm1786_vm2, %v10486_v23  ;;  %v10512_v60 = vrot.slane %v10504_v32, %v18752_v9  ;;  %v10102_v61 = vrot.slane %v10088_v15, %v18752_v9  ;;  %v10104_v0 = vcombine.high %v16004_v52, %v16004_v52  ;;  %v10529_v38 = vrot.slane %v10521_v51, %v18752_v9  ;;  %v17128_v27 = vpop.f32.mrb[127].mxu0  ;;  %v21020_v21 = vpop.f32.mrb[126].mxu1  ;;  %v16006_v51 = vld [vmem:[%s18750_s19 + $0x72] sm:$0xff] }
 0x235   : > { %17404 = vmatprep.mubr.msk.f32.mxu0 %vm18663_vm1, %v23473_v16  ;;  %v10103_v7 = vcombine.high %v10095_v5, %v10095_v5  ;;  %v10538_v23 = vcombine.low %v10087_v12, %v10095_v5  ;;  %v10111_v2 = vrot.slane %v16004_v52, %v18752_v9  ;;  %v10536_v10 = vrot.slane %v10522_v48, %v18752_v9  ;;  %v17205_v52 = vpop.f32.mrb[127].mxu1 }
 0x236   : > { %v10118_v11 = vrot.slane %v10104_v0, %v18752_v9  ;;  %v21016_v55 = vadd.f32 %v20784_v62, %v6282_v45  ;;  %v6283_v20 = vadd.f32 %v20794_v22, %v23495_v30  ;;  %v10520_v13 = vcombine.low %v10512_v60, %v10519_v24 }
 0x237   : > { %v10539_v31 = vcombine.low %v10103_v7, %v10102_v61  ;;  %v10119_v32 = vcombine.high %v10111_v2, %v10111_v2  ;;  %v10121_v37 = vcombine.high %v16005_v57, %v16005_v57  ;;  %v10128_v48 = vrot.slane %v16005_v57, %v18752_v9  ;;  %v16007_v57 = vld [vmem:[%s18750_s19 + $0x7a] sm:$0x3f] }
 0x238   : > { %17405 = vmatmul.mubr.msk.f32.gmra.mrb[206].mxu0 %vm1786_vm2, %v10503_v28  ;;  %v10120_v62 = vcombine.high %v10118_v11, %v10118_v11  ;;  %v21028_v22 = vadd.f32 %v20808_v4, %v6283_v20  ;;  %v10546_v12 = vrot.slane %v10538_v23, %v18752_v9  ;;  %v6284_v60 = vadd.f32 %v20827_v54, %v23496_v36 }
 0x239   : > { %17407 = vmatprep.mubr.msk.f32.mxu0 %vm18663_vm1, %v23473_v16  ;;  %v10553_v28 = vrot.slane %v10539_v31, %v18752_v9  ;;  %v10555_v15 = vcombine.low %v10111_v2, %v10119_v32  ;;  %v10135_v5 = vrot.slane %v10121_v37, %v18752_v9  ;;  %v10144_v61 = vrot.slane %v16006_v51, %v18752_v9  ;;  %v21038_v7 = vpop.f32.mrb[128].mxu0 }
 0x23a   : > { %v10556_v24 = vcombine.low %v10118_v11, %v10120_v62  ;;  %v10137_v45 = vcombine.high %v16006_v51, %v16006_v51  ;;  %v10537_v0 = vcombine.low %v10529_v38, %v10536_v10  ;;  %v10136_v4 = vcombine.high %v10128_v48, %v10128_v48  ;;  %v16008_v11 = vld [vmem:[%s18750_s19 + $0x82] sm:$0xff]  ;;  %v17131_v30 = vpop.f32.mrb[129].mxu0  ;;  %v21047_v20 = vpop.f32.mrb[128].mxu1 }
 0x23b   : > { %v10152_v2 = vcombine.high %v10144_v61, %v10144_v61  ;;  %v21044_v54 = vadd.f32 %v20831_v1, %v6284_v60  ;;  %v10554_v27 = vcombine.low %v10546_v12, %v10553_v28  ;;  %v10563_v38 = vrot.slane %v10555_v15, %v18752_v9  ;;  %v17208_v31 = vpop.f32.mrb[129].mxu1 }
 0x23c   : > { %17408 = vmatmul.mubr.msk.f32.gmra.mrb[208].mxu0 %vm1786_vm2, %v10520_v13  ;;  %v10151_v23 = vrot.slane %v10137_v45, %v18752_v9  ;;  %v6285_v10 = vadd.f32 %v20854_v47, %v20517_v49  ;;  %v10154_v13 = vcombine.high %v16007_v57, %v16007_v57  ;;  %v10570_v32 = vrot.slane %v10556_v24, %v18752_v9  ;;  %v16009_v47 = vld [vmem:[%s18750_s19 + $0x8a] sm:$0x3f] }
 0x23d   : > { %17410 = vmatprep.mubr.msk.f32.mxu0 %vm18663_vm1, %v23473_v16  ;;  %v10573_v51 = vcombine.low %v10135_v5, %v10144_v61  ;;  %v10161_v1 = vrot.slane %v16007_v57, %v18752_v9  ;;  %v10572_v52 = vcombine.low %v10128_v48, %v10136_v4  ;;  %v10177_v62 = vrot.slane %v16008_v11, %v18752_v9  ;;  %v21062_v28 = vpop.f32.mrb[130].mxu0 }
 0x23e   : > { %v10153_v37 = vcombine.high %v10151_v23, %v10151_v23  ;;  %v21057_v12 = vadd.f32 %v20861_v43, %v6285_v10  ;;  %v6286_v49 = vadd.f32 %v20873_v14, %v20542_v8  ;;  %v10589_v15 = vcombine.low %v10152_v2, %v10151_v23  ;;  %v17134_v60 = vpop.f32.mrb[131].mxu0  ;;  %v16010_v14 = vld [vmem:[%s18750_s19 + $0x92] sm:$0xff] }
 0x23f   : > { %v10170_v36 = vcombine.high %v16008_v11, %v16008_v11  ;;  %v10168_v48 = vrot.slane %v10154_v13, %v18752_v9  ;;  %v10169_v24 = vcombine.high %v10161_v1, %v10161_v1  ;;  %v10185_v61 = vcombine.high %v10177_v62, %v10177_v62 }
 0x240   : > { %17411 = vmatmul.mubr.msk.f32.gmra.mrb[210].mxu0 %vm1786_vm2, %v10537_v0  ;;  %v21068_v5 = vadd.f32 %v20886_v33, %v6286_v49  ;;  %v10590_v43 = vcombine.low %v10153_v37, %v10161_v1  ;;  %v10194_v45 = vrot.slane %v16009_v47, %v18752_v9  ;;  %v6287_v8 = vadd.f32 %v20906_v56, %v20572_v26  ;;  %v21074_v0 = vpop.f32.mrb[130].mxu1 }
 0x241   : > { %17413 = vmatprep.mubr.msk.f32.mxu0 %vm18663_vm1, %v23473_v16  ;;  %v10571_v4 = vcombine.low %v10563_v38, %v10570_v32  ;;  %v10580_v57 = vrot.slane %v10572_v52, %v18752_v9  ;;  %v10587_v23 = vrot.slane %v10573_v51, %v18752_v9  ;;  %v10184_v33 = vrot.slane %v10170_v36, %v18752_v9  ;;  %v17211_v2 = vpop.f32.mrb[131].mxu1  ;;  %v16011_v38 = vld [vmem:[%s18750_s19 + $0x9a] sm:$0x3f]  ;;  %v16012_v36 = vld [vmem:[%s18750_s19 + $0xa2] sm:$0xff] }
 0x242   : > { %v10597_v11 = vrot.slane %v10589_v15, %v18752_v9  ;;  %v10187_v26 = vcombine.high %v16009_v47, %v16009_v47  ;;  %v10606_v56 = vcombine.low %v10169_v24, %v10168_v48  ;;  %v10203_v30 = vcombine.high %v16010_v14, %v16010_v14 }
 0x243   : > { %v10210_v10 = vrot.slane %v16010_v14, %v18752_v9  ;;  %v10604_v13 = vrot.slane %v10590_v43, %v18752_v9  ;;  %v10607_v31 = vcombine.low %v10177_v62, %v10185_v61  ;;  %v10202_v32 = vcombine.high %v10194_v45, %v10194_v45 }
 0x244   : > { %17414 = vmatmul.mubr.msk.f32.gmra.mrb[212].mxu0 %vm1786_vm2, %v10554_v27  ;;  %v21085_v27 = vadd.f32 %v20913_v34, %v6287_v8  ;;  %v6288_v51 = vadd.f32 %v20928_v25, %v20599_v53  ;;  %v21091_v37 = vpop.f32.mrb[132].mxu0  ;;  %v10588_v1 = vcombine.low %v10580_v57, %v10587_v23  ;;  %v10186_v52 = vcombine.high %v10184_v33, %v10184_v33 }
 0x245   : > { %17416 = vmatprep.mubr.msk.f32.mxu0 %vm18663_vm1, %v23473_v16  ;;  %v17137_v49 = vpop.f32.mrb[133].mxu0  ;;  %v21094_v47 = vpop.f32.mrb[132].mxu1  ;;  %v10201_v34 = vrot.slane %v10187_v26, %v18752_v9  ;;  %v10220_v15 = vcombine.high %v16011_v38, %v16011_v38  ;;  %v10227_v62 = vrot.slane %v16011_v38, %v18752_v9  ;;  %v10217_v53 = vrot.slane %v10203_v30, %v18752_v9  ;;  %v16014_v38 = vld [vmem:[%s18750_s19 + $0xb2] sm:$0xff] }
 0x246   : > { %v17214_v60 = vpop.f32.mrb[133].mxu1  ;;  %v10218_v25 = vcombine.high %v10210_v10, %v10210_v10  ;;  %v21103_v48 = vadd.f32 %v20937_v63, %v6288_v51  ;;  %v6289_v24 = vadd.f32 %v20959_v29, %v20624_v40  ;;  %v10605_v43 = vcombine.low %v10597_v11, %v10604_v13 }
 0x247   : > { %v10614_v61 = vrot.slane %v10606_v56, %v18752_v9  ;;  %v10621_v8 = vrot.slane %v10607_v31, %v18752_v9  ;;  %v10624_v14 = vcombine.low %v10194_v45, %v10202_v32  ;;  %v10623_v57 = vcombine.low %v10184_v33, %v10186_v52 }
 0x248   : > { %17417 = vmatmul.mubr.msk.f32.gmra.mrb[214].mxu0 %vm1786_vm2, %v10571_v4  ;;  %v21109_v4 = vpop.f32.mrb[134].mxu0  ;;  %v10236_v23 = vcombine.high %v16012_v36, %v16012_v36  ;;  %v21113_v2 = vadd.f32 %v20973_v6, %v6289_v24  ;;  %v6290_v63 = vadd.f32 %v20983_v59, %v20655_v39  ;;  %v10219_v29 = vcombine.high %v10217_v53, %v10217_v53  ;;  %v23497_v39 = vld [vmem:[#allocation14_spill] sm:$0xff]  ;;  %v23498_v24 = vld [vmem:[#allocation15_spill] sm:$0xff] }
 0x249   : > { %17419 = vmatprep.mubr.msk.f32.mxu0 %vm18663_vm1, %v23473_v16  ;;  %v17140_v40 = vpop.f32.mrb[135].mxu0  ;;  %v10234_v45 = vrot.slane %v10220_v15, %v18752_v9  ;;  %v10235_v11 = vcombine.high %v10227_v62, %v10227_v62  ;;  %v10640_v56 = vcombine.low %v10201_v34, %v10210_v10  ;;  %v10641_v33 = vcombine.low %v10218_v25, %v10217_v53 }
 0x24a   : > { %v21120_v26 = vpop.f32.mrb[134].mxu1  ;;  %v10243_v6 = vrot.slane %v16012_v36, %v18752_v9  ;;  %v21125_v13 = vadd.f32 %v20994_v3, %v6290_v63  ;;  %v6291_v59 = vadd.f32 %v21011_v42, %v23497_v39  ;;  %v10622_v31 = vcombine.low %v10614_v61, %v10621_v8  ;;  %v23499_v40 = vld [vmem:[#allocation16_spill] sm:$0xff]  ;;  %v16015_v39 = vld [vmem:[%s18750_s19 + $0xba] sm:$0x3f] }
 0x24b   : > { %v17217_v30 = vpop.f32.mrb[135].mxu1  ;;  %v10631_v32 = vrot.slane %v10623_v57, %v18752_v9  ;;  %v10638_v51 = vrot.slane %v10624_v14, %v18752_v9  ;;  %v10250_v10 = vrot.slane %v10236_v23, %v18752_v9  ;;  %v10657_v52 = vcombine.low %v10219_v29, %v10227_v62 }
 0x24c   : > { %17420 = vmatmul.mubr.msk.f32.gmra.mrb[216].mxu0 %vm1786_vm2, %v10588_v1  ;;  %v16013_v1 = vld [vmem:[%s18750_s19 + $0xaa] sm:$0x3f]  ;;  %v10658_v49 = vcombine.low %v10235_v11, %v10234_v45  ;;  %v10648_v34 = vrot.slane %v10640_v56, %v18752_v9  ;;  %v10655_v42 = vrot.slane %v10641_v33, %v18752_v9  ;;  %v10269_v15 = vcombine.high %v16014_v38, %v16014_v38 }
 0x24d   : > { %17422 = vmatprep.mubr.msk.f32.mxu0 %vm18663_vm1, %v23473_v16  ;;  %v10251_v60 = vcombine.high %v10243_v6, %v10243_v6  ;;  %v10253_v53 = vcombine.high %v16013_v1, %v16013_v1  ;;  %v21141_v25 = vadd.f32 %v21020_v21, %v6291_v59  ;;  %v10639_v62 = vcombine.low %v10631_v32, %v10638_v51  ;;  %v23500_v51 = vld [vmem:[#allocation4_spill] sm:$0xff] }
 0x24e   : > { %v21136_v3 = vpop.f32.mrb[136].mxu0  ;;  %v10252_v8 = vcombine.high %v10250_v10, %v10250_v10  ;;  %v10260_v14 = vrot.slane %v16013_v1, %v18752_v9  ;;  %v10665_v23 = vrot.slane %v10657_v52, %v18752_v9  ;;  %v10672_v21 = vrot.slane %v10658_v49, %v18752_v9  ;;  %v16016_v52 = vld [vmem:[%s18750_s19 + $0xc2] sm:$0xff] }
 0x24f   : > { %v17143_v36 = vpop.f32.mrb[137].mxu0  ;;  %v6293_v29 = vadd.f32 %v21062_v28, %v23499_v40  ;;  %v10656_v11 = vcombine.low %v10648_v34, %v10655_v42  ;;  %v10674_v56 = vcombine.low %v10243_v6, %v10251_v60  ;;  %v10267_v33 = vrot.slane %v10253_v53, %v18752_v9 }
 0x250   : > { %17423 = vmatmul.mubr.msk.f32.gmra.mrb[218].mxu0 %vm1786_vm2, %v10605_v43  ;;  %v6292_v43 = vadd.f32 %v21038_v7, %v23498_v24  ;;  %v21145_v61 = vpop.f32.mrb[136].mxu1  ;;  %v10283_v7 = vrot.slane %v10269_v15, %v18752_v9  ;;  %v10276_v30 = vrot.slane %v16014_v38, %v18752_v9  ;;  %v6294_v28 = vadd.f32 %v21091_v37, %v23500_v51  ;;  %v16018_v51 = vld [vmem:[%s18750_s19 + $0xd2] sm:$0xff] }
 0x251   : > { %17425 = vmatprep.mubr.msk.f32.mxu0 %vm18663_vm1, %v23473_v16  ;;  %v17220_v57 = vpop.f32.mrb[137].mxu1  ;;  %v21164_v32 = vadd.f32 %v21074_v0, %v6293_v29  ;;  %v10673_v6 = vcombine.low %v10665_v23, %v10672_v21  ;;  %v10293_v42 = vrot.slane %v16015_v39, %v18752_v9  ;;  %v10682_v15 = vrot.slane %v10674_v56, %v18752_v9 }
 0x252   : > { %v21154_v63 = vadd.f32 %v21047_v20, %v6292_v43  ;;  %v10268_v20 = vcombine.high %v10260_v14, %v10260_v14  ;;  %v10284_v49 = vcombine.high %v10276_v30, %v10276_v30  ;;  %v10285_v34 = vcombine.high %v10283_v7, %v10283_v7  ;;  %v16017_v43 = vld [vmem:[%s18750_s19 + $0xca] sm:$0x3f] }
 0x253   : > { %v6249_v45 = vpop.f32.mrb[138].mxu0  ;;  %v10692_v0 = vcombine.low %v10267_v33, %v10276_v30  ;;  %v10302_v36 = vcombine.high %v16016_v52, %v16016_v52  ;;  %v21174_v60 = vadd.f32 %v21094_v47, %v6294_v28  ;;  %v10309_v24 = vrot.slane %v16016_v52, %v18752_v9  ;;  %v23503_v52 = vld [vmem:[#allocation7_spill] sm:$0xff] }
 0x254   : > { %17426 = vmatmul.mubr.msk.f32.gmra.mrb[220].mxu0 %vm1786_vm2, %v10622_v31  ;;  %v17146_v59 = vpop.f32.mrb[139].mxu0  ;;  %v10675_v31 = vcombine.low %v10250_v10, %v10252_v8  ;;  %v10286_v10 = vcombine.high %v16015_v39, %v16015_v39  ;;  %v10691_v53 = vcombine.low %v10260_v14, %v10268_v20  ;;  %v10708_v47 = vcombine.low %v10284_v49, %v10283_v7 }
 0x255   : > { %17428 = vmatprep.mubr.msk.f32.mxu0 %vm18663_vm1, %v23473_v16  ;;  %v10709_v40 = vcombine.low %v10285_v34, %v10293_v42  ;;  %v10316_v14 = vrot.slane %v10302_v36, %v18752_v9  ;;  %v10326_v33 = vrot.slane %v16017_v43, %v18752_v9  ;;  %v10317_v20 = vcombine.high %v10309_v24, %v10309_v24  ;;  %v16019_v36 = vld [vmem:[%s18750_s19 + $0xda] sm:$0x3f] }
 0x256   : > { %v7453_v1 = vpop.f32.mrb[138].mxu1  ;;  %v10689_v37 = vrot.slane %v10675_v31, %v18752_v9  ;;  %v10300_v29 = vrot.slane %v10286_v10, %v18752_v9  ;;  %v10699_v7 = vrot.slane %v10691_v53, %v18752_v9  ;;  %v10706_v31 = vrot.slane %v10692_v0, %v18752_v9 }
 0x257   : > { %v17223_v38 = vpop.f32.mrb[139].mxu1  ;;  %v10319_v28 = vcombine.high %v16017_v43, %v16017_v43  ;;  %v10334_v10 = vcombine.high %v10326_v33, %v10326_v33  ;;  %v10342_v0 = vrot.slane %v16018_v51, %v18752_v9  ;;  %v10726_v43 = vcombine.low %v10309_v24, %v10317_v20 }
 0x258   : > { %17429 = vmatmul.mubr.msk.f32.gmra.mrb[222].mxu0 %vm1786_vm2, %v10639_v62  ;;  %v23501_v62 = vld [vmem:[#allocation5_spill] sm:$0xff]  ;;  %v10690_v59 = vcombine.low %v10682_v15, %v10689_v37  ;;  %v6297_v38 = vadd.f32 %v6249_v45, %v23503_v52  ;;  %v10335_v15 = vcombine.high %v16018_v51, %v16018_v51 }
 0x259   : > { %17431 = vmatprep.mubr.msk.f32.mxu0 %vm18663_vm1, %v23473_v16  ;;  %v6295_v8 = vadd.f32 %v21109_v4, %v23501_v62  ;;  %v6254_v57 = vpop.f32.mrb[140].mxu0  ;;  %v23502_v4 = vld [vmem:[#allocation6_spill] sm:$0xff]  ;;  %v10743_v24 = vcombine.low %v10326_v33, %v10334_v10 }
 0x25a   : > { %v17149_v23 = vpop.f32.mrb[141].mxu0  ;;  %v7458_v21 = vpop.f32.mrb[140].mxu1  ;;  %v6296_v39 = vadd.f32 %v21136_v3, %v23502_v4  ;;  %v10716_v3 = vrot.slane %v10708_v47, %v18752_v9  ;;  %v21207_v45 = vadd.f32 %v7453_v1, %v6297_v38  ;;  %v6298_v62 = vadd.f32 %v6254_v57, %v20868_v18  ;;  %v16020_v47 = vld [vmem:[%s18750_s19 + $0xe2] sm:$0xff] }
 0x25b   : > { %v17226_v56 = vpop.f32.mrb[141].mxu1  ;;  %v21188_v30 = vadd.f32 %v21120_v26, %v6295_v8  ;;  %v10333_v23 = vrot.slane %v10319_v28, %v18752_v9  ;;  %v10349_v1 = vrot.slane %v10335_v15, %v18752_v9  ;;  %v10740_v57 = vrot.slane %v10726_v43, %v18752_v9  ;;  %v16021_v15 = vld [vmem:[%s18750_s19 + $0xea] sm:$0x3f] }
 0x25c   : > { %17432 = vmatmul.mubr.msk.f32.gmra.mrb[224].mxu0 %vm1786_vm2, %v10656_v11  ;;  %v10301_v11 = vcombine.high %v10293_v42, %v10293_v42  ;;  %v21199_v26 = vadd.f32 %v21145_v61, %v6296_v39  ;;  %v10318_v42 = vcombine.high %v10316_v14, %v10316_v14  ;;  %v10707_v61 = vcombine.low %v10699_v7, %v10706_v31 }
 0x25d   : > { %17434 = vmatprep.mubr.msk.f32.mxu0 %vm18663_vm1, %v23473_v16  ;;  %v10359_v56 = vrot.slane %v16019_v36, %v18752_v9  ;;  %v10368_v7 = vcombine.high %v16020_v47, %v16020_v47  ;;  %v21219_v31 = vadd.f32 %v7458_v21, %v6298_v62  ;;  %v10759_v51 = vcombine.low %v10333_v23, %v10342_v0 }
 0x25e   : > { %v10725_v49 = vcombine.low %v10301_v11, %v10300_v29  ;;  %v10352_v11 = vcombine.high %v16019_v36, %v16019_v36  ;;  %v10742_v39 = vcombine.low %v10316_v14, %v10318_v42  ;;  %v10351_v33 = vcombine.high %v10349_v1, %v10349_v1 }
 0x25f   : > { %v6259_v34 = vpop.f32.mrb[142].mxu0  ;;  %v10367_v52 = vcombine.high %v10359_v56, %v10359_v56  ;;  %v10757_v21 = vrot.slane %v10743_v24, %v18752_v9  ;;  %v10375_v42 = vrot.slane %v16020_v47, %v18752_v9  ;;  %v10382_v10 = vrot.slane %v10368_v7, %v18752_v9 }
 0x260   : > { %17435 = vmatmul.mubr.msk.f32.gmra.mrb[226].mxu0 %vm1786_vm2, %v10673_v6  ;;  %v10723_v6 = vrot.slane %v10709_v40, %v18752_v9  ;;  %v17152_v37 = vpop.f32.mrb[143].mxu0  ;;  %v10733_v29 = vrot.slane %v10725_v49, %v18752_v9  ;;  %v6299_v20 = vadd.f32 %v6259_v34, %v20890_v41  ;;  %v10366_v28 = vrot.slane %v10352_v11, %v18752_v9 }
 0x261   : > { %17437 = vmatprep.mubr.msk.f32.mxu0 %vm18663_vm1, %v23473_v16  ;;  %v7463_v53 = vpop.f32.mrb[142].mxu1 }
 0x262   : > { %v17229_v8 = vpop.f32.mrb[143].mxu1  ;;  %v10724_v40 = vcombine.low %v10716_v3, %v10723_v6  ;;  %v21225_v38 = vadd.f32 %v7463_v53, %v6299_v20  ;;  %v10750_v6 = vrot.slane %v10742_v39, %v18752_v9  ;;  %v10741_v34 = vcombine.low %v10733_v29, %v10740_v57 }
 0x263   : > { %v6264_v4 = vpop.f32.mrb[144].mxu0  ;;  %v10767_v53 = vrot.slane %v10759_v51, %v18752_v9  ;;  %v10777_v43 = vcombine.low %v10367_v52, %v10366_v28  ;;  %v10392_v29 = vrot.slane %v16021_v15, %v18752_v9  ;;  %v10384_v39 = vcombine.high %v10382_v10, %v10382_v10 }
 0x264   : > { %17438 = vmatmul.mubr.msk.f32.gmra.mrb[228].mxu0 %vm1786_vm2, %v10690_v59  ;;  %v10350_v59 = vcombine.high %v10342_v0, %v10342_v0  ;;  %v17155_v18 = vpop.f32.mrb[145].mxu0  ;;  %v6300_v41 = vadd.f32 %v6264_v4, %v20903_v19  ;;  %v16022_v0 = vld [vmem:[%s18750_s19 + $0xf2] sm:$0xff]  ;;  %v10758_v23 = vcombine.low %v10750_v6, %v10757_v21  ;;  %v10383_v4 = vcombine.high %v10375_v42, %v10375_v42  ;;  %v16023_v6 = vld [vmem:[%s18750_s19 + $0xfa] sm:$0x3f] }
 0x265   : > { %17440 = vmatprep.mubr.msk.f32.mxu0 %vm18663_vm1, %v23473_v16  ;;  %v10401_v24 = vcombine.high %v16022_v0, %v16022_v0 }
 0x266   : > { %v7468_v14 = vpop.f32.mrb[144].mxu1  ;;  %v10760_v49 = vcombine.low %v10350_v59, %v10349_v1  ;;  %v10791_v59 = vrot.slane %v10777_v43, %v18752_v9  ;;  %v10793_v52 = vcombine.low %v10375_v42, %v10383_v4  ;;  %v10425_v42 = vrot.slane %v16023_v6, %v18752_v9 }
 0x267   : > { %v17232_v3 = vpop.f32.mrb[145].mxu1  ;;  %v21237_v36 = vadd.f32 %v7468_v14, %v6300_v41  ;;  %v10400_v14 = vcombine.high %v10392_v29, %v10392_v29  ;;  %v10415_v21 = vrot.slane %v10401_v24, %v18752_v9 }
 0x268   : > { %17441 = vmatmul.mubr.msk.f32.gmra.mrb[230].mxu0 %vm1786_vm2, %v10707_v61  ;;  %v10776_v61 = vcombine.low %v10351_v33, %v10359_v56  ;;  %v10774_v47 = vrot.slane %v10760_v49, %v18752_v9  ;;  %v10408_v33 = vrot.slane %v16022_v0, %v18752_v9  ;;  %v10794_v3 = vcombine.low %v10382_v10, %v10384_v39 }
 0x269   : > { %17443 = vmatprep.mubr.msk.f32.mxu0 %vm18663_vm1, %v23473_v16  ;;  %v10810_v0 = vcombine.low %v10392_v29, %v10400_v14  ;;  %v10801_v43 = vrot.slane %v10793_v52, %v18752_v9 }
 0x26a   : > { %v10784_v56 = vrot.slane %v10776_v61, %v18752_v9  ;;  %v10775_v20 = vcombine.low %v10767_v53, %v10774_v47  ;;  %v10416_v61 = vcombine.high %v10408_v33, %v10408_v33 }
 0x26b   : > { %v6269_v37 = vpop.f32.mrb[146].mxu0 }
 0x26c   : > { %17444 = vmatmul.mubr.msk.f32.gmra.mrb[232].mxu0 %vm1786_vm2, %v10724_v40  ;;  %v6301_v19 = vadd.f32 %v6269_v37, %v20923_v17  ;;  %v17158_v62 = vpop.f32.mrb[147].mxu0  ;;  %v7473_v8 = vpop.f32.mrb[146].mxu1  ;;  %v10385_v40 = vcombine.high %v16021_v15, %v16021_v15  ;;  %v10792_v41 = vcombine.low %v10784_v56, %v10791_v59  ;;  %v10827_v24 = vcombine.low %v10416_v61, %v10415_v21 }
 0x26d   : > { %17446 = vmatprep.mubr.msk.f32.mxu0 %vm18663_vm1, %v23473_v16  ;;  %v17235_v11 = vpop.f32.mrb[147].mxu1  ;;  %v10417_v62 = vcombine.high %v10415_v21, %v10415_v21 }
 0x26e   : > { %v21244_v1 = vadd.f32 %v7473_v8, %v6301_v19  ;;  %v10399_v51 = vrot.slane %v10385_v40, %v18752_v9  ;;  %v10808_v19 = vrot.slane %v10794_v3, %v18752_v9  ;;  %v10818_v40 = vrot.slane %v10810_v0, %v18752_v9 }
 0x26f   : > { %v6274_v17 = vpop.f32.mrb[148].mxu0  ;;  %v10418_v11 = vcombine.high %v16023_v6, %v16023_v6 }
 0x270   : > { %17447 = vmatmul.mubr.msk.f32.gmra.mrb[234].mxu0 %vm1786_vm2, %v10741_v34  ;;  %v6302_v18 = vadd.f32 %v6274_v17, %v20944_v50  ;;  %v17161_v57 = vpop.f32.mrb[149].mxu0  ;;  %v7478_v7 = vpop.f32.mrb[148].mxu1  ;;  %v10811_v53 = vcombine.low %v10399_v51, %v10408_v33  ;;  %v10809_v39 = vcombine.low %v10801_v43, %v10808_v19  ;;  %v10828_v17 = vcombine.low %v10417_v62, %v10425_v42 }
 0x271   : > { %17449 = vmatprep.mubr.msk.f32.mxu0 %vm18663_vm1, %v23473_v16  ;;  %v17238_v28 = vpop.f32.mrb[149].mxu1  ;;  %v10835_v57 = vrot.slane %v10827_v24, %v18752_v9 }
 0x272   : > { %v21256_v49 = vadd.f32 %v7478_v7, %v6302_v18  ;;  %v10825_v29 = vrot.slane %v10811_v53, %v18752_v9  ;;  %v10842_v7 = vrot.slane %v10828_v17, %v18752_v9 }
 0x273   : > { %v8563_v50 = vpop.f32.mrb[150].mxu0 }
 0x274   : > { %17450 = vmatmul.mubr.msk.f32.gmra.mrb[236].mxu0 %vm1786_vm2, %v10758_v23  ;;  %v8687_v34 = vadd.f32 %v8563_v50, %v20955_v46  ;;  %v17243_v15 = vpop.f32.mrb[151].mxu0  ;;  %v9767_v37 = vpop.f32.mrb[150].mxu1  ;;  %v10826_v18 = vcombine.low %v10818_v40, %v10825_v29  ;;  %v10843_v6 = vcombine.low %v10835_v57, %v10842_v7 }
 0x275   : > { %17452 = vmatprep.mubr.msk.f32.mxu0 %vm18663_vm1, %v23473_v16  ;;  %v17320_v10 = vpop.f32.mrb[151].mxu1 }
 0x276   : > { %v21265_v8 = vadd.f32 %v9767_v37, %v8687_v34 }
 0x277   : > { %v8568_v46 = vpop.f32.mrb[152].mxu0 }
 0x278   : > { %17453 = vmatmul.mubr.msk.f32.gmra.mrb[238].mxu0 %vm1786_vm2, %v10775_v20  ;;  %v8688_v23 = vadd.f32 %v8568_v46, %v20969_v35  ;;  %v17246_v47 = vpop.f32.mrb[153].mxu0  ;;  %v10432_v35 = vrot.slane %v10418_v11, %v18752_v9  ;;  %v10433_v20 = vcombine.high %v10425_v42, %v10425_v42 }
 0x279   : > { %17455 = vmatprep.mubr.msk.f32.mxu0 %vm18663_vm1, %v23473_v16  ;;  %v9772_v4 = vpop.f32.mrb[152].mxu1 }
 0x27a   : > { %v21273_v56 = vadd.f32 %v9772_v4, %v8688_v23  ;;  %v17323_v59 = vpop.f32.mrb[153].mxu1  ;;  %v10844_v21 = vcombine.low %v10433_v20, %v10432_v35 }
 0x27c   : > { %17456 = vmatmul.mubr.msk.f32.gmra.mrb[240].mxu0 %vm1786_vm2, %v10792_v41 }
 0x27d   : > { %17458 = vmatprep.mubr.msk.f32.mxu0 %vm18663_vm1, %v23473_v16 }
 0x27e   : > { %v8573_v51 = vpop.f32.mrb[154].mxu0 }
 0x27f   : > { %v8689_v14 = vadd.f32 %v8573_v51, %v20989_v44  ;;  %v17249_v33 = vpop.f32.mrb[155].mxu0  ;;  %v10851_v44 = vrot.slane %v10844_v21, %v18752_v9 }
 0x280   : > { %17459 = vmatmul.mubr.msk.f32.gmra.mrb[242].mxu0 %vm1786_vm2, %v10809_v39  ;;  %v9777_v28 = vpop.f32.mrb[154].mxu1 }
 0x281   : > { %17461 = vmatprep.mubr.msk.f32.mxu0 %vm18663_vm1, %v23473_v16  ;;  %v21284_v52 = vadd.f32 %v9777_v28, %v8689_v14  ;;  %v17326_v3 = vpop.f32.mrb[155].mxu1 }
 0x282   : > { %v8578_v50 = vpop.f32.mrb[156].mxu0  ;;  %v23459_v3 = vmov 0.0|0.0  }
 0x283   : > { %v8690_v41 = vadd.f32 %v8578_v50, %v21001_v58  ;;  %v17252_v34 = vpop.f32.mrb[157].mxu0  ;;  %17481 = vmatprep.subr.bf16.mxu1 %v23459_v3  ;;  %17805 = vmatprep.subr.bf16.mxu0 %v23459_v3 }
 0x284   : > { %17462 = vmatmul.mubr.msk.f32.gmra.mrb[244].mxu0 %vm1786_vm2, %v10826_v18 }
 0x285   : > { %17464 = vmatprep.mubr.msk.f32.mxu0 %vm18663_vm1, %v23473_v16  ;;  %v9782_v15 = vpop.f32.mrb[156].mxu1 }
 0x286   : > { %v21292_v37 = vadd.f32 %v9782_v15, %v8690_v41  ;;  %v17329_v0 = vpop.f32.mrb[157].mxu1 }
 0x288   : > { %17465 = vmatmul.mubr.msk.f32.gmra.mrb[246].mxu0 %vm1786_vm2, %v10843_v6  ;;  %v8583_v53 = vpop.f32.mrb[158].mxu0 }
 0x289   : > { %17467 = vmatprep.mubr.msk.f32.mxu0 %vm18663_vm1, %v23473_v16  ;;  %v8691_v61 = vadd.f32 %v8583_v53, %v21016_v55  ;;  %v17255_v42 = vpop.f32.mrb[159].mxu0 }
 0x28b   : > { %v9787_v10 = vpop.f32.mrb[158].mxu1 }
 0x28c   : > { %17468 = vmatmul.mubr.msk.f32.gmra.mrb[248].mxu0 %vm1786_vm2, %v10851_v44  ;;  %v21298_v58 = vadd.f32 %v9787_v10, %v8691_v61  ;;  %v8588_v43 = vpop.f32.mrb[160].mxu0  ;;  %v17332_v19 = vpop.f32.mrb[159].mxu1 }
 0x28d   : > { %v8692_v62 = vadd.f32 %v8588_v43, %v21028_v22  ;;  %v17258_v46 = vpop.f32.mrb[161].mxu0 }
 0x291   : > { %v9792_v23 = vpop.f32.mrb[160].mxu1 }
 0x292   : > { %v21301_v47 = vadd.f32 %v9792_v23, %v8692_v62  ;;  %v17335_v40 = vpop.f32.mrb[161].mxu1 }
 0x294   : > { %v8593_v29 = vpop.f32.mrb[162].mxu0 }
 0x295   : > { %v8693_v11 = vadd.f32 %v8593_v29, %v21044_v54  ;;  %v17261_v4 = vpop.f32.mrb[163].mxu0 }
 0x296   : > { %v9797_v55 = vpop.f32.mrb[162].mxu1 }
 0x297   : > { %v21304_v39 = vadd.f32 %v9797_v55, %v8693_v11  ;;  %v17338_v24 = vpop.f32.mrb[163].mxu1 }
 0x299   : > { %v8598_v17 = vpop.f32.mrb[164].mxu0 }
 0x29a   : > { %v8694_v59 = vadd.f32 %v8598_v17, %v21057_v12  ;;  %v17264_v35 = vpop.f32.mrb[165].mxu0 }
 0x29c   : > { %v9802_v18 = vpop.f32.mrb[164].mxu1 }
 0x29d   : > { %v21307_v57 = vadd.f32 %v9802_v18, %v8694_v59  ;;  %v8603_v22 = vpop.f32.mrb[166].mxu0  ;;  %v17341_v7 = vpop.f32.mrb[165].mxu1 }
 0x29e   : > { %v8695_v20 = vadd.f32 %v8603_v22, %v21068_v5  ;;  %v17267_v51 = vpop.f32.mrb[167].mxu0 }
 0x2a1   : > { %v9807_v14 = vpop.f32.mrb[166].mxu1 }
 0x2a2   : > { %v21310_v33 = vadd.f32 %v9807_v14, %v8695_v20  ;;  %v17344_v54 = vpop.f32.mrb[167].mxu1 }
 0x2a5   : > { %v8608_v28 = vpop.f32.mrb[168].mxu0 }
 0x2a6   : > { %v8696_v12 = vadd.f32 %v8608_v28, %v21085_v27  ;;  %v17270_v6 = vpop.f32.mrb[169].mxu0 }
 0x2a8   : > { %v9812_v21 = vpop.f32.mrb[168].mxu1 }
 0x2a9   : > { %v21315_v50 = vadd.f32 %v9812_v21, %v8696_v12  ;;  %v8613_v41 = vpop.f32.mrb[170].mxu0  ;;  %v17347_v34 = vpop.f32.mrb[169].mxu1 }
 0x2aa   : > { %v8697_v5 = vadd.f32 %v8613_v41, %v21103_v48  ;;  %v17273_v15 = vpop.f32.mrb[171].mxu0 }
 0x2ad   : > { %v9817_v44 = vpop.f32.mrb[170].mxu1 }
 0x2ae   : > { %v21318_v0 = vadd.f32 %v9817_v44, %v8697_v5  ;;  %v17350_v53 = vpop.f32.mrb[171].mxu1 }
 0x2b0   : > { %v8618_v61 = vpop.f32.mrb[172].mxu0 }
 0x2b1   : > { %v8698_v42 = vadd.f32 %v8618_v61, %v21113_v2  ;;  %v17276_v10 = vpop.f32.mrb[173].mxu0 }
 0x2b2   : > { %v9822_v43 = vpop.f32.mrb[172].mxu1 }
 0x2b3   : > { %v21321_v19 = vadd.f32 %v9822_v43, %v8698_v42  ;;  %v17353_v27 = vpop.f32.mrb[173].mxu1 }
 0x2b5   : > { %v8623_v62 = vpop.f32.mrb[174].mxu0 }
 0x2b6   : > { %v8699_v46 = vadd.f32 %v8623_v62, %v21125_v13  ;;  %v17279_v23 = vpop.f32.mrb[175].mxu0 }
 0x2b9   : > { %v9827_v40 = vpop.f32.mrb[174].mxu1 }
 0x2ba   : > { %v21324_v29 = vadd.f32 %v9827_v40, %v8699_v46  ;;  %v17356_v48 = vpop.f32.mrb[175].mxu1 }
 0x2bc   : > { %v8628_v11 = vpop.f32.mrb[176].mxu0 }
 0x2bd   : > { %v8700_v4 = vadd.f32 %v8628_v11, %v21141_v25  ;;  %v17282_v55 = vpop.f32.mrb[177].mxu0 }
 0x2be   : > { %v9832_v24 = vpop.f32.mrb[176].mxu1 }
 0x2bf   : > { %v21327_v17 = vadd.f32 %v9832_v24, %v8700_v4  ;;  %v17359_v2 = vpop.f32.mrb[177].mxu1 }
 0x2c1   : > { %v8633_v59 = vpop.f32.mrb[178].mxu0 }
 0x2c2   : > { %v8701_v35 = vadd.f32 %v8633_v59, %v21154_v63  ;;  %v17285_v18 = vpop.f32.mrb[179].mxu0 }
 0x2c4   : > { %v9837_v22 = vpop.f32.mrb[178].mxu1 }
 0x2c5   : > { %v21330_v7 = vadd.f32 %v9837_v22, %v8701_v35  ;;  %v8638_v13 = vpop.f32.mrb[180].mxu0  ;;  %v17362_v20 = vpop.f32.mrb[179].mxu1 }
 0x2c6   : > { %v8702_v51 = vadd.f32 %v8638_v13, %v21164_v32  ;;  %v17288_v14 = vpop.f32.mrb[181].mxu0 }
 0x2c8   : > { %v9842_v54 = vpop.f32.mrb[180].mxu1 }
 0x2c9   : > { %v21333_v28 = vadd.f32 %v9842_v54, %v8702_v51  ;;  %v17365_v25 = vpop.f32.mrb[181].mxu1 }
 0x2cd   : > { %v8643_v12 = vpop.f32.mrb[182].mxu0 }
 0x2ce   : > { %v8703_v6 = vadd.f32 %v8643_v12, %v21174_v60  ;;  %v17291_v21 = vpop.f32.mrb[183].mxu0 }
 0x2d0   : > { %v9847_v41 = vpop.f32.mrb[182].mxu1 }
 0x2d1   : > { %v21336_v34 = vadd.f32 %v9847_v41, %v8703_v6  ;;  %v17368_v63 = vpop.f32.mrb[183].mxu1 }
 0x2d2   : > { %v8648_v5 = vpop.f32.mrb[184].mxu0 }
 0x2d3   : > { %v8704_v15 = vadd.f32 %v8648_v5, %v21188_v30  ;;  %v17294_v44 = vpop.f32.mrb[185].mxu0 }
 0x2d5   : > { %v9852_v53 = vpop.f32.mrb[184].mxu1 }
 0x2d6   : > { %v21339_v61 = vadd.f32 %v9852_v53, %v8704_v15  ;;  %v17371_v32 = vpop.f32.mrb[185].mxu1 }
 0x2d8   : > { %v8653_v42 = vpop.f32.mrb[186].mxu0 }
 0x2d9   : > { %v8705_v10 = vadd.f32 %v8653_v42, %v21199_v26  ;;  %v17297_v43 = vpop.f32.mrb[187].mxu0 }
 0x2da   : > { %v21365_v43 = vld [vmem:[%s23449_s2] ss:$0 sm:$0xff] }
 0x2db   : > { %v9857_v27 = vpop.f32.mrb[186].mxu1 }
 0x2dc   : > { %v21342_v62 = vadd.f32 %v9857_v27, %v8705_v10  ;;  %v8658_v60 = vpop.f32.mrb[188].mxu0  ;;  %v17374_v46 = vpop.f32.mrb[187].mxu1 }
 0x2dd   : > { %v8706_v23 = vadd.f32 %v8658_v60, %v21207_v45  ;;  %v17300_v40 = vpop.f32.mrb[189].mxu0 }
 0x2e1   : > { %v9862_v48 = vpop.f32.mrb[188].mxu1 }
 0x2e2   : > { %v21345_v11 = vadd.f32 %v9862_v48, %v8706_v23  ;;  %v17377_v30 = vpop.f32.mrb[189].mxu1 }
 0x2e4   : > { %v8663_v4 = vpop.f32.mrb[190].mxu0 }
 0x2e5   : > { %v8707_v55 = vadd.f32 %v8663_v4, %v21219_v31  ;;  %v17303_v24 = vpop.f32.mrb[191].mxu0 }
 0x2e7   : > { %v9867_v2 = vpop.f32.mrb[190].mxu1 }
 0x2e8   : > { %v21348_v59 = vadd.f32 %v9867_v2, %v8707_v55  ;;  %v17380_v26 = vpop.f32.mrb[191].mxu1 }
 0x2ea   : > { %v8668_v35 = vpop.f32.mrb[192].mxu0 }
 0x2eb   : > { %v8708_v18 = vadd.f32 %v8668_v35, %v21225_v38  ;;  %v17306_v22 = vpop.f32.mrb[193].mxu0 }
 0x2ec   : > { %v9872_v13 = vpop.f32.mrb[192].mxu1 }
 0x2ed   : > { %v21351_v20 = vadd.f32 %v9872_v13, %v8708_v18  ;;  %v17383_v51 = vpop.f32.mrb[193].mxu1 }
 0x2ee   : > { %v8673_v45 = vpop.f32.mrb[194].mxu0 }
 0x2ef   : > { %v8709_v14 = vadd.f32 %v8673_v45, %v21237_v36  ;;  %v17309_v54 = vpop.f32.mrb[195].mxu0 }
 0x2f1   : > { %v9877_v25 = vpop.f32.mrb[194].mxu1 }
 0x2f2   : > { %v21354_v12 = vadd.f32 %v9877_v25, %v8709_v14  ;;  %v17386_v31 = vpop.f32.mrb[195].mxu1 }
 0x2f6   : > { %v8678_v6 = vpop.f32.mrb[196].mxu0 }
 0x2f7   : > { %v8710_v21 = vadd.f32 %v8678_v6, %v21244_v1  ;;  %v17312_v41 = vpop.f32.mrb[197].mxu0 }
 0x2f8   : > { %v9882_v63 = vpop.f32.mrb[196].mxu1 }
 0x2f9   : > { %v21357_v5 = vadd.f32 %v9882_v63, %v8710_v21  ;;  %v17389_v15 = vpop.f32.mrb[197].mxu1 }
 0x2fa   : > { %v8683_v38 = vpop.f32.mrb[198].mxu0 }
 0x2fb   : > { %v8711_v44 = vadd.f32 %v8683_v38, %v21256_v49  ;;  %v17315_v53 = vpop.f32.mrb[199].mxu0 }
 0x2fc   : > { %v9887_v32 = vpop.f32.mrb[198].mxu1 }
 0x2fd   : > { %v21360_v42 = vadd.f32 %v9887_v32, %v8711_v44  ;;  %v17392_v36 = vpop.f32.mrb[199].mxu1 }
 0x2ff   : > { %v10971_v10 = vpop.f32.mrb[200].mxu0 }
 0x300   : > { %v11095_v1 = vadd.f32 %v10971_v10, %v21265_v8  ;;  %v17397_v27 = vpop.f32.mrb[201].mxu0 }
 0x302   : > { %v11127_v60 = vadd.f32 %v21365_v43, %v11095_v1 }
 0x303   : > { %v10976_v46 = vpop.f32.mrb[202].mxu0 }
 0x304   : > { %v11152_v23 = vmax.f32 %v11127_v60, 0.0  ;;  %v11096_v49 = vadd.f32 %v10976_v46, %v21273_v56  ;;  %v17400_v40 = vpop.f32.mrb[203].mxu0 }
 0x306   : > { %v11202_v48 = vcombine.high %v11152_v23, %v11152_v23  ;;  %v11209_v30 = vrot.slane %v11152_v23, %v18752_v9  ;;  %v11128_v4 = vadd.f32 %v21365_v43, %v11096_v49 }
 0x307   : > { %v10981_v55 = vpop.f32.mrb[204].mxu0 }
 0x308   : > { %v11216_v24 = vrot.slane %v11202_v48, %v18752_v9  ;;  %v11217_v2 = vcombine.high %v11209_v30, %v11209_v30  ;;  %v11153_v26 = vmax.f32 %v11128_v4, 0.0  ;;  %v11097_v8 = vadd.f32 %v10981_v55, %v21284_v52  ;;  %v17403_v35 = vpop.f32.mrb[205].mxu0 }
 0x30a   : > { %v11218_v18 = vcombine.high %v11216_v24, %v11216_v24  ;;  %v11618_v22 = vcombine.low %v11209_v30, %v11217_v2  ;;  %v11219_v13 = vcombine.high %v11153_v26, %v11153_v26  ;;  %v11226_v45 = vrot.slane %v11153_v26, %v18752_v9 }
 0x30b   : > { %v11129_v56 = vadd.f32 %v21365_v43, %v11097_v8  ;;  %v10986_v51 = vpop.f32.mrb[206].mxu0 }
 0x30c   : > { %v11619_v14 = vcombine.low %v11216_v24, %v11218_v18  ;;  %v11233_v54 = vrot.slane %v11219_v13, %v18752_v9  ;;  %v11234_v25 = vcombine.high %v11226_v45, %v11226_v45  ;;  %v17406_v31 = vpop.f32.mrb[207].mxu0  ;;  %v11098_v21 = vadd.f32 %v10986_v51, %v21292_v37 }
 0x30d   : > { %v11154_v6 = vmax.f32 %v11129_v56, 0.0  ;;  %v11626_v52 = vrot.slane %v11618_v22, %v18752_v9 }
 0x30e   : > { %v11633_v41 = vrot.slane %v11619_v14, %v18752_v9  ;;  %v11635_v63 = vcombine.low %v11226_v45, %v11234_v25  ;;  %v11235_v38 = vcombine.high %v11233_v54, %v11233_v54  ;;  %v11130_v53 = vadd.f32 %v21365_v43, %v11098_v21 }
 0x30f   : > { %v11236_v15 = vcombine.high %v11154_v6, %v11154_v6  ;;  %v11243_v44 = vrot.slane %v11154_v6, %v18752_v9  ;;  %v10991_v32 = vpop.f32.mrb[208].mxu0  ;;  %v11649_v1 = vrot.slane %v11233_v54, %v18752_v9 }
 0x310   : > { %v11634_v36 = vcombine.low %v11626_v52, %v11633_v41  ;;  %v11642_v10 = vrot.slane %v11635_v63, %v18752_v9  ;;  %v11099_v37 = vadd.f32 %v10991_v32, %v21298_v58  ;;  %v17409_v27 = vpop.f32.mrb[209].mxu0  ;;  %v11155_v49 = vmax.f32 %v11130_v53, 0.0 }
 0x311   : > { %v11250_v60 = vrot.slane %v11236_v15, %v18752_v9  ;;  %v11251_v46 = vcombine.high %v11243_v44, %v11243_v44  ;;  %v11651_v23 = vcombine.low %v11235_v38, %v11243_v44 }
 0x312   : > { %12109 = vst.msk [vmem:[#allocation2] sm:$0xff] %vm12108_vm3, %v11634_v36  ;;  %v11650_v40 = vcombine.low %v11642_v10, %v11649_v1  ;;  %v11131_v48 = vadd.f32 %v21365_v43, %v11099_v37  ;;  %v11253_v55 = vcombine.high %v11155_v49, %v11155_v49  ;;  %v11260_v2 = vrot.slane %v11155_v49, %v18752_v9 }
 0x313   : > { %v11652_v30 = vcombine.low %v11251_v46, %v11250_v60  ;;  %v11252_v4 = vcombine.high %v11250_v60, %v11250_v60  ;;  %v10996_v24 = vpop.f32.mrb[210].mxu0  ;;  %v11659_v35 = vrot.slane %v11651_v23, %v18752_v9 }
 0x314   : > { %12111 = vst.msk [vmem:[#allocation2 + $0x8] sm:$0x3f] %vm12110_vm4, %v11650_v40  ;;  %v11156_v58 = vmax.f32 %v11131_v48, 0.0  ;;  %v11100_v26 = vadd.f32 %v10996_v24, %v21301_v47  ;;  %v17412_v8 = vpop.f32.mrb[211].mxu0  ;;  %v11267_v22 = vrot.slane %v11253_v55, %v18752_v9  ;;  %v11268_v13 = vcombine.high %v11260_v2, %v11260_v2 }
 0x315   : > { %v11666_v18 = vrot.slane %v11652_v30, %v18752_v9  ;;  %v11668_v45 = vcombine.low %v11252_v4, %v11260_v2 }
 0x316   : > { %v11270_v56 = vcombine.high %v11156_v58, %v11156_v58  ;;  %v11277_v51 = vrot.slane %v11156_v58, %v18752_v9  ;;  %v11269_v54 = vcombine.high %v11267_v22, %v11267_v22  ;;  %v11132_v25 = vadd.f32 %v21365_v43, %v11100_v26 }
 0x317   : > { %v11667_v14 = vcombine.low %v11659_v35, %v11666_v18  ;;  %v11001_v31 = vpop.f32.mrb[212].mxu0  ;;  %v11675_v6 = vrot.slane %v11668_v45, %v18752_v9  ;;  %v11682_v47 = vrot.slane %v11268_v13, %v18752_v9 }
 0x318   : > { %v11284_v21 = vrot.slane %v11270_v56, %v18752_v9  ;;  %v11285_v52 = vcombine.high %v11277_v51, %v11277_v51  ;;  %v17415_v41 = vpop.f32.mrb[213].mxu0  ;;  %v11684_v63 = vcombine.low %v11267_v22, %v11269_v54  ;;  %v11157_v38 = vmax.f32 %v11132_v25, 0.0 }
 0x319   : > { %12112 = vst.msk [vmem:[#allocation2 + $0x10] sm:$0xff] %vm12108_vm3, %v11667_v14  ;;  %v11101_v15 = vadd.f32 %v11001_v31, %v21304_v39  ;;  %v11683_v44 = vcombine.low %v11675_v6, %v11682_v47 }
 0x31a   : > { %v11286_v53 = vcombine.high %v11284_v21, %v11284_v21  ;;  %v11685_v32 = vcombine.low %v11277_v51, %v11285_v52  ;;  %v11287_v36 = vcombine.high %v11157_v38, %v11157_v38  ;;  %v11294_v10 = vrot.slane %v11157_v38, %v18752_v9 }
 0x31b   : > { %v11133_v1 = vadd.f32 %v21365_v43, %v11101_v15  ;;  %v11006_v37 = vpop.f32.mrb[214].mxu0  ;;  %v12203_v27 = vld [vmem:[#allocation2 + $0x1] sm:$0xff]  ;;  %v11692_v60 = vrot.slane %v11684_v63, %v18752_v9  ;;  %12113 = vst.msk [vmem:[#allocation2 + $0x18] sm:$0x3f] %vm12110_vm4, %v11683_v44 }
 0x31c   : > { %v11699_v46 = vrot.slane %v11685_v32, %v18752_v9  ;;  %v11701_v23 = vcombine.low %v11284_v21, %v11286_v53  ;;  %v11102_v49 = vadd.f32 %v11006_v37, %v21307_v57  ;;  %v17418_v39 = vpop.f32.mrb[215].mxu0  ;;  %v11301_v40 = vrot.slane %v11287_v36, %v18752_v9 }
 0x31d   : > { %v11302_v48 = vcombine.high %v11294_v10, %v11294_v10  ;;  %v11158_v30 = vmax.f32 %v11133_v1, 0.0  ;;  %v12251_v4 = vcombine.high %v12203_v27, %v12203_v27  ;;  %v11715_v2 = vrot.slane %v11294_v10, %v18752_v9  ;;  %v12204_v10 = vld [vmem:[#allocation2 + $0x9] sm:$0xf] }
 0x31e   : > { %v11700_v55 = vcombine.low %v11692_v60, %v11699_v46  ;;  %v11708_v24 = vrot.slane %v11701_v23, %v18752_v9  ;;  %v11134_v58 = vadd.f32 %v21365_v43, %v11102_v49  ;;  %v11303_v8 = vcombine.high %v11301_v40, %v11301_v40 }
 0x31f   : > { %v11717_v26 = vcombine.low %v11302_v48, %v11301_v40  ;;  %v11304_v35 = vcombine.high %v11158_v30, %v11158_v30  ;;  %v11311_v18 = vrot.slane %v11158_v30, %v18752_v9  ;;  %v11011_v22 = vpop.f32.mrb[216].mxu0  ;;  %v12263_v47 = vcombine.low %v12203_v27, %v12251_v4  ;;  %v16517_v40 = vld [vmem:[%s23452_s5 + $0x880] sm:$0xff] }
 0x320   : > { %12114 = vst.msk [vmem:[#allocation2 + $0x20] sm:$0xff] %vm12108_vm3, %v11700_v55  ;;  %v11716_v57 = vcombine.low %v11708_v24, %v11715_v2  ;;  %v11159_v13 = vmax.f32 %v11134_v58, 0.0  ;;  %v11103_v45 = vadd.f32 %v11011_v22, %v21310_v33  ;;  %v17421_v56 = vpop.f32.mrb[217].mxu0 }
 0x321   : > { %v11318_v51 = vrot.slane %v11304_v35, %v18752_v9  ;;  %v11319_v14 = vcombine.high %v11311_v18, %v11311_v18  ;;  %v11718_v54 = vcombine.low %v11303_v8, %v11311_v18  ;;  %v11725_v21 = vrot.slane %v11717_v26, %v18752_v9 }
 0x322   : > { %12115 = vst.msk [vmem:[#allocation2 + $0x28] sm:$0x3f] %vm12110_vm4, %v11716_v57  ;;  %v11321_v25 = vcombine.high %v11159_v13, %v11159_v13  ;;  %v11328_v31 = vrot.slane %v11159_v13, %v18752_v9  ;;  %v11135_v6 = vadd.f32 %v21365_v43, %v11103_v45  ;;  %v12205_v38 = vld [vmem:[#allocation2 + $0x11] sm:$0xff] }
 0x323   : > { %v11320_v52 = vcombine.high %v11318_v51, %v11318_v51  ;;  %v11732_v41 = vrot.slane %v11718_v54, %v18752_v9  ;;  %v11734_v63 = vcombine.low %v11319_v14, %v11318_v51  ;;  %v11016_v33 = vpop.f32.mrb[218].mxu0  ;;  %v12264_v60 = vcombine.low %v12204_v10, %v12205_v38 }
 0x324   : > { %v11335_v15 = vrot.slane %v11321_v25, %v18752_v9  ;;  %v11336_v44 = vcombine.high %v11328_v31, %v11328_v31  ;;  %v11160_v53 = vmax.f32 %v11135_v6, 0.0  ;;  %v11104_v32 = vadd.f32 %v11016_v33, %v21315_v50  ;;  %v17424_v36 = vpop.f32.mrb[219].mxu0 }
 0x325   : > { %v11733_v1 = vcombine.low %v11725_v21, %v11732_v41  ;;  %v11741_v37 = vrot.slane %v11734_v63, %v18752_v9  ;;  %v11748_v27 = vrot.slane %v11320_v52, %v18752_v9  ;;  %v17482_v30 = vpack.c.bf16 %v12264_v60, %v12263_v47 }
 0x326   : > { %v11337_v46 = vcombine.high %v11335_v15, %v11335_v15  ;;  %v11750_v23 = vcombine.low %v11328_v31, %v11336_v44  ;;  %v11338_v49 = vcombine.high %v11160_v53, %v11160_v53  ;;  %v11345_v39 = vrot.slane %v11160_v53, %v18752_v9 }
 0x327   : > { %v11749_v50 = vcombine.low %v11741_v37, %v11748_v27  ;;  %12116 = vst.msk [vmem:[#allocation2 + $0x30] sm:$0xff] %vm12108_vm3, %v11733_v1  ;;  %v11136_v48 = vadd.f32 %v21365_v43, %v11104_v32  ;;  %v11021_v4 = vpop.f32.mrb[220].mxu0  ;;  %17484 = vmatpush1.bf16.xpose.msk.msra.mxu1 %vm21427_vm5, %v17482_v30  ;;  %v12252_v18 = vcombine.high %v12205_v38, %v12205_v38  ;;  %v12206_v38 = vld [vmem:[#allocation2 + $0x19] sm:$0xf] }
 0x328   : > { %v11751_v55 = vcombine.low %v11335_v15, %v11337_v46  ;;  %v11352_v24 = vrot.slane %v11338_v49, %v18752_v9  ;;  %v11353_v2 = vcombine.high %v11345_v39, %v11345_v39  ;;  %v17427_v58 = vpop.f32.mrb[221].mxu0  ;;  %v11105_v8 = vadd.f32 %v11021_v4, %v21318_v0  ;;  %17485 = vmatprep.subr.bf16.mxu1 %v23459_v3 }
 0x329   : > { %12117 = vst.msk [vmem:[#allocation2 + $0x38] sm:$0x3f] %vm12110_vm4, %v11749_v50  ;;  %v11161_v26 = vmax.f32 %v11136_v48, 0.0  ;;  %v12207_v35 = vld [vmem:[#allocation2 + $0x21] sm:$0xff]  ;;  %v11758_v22 = vrot.slane %v11750_v23, %v18752_v9  ;;  %v12265_v53 = vcombine.low %v12252_v18, %v12206_v38 }
 0x32a   : > { %v11765_v57 = vrot.slane %v11751_v55, %v18752_v9  ;;  %v11767_v13 = vcombine.low %v11345_v39, %v11353_v2  ;;  %v11354_v45 = vcombine.high %v11352_v24, %v11352_v24  ;;  %v11137_v14 = vadd.f32 %v21365_v43, %v11105_v8 }
 0x32b   : > { %v11355_v56 = vcombine.high %v11161_v26, %v11161_v26  ;;  %v11362_v51 = vrot.slane %v11161_v26, %v18752_v9  ;;  %v11026_v54 = vpop.f32.mrb[222].mxu0  ;;  %v12253_v25 = vcombine.high %v12207_v35, %v12207_v35  ;;  %v11781_v6 = vrot.slane %v11352_v24, %v18752_v9 }
 0x32c   : > { %v11766_v31 = vcombine.low %v11758_v22, %v11765_v57  ;;  %v11774_v0 = vrot.slane %v11767_v13, %v18752_v9  ;;  %v11106_v47 = vadd.f32 %v11026_v54, %v21321_v19  ;;  %v17430_v21 = vpop.f32.mrb[223].mxu0  ;;  %v11162_v33 = vmax.f32 %v11137_v14, 0.0 }
 0x32d   : > { %v11369_v52 = vrot.slane %v11355_v56, %v18752_v9  ;;  %v11370_v41 = vcombine.high %v11362_v51, %v11362_v51  ;;  %v11783_v63 = vcombine.low %v11354_v45, %v11362_v51  ;;  %v12266_v32 = vcombine.low %v12207_v35, %v12253_v25  ;;  %v12208_v51 = vld [vmem:[#allocation2 + $0x29] sm:$0xf] }
 0x32e   : > { %12118 = vst.msk [vmem:[#allocation2 + $0x40] sm:$0xff] %vm12108_vm3, %v11766_v31  ;;  %v11782_v15 = vcombine.low %v11774_v0, %v11781_v6  ;;  %v11138_v44 = vadd.f32 %v21365_v43, %v11106_v47  ;;  %v11372_v1 = vcombine.high %v11162_v33, %v11162_v33  ;;  %v11379_v19 = vrot.slane %v11162_v33, %v18752_v9 }
 0x32f   : > { %v11784_v36 = vcombine.low %v11370_v41, %v11369_v52  ;;  %v11371_v10 = vcombine.high %v11369_v52, %v11369_v52  ;;  %v11031_v37 = vpop.f32.mrb[224].mxu0  ;;  %v17486_v46 = vpack.c.bf16 %v12266_v32, %v12265_v53  ;;  %v11791_v39 = vrot.slane %v11783_v63, %v18752_v9 }
 0x330   : > { %12119 = vst.msk [vmem:[#allocation2 + $0x48] sm:$0x3f] %vm12110_vm4, %v11782_v15  ;;  %v11163_v27 = vmax.f32 %v11138_v44, 0.0  ;;  %v11107_v60 = vadd.f32 %v11031_v37, %v21324_v29  ;;  %v17433_v23 = vpop.f32.mrb[225].mxu0  ;;  %v12209_v49 = vld [vmem:[#allocation2 + $0x31] sm:$0xff]  ;;  %v11386_v48 = vrot.slane %v11372_v1, %v18752_v9  ;;  %v11387_v4 = vcombine.high %v11379_v19, %v11379_v19 }
 0x331   : > { %v11798_v50 = vrot.slane %v11784_v36, %v18752_v9  ;;  %v21455_v30 = vcombine.high %v12209_v49, %v12209_v49  ;;  %v11800_v55 = vcombine.low %v11371_v10, %v11379_v19  ;;  %17488 = vmatpush1.bf16.xpose.msk.msra.mxu1 %vm21427_vm5, %v17486_v46  ;;  %v12210_v29 = vld [vmem:[#allocation2 + $0x39] sm:$0xf]  ;;  %v12267_v31 = vcombine.low %v12208_v51, %v12209_v49 }
 0x332   : > { %v11389_v24 = vcombine.high %v11163_v27, %v11163_v27  ;;  %v11396_v2 = vrot.slane %v11163_v27, %v18752_v9  ;;  %v11388_v26 = vcombine.high %v11386_v48, %v11386_v48  ;;  %v11139_v8 = vadd.f32 %v21365_v43, %v11107_v60  ;;  %17489 = vmatprep.subr.bf16.mxu1 %v23459_v3 }
 0x333   : > { %23506 = vst [vmem:[#allocation8_spill] sm:$0xff] %v21455_v30  ;;  %v11799_v58 = vcombine.low %v11791_v39, %v11798_v50  ;;  %v11036_v35 = vpop.f32.mrb[226].mxu0  ;;  %v12268_v18 = vcombine.low %v21455_v30, %v12210_v29  ;;  %v11807_v22 = vrot.slane %v11800_v55, %v18752_v9  ;;  %v11814_v57 = vrot.slane %v11387_v4, %v18752_v9 }
 0x334   : > { %v11403_v13 = vrot.slane %v11389_v24, %v18752_v9  ;;  %v11404_v45 = vcombine.high %v11396_v2, %v11396_v2  ;;  %v17436_v56 = vpop.f32.mrb[227].mxu0  ;;  %v11816_v14 = vcombine.low %v11386_v48, %v11388_v26  ;;  %v11164_v54 = vmax.f32 %v11139_v8, 0.0 }
 0x335   : > { %12120 = vst.msk [vmem:[#allocation2 + $0x50] sm:$0xff] %vm12108_vm3, %v11799_v58  ;;  %v11108_v25 = vadd.f32 %v11036_v35, %v21327_v17  ;;  %v11815_v0 = vcombine.low %v11807_v22, %v11814_v57  ;;  %v17490_v33 = vpack.c.bf16 %v12268_v18, %v12267_v31 }
 0x336   : > { %v11405_v6 = vcombine.high %v11403_v13, %v11403_v13  ;;  %v11817_v47 = vcombine.low %v11396_v2, %v11404_v45  ;;  %v11406_v21 = vcombine.high %v11164_v54, %v11164_v54  ;;  %v11413_v52 = vrot.slane %v11164_v54, %v18752_v9 }
 0x337   : > { %v11140_v41 = vadd.f32 %v21365_v43, %v11108_v25  ;;  %v11041_v63 = vpop.f32.mrb[228].mxu0  ;;  %v12211_v38 = vld [vmem:[#allocation2 + $0x41] sm:$0xff]  ;;  %v11824_v15 = vrot.slane %v11816_v14, %v18752_v9  ;;  %12121 = vst.msk [vmem:[#allocation2 + $0x58] sm:$0x3f] %vm12110_vm4, %v11815_v0  ;;  %v12212_v0 = vld [vmem:[#allocation2 + $0x49] sm:$0xf] }
 0x338   : > { %v11831_v44 = vrot.slane %v11817_v47, %v18752_v9  ;;  %v11833_v53 = vcombine.low %v11403_v13, %v11405_v6  ;;  %v11109_v17 = vadd.f32 %v11041_v63, %v21330_v7  ;;  %v17439_v32 = vpop.f32.mrb[229].mxu0  ;;  %v11420_v36 = vrot.slane %v11406_v21, %v18752_v9 }
 0x339   : > { %v11421_v10 = vcombine.high %v11413_v52, %v11413_v52  ;;  %v11165_v1 = vmax.f32 %v11140_v41, 0.0  ;;  %v21475_v37 = vcombine.high %v12211_v38, %v12211_v38  ;;  %v11847_v60 = vrot.slane %v11413_v52, %v18752_v9  ;;  %17492 = vmatpush1.bf16.xpose.msk.msra.mxu1 %vm21427_vm5, %v17490_v33 }
 0x33a   : > { %v11832_v19 = vcombine.low %v11824_v15, %v11831_v44  ;;  %v11840_v27 = vrot.slane %v11833_v53, %v18752_v9  ;;  %v11141_v46 = vadd.f32 %v21365_v43, %v11109_v17  ;;  %v11422_v49 = vcombine.high %v11420_v36, %v11420_v36  ;;  %17493 = vmatprep.subr.bf16.mxu1 %v23459_v3 }
 0x33b   : > { %23507 = vst [vmem:[#allocation9_spill] sm:$0xff] %v21475_v37  ;;  %v11849_v23 = vcombine.low %v11421_v10, %v11420_v36  ;;  %v11423_v7 = vcombine.high %v11165_v1, %v11165_v1  ;;  %v11430_v39 = vrot.slane %v11165_v1, %v18752_v9  ;;  %v11046_v50 = vpop.f32.mrb[230].mxu0  ;;  %v12269_v18 = vcombine.low %v12211_v38, %v21475_v37 }
 0x33c   : > { %12122 = vst.msk [vmem:[#allocation2 + $0x60] sm:$0xff] %vm12108_vm3, %v11832_v19  ;;  %v11848_v48 = vcombine.low %v11840_v27, %v11847_v60  ;;  %v11166_v4 = vmax.f32 %v11141_v46, 0.0  ;;  %v11110_v55 = vadd.f32 %v11046_v50, %v21333_v28  ;;  %v17442_v24 = vpop.f32.mrb[231].mxu0 }
 0x33d   : > { %v11437_v2 = vrot.slane %v11423_v7, %v18752_v9  ;;  %v11438_v29 = vcombine.high %v11430_v39, %v11430_v39  ;;  %v11850_v58 = vcombine.low %v11422_v49, %v11430_v39  ;;  %v11857_v22 = vrot.slane %v11849_v23, %v18752_v9 }
 0x33e   : > { %12123 = vst.msk [vmem:[#allocation2 + $0x68] sm:$0x3f] %vm12110_vm4, %v11848_v48  ;;  %v11440_v26 = vcombine.high %v11166_v4, %v11166_v4  ;;  %v11447_v8 = vrot.slane %v11166_v4, %v18752_v9  ;;  %v11142_v35 = vadd.f32 %v21365_v43, %v11110_v55  ;;  %v21493_v56 = vld [vmem:[#allocation2 + $0x51] sm:$0xff] }
 0x33f   : > { %v11439_v57 = vcombine.high %v11437_v2, %v11437_v2  ;;  %v11864_v13 = vrot.slane %v11850_v58, %v18752_v9  ;;  %v11866_v28 = vcombine.low %v11438_v29, %v11437_v2  ;;  %v11051_v45 = vpop.f32.mrb[232].mxu0  ;;  %v12270_v52 = vcombine.low %v12212_v0, %v21493_v56 }
 0x340   : > { %v11454_v51 = vrot.slane %v11440_v26, %v18752_v9  ;;  %v11455_v14 = vcombine.high %v11447_v8, %v11447_v8  ;;  %v11167_v54 = vmax.f32 %v11142_v35, 0.0  ;;  %v11111_v25 = vadd.f32 %v11051_v45, %v21336_v34  ;;  %v17445_v31 = vpop.f32.mrb[233].mxu0 }
 0x341   : > { %v11865_v6 = vcombine.low %v11857_v22, %v11864_v13  ;;  %v11873_v47 = vrot.slane %v11866_v28, %v18752_v9  ;;  %v11880_v21 = vrot.slane %v11439_v57, %v18752_v9  ;;  %v17494_v34 = vpack.c.bf16 %v12270_v52, %v12269_v18  ;;  %v12214_v22 = vld [vmem:[#allocation2 + $0x59] sm:$0xf] }
 0x342   : > { %v11456_v41 = vcombine.high %v11454_v51, %v11454_v51  ;;  %v11882_v63 = vcombine.low %v11447_v8, %v11455_v14  ;;  %v11457_v33 = vcombine.high %v11167_v54, %v11167_v54  ;;  %v11464_v38 = vrot.slane %v11167_v54, %v18752_v9 }
 0x343   : > { %v11881_v15 = vcombine.low %v11873_v47, %v11880_v21  ;;  %12124 = vst.msk [vmem:[#allocation2 + $0x70] sm:$0xff] %vm12108_vm3, %v11865_v6  ;;  %v11143_v44 = vadd.f32 %v21365_v43, %v11111_v25  ;;  %v11056_v53 = vpop.f32.mrb[234].mxu0  ;;  %17496 = vmatpush1.bf16.xpose.msk.msra.mxu1 %vm21427_vm5, %v17494_v34  ;;  %v21512_v60 = vcombine.high %v21493_v56, %v21493_v56 }
 0x344   : > { %v11883_v17 = vcombine.low %v11454_v51, %v11456_v41  ;;  %v11471_v32 = vrot.slane %v11457_v33, %v18752_v9  ;;  %v11472_v36 = vcombine.high %v11464_v38, %v11464_v38  ;;  %v17448_v10 = vpop.f32.mrb[235].mxu0  ;;  %v11112_v19 = vadd.f32 %v11056_v53, %v21339_v61  ;;  %17497 = vmatprep.subr.bf16.mxu1 %v23459_v3 }
 0x345   : > { %12125 = vst.msk [vmem:[#allocation2 + $0x78] sm:$0x3f] %vm12110_vm4, %v11881_v15  ;;  %v11168_v1 = vmax.f32 %v11143_v44, 0.0  ;;  %v21508_v27 = vld [vmem:[#allocation2 + $0x61] sm:$0xff]  ;;  %v11890_v46 = vrot.slane %v11882_v63, %v18752_v9  ;;  %v12271_v28 = vcombine.low %v21512_v60, %v12214_v22 }
 0x346   : > { %v11897_v23 = vrot.slane %v11883_v17, %v18752_v9  ;;  %v11899_v49 = vcombine.low %v11464_v38, %v11472_v36  ;;  %v11473_v7 = vcombine.high %v11471_v32, %v11471_v32  ;;  %v11144_v48 = vadd.f32 %v21365_v43, %v11112_v19 }
 0x347   : > { %v11474_v39 = vcombine.high %v11168_v1, %v11168_v1  ;;  %v11481_v50 = vrot.slane %v11168_v1, %v18752_v9  ;;  %v11061_v61 = vpop.f32.mrb[236].mxu0  ;;  %v21521_v4 = vcombine.high %v21508_v27, %v21508_v27  ;;  %v11913_v2 = vrot.slane %v11471_v32, %v18752_v9 }
 0x348   : > { %v11898_v55 = vcombine.low %v11890_v46, %v11897_v23  ;;  %v11906_v24 = vrot.slane %v11899_v49, %v18752_v9  ;;  %v11113_v29 = vadd.f32 %v11061_v61, %v21342_v62  ;;  %v17451_v58 = vpop.f32.mrb[237].mxu0  ;;  %v11169_v18 = vmax.f32 %v11144_v48, 0.0 }
 0x349   : > { %v11488_v26 = vrot.slane %v11474_v39, %v18752_v9  ;;  %v11489_v8 = vcombine.high %v11481_v50, %v11481_v50  ;;  %v11915_v35 = vcombine.low %v11473_v7, %v11481_v50  ;;  %v12272_v45 = vcombine.low %v21508_v27, %v21521_v4  ;;  %v12216_v7 = vld [vmem:[#allocation2 + $0x69] sm:$0xf] }
 0x34a   : > { %12126 = vst.msk [vmem:[#allocation2 + $0x80] sm:$0xff] %vm12108_vm3, %v11898_v55  ;;  %v11914_v57 = vcombine.low %v11906_v24, %v11913_v2  ;;  %v11145_v13 = vadd.f32 %v21365_v43, %v11113_v29  ;;  %v11491_v62 = vcombine.high %v11169_v18, %v11169_v18  ;;  %v11498_v25 = vrot.slane %v11169_v18, %v18752_v9 }
 0x34b   : > { %v11916_v51 = vcombine.low %v11489_v8, %v11488_v26  ;;  %v11490_v14 = vcombine.high %v11488_v26, %v11488_v26  ;;  %v11066_v54 = vpop.f32.mrb[238].mxu0  ;;  %v17498_v6 = vpack.c.bf16 %v12272_v45, %v12271_v28  ;;  %v11923_v52 = vrot.slane %v11915_v35, %v18752_v9 }
 0x34c   : > { %12127 = vst.msk [vmem:[#allocation2 + $0x88] sm:$0x3f] %vm12110_vm4, %v11914_v57  ;;  %v11170_v31 = vmax.f32 %v11145_v13, 0.0  ;;  %v11114_v0 = vadd.f32 %v11066_v54, %v21345_v11  ;;  %v17454_v47 = vpop.f32.mrb[239].mxu0  ;;  %v21535_v21 = vld [vmem:[#allocation2 + $0x71] sm:$0xff]  ;;  %v11505_v63 = vrot.slane %v11491_v62, %v18752_v9  ;;  %v11506_v38 = vcombine.high %v11498_v25, %v11498_v25 }
 0x34d   : > { %v11930_v41 = vrot.slane %v11916_v51, %v18752_v9  ;;  %v21542_v33 = vcombine.high %v21535_v21, %v21535_v21  ;;  %v11932_v15 = vcombine.low %v11490_v14, %v11498_v25  ;;  %17500 = vmatpush1.bf16.xpose.msk.msra.mxu1 %vm21427_vm5, %v17498_v6  ;;  %v12218_v11 = vld [vmem:[#allocation2 + $0x79] sm:$0xf]  ;;  %v12273_v61 = vcombine.low %v12216_v7, %v21535_v21 }
 0x34e   : > { %v11508_v44 = vcombine.high %v11170_v31, %v11170_v31  ;;  %v11515_v34 = vrot.slane %v11170_v31, %v18752_v9  ;;  %v11507_v17 = vcombine.high %v11505_v63, %v11505_v63  ;;  %v11146_v32 = vadd.f32 %v21365_v43, %v11114_v0  ;;  %17501 = vmatprep.subr.bf16.mxu1 %v23459_v3 }
 0x34f   : > { %v11931_v53 = vcombine.low %v11923_v52, %v11930_v41  ;;  %v11071_v36 = vpop.f32.mrb[240].mxu0  ;;  %v12274_v10 = vcombine.low %v21542_v33, %v12218_v11  ;;  %v11939_v1 = vrot.slane %v11932_v15, %v18752_v9  ;;  %v11946_v19 = vrot.slane %v11506_v38, %v18752_v9 }
 0x350   : > { %v11522_v46 = vrot.slane %v11508_v44, %v18752_v9  ;;  %v11523_v23 = vcombine.high %v11515_v34, %v11515_v34  ;;  %v17457_v49 = vpop.f32.mrb[241].mxu0  ;;  %v11948_v39 = vcombine.low %v11505_v63, %v11507_v17  ;;  %v11171_v50 = vmax.f32 %v11146_v32, 0.0 }
 0x351   : > { %12128 = vst.msk [vmem:[#allocation2 + $0x90] sm:$0xff] %vm12108_vm3, %v11931_v53  ;;  %v11115_v48 = vadd.f32 %v11071_v36, %v21348_v59  ;;  %v11947_v55 = vcombine.low %v11939_v1, %v11946_v19  ;;  %v17502_v35 = vpack.c.bf16 %v12274_v10, %v12273_v61 }
 0x352   : > { %v11524_v24 = vcombine.high %v11522_v46, %v11522_v46  ;;  %v11949_v2 = vcombine.low %v11515_v34, %v11523_v23  ;;  %v11525_v29 = vcombine.high %v11171_v50, %v11171_v50  ;;  %v11532_v58 = vrot.slane %v11171_v50, %v18752_v9 }
 0x353   : > { %v11147_v26 = vadd.f32 %v21365_v43, %v11115_v48  ;;  %v11076_v8 = vpop.f32.mrb[242].mxu0  ;;  %v21558_v18 = vld [vmem:[#allocation2 + $0x81] sm:$0xff]  ;;  %v11956_v22 = vrot.slane %v11948_v39, %v18752_v9  ;;  %12129 = vst.msk [vmem:[#allocation2 + $0x98] sm:$0x3f] %vm12110_vm4, %v11947_v55  ;;  %v12220_v55 = vld [vmem:[#allocation2 + $0x89] sm:$0xf] }
 0x354   : > { %v11963_v59 = vrot.slane %v11949_v2, %v18752_v9  ;;  %v11965_v57 = vcombine.low %v11522_v46, %v11524_v24  ;;  %v11116_v13 = vadd.f32 %v11076_v8, %v21351_v20  ;;  %v17460_v28 = vpop.f32.mrb[243].mxu0  ;;  %v11539_v45 = vrot.slane %v11525_v29, %v18752_v9 }
 0x355   : > { %v11540_v51 = vcombine.high %v11532_v58, %v11532_v58  ;;  %v11172_v14 = vmax.f32 %v11147_v26, 0.0  ;;  %v21567_v62 = vcombine.high %v21558_v18, %v21558_v18  ;;  %v11979_v31 = vrot.slane %v11532_v58, %v18752_v9  ;;  %17504 = vmatpush1.bf16.xpose.msk.msra.mxu1 %vm21427_vm5, %v17502_v35 }
 0x356   : > { %v11964_v54 = vcombine.low %v11956_v22, %v11963_v59  ;;  %v11972_v25 = vrot.slane %v11965_v57, %v18752_v9  ;;  %v11148_v0 = vadd.f32 %v21365_v43, %v11116_v13  ;;  %v11541_v6 = vcombine.high %v11539_v45, %v11539_v45  ;;  %17505 = vmatprep.subr.bf16.mxu1 %v23459_v3 }
 0x357   : > { %v11981_v20 = vcombine.low %v11540_v51, %v11539_v45  ;;  %v11542_v47 = vcombine.high %v11172_v14, %v11172_v14  ;;  %v11549_v52 = vrot.slane %v11172_v14, %v18752_v9  ;;  %v11081_v41 = vpop.f32.mrb[244].mxu0  ;;  %v12275_v10 = vcombine.low %v21558_v18, %v21567_v62 }
 0x358   : > { %12130 = vst.msk [vmem:[#allocation2 + $0xa0] sm:$0xff] %vm12108_vm3, %v11964_v54  ;;  %v11980_v63 = vcombine.low %v11972_v25, %v11979_v31  ;;  %v11173_v38 = vmax.f32 %v11148_v0, 0.0  ;;  %v11117_v15 = vadd.f32 %v11081_v41, %v21354_v12  ;;  %v17463_v44 = vpop.f32.mrb[245].mxu0 }
 0x359   : > { %v11556_v34 = vrot.slane %v11542_v47, %v18752_v9  ;;  %v11557_v11 = vcombine.high %v11549_v52, %v11549_v52  ;;  %v11982_v53 = vcombine.low %v11541_v6, %v11549_v52  ;;  %v11989_v1 = vrot.slane %v11981_v20, %v18752_v9 }
 0x35a   : > { %12131 = vst.msk [vmem:[#allocation2 + $0xa8] sm:$0x3f] %vm12110_vm4, %v11980_v63  ;;  %v11559_v17 = vcombine.high %v11173_v38, %v11173_v38  ;;  %v11566_v32 = vrot.slane %v11173_v38, %v18752_v9  ;;  %v11149_v36 = vadd.f32 %v21365_v43, %v11117_v15  ;;  %v21586_v49 = vld [vmem:[#allocation2 + $0x91] sm:$0xff] }
 0x35b   : > { %v11558_v19 = vcombine.high %v11556_v34, %v11556_v34  ;;  %v11996_v12 = vrot.slane %v11982_v53, %v18752_v9  ;;  %v11998_v46 = vcombine.low %v11557_v11, %v11556_v34  ;;  %v11086_v23 = vpop.f32.mrb[246].mxu0  ;;  %v12276_v58 = vcombine.low %v12220_v55, %v21586_v49 }
 0x35c   : > { %v11573_v7 = vrot.slane %v11559_v17, %v18752_v9  ;;  %v11574_v39 = vcombine.high %v11566_v32, %v11566_v32  ;;  %v11174_v50 = vmax.f32 %v11149_v36, 0.0  ;;  %v11118_v48 = vadd.f32 %v11086_v23, %v21357_v5  ;;  %v17466_v61 = vpop.f32.mrb[247].mxu0  ;;  %v12222_v36 = vld [vmem:[#allocation2 + $0x99] sm:$0xf] }
 0x35d   : > { %v11997_v24 = vcombine.low %v11989_v1, %v11996_v12  ;;  %v12005_v2 = vrot.slane %v11998_v46, %v18752_v9  ;;  %v12012_v29 = vrot.slane %v11558_v19, %v18752_v9  ;;  %v17506_v5 = vpack.c.bf16 %v12276_v58, %v12275_v10 }
 0x35e   : > { %v11575_v26 = vcombine.high %v11573_v7, %v11573_v7  ;;  %v12014_v8 = vcombine.low %v11566_v32, %v11574_v39  ;;  %v11576_v35 = vcombine.high %v11174_v50, %v11174_v50  ;;  %v11583_v22 = vrot.slane %v11174_v50, %v18752_v9 }
 0x35f   : > { %v12013_v59 = vcombine.low %v12005_v2, %v12012_v29  ;;  %12132 = vst.msk [vmem:[#allocation2 + $0xb0] sm:$0xff] %vm12108_vm3, %v11997_v24  ;;  %v11150_v57 = vadd.f32 %v21365_v43, %v11118_v48  ;;  %v11091_v13 = vpop.f32.mrb[248].mxu0  ;;  %17508 = vmatpush1.bf16.xpose.msk.msra.mxu1 %vm21427_vm5, %v17506_v5  ;;  %v21605_v0 = vcombine.high %v21586_v49, %v21586_v49  ;;  %v21642_v5 = vld [vmem:[#allocation2 + $0x10] sm:$0xff] }
 0x360   : > { %v12015_v28 = vcombine.low %v11573_v7, %v11575_v26  ;;  %v11590_v45 = vrot.slane %v11576_v35, %v18752_v9  ;;  %v11591_v51 = vcombine.high %v11583_v22, %v11583_v22  ;;  %v17469_v14 = vpop.f32.mrb[249].mxu0  ;;  %v11119_v25 = vadd.f32 %v11091_v13, %v21360_v42  ;;  %17509 = vmatprep.subr.bf16.mxu1 %v23459_v3  ;;  %v21646_v13 = vld [vmem:[#allocation2 + $0x40] sm:$0xff] }
 0x361   : > { %12133 = vst.msk [vmem:[#allocation2 + $0xb8] sm:$0x3f] %vm12110_vm4, %v12013_v59  ;;  %v11175_v54 = vmax.f32 %v11150_v57, 0.0  ;;  %v21601_v31 = vld [vmem:[#allocation2 + $0xa1] sm:$0xff]  ;;  %v12022_v20 = vrot.slane %v12014_v8, %v18752_v9  ;;  %v12224_v35 = vld [vmem:[#allocation2 + $0xa9] sm:$0xf] }
 0x362   : > { %v12029_v6 = vrot.slane %v12015_v28, %v18752_v9  ;;  %v12031_v47 = vcombine.low %v11583_v22, %v11591_v51  ;;  %v11592_v52 = vcombine.high %v11590_v45, %v11590_v45  ;;  %v11151_v38 = vadd.f32 %v21365_v43, %v11119_v25  ;;  %v12140_v59 = vld [vmem:[#allocation2] sm:$0xff]  ;;  %v12141_v28 = vld [vmem:[#allocation2 + $0x8] sm:$0xf]  ;;  %v21651_v51 = vld [vmem:[#allocation2 + $0x50] sm:$0xff] }
 0x363   : > { %v11593_v41 = vcombine.high %v11175_v54, %v11175_v54  ;;  %v11600_v63 = vrot.slane %v11175_v54, %v18752_v9  ;;  %v21614_v42 = vcombine.high %v21601_v31, %v21601_v31  ;;  %v12045_v34 = vrot.slane %v11590_v45, %v18752_v9  ;;  %v21649_v45 = vld [vmem:[#allocation2 + $0x20] sm:$0xff]  ;;  %v16052_v14 = vld [vmem:[%s23450_s3 + $0x10] sm:$0xff] }
 0x364   : > { %v12030_v15 = vcombine.low %v12022_v20, %v12029_v6  ;;  %v12038_v44 = vrot.slane %v12031_v47, %v18752_v9  ;;  %v11176_v32 = vmax.f32 %v11151_v38, 0.0  ;;  %v12277_v43 = vcombine.low %v21605_v0, %v12222_v36  ;;  %v21657_v25 = vld [vmem:[#allocation2 + $0x30] sm:$0xff]  ;;  %v21659_v20 = vld [vmem:[#allocation2 + $0x60] sm:$0xff]  ;;  %v12147_v36 = vld [vmem:[#allocation2 + $0x38] sm:$0xf] }
 0x365   : > { %v11607_v11 = vrot.slane %v11593_v41, %v18752_v9  ;;  %v11608_v53 = vcombine.high %v11600_v63, %v11600_v63  ;;  %v12047_v17 = vcombine.low %v11592_v52, %v11600_v63  ;;  %v12278_v1 = vcombine.low %v21601_v31, %v21614_v42  ;;  %23508 = vst [vmem:[#allocation10_spill] sm:$0xff] %v21657_v25  ;;  %v21665_v47 = vld [vmem:[#allocation2 + $0x70] sm:$0xff]  ;;  %v21667_v52 = vld [vmem:[#allocation2 + $0x80] sm:$0xff] }
 0x366   : > { %12134 = vst.msk [vmem:[#allocation2 + $0xc0] sm:$0xff] %vm12108_vm3, %v12030_v15  ;;  %v12046_v10 = vcombine.low %v12038_v44, %v12045_v34  ;;  %v11616_v46 = vrot.slane %v11176_v32, %v18752_v9  ;;  %v12401_v54 = vcombine.low %v12141_v28, %v21642_v5  ;;  %v21663_v6 = vcombine.high %v21646_v13, %v21646_v13  ;;  %v21669_v41 = vld [vmem:[#allocation2 + $0x90] sm:$0xff]  ;;  %v21679_v44 = vld [vmem:[#allocation2 + $0xa0] sm:$0xff] }
 0x367   : > { %v12048_v19 = vcombine.low %v11608_v53, %v11607_v11  ;;  %v11609_v12 = vcombine.high %v11607_v11, %v11607_v11  ;;  %v12055_v23 = vrot.slane %v12047_v17, %v18752_v9  ;;  %v17510_v7 = vpack.c.bf16 %v12278_v1, %v12277_v43  ;;  %v21681_v34 = vld [vmem:[#allocation2 + $0xb0] sm:$0xff]  ;;  %v12752_v11 = vld [vmem:[#allocation2 + $0x48] sm:$0xf] }
 0x368   : > { %12135 = vst.msk [vmem:[#allocation2 + $0xc8] sm:$0x3f] %vm12110_vm4, %v12046_v10  ;;  %v21626_v39 = vld [vmem:[#allocation2 + $0xb1] sm:$0xff]  ;;  %v11617_v48 = vcombine.high %v11616_v46, %v11616_v46  ;;  %v12226_v58 = vld [vmem:[#allocation2 + $0xb9] sm:$0xf]  ;;  %v21673_v38 = vcombine.high %v21649_v45, %v21649_v45  ;;  %v21677_v15 = vcombine.high %v21651_v51, %v21651_v51  ;;  %v21685_v53 = vcombine.high %v21657_v25, %v21657_v25 }
 0x369   : > { %v12062_v50 = vrot.slane %v12048_v19, %v18752_v9  ;;  %v12064_v61 = vcombine.low %v11609_v12, %v11616_v46  ;;  %v21631_v55 = vcombine.high %v21626_v39, %v21626_v39  ;;  %17512 = vmatpush1.bf16.xpose.msk.msra.mxu1 %vm21427_vm5, %v17510_v7  ;;  %v12279_v22 = vcombine.low %v12224_v35, %v21626_v39  ;;  %v12750_v19 = vld [vmem:[#allocation2 + $0x38] sm:$0xf]  ;;  %v12756_v12 = vld [vmem:[#allocation2 + $0x68] sm:$0xf] }
 0x36a   : > { %v12078_v29 = vrot.slane %v11617_v48, %v18752_v9  ;;  %17513 = vmatprep.subr.bf16.mxu1 %v23459_v3  ;;  %23509 = vst [vmem:[#allocation11_spill] sm:$0xff] %v21673_v38  ;;  %23510 = vst [vmem:[#allocation12_spill] sm:$0xff] %v21685_v53  ;;  %v21689_v17 = vcombine.high %v21659_v20, %v21659_v20  ;;  %v21693_v10 = vcombine.high %v21665_v47, %v21665_v47  ;;  %v12760_v48 = vld [vmem:[#allocation2 + $0x88] sm:$0xf] }
 0x36b   : > { %v12063_v24 = vcombine.low %v12055_v23, %v12062_v50  ;;  %v12071_v2 = vrot.slane %v12064_v61, %v18752_v9  ;;  %v12280_v26 = vcombine.low %v21631_v55, %v12226_v58  ;;  %v12188_v9 = vcombine.high %v12140_v59, %v12140_v59 }
 0x36c   : > { %v21697_v43 = vcombine.high %v21667_v52, %v21667_v52  ;;  %v21701_v1 = vcombine.high %v21669_v41, %v21669_v41  ;;  %v21706_v46 = vcombine.high %v21679_v44, %v21679_v44  ;;  %v21710_v23 = vcombine.high %v21681_v34, %v21681_v34 }
 0x36d   : > { %12136 = vst.msk [vmem:[#allocation2 + $0xd0] sm:$0xff] %vm12108_vm3, %v12063_v24  ;;  %v12079_v8 = vcombine.low %v12071_v2, %v12078_v29  ;;  %v17514_v57 = vpack.c.bf16 %v12280_v26, %v12279_v22  ;;  %v12400_v63 = vcombine.low %v12140_v59, %v12188_v9  ;;  %v12809_v7 = vcombine.low %v12750_v19, %v21646_v13  ;;  %v16053_v2 = vld [vmem:[%s23450_s3 + $0x18] sm:$0xff]  ;;  %v12764_v26 = vld [vmem:[#allocation2 + $0xa8] sm:$0xf] }
 0x36e   : > { %v12810_v50 = vcombine.low %v21663_v6, %v12752_v11  ;;  %v21718_v61 = vcombine.high %v21642_v5, %v21642_v5  ;;  %v21722_v24 = vcombine.low %v21649_v45, %v21673_v38  ;;  %v12754_v29 = vld [vmem:[#allocation2 + $0x58] sm:$0xf]  ;;  %v12811_v58 = vcombine.low %v21651_v51, %v21677_v15 }
 0x36f   : > { %12137 = vst.msk [vmem:[#allocation2 + $0xd8] sm:$0x3f] %vm12110_vm4, %v12079_v8  ;;  %v17518_v32 = vpack.c.bf16 %v12401_v54, %v12400_v63  ;;  %v12143_v8 = vld [vmem:[#allocation2 + $0x18] sm:$0xf]  ;;  %v12405_v35 = vcombine.low %v21685_v53, %v12147_v36  ;;  %v12812_v59 = vcombine.low %v12754_v29, %v21659_v20  ;;  %v12814_v28 = vcombine.low %v21665_v47, %v21693_v10 }
 0x370   : > { %23511 = vst [vmem:[#allocation13_spill] sm:$0xff] %v21722_v24  ;;  %v21732_v22 = vpack.c.bf16 %v12810_v50, %v12809_v7  ;;  %v12758_v9 = vld [vmem:[#allocation2 + $0x78] sm:$0xf]  ;;  %v12816_v54 = vcombine.low %v21697_v43, %v12760_v48  ;;  %v12817_v11 = vcombine.low %v21669_v41, %v21701_v1  ;;  %v12819_v7 = vcombine.low %v21706_v46, %v12764_v26 }
 0x371   : > { %17516 = vmatpush1.bf16.xpose.msk.msra.mxu1 %vm21427_vm5, %v17514_v57  ;;  %v12813_v57 = vcombine.low %v21689_v17, %v12756_v12  ;;  %v12762_v63 = vld [vmem:[#allocation2 + $0x98] sm:$0xf]  ;;  %v21745_v19 = vpack.c.bf16 %v12812_v59, %v12811_v58  ;;  %v12820_v50 = vcombine.low %v21681_v34, %v21710_v23  ;;  %v12402_v48 = vcombine.low %v21718_v61, %v12143_v8  ;;  %v21762_v59 = vld [vmem:[#allocation2 + $0x42] sm:$0xff] }
 0x372   : > { %17517 = vmatprep.subr.bf16.mxu1 %v23459_v3  ;;  %23512 = vst [vmem:[#allocation14_spill] sm:$0xff] %v21732_v22  ;;  %v21743_v36 = vld [vmem:[#allocation2 + $0x12] sm:$0xff]  ;;  %v12818_v12 = vcombine.low %v12762_v63, %v21679_v44  ;;  %v13021_v38 = vcombine.low %v21586_v49, %v21605_v0 }
 0x373   : > { %23513 = vst [vmem:[#allocation15_spill] sm:$0xff] %v21745_v19  ;;  %v21764_v26 = vld [vmem:[#allocation2 + $0x52] sm:$0xff]  ;;  %v21768_v37 = vpack.c.bf16 %v12820_v50, %v12819_v7  ;;  %v21773_v19 = vcombine.high %v21743_v36, %v21743_v36  ;;  %v12960_v7 = vld [vmem:[#allocation2 + $0x69] sm:$0xf]  ;;  %v21796_v50 = vcombine.high %v21762_v59, %v21762_v59 }
 0x374   : > { %v21766_v63 = vpack.c.bf16 %v12818_v12, %v12817_v11  ;;  %v12958_v8 = vld [vmem:[#allocation2 + $0x59] sm:$0xf] }
 0x375   : > { %23517 = vst [vmem:[#allocation6_spill] sm:$0xff] %v21768_v37  ;;  %v13016_v12 = vcombine.low %v12958_v8, %v21508_v27  ;;  %v23518_v27 = vmov 0.0|0.0   ;;  %v21820_v37 = vld [vmem:[#allocation2 + $0xa2] sm:$0xff]  ;;  %v12966_v22 = vld [vmem:[#allocation2 + $0x99] sm:$0xf]  ;;  %v13213_v49 = vcombine.low %v21743_v36, %v21773_v19 }
 0x376   : > { %23516 = vst [vmem:[#allocation5_spill] sm:$0xff] %v21766_v63 }
 0x378   : > { %16072 = vmatmul.mubr.msk.f32.vlgmr.msra.gmra.mrb[200].mxu1 %vm12108_vm3, %v16052_v14  ;;  %v12815_v14 = vcombine.low %v12758_v9, %v21667_v52  ;;  %v21754_v9 = vld [vmem:[#allocation2 + $0x22] sm:$0xff] }
 0x379   : > { %17520 = vmatpush1.bf16.xpose.msk.msra.mxu1 %vm21427_vm5, %v17518_v32  ;;  %12393 = vmatprep.mubr.f32.mxu1 %v23473_v16  ;;  %v12145_v32 = vld [vmem:[#allocation2 + $0x28] sm:$0xf] }
 0x37a   : > { %17521 = vmatprep.subr.bf16.mxu1 %v23459_v3  ;;  %v12404_v29 = vcombine.low %v12145_v32, %v21657_v25  ;;  %v21758_v3 = vpack.c.bf16 %v12814_v28, %v12813_v57  ;;  %v21760_v58 = vpack.c.bf16 %v12816_v54, %v12815_v14  ;;  %v17522_v32 = vpack.c.bf16 %v21722_v24, %v12402_v48  ;;  %v21775_v57 = vld [vmem:[#allocation2 + $0x62] sm:$0xff]  ;;  %v21777_v28 = vld [vmem:[#allocation2 + $0x72] sm:$0xff] }
 0x37b   : > { %v21779_v14 = vld [vmem:[#allocation2 + $0x82] sm:$0xff]  ;;  %v21783_v54 = vcombine.high %v21754_v9, %v21754_v9  ;;  %v21800_v48 = vcombine.high %v21764_v26, %v21764_v26  ;;  %v13017_v24 = vcombine.low %v21521_v4, %v12960_v7  ;;  %v21814_v8 = vcombine.high %v21777_v28, %v21777_v28  ;;  %v12962_v7 = vld [vmem:[#allocation2 + $0x79] sm:$0xf] }
 0x37c   : > { %16073 = vmatmul.mubr.msk.f32.gmra.mrb[202].mxu1 %vm12108_vm3, %v16053_v2  ;;  %v21756_v2 = vld [vmem:[#allocation2 + $0x32] sm:$0xff]  ;;  %23514 = vst [vmem:[#allocation16_spill] sm:$0xff] %v21758_v3  ;;  %23515 = vst [vmem:[#allocation4_spill] sm:$0xff] %v21760_v58  ;;  %v17526_v30 = vpack.c.bf16 %v12405_v35, %v12404_v29  ;;  %v13015_v35 = vcombine.low %v21493_v56, %v21512_v60  ;;  %v13018_v56 = vcombine.low %v21535_v21, %v21542_v33  ;;  %v12964_v21 = vld [vmem:[#allocation2 + $0x89] sm:$0xf] }
 0x37d   : > { %12524 = vmatprep.mubr.f32.mxu1 %v23473_v16  ;;  %v21787_v11 = vcombine.high %v21756_v2, %v21756_v2  ;;  %v21802_v29 = vld [vmem:[#allocation2 + $0x92] sm:$0xff]  ;;  %v21810_v60 = vcombine.high %v21775_v57, %v21775_v57  ;;  %v13019_v58 = vcombine.low %v12962_v7, %v21558_v18  ;;  %v13020_v3 = vcombine.low %v21567_v62, %v12964_v21  ;;  %v12968_v25 = vld [vmem:[#allocation2 + $0xa9] sm:$0xf] }
 0x37e   : > { %v21822_v4 = vpack.c.bf16 %v13016_v12, %v13015_v35  ;;  %v21824_v33 = vld [vmem:[#allocation2 + $0xb2] sm:$0xff]  ;;  %v21826_v63 = vpack.c.bf16 %v13018_v56, %v13017_v24  ;;  %v21834_v53 = vcombine.high %v21802_v29, %v21802_v29  ;;  %v13022_v35 = vcombine.low %v12966_v22, %v21601_v31  ;;  %v13154_v56 = vld [vmem:[#allocation2 + $0x1a] sm:$0xf]  ;;  %v13156_v7 = vld [vmem:[#allocation2 + $0x2a] sm:$0xf] }
 0x37f   : > { %v13023_v12 = vcombine.low %v21614_v42, %v12968_v25  ;;  %v13024_v24 = vcombine.low %v21626_v39, %v21631_v55  ;;  %v21842_v18 = vcombine.high %v21820_v37, %v21820_v37  ;;  %v21844_v62 = vpack.c.bf16 %v13020_v3, %v13019_v58  ;;  %v13158_v25 = vld [vmem:[#allocation2 + $0x3a] sm:$0xf]  ;;  %v13160_v22 = vld [vmem:[#allocation2 + $0x4a] sm:$0xf] }
 0x380   : > { %23519 = vst [vmem:[#allocation7_spill] sm:$0xff] %v21822_v4  ;;  %23520 = vst [vmem:[#allocation17_spill] sm:$0xff] %v21826_v63  ;;  %v13214_v0 = vcombine.low %v13154_v56, %v21754_v9  ;;  %v21851_v31 = vcombine.high %v21824_v33, %v21824_v33  ;;  %v21853_v42 = vpack.c.bf16 %v13022_v35, %v13021_v38  ;;  %v13164_v63 = vld [vmem:[#allocation2 + $0x6a] sm:$0xf]  ;;  %v13365_v4 = vld [vmem:[#allocation2 + $0x58] sm:$0xf] }
 0x381   : > { %17524 = vmatpush1.bf16.xpose.msk.msra.mxu1 %vm21427_vm5, %v17522_v32  ;;  %v21818_v32 = vcombine.high %v21779_v14, %v21779_v14  ;;  %23521 = vst [vmem:[#allocation18_spill] sm:$0xff] %v21844_v62  ;;  %v21855_v39 = vpack.c.bf16 %v13024_v24, %v13023_v12  ;;  %v13215_v55 = vcombine.low %v21783_v54, %v13156_v7  ;;  %v13162_v62 = vld [vmem:[#allocation2 + $0x5a] sm:$0xf] }
 0x382   : > { %17525 = vmatprep.subr.bf16.mxu1 %v23518_v27  ;;  %23522 = vst [vmem:[#allocation19_spill] sm:$0xff] %v21853_v42  ;;  %v21858_v3 = vpack.c.bf16 %v13214_v0, %v13213_v49  ;;  %v13216_v58 = vcombine.low %v21756_v2, %v21787_v11  ;;  %v13217_v21 = vcombine.low %v13158_v25, %v21762_v59  ;;  %v13166_v24 = vld [vmem:[#allocation2 + $0x7a] sm:$0xf]  ;;  %v21870_v49 = vld [vmem:[#allocation2 + $0x21] sm:$0xff] }
 0x383   : > { %23523 = vst [vmem:[#allocation20_spill] sm:$0xff] %v21855_v39  ;;  %v13218_v56 = vcombine.low %v21796_v50, %v13160_v22  ;;  %v13219_v38 = vcombine.low %v21764_v26, %v21800_v48  ;;  %v13220_v35 = vcombine.low %v13162_v62, %v21775_v57  ;;  %v13221_v12 = vcombine.low %v21810_v60, %v13164_v63  ;;  %v13168_v22 = vld [vmem:[#allocation2 + $0x8a] sm:$0xf]  ;;  %v13170_v39 = vld [vmem:[#allocation2 + $0x9a] sm:$0xf]  ;;  %v21880_v62 = vld [vmem:[#allocation2 + $0xc0] sm:$0xff] }
 0x384   : > { %23524 = vst [vmem:[#allocation21_spill] sm:$0xff] %v21858_v3  ;;  %v21872_v0 = vpack.c.bf16 %v13216_v58, %v13215_v55  ;;  %v13222_v25 = vcombine.low %v21777_v28, %v21814_v8  ;;  %v13223_v3 = vcombine.low %v13166_v24, %v21779_v14  ;;  %v12149_v63 = vld [vmem:[#allocation2 + $0x48] sm:$0xf]  ;;  %v13225_v55 = vcombine.low %v21802_v29, %v21834_v53 }
 0x385   : > { %v21874_v7 = vpack.c.bf16 %v13218_v56, %v13217_v21  ;;  %v21882_v42 = vpack.c.bf16 %v13220_v35, %v13219_v38  ;;  %v13226_v58 = vcombine.low %v13170_v39, %v21820_v37  ;;  %v13172_v21 = vld [vmem:[#allocation2 + $0xaa] sm:$0xf]  ;;  %v12407_v56 = vcombine.low %v12149_v63, %v21651_v51  ;;  %v13369_v38 = vld [vmem:[#allocation2 + $0x78] sm:$0xf] }
 0x386   : > { %23525 = vst [vmem:[#allocation22_spill] sm:$0xff] %v21872_v0  ;;  %v13227_v24 = vcombine.low %v21842_v18, %v13172_v21  ;;  %v13228_v0 = vcombine.low %v21824_v33, %v21851_v31  ;;  %v21896_v35 = vcombine.low %v21646_v13, %v21663_v6  ;;  %v21910_v21 = vcombine.high %v21880_v62, %v21880_v62 }
 0x387   : > { %23526 = vst [vmem:[#allocation23_spill] sm:$0xff] %v21874_v7  ;;  %v21889_v7 = vpack.c.bf16 %v13222_v25, %v13221_v12  ;;  %v21904_v63 = vpack.c.bf16 %v13226_v58, %v13225_v55  ;;  %v13373_v12 = vld [vmem:[#allocation2 + $0x98] sm:$0xf]  ;;  %v12409_v25 = vcombine.low %v21659_v20, %v21689_v17  ;;  %v21914_v13 = vcombine.high %v21870_v49, %v21870_v49  ;;  %v13371_v17 = vld [vmem:[#allocation2 + $0x88] sm:$0xf] }
 0x388   : > { %v21916_v6 = vpack.c.bf16 %v13228_v0, %v13227_v24  ;;  %v13426_v20 = vcombine.low %v21693_v10, %v13369_v38  ;;  %v13377_v58 = vld [vmem:[#allocation2 + $0xb8] sm:$0xf]  ;;  %v13428_v0 = vcombine.low %v13371_v17, %v21669_v41  ;;  %v13429_v24 = vcombine.low %v21701_v1, %v13373_v12 }
 0x389   : > { %17528 = vmatpush1.bf16.xpose.msk.msra.mxu1 %vm21427_vm5, %v17526_v30  ;;  %v13224_v30 = vcombine.low %v21818_v32, %v13168_v22  ;;  %23527 = vst [vmem:[#allocation24_spill] sm:$0xff] %v21889_v7  ;;  %v21900_v22 = vcombine.low %v21667_v52, %v21697_v43  ;;  %23529 = vst [vmem:[#allocation26_spill] sm:$0xff] %v21904_v63  ;;  %v13363_v52 = vld [vmem:[#allocation2 + $0x48] sm:$0xf]  ;;  %v17530_v63 = vpack.c.bf16 %v12407_v56, %v21896_v35  ;;  %v12151_v12 = vld [vmem:[#allocation2 + $0x58] sm:$0xf] }
 0x38a   : > { %17529 = vmatprep.subr.bf16.mxu1 %v23518_v27  ;;  %23530 = vst [vmem:[#allocation27_spill] sm:$0xff] %v21916_v6  ;;  %v13367_v43 = vld [vmem:[#allocation2 + $0x68] sm:$0xf]  ;;  %v21937_v56 = vpack.c.bf16 %v13429_v24, %v13428_v0 }
 0x38b   : > { %v21902_v39 = vpack.c.bf16 %v13224_v30, %v13223_v3  ;;  %v13422_v3 = vcombine.low %v13363_v52, %v21651_v51  ;;  %v13423_v30 = vcombine.low %v21677_v15, %v13365_v4  ;;  %v13425_v55 = vcombine.low %v13367_v43, %v21665_v47  ;;  %v13375_v6 = vld [vmem:[#allocation2 + $0xa8] sm:$0xf] }
 0x38c   : > { %v21932_v4 = vpack.c.bf16 %v21900_v22, %v13426_v20  ;;  %v13431_v38 = vcombine.low %v13375_v6, %v21681_v34  ;;  %v13622_v43 = vcombine.low %v21870_v49, %v21914_v13  ;;  %v12155_v20 = vld [vmem:[#allocation2 + $0x78] sm:$0xf]  ;;  %v21962_v0 = vld [vmem:[#allocation2 + $0xc2] sm:$0xff] }
 0x38d   : > { %23528 = vst [vmem:[#allocation25_spill] sm:$0xff] %v21902_v39  ;;  %v12415_v39 = vcombine.low %v21679_v44, %v21706_v46  ;;  %v21927_v7 = vpack.c.bf16 %v13423_v30, %v13422_v3  ;;  %v21929_v51 = vpack.c.bf16 %v13425_v55, %v12409_v25  ;;  %v13432_v44 = vcombine.low %v21710_v23, %v13377_v58  ;;  %v21947_v3 = vld [vmem:[#allocation2 + $0xc1] sm:$0xff] }
 0x38e   : > { %v13433_v46 = vcombine.low %v21880_v62, %v21910_v21  ;;  %v21954_v30 = vcombine.high %v21947_v3, %v21947_v3  ;;  %v12411_v58 = vcombine.low %v21693_v10, %v12155_v20  ;;  %v12153_v24 = vld [vmem:[#allocation2 + $0x68] sm:$0xf]  ;;  %v21976_v10 = vcombine.low %v21779_v14, %v21818_v32  ;;  %v13785_v32 = vld [vmem:[#allocation2 + $0xba] sm:$0xf] }
 0x38f   : > { %v21943_v52 = vpack.c.bf16 %v13431_v38, %v12415_v39  ;;  %v13769_v38 = vld [vmem:[#allocation2 + $0x3a] sm:$0xf] }
 0x390   : > { %v21949_v6 = vpack.c.bf16 %v13433_v46, %v13432_v44  ;;  %v13637_v17 = vcombine.low %v21947_v3, %v21954_v30  ;;  %v21971_v44 = vcombine.high %v21962_v0, %v21962_v0  ;;  %v13828_v46 = vcombine.low %v21787_v11, %v13769_v38  ;;  %v12159_v38 = vld [vmem:[#allocation2 + $0x98] sm:$0xf] }
 0x391   : > { %17532 = vmatpush1.bf16.xpose.msk.msra.mxu1 %vm21427_vm5, %v17530_v63  ;;  %v12408_v63 = vcombine.low %v21677_v15, %v12151_v12  ;;  %v21966_v15 = vcombine.low %v21762_v59, %v21796_v50  ;;  %v12157_v59 = vld [vmem:[#allocation2 + $0x88] sm:$0xf] }
 0x392   : > { %17533 = vmatprep.subr.bf16.mxu1 %v23518_v27  ;;  %v13841_v50 = vcombine.low %v21962_v0, %v21971_v44  ;;  %v12413_v20 = vcombine.low %v12157_v59, %v21669_v41  ;;  %v12163_v41 = vld [vmem:[#allocation2 + $0xb8] sm:$0xf]  ;;  %v12540_v59 = vld [vmem:[#allocation2 + $0x2] sm:$0xff] }
 0x393   : > { %v17534_v55 = vpack.c.bf16 %v12409_v25, %v12408_v63  ;;  %v12410_v25 = vcombine.low %v12153_v24, %v21665_v47  ;;  %v21979_v63 = vpack.c.bf16 %v21966_v15, %v13828_v46  ;;  %v12414_v46 = vcombine.low %v21701_v1, %v12159_v38  ;;  %v12541_v1 = vld [vmem:[#allocation2 + $0xa] sm:$0xf] }
 0x395   : > { %v17538_v12 = vpack.c.bf16 %v12411_v58, %v12410_v25  ;;  %v13840_v58 = vcombine.low %v21851_v31, %v13785_v32  ;;  %v17542_v25 = vpack.c.bf16 %v12413_v20, %v21900_v22  ;;  %v12588_v20 = vcombine.high %v12540_v59, %v12540_v59  ;;  %v12138_v32 = vld [vmem:[%s23450_s3] sm:$0xff] }
 0x397   : > { %v21992_v24 = vpack.c.bf16 %v13841_v50, %v13840_v58  ;;  %v12600_v58 = vcombine.low %v12540_v59, %v12588_v20  ;;  %v12551_v59 = vld [vmem:[#allocation2 + $0x5a] sm:$0xf] }
 0x399   : > { %17536 = vmatpush1.bf16.xpose.msk.msra.mxu1 %vm21427_vm5, %v17534_v55  ;;  %v13777_v55 = vld [vmem:[#allocation2 + $0x7a] sm:$0xf] }
 0x39a   : > { %17537 = vmatprep.subr.bf16.mxu1 %v23518_v27  ;;  %v13834_v47 = vcombine.low %v21814_v8, %v13777_v55  ;;  %v12417_v55 = vcombine.low %v21710_v23, %v12163_v41 }
 0x39c   : > { %v21989_v14 = vpack.c.bf16 %v21976_v10, %v13834_v47  ;;  %v12161_v47 = vld [vmem:[#allocation2 + $0xa8] sm:$0xf] }
 0x39d   : > { %v12416_v22 = vcombine.low %v12161_v47, %v21681_v34  ;;  %v12139_v34 = vld [vmem:[%s23450_s3 + $0x8] sm:$0xff] }
 0x39f   : > { %v17550_v50 = vpack.c.bf16 %v12417_v55, %v12416_v22  ;;  %v12545_v55 = vld [vmem:[#allocation2 + $0x2a] sm:$0xf] }
 0x3a0   : > { %v12604_v47 = vcombine.low %v12545_v55, %v21756_v2 }
 0x3a1   : > { %17540 = vmatpush1.bf16.xpose.msk.msra.mxu1 %vm21427_vm5, %v17538_v12  ;;  %v17546_v12 = vpack.c.bf16 %v12415_v39, %v12414_v46  ;;  %v12601_v39 = vcombine.low %v12541_v1, %v21743_v36  ;;  %v12603_v36 = vcombine.low %v21754_v9, %v21783_v54  ;;  %v12553_v1 = vld [vmem:[#allocation2 + $0x6a] sm:$0xf] }
 0x3a2   : > { %17541 = vmatprep.subr.bf16.mxu1 %v23518_v27 }
 0x3a3   : > { %v17554_v23 = vpack.c.bf16 %v12601_v39, %v12600_v58  ;;  %v12610_v39 = vcombine.low %v12553_v1, %v21777_v28  ;;  %v12559_v28 = vld [vmem:[#allocation2 + $0x9a] sm:$0xf] }
 0x3a4   : > { %v12614_v58 = vcombine.low %v21834_v53, %v12559_v28  ;;  %v23540_v28 = vld [vmem:[#allocation8_spill] sm:$0xff] }
 0x3a9   : > { %17544 = vmatpush1.bf16.xpose.msk.msra.mxu1 %vm21427_vm5, %v17542_v25  ;;  %v12543_v25 = vld [vmem:[#allocation2 + $0x1a] sm:$0xf] }
 0x3aa   : > { %17545 = vmatprep.subr.bf16.mxu1 %v23518_v27  ;;  %v12602_v38 = vcombine.low %v21773_v19, %v12543_v25  ;;  %v12549_v19 = vld [vmem:[#allocation2 + $0x4a] sm:$0xf] }
 0x3ab   : > { %v12607_v54 = vcombine.low %v12549_v19, %v21764_v26  ;;  %v12555_v26 = vld [vmem:[#allocation2 + $0x7a] sm:$0xf]  ;;  %v23536_v19 = vld [vmem:[#allocation16_spill] sm:$0xff] }
 0x3ac   : > { %v17558_v46 = vpack.c.bf16 %v12603_v36, %v12602_v38  ;;  %v12805_v38 = vcombine.low %v21642_v5, %v21718_v61  ;;  %v23533_v5 = vld [vmem:[#allocation11_spill] sm:$0xff] }
 0x3ad   : > { %v17566_v22 = vpack.c.bf16 %v12607_v54, %v21966_v15  ;;  %v12611_v15 = vcombine.low %v21814_v8, %v12555_v26  ;;  %v12615_v8 = vcombine.low %v21820_v37, %v21842_v18  ;;  %v12746_v37 = vld [vmem:[#allocation2 + $0x18] sm:$0xf]  ;;  %v16094_v18 = vld [vmem:[%s23450_s3 + $0x20] sm:$0xff] }
 0x3ae   : > { %v12806_v53 = vcombine.low %v12746_v37, %v21649_v45  ;;  %v12748_v45 = vld [vmem:[#allocation2 + $0x28] sm:$0xf]  ;;  %v12954_v37 = vld [vmem:[#allocation2 + $0x39] sm:$0xf] }
 0x3af   : > { %v12807_v61 = vcombine.low %v23533_v5, %v12748_v45  ;;  %v23537_v54 = vld [vmem:[#allocation4_spill] sm:$0xff]  ;;  %v23544_v45 = vld [vmem:[#allocation18_spill] sm:$0xff] }
 0x3b0   : > { %v23546_v5 = vld [vmem:[#allocation20_spill] sm:$0xff] }
 0x3b1   : > { %17548 = vmatpush1.bf16.xpose.msk.msra.mxu1 %vm21427_vm5, %v17546_v12  ;;  %v12547_v12 = vld [vmem:[#allocation2 + $0x3a] sm:$0xf] }
 0x3b2   : > { %17549 = vmatprep.subr.bf16.mxu1 %v23518_v27  ;;  %v12605_v41 = vcombine.low %v21787_v11, %v12547_v12  ;;  %v12609_v11 = vcombine.low %v21775_v57, %v21810_v60  ;;  %v12557_v57 = vld [vmem:[#allocation2 + $0x8a] sm:$0xf]  ;;  %v23532_v12 = vld [vmem:[#allocation10_spill] sm:$0xff] }
 0x3b4   : > { %v17562_v9 = vpack.c.bf16 %v12605_v41, %v12604_v47  ;;  %v23534_v47 = vld [vmem:[#allocation14_spill] sm:$0xff] }
 0x3b9   : > { %17552 = vmatpush1.bf16.xpose.msk.msra.mxu1 %vm21427_vm5, %v17550_v50  ;;  %v12608_v50 = vcombine.low %v21800_v48, %v12551_v59  ;;  %v12613_v48 = vcombine.low %v12557_v57, %v21802_v29  ;;  %v12563_v29 = vld [vmem:[#allocation2 + $0xba] sm:$0xf]  ;;  %v23539_v59 = vld [vmem:[#allocation6_spill] sm:$0xff] }
 0x3ba   : > { %17553 = vmatprep.subr.bf16.mxu1 %v23518_v27 }
 0x3bb   : > { %v17570_v20 = vpack.c.bf16 %v12609_v11, %v12608_v50  ;;  %v17578_v60 = vpack.c.bf16 %v12613_v48, %v21976_v10  ;;  %v12617_v10 = vcombine.low %v21851_v31, %v12563_v29  ;;  %v17590_v31 = vpack.c.bf16 %v12806_v53, %v12805_v38  ;;  %v12768_v11 = vld [vmem:[#allocation2 + $0xc8] sm:$0xf]  ;;  %v16116_v48 = vld [vmem:[%s23450_s3 + $0x30] sm:$0xff] }
 0x3bc   : > { %v12822_v50 = vcombine.low %v21910_v21, %v12768_v11  ;;  %v18651_v53 = vld [vmem:[#allocation2 + $0x41] sm:$0xff] }
 0x3bd   : > { %v16139_v11 = vld [vmem:[%s23450_s3 + $0x48] sm:$0xff] }
 0x3c0   : > { %16092 = vmatmul.mubr.msk.f32.vlgmr.msra.gmra.mrb[200].mxu1 %vm12108_vm3, %v12138_v32  ;;  %v17574_v32 = vpack.c.bf16 %v12611_v15, %v12610_v39  ;;  %v12949_v15 = vld [vmem:[#allocation2 + $0x11] sm:$0xff] }
 0x3c1   : > { %17556 = vmatpush1.bf16.xpose.msk.msra.mxu1 %vm21427_vm5, %v17554_v23  ;;  %12530 = vmatprep.mubr.f32.mxu1 %v23473_v16  ;;  %v17582_v23 = vpack.c.bf16 %v12615_v8, %v12614_v58  ;;  %v12997_v39 = vcombine.high %v12949_v15, %v12949_v15  ;;  %v18650_v8 = vld [vmem:[#allocation2 + $0x31] sm:$0xff] }
 0x3c2   : > { %17557 = vmatprep.subr.bf16.mxu1 %v23518_v27  ;;  %v13012_v58 = vcombine.low %v18650_v8, %v23540_v28  ;;  %v23554_v8 = vld [vmem:[#allocation13_spill] sm:$0xff] }
 0x3c4   : > { %16093 = vmatmul.mubr.msk.f32.gmra.mrb[202].mxu1 %vm12108_vm3, %v12139_v34  ;;  %v12561_v34 = vld [vmem:[#allocation2 + $0xaa] sm:$0xf] }
 0x3c5   : > { %12724 = vmatprep.mubr.f32.mxu1 %v23473_v16  ;;  %v12616_v36 = vcombine.low %v12561_v34, %v21824_v33  ;;  %v16095_v33 = vld [vmem:[%s23450_s3 + $0x28] sm:$0xff] }
 0x3c6   : > { %v12956_v34 = vld [vmem:[#allocation2 + $0x49] sm:$0xf] }
 0x3c7   : > { %v17586_v25 = vpack.c.bf16 %v12617_v10, %v12616_v36  ;;  %v23541_v36 = vld [vmem:[#allocation9_spill] sm:$0xff] }
 0x3c9   : > { %17560 = vmatpush1.bf16.xpose.msk.msra.mxu1 %vm21427_vm5, %v17558_v46  ;;  %v23531_v46 = vld [vmem:[#allocation12_spill] sm:$0xff] }
 0x3ca   : > { %17561 = vmatprep.subr.bf16.mxu1 %v23518_v27  ;;  %v12808_v41 = vcombine.low %v23532_v12, %v23531_v46 }
 0x3cc   : > { %v17594_v55 = vpack.c.bf16 %v12808_v41, %v12807_v61  ;;  %v23545_v41 = vld [vmem:[#allocation19_spill] sm:$0xff]  ;;  %v12972_v61 = vld [vmem:[#allocation2 + $0xc9] sm:$0xf] }
 0x3d1   : > { %17564 = vmatpush1.bf16.xpose.msk.msra.mxu1 %vm21427_vm5, %v17562_v9  ;;  %v23535_v9 = vld [vmem:[#allocation15_spill] sm:$0xff] }
 0x3d2   : > { %17565 = vmatprep.subr.bf16.mxu1 %v23518_v27 }
 0x3d9   : > { %17568 = vmatpush1.bf16.xpose.msk.msra.mxu1 %vm21427_vm5, %v17566_v22  ;;  %v23538_v22 = vld [vmem:[#allocation5_spill] sm:$0xff] }
 0x3da   : > { %17569 = vmatprep.subr.bf16.mxu1 %v23518_v27 }
 0x3e1   : > { %17572 = vmatpush1.bf16.xpose.msk.msra.mxu1 %vm21427_vm5, %v17570_v20  ;;  %v12766_v20 = vld [vmem:[#allocation2 + $0xb8] sm:$0xf] }
 0x3e2   : > { %17573 = vmatprep.subr.bf16.mxu1 %v23518_v27  ;;  %v12821_v26 = vcombine.low %v12766_v20, %v21880_v62  ;;  %v16117_v62 = vld [vmem:[%s23450_s3 + $0x38] sm:$0xff]  ;;  %v23550_v20 = vld [vmem:[#allocation24_spill] sm:$0xff] }
 0x3e4   : > { %v17622_v1 = vpack.c.bf16 %v12822_v50, %v12821_v26  ;;  %v23549_v50 = vld [vmem:[#allocation23_spill] sm:$0xff]  ;;  %v23551_v26 = vld [vmem:[#allocation25_spill] sm:$0xff] }
 0x3e9   : > { %17576 = vmatpush1.bf16.xpose.msk.msra.mxu1 %vm21427_vm5, %v17574_v32  ;;  %v12950_v32 = vld [vmem:[#allocation2 + $0x19] sm:$0xf] }
 0x3ea   : > { %17577 = vmatprep.subr.bf16.mxu1 %v23518_v27  ;;  %v13010_v57 = vcombine.low %v12950_v32, %v21870_v49  ;;  %v13174_v32 = vld [vmem:[#allocation2 + $0xba] sm:$0xf] }
 0x3f1   : > { %17580 = vmatpush1.bf16.xpose.msk.msra.mxu1 %vm21427_vm5, %v17578_v60  ;;  %v13009_v60 = vcombine.low %v12949_v15, %v12997_v39  ;;  %v23552_v15 = vld [vmem:[#allocation26_spill] sm:$0xff] }
 0x3f2   : > { %17581 = vmatprep.subr.bf16.mxu1 %v23518_v27 }
 0x3f3   : > { %v17626_v21 = vpack.c.bf16 %v13010_v57, %v13009_v60  ;;  %v13229_v57 = vcombine.low %v13174_v32, %v21962_v0  ;;  %v13359_v60 = vld [vmem:[#allocation2 + $0x28] sm:$0xf]  ;;  %v16161_v0 = vld [vmem:[%s23450_s3 + $0x58] sm:$0xff] }
 0x3f9   : > { %17584 = vmatpush1.bf16.xpose.msk.msra.mxu1 %vm21427_vm5, %v17582_v23  ;;  %v12952_v23 = vld [vmem:[#allocation2 + $0x29] sm:$0xf] }
 0x3fa   : > { %17585 = vmatprep.subr.bf16.mxu1 %v23518_v27  ;;  %v13011_v29 = vcombine.low %v21914_v13, %v12952_v23 }
 0x3fc   : > { %v17630_v10 = vpack.c.bf16 %v13012_v58, %v13011_v29  ;;  %v13564_v29 = vld [vmem:[#allocation2 + $0x31] sm:$0xff] }
 0x401   : > { %17588 = vmatpush1.bf16.xpose.msk.msra.mxu1 %vm21427_vm5, %v17586_v25  ;;  %v13014_v25 = vcombine.low %v23541_v36, %v12956_v34  ;;  %v13566_v34 = vld [vmem:[#allocation2 + $0x41] sm:$0xff] }
 0x402   : > { %17589 = vmatprep.subr.bf16.mxu1 %v23518_v27  ;;  %v16182_v36 = vld [vmem:[%s23450_s3 + $0x60] sm:$0xff] }
 0x408   : > { %16114 = vmatmul.mubr.msk.f32.vlgmr.msra.gmra.mrb[200].mxu1 %vm12108_vm3, %v16094_v18  ;;  %v13013_v18 = vcombine.low %v12954_v37, %v18651_v53  ;;  %v13611_v37 = vcombine.high %v13564_v29, %v13564_v29  ;;  %v16183_v53 = vld [vmem:[%s23450_s3 + $0x68] sm:$0xff] }
 0x409   : > { %17592 = vmatpush1.bf16.xpose.msk.msra.mxu1 %vm21427_vm5, %v17590_v31  ;;  %12730 = vmatprep.mubr.f32.mxu1 %v23473_v16  ;;  %v23542_v31 = vld [vmem:[#allocation7_spill] sm:$0xff] }
 0x40a   : > { %17593 = vmatprep.subr.bf16.mxu1 %v23518_v27  ;;  %v17634_v38 = vpack.c.bf16 %v13014_v25, %v13013_v18  ;;  %v13612_v25 = vcombine.high %v13566_v34, %v13566_v34 }
 0x40c   : > { %16115 = vmatmul.mubr.msk.f32.gmra.mrb[202].mxu1 %vm12108_vm3, %v16095_v33  ;;  %v23543_v33 = vld [vmem:[#allocation17_spill] sm:$0xff]  ;;  %v13625_v18 = vcombine.low %v13566_v34, %v13612_v25  ;;  %v13578_v25 = vld [vmem:[#allocation2 + $0xa1] sm:$0xff] }
 0x40d   : > { %12929 = vmatprep.mubr.f32.mxu1 %v23473_v16 }
 0x411   : > { %17596 = vmatpush1.bf16.xpose.msk.msra.mxu1 %vm21427_vm5, %v17594_v55  ;;  %v13026_v55 = vcombine.low %v21954_v30, %v12972_v61  ;;  %v13570_v61 = vld [vmem:[#allocation2 + $0x61] sm:$0xff] }
 0x412   : > { %17597 = vmatprep.subr.bf16.mxu1 %v23518_v27 }
 0x419   : > { %17600 = vmatpush1.bf16.xpose.msk.msra.mxu1 %vm21427_vm5, %v23534_v47  ;;  %v12970_v47 = vld [vmem:[#allocation2 + $0xb9] sm:$0xf] }
 0x41a   : > { %17601 = vmatprep.subr.bf16.mxu1 %v23518_v27 }
 0x421   : > { %17604 = vmatpush1.bf16.xpose.msk.msra.mxu1 %vm21427_vm5, %v23535_v9  ;;  %v13025_v9 = vcombine.low %v12970_v47, %v21947_v3  ;;  %v13572_v47 = vld [vmem:[#allocation2 + $0x71] sm:$0xff]  ;;  %v13767_v3 = vld [vmem:[#allocation2 + $0x2a] sm:$0xf] }
 0x422   : > { %17605 = vmatprep.subr.bf16.mxu1 %v23518_v27  ;;  %v13827_v30 = vcombine.low %v13767_v3, %v21756_v2  ;;  %v13772_v2 = vld [vmem:[#allocation2 + $0x52] sm:$0xff]  ;;  %v16263_v3 = vld [vmem:[%s23452_s5 + $0x108] sm:$0xff] }
 0x429   : > { %17608 = vmatpush1.bf16.xpose.msk.msra.mxu1 %vm21427_vm5, %v23536_v19  ;;  %v17658_v19 = vpack.c.bf16 %v13026_v55, %v13025_v9  ;;  %v13614_v9 = vcombine.high %v13570_v61, %v13570_v61 }
 0x42a   : > { %17609 = vmatprep.subr.bf16.mxu1 %v23518_v27 }
 0x431   : > { %17612 = vmatpush1.bf16.xpose.msk.msra.mxu1 %vm21427_vm5, %v23537_v54  ;;  %v16138_v54 = vld [vmem:[%s23450_s3 + $0x40] sm:$0xff] }
 0x432   : > { %17613 = vmatprep.subr.bf16.mxu1 %v23518_v27 }
 0x439   : > { %17616 = vmatpush1.bf16.xpose.msk.msra.mxu1 %vm21427_vm5, %v23538_v22  ;;  %v23547_v22 = vld [vmem:[#allocation21_spill] sm:$0xff] }
 0x43a   : > { %17617 = vmatprep.subr.bf16.mxu1 %v23518_v27 }
 0x441   : > { %17620 = vmatpush1.bf16.xpose.msk.msra.mxu1 %vm21427_vm5, %v23539_v59  ;;  %v23548_v59 = vld [vmem:[#allocation22_spill] sm:$0xff] }
 0x442   : > { %17621 = vmatprep.subr.bf16.mxu1 %v23518_v27 }
 0x449   : > { %17624 = vmatpush1.bf16.xpose.msk.msra.mxu1 %vm21427_vm5, %v17622_v1  ;;  %v13176_v1 = vld [vmem:[#allocation2 + $0xca] sm:$0xf] }
 0x44a   : > { %17625 = vmatprep.subr.bf16.mxu1 %v23518_v27  ;;  %v13230_v39 = vcombine.low %v21971_v44, %v13176_v1  ;;  %v13361_v44 = vld [vmem:[#allocation2 + $0x38] sm:$0xf] }
 0x450   : > { %16136 = vmatmul.mubr.msk.f32.vlgmr.msra.gmra.mrb[200].mxu1 %vm12108_vm3, %v16116_v48  ;;  %v17694_v48 = vpack.c.bf16 %v13230_v39, %v13229_v57  ;;  %v13968_v57 = vld [vmem:[%s23451_s4 + $0x8] sm:$0xff] }
 0x451   : > { %17628 = vmatpush1.bf16.xpose.msk.msra.mxu1 %vm21427_vm5, %v17626_v21  ;;  %12935 = vmatprep.mubr.f32.mxu1 %v23473_v16  ;;  %v13419_v21 = vcombine.low %v13359_v60, %v23532_v12  ;;  %v13420_v12 = vcombine.low %v23531_v46, %v13361_v44  ;;  %v13379_v46 = vld [vmem:[#allocation2 + $0xc8] sm:$0xf]  ;;  %v13615_v60 = vcombine.high %v13572_v47, %v13572_v47 }
 0x452   : > { %17629 = vmatprep.subr.bf16.mxu1 %v23518_v27 }
 0x453   : > { %v17698_v28 = vpack.c.bf16 %v13419_v21, %v23554_v8  ;;  %v17702_v58 = vpack.c.bf16 %v21896_v35, %v13420_v12  ;;  %v16252_v21 = vld [vmem:[%s23452_s5 + $0xb0] sm:$0xff] }
 0x454   : > { %16137 = vmatmul.mubr.msk.f32.gmra.mrb[202].mxu1 %vm12108_vm3, %v16117_v62  ;;  %v16160_v62 = vld [vmem:[%s23450_s3 + $0x50] sm:$0xff] }
 0x455   : > { %13133 = vmatprep.mubr.f32.mxu1 %v23473_v16 }
 0x459   : > { %17632 = vmatpush1.bf16.xpose.msk.msra.mxu1 %vm21427_vm5, %v17630_v10 }
 0x45a   : > { %17633 = vmatprep.subr.bf16.mxu1 %v23518_v27 }
 0x461   : > { %17636 = vmatpush1.bf16.xpose.msk.msra.mxu1 %vm21427_vm5, %v17634_v38  ;;  %v13565_v38 = vld [vmem:[#allocation2 + $0x39] sm:$0xf] }
 0x462   : > { %17637 = vmatprep.subr.bf16.mxu1 %v23518_v27  ;;  %v13624_v49 = vcombine.low %v13611_v37, %v13565_v38  ;;  %v13618_v38 = vcombine.high %v13578_v25, %v13578_v25 }
 0x464   : > { %v17738_v13 = vpack.c.bf16 %v13625_v18, %v13624_v49  ;;  %v16261_v49 = vld [vmem:[%s23452_s5 + $0xf8] sm:$0xff] }
 0x469   : > { %17640 = vmatpush1.bf16.xpose.msk.msra.mxu1 %vm21427_vm5, %v23542_v31  ;;  %v13568_v31 = vld [vmem:[#allocation2 + $0x51] sm:$0xff] }
 0x46a   : > { %17641 = vmatprep.subr.bf16.mxu1 %v23518_v27 }
 0x471   : > { %17644 = vmatpush1.bf16.xpose.msk.msra.mxu1 %vm21427_vm5, %v23543_v33  ;;  %v13569_v33 = vld [vmem:[#allocation2 + $0x59] sm:$0xf] }
 0x472   : > { %17645 = vmatprep.subr.bf16.mxu1 %v23518_v27 }
 0x479   : > { %17648 = vmatpush1.bf16.xpose.msk.msra.mxu1 %vm21427_vm5, %v23544_v45 }
 0x47a   : > { %17649 = vmatprep.subr.bf16.mxu1 %v23518_v27 }
 0x481   : > { %17652 = vmatpush1.bf16.xpose.msk.msra.mxu1 %vm21427_vm5, %v23545_v41  ;;  %v13567_v41 = vld [vmem:[#allocation2 + $0x49] sm:$0xf] }
 0x482   : > { %17653 = vmatprep.subr.bf16.mxu1 %v23518_v27 }
 0x489   : > { %17656 = vmatpush1.bf16.xpose.msk.msra.mxu1 %vm21427_vm5, %v23546_v5  ;;  %v13626_v5 = vcombine.low %v13567_v41, %v13568_v31 }
 0x48a   : > { %17657 = vmatprep.subr.bf16.mxu1 %v23518_v27 }
 0x491   : > { %17660 = vmatpush1.bf16.xpose.msk.msra.mxu1 %vm21427_vm5, %v17658_v19  ;;  %v13571_v19 = vld [vmem:[#allocation2 + $0x69] sm:$0xf] }
 0x492   : > { %17661 = vmatprep.subr.bf16.mxu1 %v23518_v27 }
 0x498   : > { %16158 = vmatmul.mubr.msk.f32.vlgmr.msra.gmra.mrb[200].mxu1 %vm12108_vm3, %v16138_v54  ;;  %v13629_v54 = vcombine.low %v13571_v19, %v13572_v47 }
 0x499   : > { %17664 = vmatpush1.bf16.xpose.msk.msra.mxu1 %vm21427_vm5, %v23547_v22  ;;  %13139 = vmatprep.mubr.f32.mxu1 %v23473_v16  ;;  %v13574_v22 = vld [vmem:[#allocation2 + $0x81] sm:$0xff] }
 0x49a   : > { %17665 = vmatprep.subr.bf16.mxu1 %v23518_v27  ;;  %v13616_v32 = vcombine.high %v13574_v22, %v13574_v22 }
 0x49c   : > { %16159 = vmatmul.mubr.msk.f32.gmra.mrb[202].mxu1 %vm12108_vm3, %v16139_v11  ;;  %v13967_v11 = vld [vmem:[%s23451_s4] sm:$0xff]  ;;  %v13631_v8 = vcombine.low %v13574_v22, %v13616_v32  ;;  %v13773_v32 = vld [vmem:[#allocation2 + $0x5a] sm:$0xf] }
 0x49d   : > { %13337 = vmatprep.mubr.f32.mxu1 %v23473_v16 }
 0x4a1   : > { %17668 = vmatpush1.bf16.xpose.msk.msra.mxu1 %vm21427_vm5, %v23548_v59  ;;  %v16248_v59 = vld [vmem:[%s23452_s5 + $0x90] sm:$0xff] }
 0x4a2   : > { %17669 = vmatprep.subr.bf16.mxu1 %v23518_v27 }
 0x4a9   : > { %17672 = vmatpush1.bf16.xpose.msk.msra.mxu1 %vm21427_vm5, %v23549_v50  ;;  %v13628_v50 = vcombine.low %v13570_v61, %v13614_v9  ;;  %v13581_v61 = vld [vmem:[#allocation2 + $0xb9] sm:$0xf] }
 0x4aa   : > { %17673 = vmatprep.subr.bf16.mxu1 %v23518_v27 }
 0x4ab   : > { %v17746_v39 = vpack.c.bf16 %v13629_v54, %v13628_v50  ;;  %v13585_v54 = vld [vmem:[#allocation2 + $0xd9] sm:$0xf]  ;;  %v13766_v50 = vld [vmem:[#allocation2 + $0x22] sm:$0xff] }
 0x4b1   : > { %17676 = vmatpush1.bf16.xpose.msk.msra.mxu1 %vm21427_vm5, %v21882_v42  ;;  %v23553_v42 = vld [vmem:[#allocation27_spill] sm:$0xff] }
 0x4b2   : > { %17677 = vmatprep.subr.bf16.mxu1 %v23518_v27 }
 0x4b9   : > { %17680 = vmatpush1.bf16.xpose.msk.msra.mxu1 %vm21427_vm5, %v23550_v20  ;;  %v18666_v20 = vmov 0  }
 0x4ba   : > { %17681 = vmatprep.subr.bf16.mxu1 %v23518_v27  ;;  %18288 = vset.pattern.permute.xlu0 %v18666_v20 }
 0x4bb   : > { %13971 = vperm.xlu0 %18288, %v13967_v11   ;;  %v13583_v11 = vld [vmem:[#allocation2 + $0xc9] sm:$0xf] }
 0x4bf   : > { %13976 = vperm.xlu0 %18288, %v13968_v57  }
 0x4c1   : > { %17684 = vmatpush1.bf16.xpose.msk.msra.mxu1 %vm21427_vm5, %v23551_v26  ;;  %v16249_v26 = vld [vmem:[%s23452_s5 + $0x98] sm:$0xff] }
 0x4c2   : > { %17685 = vmatprep.subr.bf16.mxu1 %v23518_v27  ;;  %v17806_v1 = vpack.c.bf16 %v16249_v26, %v16248_v59  ;;  %v13814_v26 = vcombine.high %v13766_v50, %v13766_v50 }
 0x4c4   : > { %17807 = vmatpush1.bf16.msra.mxu0 %v17806_v1  ;;  %v16205_v1 = vld [vmem:[%s23450_s3 + $0x78] sm:$0xff] }
 0x4c5   : > { %17808 = vmatprep.subr.bf16.mxu0 %v23518_v27 }
 0x4c9   : > { %17688 = vmatpush1.bf16.xpose.msk.msra.mxu1 %vm21427_vm5, %v23552_v15  ;;  %v16250_v15 = vld [vmem:[%s23452_s5 + $0xa0] sm:$0xff] }
 0x4ca   : > { %17689 = vmatprep.subr.bf16.mxu1 %v23518_v27 }
 0x4d1   : > { %17692 = vmatpush1.bf16.xpose.msk.msra.mxu1 %vm21427_vm5, %v23553_v42  ;;  %v16251_v42 = vld [vmem:[%s23452_s5 + $0xa8] sm:$0xff] }
 0x4d2   : > { %17693 = vmatprep.subr.bf16.mxu1 %v23518_v27 }
 0x4d9   : > { %17696 = vmatpush1.bf16.xpose.msk.msra.mxu1 %vm21427_vm5, %v17694_v48  ;;  %v17809_v48 = vpack.c.bf16 %v16251_v42, %v16250_v15  ;;  %v13826_v15 = vcombine.low %v13766_v50, %v13814_v26  ;;  %v16526_v50 = vld [vmem:[%s23452_s5 + $0x8c8] sm:$0xff]  ;;  %v16262_v26 = vld [vmem:[%s23452_s5 + $0x100] sm:$0xff] }
 0x4da   : > { %17697 = vmatprep.subr.bf16.mxu1 %v23518_v27 }
 0x4db   : > { %17810 = vmatpush1.bf16.msra.mxu0 %v17809_v48  ;;  %v17770_v42 = vpack.c.bf16 %v13827_v30, %v13826_v15  ;;  %v13771_v48 = vld [vmem:[#allocation2 + $0x4a] sm:$0xf]  ;;  %v16527_v30 = vld [vmem:[%s23452_s5 + $0x8d0] sm:$0xff]  ;;  %v16528_v15 = vld [vmem:[%s23452_s5 + $0x8d8] sm:$0xff] }
 0x4dc   : > { %17811 = vmatprep.subr.bf16.mxu0 %v23518_v27 }
 0x4e0   : > { %16180 = vmatmul.mubr.msk.f32.vlgmr.msra.gmra.mrb[200].mxu1 %vm12108_vm3, %v16160_v62  ;;  %v16253_v62 = vld [vmem:[%s23452_s5 + $0xb8] sm:$0xff] }
 0x4e1   : > { %17700 = vmatpush1.bf16.xpose.msk.msra.mxu1 %vm21427_vm5, %v17698_v28  ;;  %13343 = vmatprep.mubr.f32.mxu1 %v23473_v16  ;;  %v13573_v28 = vld [vmem:[#allocation2 + $0x79] sm:$0xf]  ;;  %v17812_v44 = vpack.c.bf16 %v16253_v62, %v16252_v21  ;;  %v13774_v21 = vld [vmem:[#allocation2 + $0x62] sm:$0xff] }
 0x4e2   : > { %17701 = vmatprep.subr.bf16.mxu1 %v23518_v27  ;;  %v13630_v12 = vcombine.low %v13615_v60, %v13573_v28  ;;  %v13830_v60 = vcombine.low %v13771_v48, %v13772_v2  ;;  %v13775_v28 = vld [vmem:[#allocation2 + $0x6a] sm:$0xf] }
 0x4e3   : > { %17813 = vmatpush1.bf16.msra.mxu0 %v17812_v44 }
 0x4e4   : > { %16181 = vmatmul.mubr.msk.f32.gmra.mrb[202].mxu1 %vm12108_vm3, %v16161_v0  ;;  %v13576_v0 = vld [vmem:[#allocation2 + $0x91] sm:$0xff]  ;;  %17814 = vmatprep.subr.bf16.mxu0 %v23518_v27 }
 0x4e5   : > { %13542 = vmatprep.mubr.f32.mxu1 %v23473_v16 }
 0x4e9   : > { %17704 = vmatpush1.bf16.xpose.msk.msra.mxu1 %vm21427_vm5, %v17702_v58  ;;  %v16254_v58 = vld [vmem:[%s23452_s5 + $0xc0] sm:$0xff] }
 0x4ea   : > { %17705 = vmatprep.subr.bf16.mxu1 %v23518_v27 }
 0x4f1   : > { %17708 = vmatpush1.bf16.xpose.msk.msra.mxu1 %vm21427_vm5, %v21927_v7  ;;  %v13380_v7 = vld [vmem:[#allocation2 + $0xd0] sm:$0xff] }
 0x4f2   : > { %17709 = vmatprep.subr.bf16.mxu1 %v23518_v27  ;;  %v13417_v35 = vcombine.high %v13380_v7, %v13380_v7 }
 0x4f9   : > { %17712 = vmatpush1.bf16.xpose.msk.msra.mxu1 %vm21427_vm5, %v21929_v51  ;;  %v13381_v51 = vld [vmem:[#allocation2 + $0xd8] sm:$0xf] }
 0x4fa   : > { %17713 = vmatprep.subr.bf16.mxu1 %v23518_v27 }
 0x501   : > { %17716 = vmatpush1.bf16.xpose.msk.msra.mxu1 %vm21427_vm5, %v21932_v4  ;;  %v13435_v4 = vcombine.low %v13417_v35, %v13381_v51  ;;  %v17750_v35 = vpack.c.bf16 %v13631_v8, %v13630_v12  ;;  %v13617_v51 = vcombine.high %v13576_v0, %v13576_v0  ;;  %v13818_v8 = vcombine.high %v13774_v21, %v13774_v21 }
 0x502   : > { %17717 = vmatprep.subr.bf16.mxu1 %v23518_v27 }
 0x503   : > { %v13832_v12 = vcombine.low %v13774_v21, %v13818_v8  ;;  %v16532_v21 = vld [vmem:[%s23452_s5 + $0x8f8] sm:$0xff] }
 0x509   : > { %17720 = vmatpush1.bf16.xpose.msk.msra.mxu1 %vm21427_vm5, %v21937_v56  ;;  %v13434_v56 = vcombine.low %v13379_v46, %v13380_v7  ;;  %v16255_v7 = vld [vmem:[%s23452_s5 + $0xc8] sm:$0xff]  ;;  %v16256_v46 = vld [vmem:[%s23452_s5 + $0xd0] sm:$0xff] }
 0x50a   : > { %17721 = vmatprep.subr.bf16.mxu1 %v23518_v27 }
 0x50b   : > { %v17730_v23 = vpack.c.bf16 %v13435_v4, %v13434_v56  ;;  %v17815_v4 = vpack.c.bf16 %v16255_v7, %v16254_v58  ;;  %v16257_v56 = vld [vmem:[%s23452_s5 + $0xd8] sm:$0xff] }
 0x50d   : > { %17816 = vmatpush1.bf16.msra.mxu0 %v17815_v4  ;;  %v13779_v4 = vld [vmem:[#allocation2 + $0x8a] sm:$0xf] }
 0x50e   : > { %17817 = vmatprep.subr.bf16.mxu0 %v23518_v27 }
 0x511   : > { %17724 = vmatpush1.bf16.xpose.msk.msra.mxu1 %vm21427_vm5, %v21943_v52  ;;  %v13563_v52 = vld [vmem:[#allocation2 + $0x29] sm:$0xf] }
 0x512   : > { %17725 = vmatprep.subr.bf16.mxu1 %v23518_v27  ;;  %v13623_v10 = vcombine.low %v13563_v52, %v13564_v29  ;;  %v13575_v52 = vld [vmem:[#allocation2 + $0x89] sm:$0xf] }
 0x513   : > { %v13632_v34 = vcombine.low %v13575_v52, %v13576_v0  ;;  %v18652_v0 = vld [vmem:[#allocation2 + $0x72] sm:$0xff]  ;;  %v13783_v52 = vld [vmem:[#allocation2 + $0xaa] sm:$0xf] }
 0x514   : > { %v13833_v44 = vcombine.low %v13775_v28, %v18652_v0 }
 0x516   : > { %v17782_v58 = vpack.c.bf16 %v13833_v44, %v13832_v12 }
 0x519   : > { %17728 = vmatpush1.bf16.xpose.msk.msra.mxu1 %vm21427_vm5, %v21949_v6  ;;  %v17734_v6 = vpack.c.bf16 %v13623_v10, %v13622_v43  ;;  %v13613_v43 = vcombine.high %v13568_v31, %v13568_v31  ;;  %v17818_v10 = vpack.c.bf16 %v16257_v56, %v16256_v46  ;;  %v16260_v31 = vld [vmem:[%s23452_s5 + $0xf0] sm:$0xff]  ;;  %v13782_v56 = vld [vmem:[#allocation2 + $0xa2] sm:$0xff] }
 0x51a   : > { %17729 = vmatprep.subr.bf16.mxu1 %v23518_v27 }
 0x51b   : > { %v13627_v45 = vcombine.low %v13613_v43, %v13569_v33  ;;  %17819 = vmatpush1.bf16.msra.mxu0 %v17818_v10  ;;  %v17824_v33 = vpack.c.bf16 %v16261_v49, %v16260_v31  ;;  %v18653_v10 = vld [vmem:[#allocation2 + $0xb2] sm:$0xff] }
 0x51c   : > { %17820 = vmatprep.subr.bf16.mxu0 %v23518_v27  ;;  %v16515_v49 = vld [vmem:[%s23452_s5 + $0x870] sm:$0xff] }
 0x51d   : > { %v17742_v55 = vpack.c.bf16 %v13627_v45, %v13626_v5  ;;  %v13634_v45 = vcombine.low %v13578_v25, %v13618_v38 }
 0x521   : > { %17732 = vmatpush1.bf16.xpose.msk.msra.mxu1 %vm21427_vm5, %v17730_v23  ;;  %v13577_v23 = vld [vmem:[#allocation2 + $0x99] sm:$0xf] }
 0x522   : > { %17733 = vmatprep.subr.bf16.mxu1 %v23518_v27  ;;  %v13633_v29 = vcombine.low %v13617_v51, %v13577_v23 }
 0x524   : > { %v17754_v37 = vpack.c.bf16 %v13633_v29, %v13632_v34  ;;  %v13822_v29 = vcombine.high %v13782_v56, %v13782_v56  ;;  %v13839_v34 = vcombine.low %v13783_v52, %v18653_v10 }
 0x528   : > { %16202 = vmatmul.mubr.msk.f32.vlgmr.msra.gmra.mrb[200].mxu1 %vm12108_vm3, %v16182_v36  ;;  %v16258_v36 = vld [vmem:[%s23452_s5 + $0xe0] sm:$0xff] }
 0x529   : > { %17736 = vmatpush1.bf16.xpose.msk.msra.mxu1 %vm21427_vm5, %v17734_v6  ;;  %13548 = vmatprep.mubr.f32.mxu1 %v23473_v16  ;;  %v16259_v6 = vld [vmem:[%s23452_s5 + $0xe8] sm:$0xff] }
 0x52a   : > { %17737 = vmatprep.subr.bf16.mxu1 %v23518_v27  ;;  %v17821_v18 = vpack.c.bf16 %v16259_v6, %v16258_v36  ;;  %v13838_v36 = vcombine.low %v13782_v56, %v13822_v29 }
 0x52c   : > { %16203 = vmatmul.mubr.msk.f32.gmra.mrb[202].mxu1 %vm12108_vm3, %v16183_v53  ;;  %v13580_v53 = vld [vmem:[#allocation2 + $0xb1] sm:$0xff]  ;;  %17822 = vmatpush1.bf16.msra.mxu0 %v17821_v18  ;;  %v17794_v6 = vpack.c.bf16 %v13839_v34, %v13838_v36  ;;  %v13787_v18 = vld [vmem:[#allocation2 + $0xca] sm:$0xf] }
 0x52d   : > { %13746 = vmatprep.mubr.f32.mxu1 %v23473_v16  ;;  %17823 = vmatprep.subr.bf16.mxu0 %v23518_v27  ;;  %v13619_v5 = vcombine.high %v13580_v53, %v13580_v53  ;;  %v13989_v36 = vld [vmem:[%s23452_s5 + $0x10] sm:$0xff] }
 0x52f   : > { %v13636_v47 = vcombine.low %v13619_v5, %v13581_v61  ;;  %v16519_v5 = vld [vmem:[%s23452_s5 + $0x890] sm:$0xff]  ;;  %v16520_v61 = vld [vmem:[%s23452_s5 + $0x898] sm:$0xff] }
 0x530   : > { %17825 = vmatpush1.bf16.msra.mxu0 %v17824_v33  ;;  %v16518_v33 = vld [vmem:[%s23452_s5 + $0x888] sm:$0xff] }
 0x531   : > { %17740 = vmatpush1.bf16.xpose.msk.msra.mxu1 %vm21427_vm5, %v17738_v13  ;;  %v13579_v13 = vld [vmem:[#allocation2 + $0xa9] sm:$0xf]  ;;  %17826 = vmatprep.subr.bf16.mxu0 %v23518_v27  ;;  %v17762_v9 = vpack.c.bf16 %v13637_v17, %v13636_v47  ;;  %v16204_v17 = vld [vmem:[%s23450_s3 + $0x70] sm:$0xff]  ;;  %v16521_v47 = vld [vmem:[%s23452_s5 + $0x8a0] sm:$0xff] }
 0x532   : > { %17741 = vmatprep.subr.bf16.mxu1 %v23518_v27  ;;  %v13635_v43 = vcombine.low %v13579_v13, %v13580_v53  ;;  %v16226_v13 = vld [vmem:[%s23450_s3 + $0x80] sm:$0xff] }
 0x534   : > { %v17758_v41 = vpack.c.bf16 %v13635_v43, %v13634_v45  ;;  %v16227_v45 = vld [vmem:[%s23450_s3 + $0x88] sm:$0xff] }
 0x539   : > { %17744 = vmatpush1.bf16.xpose.msk.msra.mxu1 %vm21427_vm5, %v17742_v55  ;;  %v13584_v55 = vld [vmem:[#allocation2 + $0xd1] sm:$0xff] }
 0x53a   : > { %17745 = vmatprep.subr.bf16.mxu1 %v23518_v27  ;;  %v13621_v19 = vcombine.high %v13584_v55, %v13584_v55  ;;  %v13638_v59 = vcombine.low %v13583_v11, %v13584_v55  ;;  %v18217_v55 = vpack.c.bf16 %v16520_v61, %v16519_v5  ;;  %v13972_v8 = vpop.permute.xlu0 %13971  ;;  %v13999_v61 = vld [vmem:[%s23452_s5 + $0x60] sm:$0xff] }
 0x53c   : > { %v13639_v22 = vcombine.low %v13621_v19, %v13585_v54  ;;  %v16523_v54 = vld [vmem:[%s23452_s5 + $0x8b0] sm:$0xff] }
 0x53e   : > { %v17766_v20 = vpack.c.bf16 %v13639_v22, %v13638_v59  ;;  %v16524_v22 = vld [vmem:[%s23452_s5 + $0x8b8] sm:$0xff]  ;;  %v16525_v59 = vld [vmem:[%s23452_s5 + $0x8c0] sm:$0xff] }
 0x53f   : > { %v18223_v11 = vpack.c.bf16 %v16524_v22, %v16523_v54  ;;  %v14003_v22 = vld [vmem:[%s23452_s5 + $0x80] sm:$0xff] }
 0x541   : > { %17748 = vmatpush1.bf16.xpose.msk.msra.mxu1 %vm21427_vm5, %v17746_v39  ;;  %v13817_v39 = vcombine.high %v13772_v2, %v13772_v2  ;;  %v16265_v2 = vld [vmem:[%s23452_s5 + $0x118] sm:$0xff] }
 0x542   : > { %17749 = vmatprep.subr.bf16.mxu1 %v23518_v27 }
 0x543   : > { %v13831_v57 = vcombine.low %v13817_v39, %v13773_v32  ;;  %v16529_v39 = vld [vmem:[%s23452_s5 + $0x8e0] sm:$0xff] }
 0x545   : > { %v17778_v62 = vpack.c.bf16 %v13831_v57, %v13830_v60  ;;  %v16530_v57 = vld [vmem:[%s23452_s5 + $0x8e8] sm:$0xff]  ;;  %v16531_v60 = vld [vmem:[%s23452_s5 + $0x8f0] sm:$0xff] }
 0x546   : > { %v18232_v48 = vpack.c.bf16 %v16530_v57, %v16529_v39  ;;  %v16274_v39 = vld [vmem:[%s23452_s5 + $0x150] sm:$0xff] }
 0x549   : > { %17752 = vmatpush1.bf16.xpose.msk.msra.mxu1 %vm21427_vm5, %v17750_v35  ;;  %v13781_v35 = vld [vmem:[#allocation2 + $0x9a] sm:$0xf] }
 0x54a   : > { %17753 = vmatprep.subr.bf16.mxu1 %v23518_v27 }
 0x551   : > { %17756 = vmatpush1.bf16.xpose.msk.msra.mxu1 %vm21427_vm5, %v17754_v37  ;;  %v13789_v37 = vld [vmem:[#allocation2 + $0xda] sm:$0xf] }
 0x552   : > { %17757 = vmatprep.subr.bf16.mxu1 %v23518_v27 }
 0x559   : > { %17760 = vmatpush1.bf16.xpose.msk.msra.mxu1 %vm21427_vm5, %v17758_v41  ;;  %v18214_v41 = vpack.c.bf16 %v16518_v33, %v16517_v40  ;;  %v13996_v40 = vld [vmem:[%s23452_s5 + $0x48] sm:$0xff] }
 0x55a   : > { %17761 = vmatprep.subr.bf16.mxu1 %v23518_v27 }
 0x561   : > { %17764 = vmatpush1.bf16.xpose.msk.msra.mxu1 %vm21427_vm5, %v17762_v9  ;;  %v16522_v9 = vld [vmem:[%s23452_s5 + $0x8a8] sm:$0xff] }
 0x562   : > { %17765 = vmatprep.subr.bf16.mxu1 %v23518_v27  ;;  %v18220_v19 = vpack.c.bf16 %v16522_v9, %v16521_v47  ;;  %v14001_v9 = vld [vmem:[%s23452_s5 + $0x70] sm:$0xff] }
 0x569   : > { %17768 = vmatpush1.bf16.xpose.msk.msra.mxu1 %vm21427_vm5, %v17766_v20  ;;  %v18226_v20 = vpack.c.bf16 %v16526_v50, %v16525_v59  ;;  %v16268_v50 = vld [vmem:[%s23452_s5 + $0x120] sm:$0xff] }
 0x56a   : > { %17769 = vmatprep.subr.bf16.mxu1 %v23518_v27 }
 0x570   : > { %16224 = vmatmul.mubr.msk.f32.vlgmr.msra.gmra.mrb[200].mxu1 %vm12108_vm3, %v16204_v17  ;;  %v17827_v17 = vpack.c.bf16 %v16263_v3, %v16262_v26  ;;  %v16270_v3 = vld [vmem:[%s23452_s5 + $0x130] sm:$0xff] }
 0x571   : > { %17772 = vmatpush1.bf16.xpose.msk.msra.mxu1 %vm21427_vm5, %v17770_v42  ;;  %13752 = vmatprep.mubr.f32.mxu1 %v23473_v16  ;;  %v18229_v42 = vpack.c.bf16 %v16528_v15, %v16527_v30  ;;  %v16271_v30 = vld [vmem:[%s23452_s5 + $0x138] sm:$0xff] }
 0x572   : > { %17773 = vmatprep.subr.bf16.mxu1 %v23518_v27  ;;  %17828 = vmatpush1.bf16.msra.mxu0 %v17827_v17  ;;  %v17863_v15 = vpack.c.bf16 %v16271_v30, %v16270_v3  ;;  %v16308_v3 = vld [vmem:[%s23452_s5 + $0x250] sm:$0xff]  ;;  %v16309_v30 = vld [vmem:[%s23452_s5 + $0x258] sm:$0xff] }
 0x573   : > { %17829 = vmatprep.subr.bf16.mxu0 %v23518_v27 }
 0x574   : > { %16225 = vmatmul.mubr.msk.f32.gmra.mrb[202].mxu1 %vm12108_vm3, %v16205_v1  ;;  %v16264_v1 = vld [vmem:[%s23452_s5 + $0x110] sm:$0xff] }
 0x575   : > { %13950 = vmatprep.mubr.f32.mxu1 %v23473_v16  ;;  %v17830_v32 = vpack.c.bf16 %v16265_v2, %v16264_v1  ;;  %v16273_v1 = vld [vmem:[%s23452_s5 + $0x148] sm:$0xff] }
 0x577   : > { %17831 = vmatpush1.bf16.msra.mxu0 %v17830_v32  ;;  %v16275_v32 = vld [vmem:[%s23452_s5 + $0x158] sm:$0xff] }
 0x578   : > { %17832 = vmatprep.subr.bf16.mxu0 %v23518_v27  ;;  %v17869_v57 = vpack.c.bf16 %v16275_v32, %v16274_v39  ;;  %v16312_v39 = vld [vmem:[%s23452_s5 + $0x270] sm:$0xff]  ;;  %v16313_v32 = vld [vmem:[%s23452_s5 + $0x278] sm:$0xff] }
 0x579   : > { %17776 = vmatpush1.bf16.xpose.msk.msra.mxu1 %vm21427_vm5, %v21979_v63  ;;  %v13780_v63 = vld [vmem:[#allocation2 + $0x92] sm:$0xff] }
 0x57a   : > { %17777 = vmatprep.subr.bf16.mxu1 %v23518_v27  ;;  %v13821_v7 = vcombine.high %v13780_v63, %v13780_v63  ;;  %v13836_v46 = vcombine.low %v13779_v4, %v13780_v63  ;;  %v13987_v63 = vld [vmem:[%s23452_s5] sm:$0xff] }
 0x57c   : > { %v13837_v51 = vcombine.low %v13821_v7, %v13781_v35  ;;  %v13988_v7 = vld [vmem:[%s23452_s5 + $0x8] sm:$0xff] }
 0x57d   : > { %v17833_v52 = vpack.c.bf16 %v13988_v7, %v13987_v63  ;;  %v16282_v63 = vld [vmem:[%s23452_s5 + $0x190] sm:$0xff]  ;;  %v16283_v7 = vld [vmem:[%s23452_s5 + $0x198] sm:$0xff] }
 0x57e   : > { %v17790_v23 = vpack.c.bf16 %v13837_v51, %v13836_v46  ;;  %v13977_v51 = vpop.permute.xlu0 %13976 }
 0x581   : > { %17780 = vmatpush1.bf16.xpose.msk.msra.mxu1 %vm21427_vm5, %v17778_v62  ;;  %v18235_v62 = vpack.c.bf16 %v16532_v21, %v16531_v60  ;;  %v16277_v60 = vld [vmem:[%s23452_s5 + $0x168] sm:$0xff] }
 0x582   : > { %17781 = vmatprep.subr.bf16.mxu1 %v23518_v27 }
 0x589   : > { %17784 = vmatpush1.bf16.xpose.msk.msra.mxu1 %vm21427_vm5, %v17782_v58 }
 0x58a   : > { %17785 = vmatprep.subr.bf16.mxu1 %v23518_v27 }
 0x591   : > { %17788 = vmatpush1.bf16.xpose.msk.msra.mxu1 %vm21427_vm5, %v21989_v14  ;;  %v13788_v14 = vld [vmem:[#allocation2 + $0xd2] sm:$0xff] }
 0x592   : > { %17789 = vmatprep.subr.bf16.mxu1 %v23518_v27  ;;  %v13825_v25 = vcombine.high %v13788_v14, %v13788_v14  ;;  %v13842_v38 = vcombine.low %v13787_v18, %v13788_v14  ;;  %v13991_v18 = vld [vmem:[%s23452_s5 + $0x20] sm:$0xff] }
 0x594   : > { %v13843_v53 = vcombine.low %v13825_v25, %v13789_v37 }
 0x596   : > { %v17802_v31 = vpack.c.bf16 %v13843_v53, %v13842_v38  ;;  %v13992_v38 = vld [vmem:[%s23452_s5 + $0x28] sm:$0xff] }
 0x599   : > { %17792 = vmatpush1.bf16.xpose.msk.msra.mxu1 %vm21427_vm5, %v17790_v23 }
 0x59a   : > { %17793 = vmatprep.subr.bf16.mxu1 %v23518_v27 }
 0x5a1   : > { %17796 = vmatpush1.bf16.xpose.msk.msra.mxu1 %vm21427_vm5, %v17794_v6  ;;  %v13990_v6 = vld [vmem:[%s23452_s5 + $0x18] sm:$0xff] }
 0x5a2   : > { %17797 = vmatprep.subr.bf16.mxu1 %v23518_v27  ;;  %v17836_v37 = vpack.c.bf16 %v13990_v6, %v13989_v36  ;;  %v16289_v36 = vld [vmem:[%s23452_s5 + $0x1c0] sm:$0xff]  ;;  %v16290_v6 = vld [vmem:[%s23452_s5 + $0x1c8] sm:$0xff] }
 0x5a9   : > { %17800 = vmatpush1.bf16.xpose.msk.msra.mxu1 %vm21427_vm5, %v21992_v24  ;;  %v16516_v24 = vld [vmem:[%s23452_s5 + $0x878] sm:$0xff] }
 0x5aa   : > { %17801 = vmatprep.subr.bf16.mxu1 %v23518_v27  ;;  %v18211_v43 = vpack.c.bf16 %v16516_v24, %v16515_v49  ;;  %v13993_v49 = vld [vmem:[%s23452_s5 + $0x30] sm:$0xff]  ;;  %v13994_v24 = vld [vmem:[%s23452_s5 + $0x38] sm:$0xff] }
 0x5b1   : > { %17804 = vmatpush1.bf16.xpose.msk.msra.mxu1 %vm21427_vm5, %v17802_v31  ;;  %v17839_v31 = vpack.c.bf16 %v13992_v38, %v13991_v18  ;;  %v16292_v18 = vld [vmem:[%s23452_s5 + $0x1d8] sm:$0xff] }
 0x5b2   : > { %18210 = vmatprep.subr.bf16.mxu1 %v23518_v27 }
 0x5b8   : > { %16246 = vmatmul.mubr.msk.f32.vlgmr.msra.gmra.mrb[200].mxu1 %vm12108_vm3, %v16226_v13  ;;  %v17842_v13 = vpack.c.bf16 %v13994_v24, %v13993_v49  ;;  %v16294_v49 = vld [vmem:[%s23452_s5 + $0x1e8] sm:$0xff] }
 0x5b9   : > { %13956 = vmatprep.mubr.f32.mxu1 %v23473_v16  ;;  %18212 = vmatpush1.bf16.msra.mxu1 %v18211_v43  ;;  %v13995_v43 = vld [vmem:[%s23452_s5 + $0x40] sm:$0xff] }
 0x5ba   : > { %18213 = vmatprep.subr.bf16.mxu1 %v23518_v27  ;;  %v17845_v33 = vpack.c.bf16 %v13996_v40, %v13995_v43  ;;  %v16296_v43 = vld [vmem:[%s23452_s5 + $0x1f8] sm:$0xff] }
 0x5bc   : > { %16247 = vmatmul.mubr.msk.f32.gmra.mrb[202].mxu1 %vm12108_vm3, %v16227_v45  ;;  %v13997_v45 = vld [vmem:[%s23452_s5 + $0x50] sm:$0xff] }
 0x5bd   : > { %18215 = vmatpush1.bf16.msra.mxu1 %v18214_v41  ;;  %v13998_v41 = vld [vmem:[%s23452_s5 + $0x58] sm:$0xff] }
 0x5be   : > { %18216 = vmatprep.subr.bf16.mxu1 %v23518_v27  ;;  %v17848_v5 = vpack.c.bf16 %v13998_v41, %v13997_v45  ;;  %v16298_v45 = vld [vmem:[%s23452_s5 + $0x208] sm:$0xff] }
 0x5c1   : > { %18218 = vmatpush1.bf16.msra.mxu1 %v18217_v55  ;;  %v14000_v55 = vld [vmem:[%s23452_s5 + $0x68] sm:$0xff] }
 0x5c2   : > { %18219 = vmatprep.subr.bf16.mxu1 %v23518_v27  ;;  %v17851_v47 = vpack.c.bf16 %v14000_v55, %v13999_v61  ;;  %v16300_v61 = vld [vmem:[%s23452_s5 + $0x218] sm:$0xff] }
 0x5c5   : > { %18221 = vmatpush1.bf16.msra.mxu1 %v18220_v19  ;;  %v14002_v19 = vld [vmem:[%s23452_s5 + $0x78] sm:$0xff] }
 0x5c6   : > { %18222 = vmatprep.subr.bf16.mxu1 %v23518_v27  ;;  %v17854_v54 = vpack.c.bf16 %v14002_v19, %v14001_v9  ;;  %v16302_v9 = vld [vmem:[%s23452_s5 + $0x228] sm:$0xff] }
 0x5c9   : > { %18224 = vmatpush1.bf16.msra.mxu1 %v18223_v11  ;;  %v14004_v11 = vld [vmem:[%s23452_s5 + $0x88] sm:$0xff] }
 0x5ca   : > { %18225 = vmatprep.subr.bf16.mxu1 %v23518_v27  ;;  %v17857_v59 = vpack.c.bf16 %v14004_v11, %v14003_v22  ;;  %v16304_v22 = vld [vmem:[%s23452_s5 + $0x238] sm:$0xff] }
 0x5cd   : > { %18227 = vmatpush1.bf16.msra.mxu1 %v18226_v20  ;;  %v16269_v20 = vld [vmem:[%s23452_s5 + $0x128] sm:$0xff] }
 0x5ce   : > { %18228 = vmatprep.subr.bf16.mxu1 %v23518_v27  ;;  %v17860_v26 = vpack.c.bf16 %v16269_v20, %v16268_v50  ;;  %v16307_v50 = vld [vmem:[%s23452_s5 + $0x248] sm:$0xff] }
 0x5d1   : > { %18230 = vmatpush1.bf16.msra.mxu1 %v18229_v42  ;;  %v16272_v42 = vld [vmem:[%s23452_s5 + $0x140] sm:$0xff] }
 0x5d2   : > { %18231 = vmatprep.subr.bf16.mxu1 %v23518_v27  ;;  %v17866_v2 = vpack.c.bf16 %v16273_v1, %v16272_v42  ;;  %v16310_v42 = vld [vmem:[%s23452_s5 + $0x260] sm:$0xff]  ;;  %v16311_v1 = vld [vmem:[%s23452_s5 + $0x268] sm:$0xff] }
 0x5d5   : > { %18233 = vmatpush1.bf16.msra.mxu1 %v18232_v48  ;;  %v16276_v48 = vld [vmem:[%s23452_s5 + $0x160] sm:$0xff] }
 0x5d6   : > { %18234 = vmatprep.subr.bf16.mxu1 %v23518_v27  ;;  %v17872_v21 = vpack.c.bf16 %v16277_v60, %v16276_v48  ;;  %v16314_v48 = vld [vmem:[%s23452_s5 + $0x280] sm:$0xff]  ;;  %v16315_v60 = vld [vmem:[%s23452_s5 + $0x288] sm:$0xff] }
 0x5d9   : > { %18236 = vmatpush1.bf16.msra.mxu1 %v18235_v62  ;;  %v16278_v62 = vld [vmem:[%s23452_s5 + $0x170] sm:$0xff] }
 0x68b   : > { %v13952_v28 = vpop.f32.mrb[200].mxu1 }
 0x68c   : > { %v13979_v0 = vadd.f32 %v13972_v8, %v13952_v28  ;;  %v13954_v44 = vpop.f32.mrb[201].mxu1 }
 0x68d   : > { %v13980_v12 = vadd.f32 %v13972_v8, %v13954_v44  ;;  %v16279_v8 = vld [vmem:[%s23452_s5 + $0x178] sm:$0xff]  ;;  %v16281_v44 = vld [vmem:[%s23452_s5 + $0x188] sm:$0xff] }
 0x68e   : > { %v22481_v58 = vmax.f32 %v13979_v0, 0.0  ;;  %v17875_v28 = vpack.c.bf16 %v16279_v8, %v16278_v62  ;;  %v16280_v0 = vld [vmem:[%s23452_s5 + $0x180] sm:$0xff]  ;;  %v16316_v62 = vld [vmem:[%s23452_s5 + $0x290] sm:$0xff]  ;;  %v16317_v8 = vld [vmem:[%s23452_s5 + $0x298] sm:$0xff] }
 0x68f   : > { %v22489_v35 = vmax.f32 %v13980_v12, 0.0  ;;  %v13958_v4 = vpop.f32.mrb[202].mxu1  ;;  %v17878_v12 = vpack.c.bf16 %v16281_v44, %v16280_v0  ;;  %v16318_v0 = vld [vmem:[%s23452_s5 + $0x2a0] sm:$0xff]  ;;  %v16319_v44 = vld [vmem:[%s23452_s5 + $0x2a8] sm:$0xff] }
 0x690   : > { %v13981_v46 = vadd.f32 %v13977_v51, %v13958_v4  ;;  %v13960_v56 = vpop.f32.mrb[203].mxu1  ;;  %v14026_v34 = vrot.slane %v22481_v58, 1  ;;  %v16284_v4 = vld [vmem:[%s23452_s5 + $0x1a0] sm:$0xff] }
 0x691   : > { %v13982_v23 = vadd.f32 %v13977_v51, %v13960_v56  ;;  %v14027_v29 = vrot.slane %v22489_v35, 1  ;;  %v14194_v17 = vrot.slane %v22489_v35, 2  ;;  %v17881_v51 = vpack.c.bf16 %v16283_v7, %v16282_v63  ;;  %v16320_v63 = vld [vmem:[%s23452_s5 + $0x2b0] sm:$0xff]  ;;  %v16321_v7 = vld [vmem:[%s23452_s5 + $0x2b8] sm:$0xff] }
 0x692   : > { %v22492_v10 = vmax.f32 %v13981_v46, 0.0  ;;  %v16285_v46 = vld [vmem:[%s23452_s5 + $0x1a8] sm:$0xff] }
 0x693   : > { %v22501_v14 = vmax.f32 %v13982_v23, 0.0  ;;  %16266 = vmatprep.mubr.msk.f32.mxu0 %vm14029_vm6, %v14027_v29  ;;  %v17884_v56 = vpack.c.bf16 %v16285_v46, %v16284_v4  ;;  %v16287_v23 = vld [vmem:[%s23452_s5 + $0x1b0] sm:$0xff]  ;;  %v16288_v29 = vld [vmem:[%s23452_s5 + $0x1b8] sm:$0xff]  ;;  %v16322_v4 = vld [vmem:[%s23452_s5 + $0x2c0] sm:$0xff] }
 0x694   : > { %14097 = vmatmul.mubr.f32.vlgmr.msra.gmra.mrb[250].mxu0 %v14026_v34  ;;  %v15427_v53 = vrot.slane %v22492_v10, 7  ;;  %v14193_v34 = vrot.slane %v22481_v58, 2  ;;  %v16323_v46 = vld [vmem:[%s23452_s5 + $0x2c8] sm:$0xff] }
 0x695   : > { %17834 = vmatpush1.bf16.msra.mxu0 %v17833_v52  ;;  %16267 = vmatprep.mubr.msk.f32.mxu0 %vm14029_vm6, %v22489_v35  ;;  %v15428_v25 = vrot.slane %v22501_v14, 7  ;;  %v17887_v52 = vpack.c.bf16 %v16288_v29, %v16287_v23  ;;  %v16325_v23 = vld [vmem:[%s23452_s5 + $0x2d0] sm:$0xff]  ;;  %v16326_v29 = vld [vmem:[%s23452_s5 + $0x2d8] sm:$0xff] }
 0x696   : > { %17835 = vmatprep.subr.bf16.mxu0 %v23518_v27 }
 0x697   : > { %16533 = vmatprep.mubr.msk.f32.mxu1 %vm14029_vm6, %v15428_v25  ;;  %v14289_v25 = vrot.slane %v22489_v35, 3 }
 0x698   : > { %15497 = vmatmul.mubr.f32.vlgmr.msra.gmra.mrb[204].mxu1 %v15427_v53  ;;  %v16291_v53 = vld [vmem:[%s23452_s5 + $0x1d0] sm:$0xff] }
 0x699   : > { %17837 = vmatpush1.bf16.msra.mxu0 %v17836_v37  ;;  %v17890_v37 = vpack.c.bf16 %v16290_v6, %v16289_v36  ;;  %v17893_v38 = vpack.c.bf16 %v16292_v18, %v16291_v53  ;;  %v16327_v36 = vld [vmem:[%s23452_s5 + $0x2e0] sm:$0xff]  ;;  %v16328_v6 = vld [vmem:[%s23452_s5 + $0x2e8] sm:$0xff]  ;;  %v16329_v53 = vld [vmem:[%s23452_s5 + $0x2f0] sm:$0xff] }
 0x69a   : > { %17838 = vmatprep.subr.bf16.mxu0 %v23518_v27  ;;  %v16330_v18 = vld [vmem:[%s23452_s5 + $0x2f8] sm:$0xff] }
 0x69d   : > { %17840 = vmatpush1.bf16.msra.mxu0 %v17839_v31  ;;  %v16293_v31 = vld [vmem:[%s23452_s5 + $0x1e0] sm:$0xff] }
 0x69e   : > { %17841 = vmatprep.subr.bf16.mxu0 %v23518_v27  ;;  %v17896_v24 = vpack.c.bf16 %v16294_v49, %v16293_v31  ;;  %v16331_v31 = vld [vmem:[%s23452_s5 + $0x300] sm:$0xff]  ;;  %v16332_v49 = vld [vmem:[%s23452_s5 + $0x308] sm:$0xff] }
 0x6a1   : > { %17843 = vmatpush1.bf16.msra.mxu0 %v17842_v13  ;;  %v16295_v13 = vld [vmem:[%s23452_s5 + $0x1f0] sm:$0xff] }
 0x6a2   : > { %17844 = vmatprep.subr.bf16.mxu0 %v23518_v27  ;;  %v17899_v40 = vpack.c.bf16 %v16296_v43, %v16295_v13  ;;  %v16333_v13 = vld [vmem:[%s23452_s5 + $0x310] sm:$0xff]  ;;  %v16334_v43 = vld [vmem:[%s23452_s5 + $0x318] sm:$0xff] }
 0x6a5   : > { %17846 = vmatpush1.bf16.msra.mxu0 %v17845_v33  ;;  %v16297_v33 = vld [vmem:[%s23452_s5 + $0x200] sm:$0xff] }
 0x6a6   : > { %17847 = vmatprep.subr.bf16.mxu0 %v23518_v27  ;;  %v17902_v41 = vpack.c.bf16 %v16298_v45, %v16297_v33  ;;  %v16335_v33 = vld [vmem:[%s23452_s5 + $0x320] sm:$0xff]  ;;  %v16336_v45 = vld [vmem:[%s23452_s5 + $0x328] sm:$0xff] }
 0x6a9   : > { %17849 = vmatpush1.bf16.msra.mxu0 %v17848_v5  ;;  %v16299_v5 = vld [vmem:[%s23452_s5 + $0x210] sm:$0xff] }
 0x6aa   : > { %17850 = vmatprep.subr.bf16.mxu0 %v23518_v27  ;;  %v17905_v55 = vpack.c.bf16 %v16300_v61, %v16299_v5  ;;  %v16337_v5 = vld [vmem:[%s23452_s5 + $0x330] sm:$0xff]  ;;  %v16338_v61 = vld [vmem:[%s23452_s5 + $0x338] sm:$0xff] }
 0x6ad   : > { %17852 = vmatpush1.bf16.msra.mxu0 %v17851_v47  ;;  %v16301_v47 = vld [vmem:[%s23452_s5 + $0x220] sm:$0xff] }
 0x6ae   : > { %17853 = vmatprep.subr.bf16.mxu0 %v23518_v27  ;;  %v17908_v19 = vpack.c.bf16 %v16302_v9, %v16301_v47  ;;  %v16339_v47 = vld [vmem:[%s23452_s5 + $0x340] sm:$0xff]  ;;  %v16340_v9 = vld [vmem:[%s23452_s5 + $0x348] sm:$0xff] }
 0x6b1   : > { %17855 = vmatpush1.bf16.msra.mxu0 %v17854_v54  ;;  %v16303_v54 = vld [vmem:[%s23452_s5 + $0x230] sm:$0xff] }
 0x6b2   : > { %17856 = vmatprep.subr.bf16.mxu0 %v23518_v27  ;;  %v17911_v11 = vpack.c.bf16 %v16304_v22, %v16303_v54  ;;  %v16341_v54 = vld [vmem:[%s23452_s5 + $0x350] sm:$0xff]  ;;  %v16342_v22 = vld [vmem:[%s23452_s5 + $0x358] sm:$0xff] }
 0x6b5   : > { %17858 = vmatpush1.bf16.msra.mxu0 %v17857_v59  ;;  %v16306_v59 = vld [vmem:[%s23452_s5 + $0x240] sm:$0xff] }
 0x6b6   : > { %17859 = vmatprep.subr.bf16.mxu0 %v23518_v27  ;;  %v17914_v20 = vpack.c.bf16 %v16307_v50, %v16306_v59  ;;  %v16344_v59 = vld [vmem:[%s23452_s5 + $0x360] sm:$0xff]  ;;  %v16345_v50 = vld [vmem:[%s23452_s5 + $0x368] sm:$0xff] }
 0x6b8   : > { %14169 = vmatmul.mubr.f32.vlgmr.msra.gmra.mrb[252].mxu0 %v22481_v58 }
 0x6b9   : > { %17861 = vmatpush1.bf16.msra.mxu0 %v17860_v26  ;;  %16286 = vmatprep.mubr.msk.f32.mxu0 %vm14029_vm6, %v14194_v17  ;;  %v14288_v26 = vrot.slane %v22481_v58, 3  ;;  %v14384_v17 = vrot.slane %v22489_v35, 4 }
 0x6ba   : > { %17862 = vmatprep.subr.bf16.mxu0 %v23518_v27 }
 0x6bd   : > { %17864 = vmatpush1.bf16.msra.mxu0 %v17863_v15  ;;  %v17917_v15 = vpack.c.bf16 %v16309_v30, %v16308_v3  ;;  %v16346_v3 = vld [vmem:[%s23452_s5 + $0x370] sm:$0xff]  ;;  %v16347_v30 = vld [vmem:[%s23452_s5 + $0x378] sm:$0xff] }
 0x6be   : > { %17865 = vmatprep.subr.bf16.mxu0 %v23518_v27 }
 0x6c1   : > { %17867 = vmatpush1.bf16.msra.mxu0 %v17866_v2  ;;  %v17920_v2 = vpack.c.bf16 %v16311_v1, %v16310_v42  ;;  %v16348_v42 = vld [vmem:[%s23452_s5 + $0x380] sm:$0xff]  ;;  %v16349_v1 = vld [vmem:[%s23452_s5 + $0x388] sm:$0xff] }
 0x6c2   : > { %17868 = vmatprep.subr.bf16.mxu0 %v23518_v27 }
 0x6c5   : > { %17870 = vmatpush1.bf16.msra.mxu0 %v17869_v57  ;;  %v17923_v57 = vpack.c.bf16 %v16313_v32, %v16312_v39  ;;  %v16350_v39 = vld [vmem:[%s23452_s5 + $0x390] sm:$0xff]  ;;  %v16351_v32 = vld [vmem:[%s23452_s5 + $0x398] sm:$0xff] }
 0x6c6   : > { %17871 = vmatprep.subr.bf16.mxu0 %v23518_v27 }
 0x6c9   : > { %17873 = vmatpush1.bf16.msra.mxu0 %v17872_v21  ;;  %v17926_v21 = vpack.c.bf16 %v16315_v60, %v16314_v48  ;;  %v16352_v48 = vld [vmem:[%s23452_s5 + $0x3a0] sm:$0xff]  ;;  %v16353_v60 = vld [vmem:[%s23452_s5 + $0x3a8] sm:$0xff] }
 0x6ca   : > { %17874 = vmatprep.subr.bf16.mxu0 %v23518_v27 }
 0x6cd   : > { %17876 = vmatpush1.bf16.msra.mxu0 %v17875_v28  ;;  %v17929_v28 = vpack.c.bf16 %v16317_v8, %v16316_v62  ;;  %v16354_v62 = vld [vmem:[%s23452_s5 + $0x3b0] sm:$0xff]  ;;  %v16355_v8 = vld [vmem:[%s23452_s5 + $0x3b8] sm:$0xff] }
 0x6ce   : > { %17877 = vmatprep.subr.bf16.mxu0 %v23518_v27 }
 0x6d1   : > { %17879 = vmatpush1.bf16.msra.mxu0 %v17878_v12  ;;  %v17932_v12 = vpack.c.bf16 %v16319_v44, %v16318_v0  ;;  %v16356_v0 = vld [vmem:[%s23452_s5 + $0x3c0] sm:$0xff]  ;;  %v16357_v44 = vld [vmem:[%s23452_s5 + $0x3c8] sm:$0xff] }
 0x6d2   : > { %17880 = vmatprep.subr.bf16.mxu0 %v23518_v27 }
 0x6d5   : > { %17882 = vmatpush1.bf16.msra.mxu0 %v17881_v51  ;;  %v17935_v51 = vpack.c.bf16 %v16321_v7, %v16320_v63  ;;  %v16358_v63 = vld [vmem:[%s23452_s5 + $0x3d0] sm:$0xff]  ;;  %v16359_v7 = vld [vmem:[%s23452_s5 + $0x3d8] sm:$0xff] }
 0x6d6   : > { %17883 = vmatprep.subr.bf16.mxu0 %v23518_v27 }
 0x6d9   : > { %17885 = vmatpush1.bf16.msra.mxu0 %v17884_v56  ;;  %v17938_v56 = vpack.c.bf16 %v16323_v46, %v16322_v4  ;;  %v16360_v4 = vld [vmem:[%s23452_s5 + $0x3e0] sm:$0xff]  ;;  %v16361_v46 = vld [vmem:[%s23452_s5 + $0x3e8] sm:$0xff] }
 0x6da   : > { %17886 = vmatprep.subr.bf16.mxu0 %v23518_v27 }
 0x6dc   : > { %14263 = vmatmul.mubr.f32.vlgmr.msra.gmra.mrb[254].mxu0 %v14193_v34  ;;  %v14383_v34 = vrot.slane %v22481_v58, 4 }
 0x6dd   : > { %17888 = vmatpush1.bf16.msra.mxu0 %v17887_v52  ;;  %16305 = vmatprep.mubr.msk.f32.mxu0 %vm14029_vm6, %v14289_v25  ;;  %v17941_v52 = vpack.c.bf16 %v16326_v29, %v16325_v23  ;;  %v14479_v25 = vrot.slane %v22489_v35, 5  ;;  %v16363_v23 = vld [vmem:[%s23452_s5 + $0x3f0] sm:$0xff]  ;;  %v16364_v29 = vld [vmem:[%s23452_s5 + $0x3f8] sm:$0xff] }
 0x6de   : > { %17889 = vmatprep.subr.bf16.mxu0 %v23518_v27 }
 0x6e1   : > { %17891 = vmatpush1.bf16.msra.mxu0 %v17890_v37  ;;  %v17944_v37 = vpack.c.bf16 %v16328_v6, %v16327_v36  ;;  %v17995_v36 = vpack.c.bf16 %v16364_v29, %v16363_v23  ;;  %v14573_v6 = vrot.slane %v22481_v58, 6  ;;  %v16398_v29 = vld [vmem:[%s23452_s5 + $0x500] sm:$0xff] }
 0x6e2   : > { %17892 = vmatprep.subr.bf16.mxu0 %v23518_v27 }
 0x6e5   : > { %17894 = vmatpush1.bf16.msra.mxu0 %v17893_v38  ;;  %v17947_v38 = vpack.c.bf16 %v16330_v18, %v16329_v53  ;;  %v14669_v18 = vrot.slane %v22489_v35, 7 }
 0x6e6   : > { %17895 = vmatprep.subr.bf16.mxu0 %v23518_v27 }
 0x6e9   : > { %17897 = vmatpush1.bf16.msra.mxu0 %v17896_v24  ;;  %v17950_v24 = vpack.c.bf16 %v16332_v49, %v16331_v31  ;;  %v16367_v49 = vld [vmem:[%s23452_s5 + $0x410] sm:$0xff] }
 0x6ea   : > { %17898 = vmatprep.subr.bf16.mxu0 %v23518_v27 }
 0x6ed   : > { %17900 = vmatpush1.bf16.msra.mxu0 %v17899_v40  ;;  %v17953_v40 = vpack.c.bf16 %v16334_v43, %v16333_v13  ;;  %v16370_v43 = vld [vmem:[%s23452_s5 + $0x428] sm:$0xff] }
 0x6ee   : > { %17901 = vmatprep.subr.bf16.mxu0 %v23518_v27 }
 0x6f1   : > { %17903 = vmatpush1.bf16.msra.mxu0 %v17902_v41  ;;  %v17956_v41 = vpack.c.bf16 %v16336_v45, %v16335_v33  ;;  %v16371_v33 = vld [vmem:[%s23452_s5 + $0x430] sm:$0xff]  ;;  %v16372_v45 = vld [vmem:[%s23452_s5 + $0x438] sm:$0xff] }
 0x6f2   : > { %17904 = vmatprep.subr.bf16.mxu0 %v23518_v27 }
 0x6f5   : > { %17906 = vmatpush1.bf16.msra.mxu0 %v17905_v55  ;;  %v17959_v55 = vpack.c.bf16 %v16338_v61, %v16337_v5  ;;  %v16373_v5 = vld [vmem:[%s23452_s5 + $0x440] sm:$0xff]  ;;  %v16374_v61 = vld [vmem:[%s23452_s5 + $0x448] sm:$0xff] }
 0x6f6   : > { %17907 = vmatprep.subr.bf16.mxu0 %v23518_v27 }
 0x6f9   : > { %17909 = vmatpush1.bf16.msra.mxu0 %v17908_v19  ;;  %v17962_v19 = vpack.c.bf16 %v16340_v9, %v16339_v47  ;;  %v16375_v47 = vld [vmem:[%s23452_s5 + $0x450] sm:$0xff]  ;;  %v16376_v9 = vld [vmem:[%s23452_s5 + $0x458] sm:$0xff] }
 0x6fa   : > { %17910 = vmatprep.subr.bf16.mxu0 %v23518_v27 }
 0x6fd   : > { %17912 = vmatpush1.bf16.msra.mxu0 %v17911_v11  ;;  %v17965_v11 = vpack.c.bf16 %v16342_v22, %v16341_v54  ;;  %v16377_v54 = vld [vmem:[%s23452_s5 + $0x460] sm:$0xff]  ;;  %v16378_v22 = vld [vmem:[%s23452_s5 + $0x468] sm:$0xff] }
 0x6fe   : > { %17913 = vmatprep.subr.bf16.mxu0 %v23518_v27 }
 0x700   : > { %14358 = vmatmul.mubr.f32.vlgmr.msra.gmra.mrb[0].mxu0 %v14288_v26  ;;  %v14478_v26 = vrot.slane %v22481_v58, 5 }
 0x701   : > { %17915 = vmatpush1.bf16.msra.mxu0 %v17914_v20  ;;  %16324 = vmatprep.mubr.msk.f32.mxu0 %vm14029_vm6, %v14384_v17  ;;  %v17968_v20 = vpack.c.bf16 %v16345_v50, %v16344_v59  ;;  %v14574_v17 = vrot.slane %v22489_v35, 6  ;;  %v16369_v35 = vld [vmem:[%s23452_s5 + $0x420] sm:$0xff]  ;;  %v16379_v59 = vld [vmem:[%s23452_s5 + $0x470] sm:$0xff]  ;;  %v16380_v50 = vld [vmem:[%s23452_s5 + $0x478] sm:$0xff] }
 0x702   : > { %17916 = vmatprep.subr.bf16.mxu0 %v23518_v27 }
 0x705   : > { %17918 = vmatpush1.bf16.msra.mxu0 %v17917_v15  ;;  %v17971_v15 = vpack.c.bf16 %v16347_v30, %v16346_v3  ;;  %v16383_v3 = vld [vmem:[%s23452_s5 + $0x488] sm:$0xff] }
 0x706   : > { %17919 = vmatprep.subr.bf16.mxu0 %v23518_v27 }
 0x709   : > { %17921 = vmatpush1.bf16.msra.mxu0 %v17920_v2  ;;  %v17974_v2 = vpack.c.bf16 %v16349_v1, %v16348_v42  ;;  %v14668_v1 = vrot.slane %v22481_v58, 7  ;;  %v16386_v58 = vld [vmem:[%s23452_s5 + $0x4a0] sm:$0xff] }
 0x70a   : > { %17922 = vmatprep.subr.bf16.mxu0 %v23518_v27 }
 0x70d   : > { %17924 = vmatpush1.bf16.msra.mxu0 %v17923_v57  ;;  %v17977_v57 = vpack.c.bf16 %v16351_v32, %v16350_v39  ;;  %v16385_v39 = vld [vmem:[%s23452_s5 + $0x498] sm:$0xff] }
 0x70e   : > { %17925 = vmatprep.subr.bf16.mxu0 %v23518_v27 }
 0x711   : > { %17927 = vmatpush1.bf16.msra.mxu0 %v17926_v21  ;;  %v17980_v21 = vpack.c.bf16 %v16353_v60, %v16352_v48  ;;  %v16388_v60 = vld [vmem:[%s23452_s5 + $0x4b0] sm:$0xff] }
 0x712   : > { %17928 = vmatprep.subr.bf16.mxu0 %v23518_v27 }
 0x715   : > { %17930 = vmatpush1.bf16.msra.mxu0 %v17929_v28  ;;  %v17983_v28 = vpack.c.bf16 %v16355_v8, %v16354_v62  ;;  %v16390_v8 = vld [vmem:[%s23452_s5 + $0x4c0] sm:$0xff] }
 0x716   : > { %17931 = vmatprep.subr.bf16.mxu0 %v23518_v27 }
 0x719   : > { %17933 = vmatpush1.bf16.msra.mxu0 %v17932_v12  ;;  %v17986_v12 = vpack.c.bf16 %v16357_v44, %v16356_v0  ;;  %v16392_v44 = vld [vmem:[%s23452_s5 + $0x4d0] sm:$0xff] }
 0x71a   : > { %17934 = vmatprep.subr.bf16.mxu0 %v23518_v27 }
 0x71d   : > { %17936 = vmatpush1.bf16.msra.mxu0 %v17935_v51  ;;  %v17989_v51 = vpack.c.bf16 %v16359_v7, %v16358_v63  ;;  %v16394_v7 = vld [vmem:[%s23452_s5 + $0x4e0] sm:$0xff] }
 0x71e   : > { %17937 = vmatprep.subr.bf16.mxu0 %v23518_v27 }
 0x721   : > { %17939 = vmatpush1.bf16.msra.mxu0 %v17938_v56  ;;  %v17992_v56 = vpack.c.bf16 %v16361_v46, %v16360_v4  ;;  %v16396_v46 = vld [vmem:[%s23452_s5 + $0x4f0] sm:$0xff] }
 0x722   : > { %17940 = vmatprep.subr.bf16.mxu0 %v23518_v27 }
 0x724   : > { %14453 = vmatmul.mubr.f32.vlgmr.msra.gmra.mrb[2].mxu0 %v14383_v34 }
 0x725   : > { %17942 = vmatpush1.bf16.msra.mxu0 %v17941_v52  ;;  %16343 = vmatprep.mubr.msk.f32.mxu0 %vm14029_vm6, %v14479_v25  ;;  %v16365_v25 = vld [vmem:[%s23452_s5 + $0x400] sm:$0xff] }
 0x726   : > { %17943 = vmatprep.subr.bf16.mxu0 %v23518_v27 }
 0x729   : > { %17945 = vmatpush1.bf16.msra.mxu0 %v17944_v37  ;;  %v16366_v37 = vld [vmem:[%s23452_s5 + $0x408] sm:$0xff] }
 0x72a   : > { %17946 = vmatprep.subr.bf16.mxu0 %v23518_v27  ;;  %v17998_v31 = vpack.c.bf16 %v16366_v37, %v16365_v25 }
 0x72d   : > { %17948 = vmatpush1.bf16.msra.mxu0 %v17947_v38 }
 0x72e   : > { %17949 = vmatprep.subr.bf16.mxu0 %v23518_v27 }
 0x731   : > { %17951 = vmatpush1.bf16.msra.mxu0 %v17950_v24  ;;  %v16368_v24 = vld [vmem:[%s23452_s5 + $0x418] sm:$0xff] }
 0x732   : > { %17952 = vmatprep.subr.bf16.mxu0 %v23518_v27  ;;  %v18001_v13 = vpack.c.bf16 %v16368_v24, %v16367_v49  ;;  %v16404_v49 = vld [vmem:[%s23452_s5 + $0x528] sm:$0xff]  ;;  %v14858_v24 = vrot.slane %v22501_v14, 1 }
 0x735   : > { %17954 = vmatpush1.bf16.msra.mxu0 %v17953_v40  ;;  %v18004_v40 = vpack.c.bf16 %v16370_v43, %v16369_v35  ;;  %v16405_v35 = vld [vmem:[%s23452_s5 + $0x530] sm:$0xff]  ;;  %v16406_v43 = vld [vmem:[%s23452_s5 + $0x538] sm:$0xff] }
 0x736   : > { %17955 = vmatprep.subr.bf16.mxu0 %v23518_v27 }
 0x739   : > { %17957 = vmatpush1.bf16.msra.mxu0 %v17956_v41  ;;  %v18007_v41 = vpack.c.bf16 %v16372_v45, %v16371_v33  ;;  %v16407_v33 = vld [vmem:[%s23452_s5 + $0x540] sm:$0xff]  ;;  %v16408_v45 = vld [vmem:[%s23452_s5 + $0x548] sm:$0xff] }
 0x73a   : > { %17958 = vmatprep.subr.bf16.mxu0 %v23518_v27 }
 0x73d   : > { %17960 = vmatpush1.bf16.msra.mxu0 %v17959_v55  ;;  %v18010_v55 = vpack.c.bf16 %v16374_v61, %v16373_v5  ;;  %v16409_v5 = vld [vmem:[%s23452_s5 + $0x550] sm:$0xff]  ;;  %v16410_v61 = vld [vmem:[%s23452_s5 + $0x558] sm:$0xff] }
 0x73e   : > { %17961 = vmatprep.subr.bf16.mxu0 %v23518_v27 }
 0x741   : > { %17963 = vmatpush1.bf16.msra.mxu0 %v17962_v19  ;;  %v18013_v19 = vpack.c.bf16 %v16376_v9, %v16375_v47  ;;  %v16411_v47 = vld [vmem:[%s23452_s5 + $0x560] sm:$0xff]  ;;  %v16412_v9 = vld [vmem:[%s23452_s5 + $0x568] sm:$0xff] }
 0x742   : > { %17964 = vmatprep.subr.bf16.mxu0 %v23518_v27 }
 0x745   : > { %17966 = vmatpush1.bf16.msra.mxu0 %v17965_v11  ;;  %v18016_v11 = vpack.c.bf16 %v16378_v22, %v16377_v54  ;;  %v16413_v54 = vld [vmem:[%s23452_s5 + $0x570] sm:$0xff]  ;;  %v16414_v22 = vld [vmem:[%s23452_s5 + $0x578] sm:$0xff] }
 0x746   : > { %17967 = vmatprep.subr.bf16.mxu0 %v23518_v27 }
 0x748   : > { %14548 = vmatmul.mubr.f32.vlgmr.msra.gmra.mrb[4].mxu0 %v14478_v26  ;;  %v16382_v26 = vld [vmem:[%s23452_s5 + $0x480] sm:$0xff] }
 0x749   : > { %17969 = vmatpush1.bf16.msra.mxu0 %v17968_v20  ;;  %16362 = vmatprep.mubr.msk.f32.mxu0 %vm14029_vm6, %v14574_v17  ;;  %v18019_v20 = vpack.c.bf16 %v16380_v50, %v16379_v59  ;;  %v18022_v42 = vpack.c.bf16 %v16383_v3, %v16382_v26  ;;  %v16415_v59 = vld [vmem:[%s23452_s5 + $0x580] sm:$0xff]  ;;  %v16416_v50 = vld [vmem:[%s23452_s5 + $0x588] sm:$0xff]  ;;  %v16417_v26 = vld [vmem:[%s23452_s5 + $0x590] sm:$0xff] }
 0x74a   : > { %17970 = vmatprep.subr.bf16.mxu0 %v23518_v27  ;;  %v16418_v3 = vld [vmem:[%s23452_s5 + $0x598] sm:$0xff] }
 0x74d   : > { %17972 = vmatpush1.bf16.msra.mxu0 %v17971_v15 }
 0x74e   : > { %17973 = vmatprep.subr.bf16.mxu0 %v23518_v27 }
 0x751   : > { %17975 = vmatpush1.bf16.msra.mxu0 %v17974_v2  ;;  %v16384_v2 = vld [vmem:[%s23452_s5 + $0x490] sm:$0xff] }
 0x752   : > { %17976 = vmatprep.subr.bf16.mxu0 %v23518_v27  ;;  %v18025_v32 = vpack.c.bf16 %v16385_v39, %v16384_v2 }
 0x755   : > { %17978 = vmatpush1.bf16.msra.mxu0 %v17977_v57  ;;  %v16387_v57 = vld [vmem:[%s23452_s5 + $0x4a8] sm:$0xff] }
 0x756   : > { %17979 = vmatprep.subr.bf16.mxu0 %v23518_v27  ;;  %v18028_v48 = vpack.c.bf16 %v16387_v57, %v16386_v58  ;;  %v16422_v58 = vld [vmem:[%s23452_s5 + $0x5b0] sm:$0xff]  ;;  %v16423_v57 = vld [vmem:[%s23452_s5 + $0x5b8] sm:$0xff] }
 0x759   : > { %17981 = vmatpush1.bf16.msra.mxu0 %v17980_v21  ;;  %v16389_v21 = vld [vmem:[%s23452_s5 + $0x4b8] sm:$0xff] }
 0x75a   : > { %17982 = vmatprep.subr.bf16.mxu0 %v23518_v27  ;;  %v18031_v62 = vpack.c.bf16 %v16389_v21, %v16388_v60  ;;  %v18079_v60 = vpack.c.bf16 %v16423_v57, %v16422_v58  ;;  %v16424_v21 = vld [vmem:[%s23452_s5 + $0x5c0] sm:$0xff] }
 0x75d   : > { %17984 = vmatpush1.bf16.msra.mxu0 %v17983_v28  ;;  %v16391_v28 = vld [vmem:[%s23452_s5 + $0x4c8] sm:$0xff] }
 0x75e   : > { %17985 = vmatprep.subr.bf16.mxu0 %v23518_v27  ;;  %v18034_v0 = vpack.c.bf16 %v16391_v28, %v16390_v8  ;;  %v16426_v28 = vld [vmem:[%s23452_s5 + $0x5d0] sm:$0xff] }
 0x761   : > { %17987 = vmatpush1.bf16.msra.mxu0 %v17986_v12  ;;  %v16393_v12 = vld [vmem:[%s23452_s5 + $0x4d8] sm:$0xff] }
 0x762   : > { %17988 = vmatprep.subr.bf16.mxu0 %v23518_v27  ;;  %v18037_v63 = vpack.c.bf16 %v16393_v12, %v16392_v44  ;;  %v16428_v12 = vld [vmem:[%s23452_s5 + $0x5e0] sm:$0xff] }
 0x765   : > { %17990 = vmatpush1.bf16.msra.mxu0 %v17989_v51  ;;  %v16395_v51 = vld [vmem:[%s23452_s5 + $0x4e8] sm:$0xff] }
 0x766   : > { %17991 = vmatprep.subr.bf16.mxu0 %v23518_v27  ;;  %v18040_v4 = vpack.c.bf16 %v16395_v51, %v16394_v7  ;;  %v16430_v51 = vld [vmem:[%s23452_s5 + $0x5f0] sm:$0xff] }
 0x767   : > { %v14098_v52 = vpop.f32.mrb[250].mxu0 }
 0x768   : > { %v14100_v34 = vpop.f32.mrb[251].mxu0 }
 0x769   : > { %17993 = vmatpush1.bf16.msra.mxu0 %v17992_v56  ;;  %v16397_v56 = vld [vmem:[%s23452_s5 + $0x4f8] sm:$0xff] }
 0x76a   : > { %17994 = vmatprep.subr.bf16.mxu0 %v23518_v27  ;;  %v18043_v23 = vpack.c.bf16 %v16397_v56, %v16396_v46  ;;  %v16432_v56 = vld [vmem:[%s23452_s5 + $0x600] sm:$0xff] }
 0x76b   : > { %v22903_v53 = vpop.f32.mrb[204].mxu1 }
 0x76c   : > { %14643 = vmatmul.mubr.f32.vlgmr.msra.gmra.mrb[6].mxu0 %v14573_v6  ;;  %v15500_v38 = vpop.f32.mrb[205].mxu1  ;;  %v16402_v6 = vld [vmem:[%s23452_s5 + $0x518] sm:$0xff] }
 0x76d   : > { %17996 = vmatpush1.bf16.msra.mxu0 %v17995_v36  ;;  %16381 = vmatprep.mubr.msk.f32.mxu0 %vm14029_vm6, %v14669_v18  ;;  %v16401_v36 = vld [vmem:[%s23452_s5 + $0x510] sm:$0xff] }
 0x76e   : > { %17997 = vmatprep.subr.bf16.mxu0 %v23518_v27  ;;  %v18049_v38 = vpack.c.bf16 %v16402_v6, %v16401_v36  ;;  %v16436_v6 = vld [vmem:[%s23452_s5 + $0x620] sm:$0xff] }
 0x771   : > { %17999 = vmatpush1.bf16.msra.mxu0 %v17998_v31  ;;  %v16403_v31 = vld [vmem:[%s23452_s5 + $0x520] sm:$0xff] }
 0x772   : > { %18000 = vmatprep.subr.bf16.mxu0 %v23518_v27 }
 0x775   : > { %18002 = vmatpush1.bf16.msra.mxu0 %v18001_v13  ;;  %v18052_v13 = vpack.c.bf16 %v16404_v49, %v16403_v31 }
 0x776   : > { %18003 = vmatprep.subr.bf16.mxu0 %v23518_v27 }
 0x779   : > { %18005 = vmatpush1.bf16.msra.mxu0 %v18004_v40  ;;  %v18055_v40 = vpack.c.bf16 %v16406_v43, %v16405_v35  ;;  %v14952_v35 = vrot.slane %v22492_v10, 2  ;;  %v16441_v43 = vld [vmem:[%s23452_s5 + $0x640] sm:$0xff] }
 0x77a   : > { %18006 = vmatprep.subr.bf16.mxu0 %v23518_v27 }
 0x77d   : > { %18008 = vmatpush1.bf16.msra.mxu0 %v18007_v41  ;;  %v18058_v41 = vpack.c.bf16 %v16408_v45, %v16407_v33  ;;  %v15048_v33 = vrot.slane %v22501_v14, 3 }
 0x77e   : > { %18009 = vmatprep.subr.bf16.mxu0 %v23518_v27 }
 0x781   : > { %18011 = vmatpush1.bf16.msra.mxu0 %v18010_v55  ;;  %v18061_v55 = vpack.c.bf16 %v16410_v61, %v16409_v5  ;;  %v16444_v5 = vld [vmem:[%s23452_s5 + $0x658] sm:$0xff] }
 0x782   : > { %18012 = vmatprep.subr.bf16.mxu0 %v23518_v27 }
 0x785   : > { %18014 = vmatpush1.bf16.msra.mxu0 %v18013_v19  ;;  %v18064_v19 = vpack.c.bf16 %v16412_v9, %v16411_v47  ;;  %v16446_v47 = vld [vmem:[%s23452_s5 + $0x668] sm:$0xff] }
 0x786   : > { %18015 = vmatprep.subr.bf16.mxu0 %v23518_v27 }
 0x789   : > { %18017 = vmatpush1.bf16.msra.mxu0 %v18016_v11  ;;  %v18067_v11 = vpack.c.bf16 %v16414_v22, %v16413_v54  ;;  %v16448_v54 = vld [vmem:[%s23452_s5 + $0x678] sm:$0xff] }
 0x78a   : > { %18018 = vmatprep.subr.bf16.mxu0 %v23518_v27 }
 0x78b   : > { %v14170_v30 = vpop.f32.mrb[252].mxu0 }
 0x78c   : > { %v14171_v17 = vadd.f32 %v14170_v30, %v14098_v52  ;;  %v14172_v15 = vpop.f32.mrb[253].mxu0  ;;  %v16399_v52 = vld [vmem:[%s23452_s5 + $0x508] sm:$0xff]  ;;  %v18073_v30 = vpack.c.bf16 %v16418_v3, %v16417_v26  ;;  %v16452_v26 = vld [vmem:[%s23452_s5 + $0x698] sm:$0xff] }
 0x78d   : > { %18020 = vmatpush1.bf16.msra.mxu0 %v18019_v20  ;;  %v18046_v34 = vpack.c.bf16 %v16399_v52, %v16398_v29  ;;  %v18070_v20 = vpack.c.bf16 %v16416_v50, %v16415_v59  ;;  %v16421_v15 = vld [vmem:[%s23452_s5 + $0x5a8] sm:$0xff]  ;;  %v16434_v52 = vld [vmem:[%s23452_s5 + $0x610] sm:$0xff] }
 0x78e   : > { %18021 = vmatprep.subr.bf16.mxu0 %v23518_v27  ;;  %v16450_v59 = vld [vmem:[%s23452_s5 + $0x688] sm:$0xff] }
 0x790   : > { %14738 = vmatmul.mubr.f32.vlgmr.msra.gmra.mrb[8].mxu0 %v14668_v1 }
 0x791   : > { %18023 = vmatpush1.bf16.msra.mxu0 %v18022_v42  ;;  %16400 = vmatprep.mubr.msk.f32.mxu0 %vm14029_vm6, %v22501_v14 }
 0x792   : > { %18024 = vmatprep.subr.bf16.mxu0 %v23518_v27 }
 0x795   : > { %18026 = vmatpush1.bf16.msra.mxu0 %v18025_v32  ;;  %v14857_v32 = vrot.slane %v22492_v10, 1 }
 0x796   : > { %18027 = vmatprep.subr.bf16.mxu0 %v23518_v27 }
 0x799   : > { %18029 = vmatpush1.bf16.msra.mxu0 %v18028_v48  ;;  %v14953_v48 = vrot.slane %v22501_v14, 2 }
 0x79a   : > { %18030 = vmatprep.subr.bf16.mxu0 %v23518_v27 }
 0x79d   : > { %18032 = vmatpush1.bf16.msra.mxu0 %v18031_v62  ;;  %v16425_v62 = vld [vmem:[%s23452_s5 + $0x5c8] sm:$0xff] }
 0x79e   : > { %18033 = vmatprep.subr.bf16.mxu0 %v23518_v27  ;;  %v18082_v8 = vpack.c.bf16 %v16425_v62, %v16424_v21  ;;  %v15047_v21 = vrot.slane %v22492_v10, 3  ;;  %v16460_v62 = vld [vmem:[%s23452_s5 + $0x6d0] sm:$0xff] }
 0x7a1   : > { %18035 = vmatpush1.bf16.msra.mxu0 %v18034_v0  ;;  %v16427_v0 = vld [vmem:[%s23452_s5 + $0x5d8] sm:$0xff] }
 0x7a2   : > { %18036 = vmatprep.subr.bf16.mxu0 %v23518_v27  ;;  %v18085_v44 = vpack.c.bf16 %v16427_v0, %v16426_v28  ;;  %v15143_v28 = vrot.slane %v22501_v14, 4 }
 0x7a5   : > { %18038 = vmatpush1.bf16.msra.mxu0 %v18037_v63  ;;  %v16429_v63 = vld [vmem:[%s23452_s5 + $0x5e8] sm:$0xff] }
 0x7a6   : > { %18039 = vmatprep.subr.bf16.mxu0 %v23518_v27  ;;  %v18088_v7 = vpack.c.bf16 %v16429_v63, %v16428_v12  ;;  %v16463_v12 = vld [vmem:[%s23452_s5 + $0x6e8] sm:$0xff] }
 0x7a9   : > { %18041 = vmatpush1.bf16.msra.mxu0 %v18040_v4  ;;  %v16431_v4 = vld [vmem:[%s23452_s5 + $0x5f8] sm:$0xff] }
 0x7aa   : > { %18042 = vmatprep.subr.bf16.mxu0 %v23518_v27  ;;  %v18091_v46 = vpack.c.bf16 %v16431_v4, %v16430_v51  ;;  %v16465_v51 = vld [vmem:[%s23452_s5 + $0x6f8] sm:$0xff] }
 0x7ad   : > { %18044 = vmatpush1.bf16.msra.mxu0 %v18043_v23  ;;  %v16433_v23 = vld [vmem:[%s23452_s5 + $0x608] sm:$0xff] }
 0x7ae   : > { %18045 = vmatprep.subr.bf16.mxu0 %v23518_v27  ;;  %v18094_v29 = vpack.c.bf16 %v16433_v23, %v16432_v56  ;;  %v16467_v56 = vld [vmem:[%s23452_s5 + $0x708] sm:$0xff] }
 0x7af   : > { %v14264_v25 = vpop.f32.mrb[254].mxu0 }
 0x7b0   : > { %v14268_v37 = vadd.f32 %v14264_v25, %v14171_v17  ;;  %v14266_v18 = vpop.f32.mrb[255].mxu0  ;;  %v16420_v17 = vld [vmem:[%s23452_s5 + $0x5a0] sm:$0xff]  ;;  %v16437_v25 = vld [vmem:[%s23452_s5 + $0x628] sm:$0xff] }
 0x7b1   : > { %18047 = vmatpush1.bf16.msra.mxu0 %v18046_v34  ;;  %v18076_v39 = vpack.c.bf16 %v16421_v15, %v16420_v17  ;;  %v16435_v34 = vld [vmem:[%s23452_s5 + $0x618] sm:$0xff]  ;;  %v16439_v18 = vld [vmem:[%s23452_s5 + $0x630] sm:$0xff]  ;;  %v16454_v17 = vld [vmem:[%s23452_s5 + $0x6a8] sm:$0xff] }
 0x7b2   : > { %18048 = vmatprep.subr.bf16.mxu0 %v23518_v27  ;;  %v18097_v36 = vpack.c.bf16 %v16435_v34, %v16434_v52  ;;  %v16469_v52 = vld [vmem:[%s23452_s5 + $0x718] sm:$0xff] }
 0x7b4   : > { %14831 = vmatmul.mubr.f32.vlgmr.msra.gmra.mrb[10].mxu0 %v22492_v10 }
 0x7b5   : > { %18050 = vmatpush1.bf16.msra.mxu0 %v18049_v38  ;;  %16419 = vmatprep.mubr.msk.f32.mxu0 %vm14029_vm6, %v14858_v24  ;;  %v16440_v38 = vld [vmem:[%s23452_s5 + $0x638] sm:$0xff] }
 0x7b6   : > { %18051 = vmatprep.subr.bf16.mxu0 %v23518_v27 }
 0x7b9   : > { %18053 = vmatpush1.bf16.msra.mxu0 %v18052_v13  ;;  %v18103_v13 = vpack.c.bf16 %v16440_v38, %v16439_v18  ;;  %v16473_v18 = vld [vmem:[%s23452_s5 + $0x738] sm:$0xff] }
 0x7ba   : > { %18054 = vmatprep.subr.bf16.mxu0 %v23518_v27 }
 0x7bd   : > { %18056 = vmatpush1.bf16.msra.mxu0 %v18055_v40  ;;  %v16442_v40 = vld [vmem:[%s23452_s5 + $0x648] sm:$0xff] }
 0x7be   : > { %18057 = vmatprep.subr.bf16.mxu0 %v23518_v27  ;;  %v18106_v45 = vpack.c.bf16 %v16442_v40, %v16441_v43 }
 0x7c1   : > { %18059 = vmatpush1.bf16.msra.mxu0 %v18058_v41  ;;  %v16443_v41 = vld [vmem:[%s23452_s5 + $0x650] sm:$0xff] }
 0x7c2   : > { %18060 = vmatprep.subr.bf16.mxu0 %v23518_v27  ;;  %v18109_v61 = vpack.c.bf16 %v16444_v5, %v16443_v41  ;;  %v15142_v41 = vrot.slane %v22492_v10, 4  ;;  %v16479_v5 = vld [vmem:[%s23452_s5 + $0x760] sm:$0xff] }
 0x7c5   : > { %18062 = vmatpush1.bf16.msra.mxu0 %v18061_v55  ;;  %v16445_v55 = vld [vmem:[%s23452_s5 + $0x660] sm:$0xff] }
 0x7c6   : > { %18063 = vmatprep.subr.bf16.mxu0 %v23518_v27  ;;  %v18112_v9 = vpack.c.bf16 %v16446_v47, %v16445_v55  ;;  %v15238_v55 = vrot.slane %v22501_v14, 5 }
 0x7c9   : > { %18065 = vmatpush1.bf16.msra.mxu0 %v18064_v19  ;;  %v16447_v19 = vld [vmem:[%s23452_s5 + $0x670] sm:$0xff] }
 0x7ca   : > { %18066 = vmatprep.subr.bf16.mxu0 %v23518_v27  ;;  %v18115_v22 = vpack.c.bf16 %v16448_v54, %v16447_v19  ;;  %v16482_v19 = vld [vmem:[%s23452_s5 + $0x778] sm:$0xff] }
 0x7cd   : > { %18068 = vmatpush1.bf16.msra.mxu0 %v18067_v11  ;;  %v16449_v11 = vld [vmem:[%s23452_s5 + $0x680] sm:$0xff] }
 0x7ce   : > { %18069 = vmatprep.subr.bf16.mxu0 %v23518_v27  ;;  %v18118_v50 = vpack.c.bf16 %v16450_v59, %v16449_v11  ;;  %v16484_v11 = vld [vmem:[%s23452_s5 + $0x788] sm:$0xff] }
 0x7d1   : > { %18071 = vmatpush1.bf16.msra.mxu0 %v18070_v20  ;;  %v16451_v20 = vld [vmem:[%s23452_s5 + $0x690] sm:$0xff] }
 0x7d2   : > { %18072 = vmatprep.subr.bf16.mxu0 %v23518_v27  ;;  %v18121_v3 = vpack.c.bf16 %v16452_v26, %v16451_v20  ;;  %v16486_v20 = vld [vmem:[%s23452_s5 + $0x798] sm:$0xff] }
 0x7d3   : > { %v14359_v42 = vpop.f32.mrb[0].mxu0 }
 0x7d4   : > { %v14363_v1 = vadd.f32 %v14359_v42, %v14268_v37  ;;  %v14361_v2 = vpop.f32.mrb[1].mxu0  ;;  %v18100_v37 = vpack.c.bf16 %v16437_v25, %v16436_v6  ;;  %v16455_v42 = vld [vmem:[%s23452_s5 + $0x6b0] sm:$0xff]  ;;  %v16471_v6 = vld [vmem:[%s23452_s5 + $0x728] sm:$0xff] }
 0x7d5   : > { %18074 = vmatpush1.bf16.msra.mxu0 %v18073_v30  ;;  %v16453_v30 = vld [vmem:[%s23452_s5 + $0x6a0] sm:$0xff] }
 0x7d6   : > { %18075 = vmatprep.subr.bf16.mxu0 %v23518_v27  ;;  %v18124_v15 = vpack.c.bf16 %v16454_v17, %v16453_v30  ;;  %v16488_v30 = vld [vmem:[%s23452_s5 + $0x7a8] sm:$0xff] }
 0x7d8   : > { %14927 = vmatmul.mubr.f32.vlgmr.msra.gmra.mrb[12].mxu0 %v14857_v32  ;;  %v16459_v32 = vld [vmem:[%s23452_s5 + $0x6c8] sm:$0xff] }
 0x7d9   : > { %18077 = vmatpush1.bf16.msra.mxu0 %v18076_v39  ;;  %16438 = vmatprep.mubr.msk.f32.mxu0 %vm14029_vm6, %v14953_v48  ;;  %v16458_v39 = vld [vmem:[%s23452_s5 + $0x6c0] sm:$0xff] }
 0x7da   : > { %18078 = vmatprep.subr.bf16.mxu0 %v23518_v27 }
 0x7dd   : > { %18080 = vmatpush1.bf16.msra.mxu0 %v18079_v60  ;;  %v18130_v60 = vpack.c.bf16 %v16459_v32, %v16458_v39  ;;  %v16492_v39 = vld [vmem:[%s23452_s5 + $0x7c8] sm:$0xff] }
 0x7de   : > { %18081 = vmatprep.subr.bf16.mxu0 %v23518_v27 }
 0x7e1   : > { %18083 = vmatpush1.bf16.msra.mxu0 %v18082_v8  ;;  %v16461_v8 = vld [vmem:[%s23452_s5 + $0x6d8] sm:$0xff] }
 0x7e2   : > { %18084 = vmatprep.subr.bf16.mxu0 %v23518_v27  ;;  %v18133_v0 = vpack.c.bf16 %v16461_v8, %v16460_v62 }
 0x7e5   : > { %18086 = vmatpush1.bf16.msra.mxu0 %v18085_v44  ;;  %v16462_v44 = vld [vmem:[%s23452_s5 + $0x6e0] sm:$0xff] }
 0x7e6   : > { %18087 = vmatprep.subr.bf16.mxu0 %v23518_v27  ;;  %v18136_v63 = vpack.c.bf16 %v16463_v12, %v16462_v44  ;;  %v15237_v44 = vrot.slane %v22492_v10, 5  ;;  %v16498_v12 = vld [vmem:[%s23452_s5 + $0x7f0] sm:$0xff] }
 0x7e9   : > { %18089 = vmatpush1.bf16.msra.mxu0 %v18088_v7  ;;  %v16464_v7 = vld [vmem:[%s23452_s5 + $0x6f0] sm:$0xff] }
 0x7ea   : > { %18090 = vmatprep.subr.bf16.mxu0 %v23518_v27  ;;  %v18139_v4 = vpack.c.bf16 %v16465_v51, %v16464_v7  ;;  %v15333_v7 = vrot.slane %v22501_v14, 6  ;;  %v16502_v14 = vld [vmem:[%s23452_s5 + $0x810] sm:$0xff] }
 0x7ed   : > { %18092 = vmatpush1.bf16.msra.mxu0 %v18091_v46  ;;  %v16466_v46 = vld [vmem:[%s23452_s5 + $0x700] sm:$0xff] }
 0x7ee   : > { %18093 = vmatprep.subr.bf16.mxu0 %v23518_v27  ;;  %v18142_v23 = vpack.c.bf16 %v16467_v56, %v16466_v46  ;;  %v16501_v46 = vld [vmem:[%s23452_s5 + $0x808] sm:$0xff] }
 0x7f1   : > { %18095 = vmatpush1.bf16.msra.mxu0 %v18094_v29  ;;  %v16468_v29 = vld [vmem:[%s23452_s5 + $0x710] sm:$0xff] }
 0x7f2   : > { %18096 = vmatprep.subr.bf16.mxu0 %v23518_v27  ;;  %v18145_v34 = vpack.c.bf16 %v16469_v52, %v16468_v29  ;;  %v16504_v52 = vld [vmem:[%s23452_s5 + $0x820] sm:$0xff] }
 0x7f5   : > { %18098 = vmatpush1.bf16.msra.mxu0 %v18097_v36  ;;  %v16470_v36 = vld [vmem:[%s23452_s5 + $0x720] sm:$0xff] }
 0x7f6   : > { %18099 = vmatprep.subr.bf16.mxu0 %v23518_v27  ;;  %v18148_v25 = vpack.c.bf16 %v16471_v6, %v16470_v36  ;;  %v16506_v6 = vld [vmem:[%s23452_s5 + $0x830] sm:$0xff] }
 0x7f7   : > { %v14454_v31 = vpop.f32.mrb[2].mxu0 }
 0x7f8   : > { %v14458_v49 = vadd.f32 %v14454_v31, %v14363_v1  ;;  %v14456_v24 = vpop.f32.mrb[3].mxu0  ;;  %v16456_v1 = vld [vmem:[%s23452_s5 + $0x6b8] sm:$0xff]  ;;  %v16474_v31 = vld [vmem:[%s23452_s5 + $0x740] sm:$0xff] }
 0x7f9   : > { %18101 = vmatpush1.bf16.msra.mxu0 %v18100_v37  ;;  %v18127_v2 = vpack.c.bf16 %v16456_v1, %v16455_v42  ;;  %v16472_v37 = vld [vmem:[%s23452_s5 + $0x730] sm:$0xff]  ;;  %v16490_v42 = vld [vmem:[%s23452_s5 + $0x7b8] sm:$0xff] }
 0x7fa   : > { %18102 = vmatprep.subr.bf16.mxu0 %v23518_v27  ;;  %v18151_v38 = vpack.c.bf16 %v16473_v18, %v16472_v37  ;;  %v16508_v18 = vld [vmem:[%s23452_s5 + $0x840] sm:$0xff] }
 0x7fc   : > { %15022 = vmatmul.mubr.f32.vlgmr.msra.gmra.mrb[14].mxu0 %v14952_v35  ;;  %v16478_v35 = vld [vmem:[%s23452_s5 + $0x758] sm:$0xff] }
 0x7fd   : > { %18104 = vmatpush1.bf16.msra.mxu0 %v18103_v13  ;;  %16457 = vmatprep.mubr.msk.f32.mxu0 %vm14029_vm6, %v15048_v33  ;;  %v16477_v13 = vld [vmem:[%s23452_s5 + $0x750] sm:$0xff] }
 0x7fe   : > { %18105 = vmatprep.subr.bf16.mxu0 %v23518_v27 }
 0x801   : > { %18107 = vmatpush1.bf16.msra.mxu0 %v18106_v45  ;;  %v18157_v45 = vpack.c.bf16 %v16478_v35, %v16477_v13  ;;  %v16512_v35 = vld [vmem:[%s23452_s5 + $0x860] sm:$0xff] }
 0x802   : > { %18108 = vmatprep.subr.bf16.mxu0 %v23518_v27 }
 0x805   : > { %18110 = vmatpush1.bf16.msra.mxu0 %v18109_v61  ;;  %v16480_v61 = vld [vmem:[%s23452_s5 + $0x768] sm:$0xff] }
 0x806   : > { %18111 = vmatprep.subr.bf16.mxu0 %v23518_v27  ;;  %v18160_v47 = vpack.c.bf16 %v16480_v61, %v16479_v5  ;;  %v15332_v5 = vrot.slane %v22492_v10, 6  ;;  %v15507_v10 = vld [vmem:[%s23454_s7 + $0x8] sm:$0xff] }
 0x809   : > { %18113 = vmatpush1.bf16.msra.mxu0 %v18112_v9  ;;  %v16481_v9 = vld [vmem:[%s23452_s5 + $0x770] sm:$0xff] }
 0x80a   : > { %18114 = vmatprep.subr.bf16.mxu0 %v23518_v27  ;;  %v18163_v54 = vpack.c.bf16 %v16482_v19, %v16481_v9 }
 0x80d   : > { %18116 = vmatpush1.bf16.msra.mxu0 %v18115_v22  ;;  %v16483_v22 = vld [vmem:[%s23452_s5 + $0x780] sm:$0xff] }
 0x80e   : > { %18117 = vmatprep.subr.bf16.mxu0 %v23518_v27  ;;  %v18166_v59 = vpack.c.bf16 %v16484_v11, %v16483_v22  ;;  %v15506_v22 = vld [vmem:[%s23454_s7] sm:$0xff]  ;;  %v15508_v11 = vld [vmem:[%s23454_s7 + $0x10] sm:$0xff] }
 0x811   : > { %18119 = vmatpush1.bf16.msra.mxu0 %v18118_v50  ;;  %v16485_v50 = vld [vmem:[%s23452_s5 + $0x790] sm:$0xff] }
 0x812   : > { %18120 = vmatprep.subr.bf16.mxu0 %v23518_v27  ;;  %v18169_v26 = vpack.c.bf16 %v16486_v20, %v16485_v50 }
 0x815   : > { %18122 = vmatpush1.bf16.msra.mxu0 %v18121_v3  ;;  %v16487_v3 = vld [vmem:[%s23452_s5 + $0x7a0] sm:$0xff] }
 0x816   : > { %18123 = vmatprep.subr.bf16.mxu0 %v23518_v27  ;;  %v18172_v17 = vpack.c.bf16 %v16488_v30, %v16487_v3 }
 0x819   : > { %18125 = vmatpush1.bf16.msra.mxu0 %v18124_v15  ;;  %v16489_v15 = vld [vmem:[%s23452_s5 + $0x7b0] sm:$0xff] }
 0x81a   : > { %18126 = vmatprep.subr.bf16.mxu0 %v23518_v27  ;;  %v18175_v1 = vpack.c.bf16 %v16490_v42, %v16489_v15 }
 0x81b   : > { %v14549_v58 = vpop.f32.mrb[4].mxu0 }
 0x81c   : > { %v14553_v57 = vadd.f32 %v14549_v58, %v14458_v49  ;;  %v14551_v48 = vpop.f32.mrb[5].mxu0  ;;  %v16475_v49 = vld [vmem:[%s23452_s5 + $0x748] sm:$0xff]  ;;  %v16493_v58 = vld [vmem:[%s23452_s5 + $0x7d0] sm:$0xff] }
 0x81d   : > { %18128 = vmatpush1.bf16.msra.mxu0 %v18127_v2  ;;  %v18154_v24 = vpack.c.bf16 %v16475_v49, %v16474_v31  ;;  %v16491_v2 = vld [vmem:[%s23452_s5 + $0x7c0] sm:$0xff]  ;;  %v16510_v49 = vld [vmem:[%s23452_s5 + $0x850] sm:$0xff] }
 0x81e   : > { %18129 = vmatprep.subr.bf16.mxu0 %v23518_v27  ;;  %v18178_v32 = vpack.c.bf16 %v16492_v39, %v16491_v2 }
 0x820   : > { %15117 = vmatmul.mubr.f32.vlgmr.msra.gmra.mrb[16].mxu0 %v15047_v21  ;;  %v16497_v21 = vld [vmem:[%s23452_s5 + $0x7e8] sm:$0xff] }
 0x821   : > { %18131 = vmatpush1.bf16.msra.mxu0 %v18130_v60  ;;  %16476 = vmatprep.mubr.msk.f32.mxu0 %vm14029_vm6, %v15143_v28  ;;  %v16496_v60 = vld [vmem:[%s23452_s5 + $0x7e0] sm:$0xff] }
 0x822   : > { %18132 = vmatprep.subr.bf16.mxu0 %v23518_v27 }
 0x825   : > { %18134 = vmatpush1.bf16.msra.mxu0 %v18133_v0  ;;  %v18184_v0 = vpack.c.bf16 %v16497_v21, %v16496_v60  ;;  %v15510_v21 = vld [vmem:[#allocation3] sm:$0x1] }
 0x826   : > { %18135 = vmatprep.subr.bf16.mxu0 %v23518_v27 }
 0x829   : > { %18137 = vmatpush1.bf16.msra.mxu0 %v18136_v63  ;;  %v16499_v63 = vld [vmem:[%s23452_s5 + $0x7f8] sm:$0xff] }
 0x82a   : > { %18138 = vmatprep.subr.bf16.mxu0 %v23518_v27  ;;  %v18187_v51 = vpack.c.bf16 %v16499_v63, %v16498_v12 }
 0x82d   : > { %18140 = vmatpush1.bf16.msra.mxu0 %v18139_v4  ;;  %v16500_v4 = vld [vmem:[%s23452_s5 + $0x800] sm:$0xff] }
 0x82e   : > { %18141 = vmatprep.subr.bf16.mxu0 %v23518_v27  ;;  %v18190_v56 = vpack.c.bf16 %v16501_v46, %v16500_v4 }
 0x831   : > { %18143 = vmatpush1.bf16.msra.mxu0 %v18142_v23  ;;  %v16503_v23 = vld [vmem:[%s23452_s5 + $0x818] sm:$0xff] }
 0x832   : > { %18144 = vmatprep.subr.bf16.mxu0 %v23518_v27  ;;  %v18193_v29 = vpack.c.bf16 %v16503_v23, %v16502_v14 }
 0x835   : > { %18146 = vmatpush1.bf16.msra.mxu0 %v18145_v34  ;;  %v16505_v34 = vld [vmem:[%s23452_s5 + $0x828] sm:$0xff] }
 0x836   : > { %18147 = vmatprep.subr.bf16.mxu0 %v23518_v27  ;;  %v18196_v36 = vpack.c.bf16 %v16505_v34, %v16504_v52 }
 0x839   : > { %18149 = vmatpush1.bf16.msra.mxu0 %v18148_v25  ;;  %v16507_v25 = vld [vmem:[%s23452_s5 + $0x838] sm:$0xff] }
 0x83a   : > { %18150 = vmatprep.subr.bf16.mxu0 %v23518_v27  ;;  %v18199_v37 = vpack.c.bf16 %v16507_v25, %v16506_v6 }
 0x83d   : > { %18152 = vmatpush1.bf16.msra.mxu0 %v18151_v38  ;;  %v16509_v38 = vld [vmem:[%s23452_s5 + $0x848] sm:$0xff] }
 0x83e   : > { %18153 = vmatprep.subr.bf16.mxu0 %v23518_v27  ;;  %v18202_v31 = vpack.c.bf16 %v16509_v38, %v16508_v18 }
 0x83f   : > { %v14644_v43 = vpop.f32.mrb[6].mxu0 }
 0x840   : > { %v14648_v40 = vadd.f32 %v14644_v43, %v14553_v57  ;;  %v14646_v33 = vpop.f32.mrb[7].mxu0  ;;  %v16494_v57 = vld [vmem:[%s23452_s5 + $0x7d8] sm:$0xff]  ;;  %v16513_v43 = vld [vmem:[%s23452_s5 + $0x868] sm:$0xff] }
 0x841   : > { %18155 = vmatpush1.bf16.msra.mxu0 %v18154_v24  ;;  %v18181_v48 = vpack.c.bf16 %v16494_v57, %v16493_v58  ;;  %v16511_v24 = vld [vmem:[%s23452_s5 + $0x858] sm:$0xff]  ;;  %v15503_v57 = vld [vmem:[%s23453_s6] sm:$0x1] }
 0x842   : > { %18156 = vmatprep.subr.bf16.mxu0 %v23518_v27  ;;  %v18205_v13 = vpack.c.bf16 %v16511_v24, %v16510_v49 }
 0x844   : > { %15212 = vmatmul.mubr.f32.vlgmr.msra.gmra.mrb[18].mxu0 %v15142_v41 }
 0x845   : > { %18158 = vmatpush1.bf16.msra.mxu0 %v18157_v45  ;;  %16495 = vmatprep.mubr.msk.f32.mxu0 %vm14029_vm6, %v15238_v55 }
 0x846   : > { %18159 = vmatprep.subr.bf16.mxu0 %v23518_v27 }
 0x849   : > { %18161 = vmatpush1.bf16.msra.mxu0 %v18160_v47 }
 0x84a   : > { %18162 = vmatprep.subr.bf16.mxu0 %v23518_v27 }
 0x84d   : > { %18164 = vmatpush1.bf16.msra.mxu0 %v18163_v54 }
 0x84e   : > { %18165 = vmatprep.subr.bf16.mxu0 %v23518_v27 }
 0x851   : > { %18167 = vmatpush1.bf16.msra.mxu0 %v18166_v59  ;;  %v18238_v59 = vpack.c.bf16 %v15507_v10, %v15506_v22 }
 0x852   : > { %18168 = vmatprep.subr.bf16.mxu0 %v23518_v27 }
 0x855   : > { %18170 = vmatpush1.bf16.msra.mxu0 %v18169_v26 }
 0x856   : > { %18171 = vmatprep.subr.bf16.mxu0 %v23518_v27 }
 0x859   : > { %18173 = vmatpush1.bf16.msra.mxu0 %v18172_v17 }
 0x85a   : > { %18174 = vmatprep.subr.bf16.mxu0 %v23518_v27 }
 0x85d   : > { %18176 = vmatpush1.bf16.msra.mxu0 %v18175_v1 }
 0x85e   : > { %18177 = vmatprep.subr.bf16.mxu0 %v23518_v27 }
 0x861   : > { %18179 = vmatpush1.bf16.msra.mxu0 %v18178_v32 }
 0x862   : > { %18180 = vmatprep.subr.bf16.mxu0 %v23518_v27 }
 0x863   : > { %v14739_v62 = vpop.f32.mrb[8].mxu0 }
 0x864   : > { %v14743_v8 = vadd.f32 %v14739_v62, %v14648_v40  ;;  %v14741_v28 = vpop.f32.mrb[9].mxu0  ;;  %v18208_v40 = vpack.c.bf16 %v16513_v43, %v16512_v35 }
 0x865   : > { %18182 = vmatpush1.bf16.msra.mxu0 %v18181_v48 }
 0x866   : > { %18183 = vmatprep.subr.bf16.mxu0 %v23518_v27 }
 0x868   : > { %15307 = vmatmul.mubr.f32.vlgmr.msra.gmra.mrb[20].mxu0 %v15237_v44 }
 0x869   : > { %18185 = vmatpush1.bf16.msra.mxu0 %v18184_v0  ;;  %16514 = vmatprep.mubr.msk.f32.mxu0 %vm14029_vm6, %v15333_v7 }
 0x86a   : > { %18186 = vmatprep.subr.bf16.mxu0 %v23518_v27 }
 0x86d   : > { %18188 = vmatpush1.bf16.msra.mxu0 %v18187_v51 }
 0x86e   : > { %18189 = vmatprep.subr.bf16.mxu0 %v23518_v27 }
 0x871   : > { %18191 = vmatpush1.bf16.msra.mxu0 %v18190_v56 }
 0x872   : > { %18192 = vmatprep.subr.bf16.mxu0 %v23518_v27 }
 0x875   : > { %18194 = vmatpush1.bf16.msra.mxu0 %v18193_v29 }
 0x876   : > { %18195 = vmatprep.subr.bf16.mxu0 %v23518_v27 }
 0x879   : > { %18197 = vmatpush1.bf16.msra.mxu0 %v18196_v36 }
 0x87a   : > { %18198 = vmatprep.subr.bf16.mxu0 %v23518_v27 }
 0x87d   : > { %18200 = vmatpush1.bf16.msra.mxu0 %v18199_v37 }
 0x87e   : > { %18201 = vmatprep.subr.bf16.mxu0 %v23518_v27 }
 0x881   : > { %18203 = vmatpush1.bf16.msra.mxu0 %v18202_v31 }
 0x882   : > { %18204 = vmatprep.subr.bf16.mxu0 %v23518_v27 }
 0x885   : > { %18206 = vmatpush1.bf16.msra.mxu0 %v18205_v13 }
 0x886   : > { %18207 = vmatprep.subr.bf16.mxu0 %v23518_v27 }
 0x887   : > { %v14832_v33 = vpop.f32.mrb[10].mxu0 }
 0x888   : > { %v14836_v45 = vadd.f32 %v14832_v33, %v14743_v8  ;;  %v14834_v41 = vpop.f32.mrb[11].mxu0 }
 0x889   : > { %18209 = vmatpush1.bf16.msra.mxu0 %v18208_v40 }
 0x88a   : > { %18237 = vmatprep.subr.bf16.mxu0 %v23518_v27 }
 0x88c   : > { %15402 = vmatmul.mubr.f32.vlgmr.msra.gmra.mrb[22].mxu0 %v15332_v5 }
 0x88d   : > { %17478 = vmatprep.mubr.msk.f32.mxu0 %vm18663_vm1, %v23473_v16  ;;  %v15509_v16 = vld [vmem:[%s23454_s7 + $0x18] sm:$0xff]  ;;  %18239 = vmatpush3.bf16.msra.mxu0 %v18238_v59 }
 0x88e   : > { %v18241_v50 = vpack.c.bf16 %v15509_v16, %v15508_v11  ;;  %18240 = vmatprep.subr.bf16.mxu0 %v23518_v27 }
 0x891   : > { %18242 = vmatpush3.bf16.msra.mxu0 %v18241_v50 }
 0x8ab   : > { %v14928_v61 = vpop.f32.mrb[12].mxu0 }
 0x8ac   : > { %v14932_v55 = vadd.f32 %v14928_v61, %v14836_v45  ;;  %v14930_v47 = vpop.f32.mrb[13].mxu0 }
 0x8cf   : > { %v15023_v9 = vpop.f32.mrb[14].mxu0 }
 0x8d0   : > { %v15027_v19 = vadd.f32 %v15023_v9, %v14932_v55  ;;  %v15025_v54 = vpop.f32.mrb[15].mxu0 }
 0x8f3   : > { %v15118_v20 = vpop.f32.mrb[16].mxu0 }
 0x8f4   : > { %v15122_v26 = vadd.f32 %v15118_v20, %v15027_v19  ;;  %v15120_v3 = vpop.f32.mrb[17].mxu0 }
 0x917   : > { %v15213_v30 = vpop.f32.mrb[18].mxu0 }
 0x918   : > { %v15217_v17 = vadd.f32 %v15213_v30, %v15122_v26  ;;  %v15215_v15 = vpop.f32.mrb[19].mxu0 }
 0x93b   : > { %v15308_v42 = vpop.f32.mrb[20].mxu0 }
 0x93c   : > { %v15312_v1 = vadd.f32 %v15308_v42, %v15217_v17  ;;  %v15310_v2 = vpop.f32.mrb[21].mxu0 }
 0x95f   : > { %v15403_v39 = vpop.f32.mrb[22].mxu0 }
 0x960   : > { %v15407_v32 = vadd.f32 %v15403_v39, %v15312_v1  ;;  %v15405_v58 = vpop.f32.mrb[23].mxu0 }
 0x962   : > { %v15502_v27 = vadd.f32 %v22903_v53, %v15407_v32 }
 0x964   : > { %v15504_v48 = vadd.f32 %v15503_v57, %v15502_v27 }
 0x966   : > { %v15505_v60 = vmax.f32 %v15504_v48, 0.0 }
 0x968   : > { %17479 = vmatmul.mubr.msk.f32.vlgmr.msra.gmra.mrb[24].mxu0 %vm15511_vm7, %v15505_v60 }
 0xa3b   : > { %v15581_v62 = vpop.f32.mrb[24].mxu0 }
 0xa3c   : > { %v15582_v8 = vadd.f32 %v15581_v62, %v15510_v21  ;;  %v17480_v28 = vpop.f32.mrb[25].mxu0 }
 0xa3e   : > { %15586 = vst.msk [vmem:[%s330_s24] sm:$0x1] %vm15585_vm8, %v15582_v8 }
 0xa3f PF: > { %s21_s11 = sadd.s32 1, %s18660_s11  }
 0xa40   : > { %p18_p4 = scmp.ge.s32.totalorder %s21_s11, 4  }
 0xa42   :  { %20 = sbr.rel (!%p18_p4) target bundleno = 3 (0x3), region = 121 }

</bundles_post_ra>
